<compile_context>
chip_gen: v7x
topology: tpu7x:2x2x1
jax: 0.10.0
libtpu: 0.0.40
codegen_flags: <defaults>
</compile_context>

<pallas_src>
import numpy as np
import jax
import jax.numpy as jnp
from jax.experimental import pallas as pl
from jax.experimental.pallas import tpu as pltpu

_LANES = 128
_CHUNK_MAX = 1024          # item-chunk width (lanes) for large catalogues
_LOGP_FLOOR = -100.0       # finite floor for log(0) so the diff table never sees -inf


def _vmem_limit_bytes():
    """Generation-aware scoped-VMEM limit (96 MiB cap on 128-MiB parts, ~48 MiB on v7x)."""
    cap = 64 * 1024 * 1024
    try:
        info = pltpu.get_tpu_info()
        cap = int(getattr(info, "vmem_capacity_bytes", cap))
    except Exception:
        pass
    return int(min(cap * 3 // 4, 96 * 1024 * 1024))


_VMEM_LIMIT = _vmem_limit_bytes()


def _ceil_to(x, m):
    return -(-x // m) * m


def _plan_rows(m, chunk, vmem_limit):
    """Pick the row tile `r` and padded row count for `m` flattened samples."""
    rows = max(1, -(-m // _LANES))
    rows8 = _ceil_to(rows, 8)
    # ~2.5 live (r, 128, chunk) f32 temporaries dominate VMEM; keep them to ~half the limit.
    per_row = int(2.5 * _LANES * chunk * 4)
    r = (vmem_limit // 2) // per_row
    r = max(8, min(512, (r // 8) * 8))
    r = min(r, rows8)
    # Keep >= 2 row steps when there is enough work: the row axis is the only
    # "parallel" axis, and on v7x a 1-step grid idles the second TensorCore.
    if rows8 // r < 2 and rows8 >= 16:
        r = max(8, ((rows8 // 2) // 8) * 8)
    rows_pad = _ceil_to(rows8, r)
    return r, rows_pad


def _to_tiles(flat, rows_pad):
    total = rows_pad * _LANES
    m = flat.shape[0]
    if total != m:
        flat = jnp.pad(flat, (0, total - m))
    return flat.reshape(rows_pad, _LANES)


def _make_sample_kernel(logp0):
    """Fused bucketize + log-prob gather for one (r, 128) seed tile x one item chunk.

    items = #{ j : table[j] < seed }             (== torch.bucketize(seed, table))
    prob  = logp[0] + sum_{j < items} dlogp[j]   (== log(pop_prob[items]))
    Accumulated across item chunks in VMEM scratch; a single f32 compare pass plus
    one multiply feed both cross-lane reductions.
    """
    def kernel(table_ref, dlogp_ref, seeds_ref, items_ref, prob_ref, idx_acc, prob_acc):
        c = pl.program_id(1)

        @pl.when(c == 0)
        def _():
            idx_acc[...] = jnp.zeros_like(idx_acc)
            prob_acc[...] = jnp.zeros_like(prob_acc)

        table = table_ref[...]                  # (1, C); padded entries 2.0 (> any seed)
        dlogp = dlogp_ref[...]                  # (1, C); padded entries 0.0
        seeds = seeds_ref[...]                  # (R, 128)

        cmp = (table[None, :, :] < seeds[:, :, None]).astype(jnp.float32)   # (R, 128, C)
        idx_acc[...] += jnp.sum(cmp, axis=-1)                # exact: counts < 2^24
        prob_acc[...] += jnp.sum(cmp * dlogp[None, :, :], axis=-1)

        @pl.when(c == pl.num_programs(1) - 1)
        def _():
            items_ref[...] = idx_acc[...].astype(jnp.int32)
            prob_ref[...] = prob_acc[...] + logp0

    return kernel


def _make_gather_kernel(logp0):
    """prob = log(pop_prob[item]) for a (r, 128) tile of indices via the same diff-table
    prefix sum (mask = global_j < item), accumulated across item chunks."""
    def kernel(dlogp_ref, items_ref, prob_ref, prob_acc):
        c = pl.program_id(1)

        @pl.when(c == 0)
        def _():
            prob_acc[...] = jnp.zeros_like(prob_acc)

        dlogp = dlogp_ref[...]                  # (1, C)
        items = items_ref[...]                  # (R, 128) int32
        chunk = dlogp.shape[-1]
        gidx = jax.lax.broadcasted_iota(jnp.int32, (1, 1, chunk), 2) + c * chunk
        mask = (gidx < items[:, :, None]).astype(jnp.float32)               # (R, 128, C)
        prob_acc[...] += jnp.sum(mask * dlogp[None, :, :], axis=-1)

        @pl.when(c == pl.num_programs(1) - 1)
        def _():
            prob_ref[...] = prob_acc[...] + logp0

    return kernel


class PopularSampler:
    """JAX/Pallas port of the PyTorch PopularSampler."""

    def __init__(self, pop_count, scorer_fn=None, mode=1):
        pop_count = jnp.asarray(pop_count, jnp.float32)
        self.num_items = int(pop_count.shape[0]) - 1
        self.scorer = scorer_fn
        if mode == 0:
            pop_count = jnp.log(pop_count + 1)
        elif mode == 1:
            pop_count = jnp.log(pop_count + 1) + 1e-06
        elif mode == 2:
            pop_count = pop_count ** 0.75
        self.pop_count = pop_count
        pop_prob = pop_count / pop_count.sum()
        # table is built from the *unmodified* pop_prob (matches torch op ordering)
        self.table = jnp.cumsum(pop_prob)
        pop_prob = pop_prob.at[0].set(1.0)
        self.pop_prob = pop_prob

        n = int(pop_count.shape[0])
        chunk = min(_CHUNK_MAX, _ceil_to(n, _LANES))
        npad = _ceil_to(n, chunk)
        self._n = n
        self._chunk = chunk
        self._npad = npad

        # Padded cumulative table: padded entries are 2.0 (> any seed in [0,1)), so
        # they never count towards the bucket index.
        self._table_pad = jnp.full((1, npad), 2.0, jnp.float32).at[0, :n].set(self.table)

        # Diff table for the fused gather: logp[k] = logp[0] + sum_{j<k} dlogp[j].
        # logp is clamped to a finite floor first so -inf entries (mode 0/2 with zero
        # counts) cannot create inf - inf; padded dlogp entries are 0, so any index
        # landing past n gathers logp[n-1] (clamped-gather semantics).
        # TODO(synk): items with pop_prob == 0 report the floor (-100) instead of -inf.
        logp = jnp.maximum(jnp.log(pop_prob), _LOGP_FLOOR)
        self._logp0 = float(logp[0])            # == 0.0 (pop_prob[0] forced to 1)
        logp_ext = jnp.concatenate(
            [logp, jnp.full((npad + 1 - n,), logp[-1], jnp.float32)])
        self._dlogp_pad = (logp_ext[1:] - logp_ext[:-1]).reshape(1, npad)

        self._sample_kernel = _make_sample_kernel(self._logp0)
        self._gather_kernel = _make_gather_kernel(self._logp0)

    def update(self, item_embs, max_iter=30):
        pass

    # ---- Pallas-backed pieces -------------------------------------------------

    def _sample(self, seeds):
        nq, k = seeds.shape
        m = nq * k
        chunk, npad = self._chunk, self._npad
        r, rows_pad = _plan_rows(m, chunk, _VMEM_LIMIT)
        seeds2d = _to_tiles(seeds.reshape(-1), rows_pad)
        items, prob = pl.pallas_call(
            self._sample_kernel,
            out_shape=(jax.ShapeDtypeStruct((rows_pad, _LANES), jnp.int32),
                       jax.ShapeDtypeStruct((rows_pad, _LANES), jnp.float32)),
            grid_spec=pltpu.PrefetchScalarGridSpec(
                num_scalar_prefetch=0,
                grid=(rows_pad // r, npad // chunk),
                in_specs=[pl.BlockSpec((1, chunk), lambda i, c: (0, c)),
                          pl.BlockSpec((1, chunk), lambda i, c: (0, c)),
                          pl.BlockSpec((r, _LANES), lambda i, c: (i, 0))],
                out_specs=[pl.BlockSpec((r, _LANES), lambda i, c: (i, 0)),
                           pl.BlockSpec((r, _LANES), lambda i, c: (i, 0))],
                scratch_shapes=[pltpu.VMEM((r, _LANES), jnp.float32),
                                pltpu.VMEM((r, _LANES), jnp.float32)]),
            compiler_params=pltpu.CompilerParams(
                dimension_semantics=("parallel", "arbitrary"),
                vmem_limit_bytes=_VMEM_LIMIT),
        )(self._table_pad, self._dlogp_pad, seeds2d)
        items = items.reshape(-1)[:m].reshape(nq, k)
        prob = prob.reshape(-1)[:m].reshape(nq, k)
        return items, prob

    def compute_item_p(self, query, pos_items):
        shape = pos_items.shape
        flat = pos_items.reshape(-1).astype(jnp.int32)
        m = flat.shape[0]
        chunk, npad = self._chunk, self._npad
        r, rows_pad = _plan_rows(m, chunk, _VMEM_LIMIT)
        items2d = _to_tiles(flat, rows_pad)
        prob = pl.pallas_call(
            self._gather_kernel,
            out_shape=jax.ShapeDtypeStruct((rows_pad, _LANES), jnp.float32),
            grid_spec=pltpu.PrefetchScalarGridSpec(
                num_scalar_prefetch=0,
                grid=(rows_pad // r, npad // chunk),
                in_specs=[pl.BlockSpec((1, chunk), lambda i, c: (0, c)),
                          pl.BlockSpec((r, _LANES), lambda i, c: (i, 0))],
                out_specs=pl.BlockSpec((r, _LANES), lambda i, c: (i, 0)),
                scratch_shapes=[pltpu.VMEM((r, _LANES), jnp.float32)]),
            compiler_params=pltpu.CompilerParams(
                dimension_semantics=("parallel", "arbitrary"),
                vmem_limit_bytes=_VMEM_LIMIT),
        )(self._dlogp_pad, items2d)
        return prob.reshape(-1)[:m].reshape(shape)

    # ---- forward --------------------------------------------------------------

    def forward(self, query, num_neg, pos_items=None, *, key):
        q_prefix = query.shape[:-1]
        num_queries = int(np.prod(q_prefix))
        # torch.rand equivalent (deterministic via explicit PRNG key).
        # TODO(synk): seeds could be drawn in-kernel (pltpu.prng_seed + prng_random_bits)
        # to skip an HBM round trip; kept external for deterministic reference checking.
        seeds = jax.random.uniform(key, (num_queries, num_neg), dtype=jnp.float32)
        neg_items, neg_prob = self._sample(seeds)
        neg_items = neg_items.reshape(*q_prefix, num_neg)
        neg_prob = neg_prob.reshape(*q_prefix, num_neg)
        if pos_items is not None:
            pos_prob = self.compute_item_p(None, pos_items)
            return pos_prob, neg_items, neg_prob
        return neg_items, neg_prob

    __call__ = forward


if __name__ == "__main__":
    root = jax.random.PRNGKey(0)
    k_pop, k_q, k_pos, k_seed = jax.random.split(root, 4)

    num_items_total = 300          # item catalogue size (pop_count.shape[0])
    B, L, D = 2, 8, 32             # query: (batch, seq, hidden)
    num_neg = 16

    pop_count = jax.random.randint(k_pop, (num_items_total,), 1, 1000).astype(jnp.float32)
    query = jax.random.normal(k_q, (B, L, D), dtype=jnp.float32)
    pos_items = jax.random.randint(k_pos, (B, L), 0, num_items_total, dtype=jnp.int32)

    sampler = PopularSampler(pop_count, mode=1)
    pos_prob, neg_items, neg_prob = sampler(query, num_neg, pos_items, key=k_seed)
    jax.block_until_ready((pos_prob, neg_items, neg_prob))

    # --- reference check (plain JAX) ---
    seeds_ref = jax.random.uniform(k_seed, (B * L, num_neg), dtype=jnp.float32)
    ref_items = jnp.searchsorted(sampler.table, seeds_ref, side="left").astype(jnp.int32)
    ref_items = ref_items.reshape(B, L, num_neg)
    logp = jnp.log(sampler.pop_prob)
    ref_neg_prob = logp[jnp.clip(ref_items, 0, num_items_total - 1)]
    ref_pos_prob = logp[pos_items]

    np.testing.assert_array_equal(np.asarray(neg_items), np.asarray(ref_items))
    # diff-table gather is a float32 prefix sum, not a bit-exact gather
    np.testing.assert_allclose(np.asarray(neg_prob), np.asarray(ref_neg_prob),
                               rtol=1e-5, atol=5e-5)
    np.testing.assert_allclose(np.asarray(pos_prob), np.asarray(ref_pos_prob),
                               rtol=1e-5, atol=5e-5)

    assert neg_items.shape == (B, L, num_neg)
    assert neg_prob.shape == (B, L, num_neg)
    assert pos_prob.shape == (B, L)
    print("KERNEL_OK")
</pallas_src>

<mosaic_0001>
module attributes {stable_mosaic.version = 11 : i64} {
  func.func @kernel(%arg0: i32, %arg1: i32, %arg2: memref<1x384xf32, #tpu.memory_space<vmem>>, %arg3: memref<1x384xf32, #tpu.memory_space<vmem>>, %arg4: memref<8x128xf32, #tpu.memory_space<vmem>>, %arg5: memref<8x128xi32, #tpu.memory_space<vmem>>, %arg6: memref<8x128xf32, #tpu.memory_space<vmem>>, %arg7: memref<8x128xf32, #tpu.memory_space<vmem>>, %arg8: memref<8x128xf32, #tpu.memory_space<vmem>>) attributes {dimension_semantics = [#tpu.dimension_semantics<parallel>, #tpu.dimension_semantics<arbitrary>], iteration_bounds = array<i64: 1, 1>, scalar_prefetch = 0 : i64, scratch_operands = 2 : i64, tpu.core_type = #tpu.core_type<tc>, window_params = [{transform_indices = @transform_0, window_bounds = array<i64: 1, 384>}, {transform_indices = @transform_1, window_bounds = array<i64: 1, 384>}, {transform_indices = @transform_2, window_bounds = array<i64: 8, 128>}, {transform_indices = @transform_3, window_bounds = array<i64: 8, 128>}, {transform_indices = @transform_4, window_bounds = array<i64: 8, 128>}]} {
    %c0_i32 = arith.constant 0 : i32
    %0 = arith.cmpi eq, %arg1, %c0_i32 : i32
    %1 = arith.extui %0 : i1 to i32
    %c0_i32_0 = arith.constant 0 : i32
    %2 = arith.cmpi ne, %1, %c0_i32_0 : i32
    scf.if %2 {
      %cst_17 = arith.constant 0.000000e+00 : f32
      %27 = vector.broadcast %cst_17 : f32 to vector<8x128xf32>
      %c0_18 = arith.constant 0 : index
      %c0_19 = arith.constant 0 : index
      %28 = vector.load %arg7[%c0_18, %c0_19] : memref<8x128xf32, #tpu.memory_space<vmem>>, vector<8x128xf32>
      tpu.vector_store %arg7[%c0_18, %c0_19], %27 {strides = array<i32>} : memref<8x128xf32, #tpu.memory_space<vmem>>, vector<8x128xf32>,
      %cst_20 = arith.constant 0.000000e+00 : f32
      %29 = vector.broadcast %cst_20 : f32 to vector<8x128xf32>
      %c0_21 = arith.constant 0 : index
      %c0_22 = arith.constant 0 : index
      %30 = vector.load %arg8[%c0_21, %c0_22] : memref<8x128xf32, #tpu.memory_space<vmem>>, vector<8x128xf32>
      tpu.vector_store %arg8[%c0_21, %c0_22], %29 {strides = array<i32>} : memref<8x128xf32, #tpu.memory_space<vmem>>, vector<8x128xf32>,
    } else {
    }
    %c0 = arith.constant 0 : index
    %c0_1 = arith.constant 0 : index
    %3 = vector.load %arg2[%c0, %c0_1] : memref<1x384xf32, #tpu.memory_space<vmem>>, vector<1x384xf32>
    %c0_2 = arith.constant 0 : index
    %c0_3 = arith.constant 0 : index
    %4 = vector.load %arg3[%c0_2, %c0_3] : memref<1x384xf32, #tpu.memory_space<vmem>>, vector<1x384xf32>
    %c0_4 = arith.constant 0 : index
    %c0_5 = arith.constant 0 : index
    %5 = vector.load %arg4[%c0_4, %c0_5] : memref<8x128xf32, #tpu.memory_space<vmem>>, vector<8x128xf32>
    %6 = vector.shape_cast %3 : vector<1x384xf32> to vector<1x1x384xf32>
    %7 = vector.shape_cast %5 : vector<8x128xf32> to vector<8x128x1xf32>
    %8 = vector.broadcast %6 : vector<1x1x384xf32> to vector<8x128x384xf32>
    %9 = vector.broadcast %7 : vector<8x128x1xf32> to vector<8x128x384xf32>
    %10 = arith.cmpf olt, %8, %9 : vector<8x128x384xf32>
    %11 = arith.extui %10 : vector<8x128x384xi1> to vector<8x128x384xi32>
    %12 = arith.sitofp %11 : vector<8x128x384xi32> to vector<8x128x384xf32>
    %c0_6 = arith.constant 0 : index
    %c0_7 = arith.constant 0 : index
    %13 = vector.load %arg7[%c0_6, %c0_7] : memref<8x128xf32, #tpu.memory_space<vmem>>, vector<8x128xf32>
    %cst = arith.constant dense<0.000000e+00> : vector<8x128xf32>
    %14 = vector.multi_reduction <add>, %12, %cst [2] : vector<8x128x384xf32> to vector<8x128xf32>
    %15 = arith.addf %13, %14 : vector<8x128xf32>
    %c0_8 = arith.constant 0 : index
    %c0_9 = arith.constant 0 : index
    %16 = vector.load %arg7[%c0_8, %c0_9] : memref<8x128xf32, #tpu.memory_space<vmem>>, vector<8x128xf32>
    tpu.vector_store %arg7[%c0_8, %c0_9], %15 {strides = array<i32>} : memref<8x128xf32, #tpu.memory_space<vmem>>, vector<8x128xf32>,
    %c0_10 = arith.constant 0 : index
    %c0_11 = arith.constant 0 : index
    %17 = vector.load %arg8[%c0_10, %c0_11] : memref<8x128xf32, #tpu.memory_space<vmem>>, vector<8x128xf32>
    %18 = vector.shape_cast %4 : vector<1x384xf32> to vector<1x1x384xf32>
    %19 = vector.broadcast %18 : vector<1x1x384xf32> to vector<8x128x384xf32>
    %20 = arith.mulf %12, %19 : vector<8x128x384xf32>
    %cst_12 = arith.constant dense<0.000000e+00> : vector<8x128xf32>
    %21 = vector.multi_reduction <add>, %20, %cst_12 [2] : vector<8x128x384xf32> to vector<8x128xf32>
    %22 = arith.addf %17, %21 : vector<8x128xf32>
    %c0_13 = arith.constant 0 : index
    %c0_14 = arith.constant 0 : index
    %23 = vector.load %arg8[%c0_13, %c0_14] : memref<8x128xf32, #tpu.memory_space<vmem>>, vector<8x128xf32>
    tpu.vector_store %arg8[%c0_13, %c0_14], %22 {strides = array<i32>} : memref<8x128xf32, #tpu.memory_space<vmem>>, vector<8x128xf32>,
    %c0_i32_15 = arith.constant 0 : i32
    %24 = arith.cmpi eq, %arg1, %c0_i32_15 : i32
    %25 = arith.extui %24 : i1 to i32
    %c0_i32_16 = arith.constant 0 : i32
    %26 = arith.cmpi ne, %25, %c0_i32_16 : i32
    scf.if %26 {
      %c0_17 = arith.constant 0 : index
      %c0_18 = arith.constant 0 : index
      %27 = vector.load %arg7[%c0_17, %c0_18] : memref<8x128xf32, #tpu.memory_space<vmem>>, vector<8x128xf32>
      %28 = arith.fptosi %27 : vector<8x128xf32> to vector<8x128xi32>
      %c0_19 = arith.constant 0 : index
      %c0_20 = arith.constant 0 : index
      %29 = vector.load %arg5[%c0_19, %c0_20] : memref<8x128xi32, #tpu.memory_space<vmem>>, vector<8x128xi32>
      tpu.vector_store %arg5[%c0_19, %c0_20], %28 {strides = array<i32>} : memref<8x128xi32, #tpu.memory_space<vmem>>, vector<8x128xi32>,
      %c0_21 = arith.constant 0 : index
      %c0_22 = arith.constant 0 : index
      %30 = vector.load %arg8[%c0_21, %c0_22] : memref<8x128xf32, #tpu.memory_space<vmem>>, vector<8x128xf32>
      %cst_23 = arith.constant 0.000000e+00 : f32
      %31 = vector.broadcast %cst_23 : f32 to vector<8x128xf32>
      %32 = arith.addf %30, %31 : vector<8x128xf32>
      %c0_24 = arith.constant 0 : index
      %c0_25 = arith.constant 0 : index
      %33 = vector.load %arg6[%c0_24, %c0_25] : memref<8x128xf32, #tpu.memory_space<vmem>>, vector<8x128xf32>
      tpu.vector_store %arg6[%c0_24, %c0_25], %32 {strides = array<i32>} : memref<8x128xf32, #tpu.memory_space<vmem>>, vector<8x128xf32>,
    } else {
    }
    return
  }
  func.func @transform_0(%arg0: i32, %arg1: i32) -> (i32, i32) {
    %c0_i32 = arith.constant 0 : i32
    %c0_i32_0 = arith.constant 0 : i32
    return %c0_i32, %arg1 : i32, i32
  }
  func.func @transform_1(%arg0: i32, %arg1: i32) -> (i32, i32) {
    %c0_i32 = arith.constant 0 : i32
    %c0_i32_0 = arith.constant 0 : i32
    return %c0_i32, %arg1 : i32, i32
  }
  func.func @transform_2(%arg0: i32, %arg1: i32) -> (i32, i32) {
    %c0_i32 = arith.constant 0 : i32
    %c0_i32_0 = arith.constant 0 : i32
    return %arg0, %c0_i32 : i32, i32
  }
  func.func @transform_3(%arg0: i32, %arg1: i32) -> (i32, i32) {
    %c0_i32 = arith.constant 0 : i32
    %c0_i32_0 = arith.constant 0 : i32
    return %arg0, %c0_i32 : i32, i32
  }
  func.func @transform_4(%arg0: i32, %arg1: i32) -> (i32, i32) {
    %c0_i32 = arith.constant 0 : i32
    %c0_i32_0 = arith.constant 0 : i32
    return %arg0, %c0_i32 : i32, i32
  }
}

</mosaic_0001>

<bundles_post_ra>
// kernel: tpu_custom_call.1
= control target key start
LH: loop header
LB: loop body
LE: loop exit
PB: predicated region body
PF: predicated region fallthrough
CT: control target
= control target key end

     0   :  { %10 = vsyncpa [#allocation5], 0  ;;  %s10255_s0 = inlined_call_operand.hbm [shape: f32[1,384], index: 0, kind: input, shape index: {}]   ;;  %s10256_s1 = inlined_call_operand.vmem [shape: f32[1,384], index: 1, kind: input, shape index: {}]   ;;  %s10257_s2 = inlined_call_operand.hbm [shape: f32[8,128], index: 2, kind: input, shape index: {}]   ;;  %s10258_s3 = inlined_call_operand.hbm [shape: s32[8,128], index: 3, kind: output, shape index: {0}]   ;;  %s10259_s4 = inlined_call_operand.hbm [shape: f32[8,128], index: 4, kind: output, shape index: {1}]  }
   0x1   :  { %11 = vsyncpa [#allocation8], 0 }
   0x2   :  { %12 = vsyncpa [#allocation6], 0 }
   0x3   :  { %13 = vsyncpa [#allocation11], 0  ;;  %s5287_s15 = smov [#allocation4]   ;;  %s5288_s17 = smov [#allocation7]  }
   0x4   :  { %s20_s16 = sshll.u32 %s5287_s15, 4  ;;  %s32_s18 = sshll.u32 %s5288_s17, 4  ;;  %s21_s16 = int_to_ptr.vmem [resolvable:$true] %s20_s16  ;;  %s33_s18 = int_to_ptr.vmem [resolvable:$true] %s32_s18 }
   0x5   :  { %s5191_s21 = scalar_lea.hbm %s10255_s0, 48 }
   0x6   :  { %p5192_p0 = scmp.ne.s32.totalorder %s10255_s0, %s5191_s21  ;;  %p5195_p1 = scmp.lt.u32.totalorder %s5191_s21, %s10255_s0 }
   0x8   :  { %p5197_p2 = pnand %p5195_p1, %p5192_p0 }
   0xa   :  { %5200 = shalt.err (!%p5197_p2)
}
   0xb   :  { %s5201_s26 = scalar_lea.vmem %s21_s16, 48  ;;  %s5205_s27 = scalar_lea.vmem %s21_s16, 64 }
   0xc   :  { %p5202_p3 = scmp.ne.s32.totalorder %s21_s16, %s5201_s26  ;;  %p5206_p4 = scmp.lt.s32.totalorder %s21_s16, %s21_s16 }
   0xd   :  { %p5207_p5 = scmp.lt.s32.totalorder %s5205_s27, %s5201_s26 }
   0xf   :  { %p5208_p6 = por %p5207_p5, %p5206_p4 }
  0x11   :  { %p5209_p7 = pnand %p5208_p6, %p5202_p3 }
  0x13   :  { %5212 = shalt.err (!%p5209_p7)
}
  0x14   :  { %23 = dma.hbm_to_vmem [thread:$0]  %s10255_s0, 48, %s21_s16, [#allocation5]  }
  0x15   :  { %s5213_s6 = scalar_lea.hbm %s10257_s2, 128 }
  0x16   :  { %p5214_p8 = scmp.ne.s32.totalorder %s10257_s2, %s5213_s6  ;;  %p5217_p9 = scmp.lt.u32.totalorder %s5213_s6, %s10257_s2 }
  0x18   :  { %p5219_p10 = pnand %p5217_p9, %p5214_p8 }
  0x1a   :  { %5222 = shalt.err (!%p5219_p10)
}
  0x1b   :  { %s5223_s11 = scalar_lea.vmem %s33_s18, 128  ;;  %p5228_p12 = scmp.lt.s32.totalorder %s33_s18, %s33_s18 }
  0x1c   :  { %p5224_p11 = scmp.ne.s32.totalorder %s33_s18, %s5223_s11  ;;  %p5229_p13 = scmp.lt.s32.totalorder %s5223_s11, %s5223_s11 }
  0x1e   :  { %p5230_p0 = por %p5229_p13, %p5228_p12 }
  0x20   :  { %p5231_p1 = pnand %p5230_p0, %p5224_p11 }
  0x22   :  { %5234 = shalt.err (!%p5231_p1)
}
  0x23   :  { %35 = dma.hbm_to_vmem [thread:$0]  %s10257_s2, 128, %s33_s18, [#allocation8]  }
  0x24   :  { %5279 = dma.done.wait [#allocation5], 48  }
  0x25   :  { %5280 = vsyncadd [#allocation5], 4294967248 }
  0x26   :  { %5281 = dma.done.wait [#allocation8], 128  }
  0x27   :  { %5282 = vsyncadd [#allocation8], 4294967168  ;;  %v10260_v0 = vlaneseq  ;;  %v5347_v3 = vld [vmem:[#allocation7] sm:$0xff] }
  0x29   :  { %v5342_v1 = vshrl.u32 %v10260_v0, 7 }
  0x2b   :  { %10719 = vst [vmem:[#allocation16_spill] sm:$0xff] %v5342_v1  ;;  %v5345_v2 = vsub.s32 0, %v5342_v1  ;;  %v5352_v5 = vsub.s32 1, %v5342_v1  ;;  %v5357_v7 = vsub.s32 2, %v5342_v1  ;;  %v254_v9 = vsub.s32 3, %v5342_v1 }
  0x2c   :  { %v321_v15 = vsub.s32 4, %v5342_v1  ;;  %v388_v33 = vsub.s32 5, %v5342_v1  ;;  %v455_v51 = vsub.s32 6, %v5342_v1 }
  0x2d   :  { %v54_v4 = vrot.slane %v5347_v3, %v5345_v2  ;;  %v121_v6 = vrot.slane %v5347_v3, %v5352_v5  ;;  %10720 = vst [vmem:[#allocation17_spill] sm:$0xff] %v5357_v7  ;;  %v188_v8 = vrot.slane %v5347_v3, %v5357_v7  ;;  %v255_v10 = vrot.slane %v5347_v3, %v254_v9 }
  0x2e   :  { %v322_v18 = vrot.slane %v5347_v3, %v321_v15  ;;  %v389_v36 = vrot.slane %v5347_v3, %v388_v33  ;;  %v456_v54 = vrot.slane %v5347_v3, %v455_v51  ;;  %v522_v15 = vsub.s32 7, %v5342_v1 }
  0x2f   :  { %64 = vbcast.lane.b32.xlu1 %v54_v4, 272  ;;  %56 = vbcast.lane.b32.xlu0 %v54_v4, 256 }
  0x33   :  { %68 = vbcast.lane.b32.xlu1 %v54_v4, 280  ;;  %60 = vbcast.lane.b32.xlu0 %v54_v4, 264 }
  0x37   :  { %76 = vbcast.lane.b32.xlu1 %v54_v4, 296  ;;  %72 = vbcast.lane.b32.xlu0 %v54_v4, 288 }
  0x3b   :  { %84 = vbcast.lane.b32.xlu1 %v54_v4, 312  ;;  %80 = vbcast.lane.b32.xlu0 %v54_v4, 304 }
  0x3f   :  { %92 = vbcast.lane.b32.xlu1 %v54_v4, 328  ;;  %88 = vbcast.lane.b32.xlu0 %v54_v4, 320 }
  0x43   :  { %100 = vbcast.lane.b32.xlu1 %v54_v4, 344  ;;  %96 = vbcast.lane.b32.xlu0 %v54_v4, 336 }
  0x47   :  { %108 = vbcast.lane.b32.xlu1 %v54_v4, 360  ;;  %104 = vbcast.lane.b32.xlu0 %v54_v4, 352 }
  0x4b   :  { %116 = vbcast.lane.b32.xlu1 %v54_v4, 376  ;;  %112 = vbcast.lane.b32.xlu0 %v54_v4, 368 }
  0x4f   :  { %127 = vbcast.lane.b32.xlu1 %v121_v6, 264  ;;  %123 = vbcast.lane.b32.xlu0 %v121_v6, 256 }
  0x53   :  { %135 = vbcast.lane.b32.xlu1 %v121_v6, 280  ;;  %131 = vbcast.lane.b32.xlu0 %v121_v6, 272 }
  0x57   :  { %143 = vbcast.lane.b32.xlu1 %v121_v6, 296  ;;  %139 = vbcast.lane.b32.xlu0 %v121_v6, 288 }
  0x5b   :  { %151 = vbcast.lane.b32.xlu1 %v121_v6, 312  ;;  %147 = vbcast.lane.b32.xlu0 %v121_v6, 304 }
  0x5f   :  { %159 = vbcast.lane.b32.xlu1 %v121_v6, 328  ;;  %155 = vbcast.lane.b32.xlu0 %v121_v6, 320 }
  0x63   :  { %167 = vbcast.lane.b32.xlu1 %v121_v6, 344  ;;  %163 = vbcast.lane.b32.xlu0 %v121_v6, 336 }
  0x67   :  { %175 = vbcast.lane.b32.xlu1 %v121_v6, 360  ;;  %171 = vbcast.lane.b32.xlu0 %v121_v6, 352 }
  0x6b   :  { %183 = vbcast.lane.b32.xlu1 %v121_v6, 376  ;;  %179 = vbcast.lane.b32.xlu0 %v121_v6, 368 }
  0x6f   :  { %194 = vbcast.lane.b32.xlu1 %v188_v8, 264  ;;  %190 = vbcast.lane.b32.xlu0 %v188_v8, 256 }
  0x73   :  { %202 = vbcast.lane.b32.xlu1 %v188_v8, 280  ;;  %198 = vbcast.lane.b32.xlu0 %v188_v8, 272 }
  0x77   :  { %210 = vbcast.lane.b32.xlu1 %v188_v8, 296  ;;  %206 = vbcast.lane.b32.xlu0 %v188_v8, 288 }
  0x7b   :  { %218 = vbcast.lane.b32.xlu1 %v188_v8, 312  ;;  %214 = vbcast.lane.b32.xlu0 %v188_v8, 304 }
  0x7f   :  { %226 = vbcast.lane.b32.xlu1 %v188_v8, 328  ;;  %222 = vbcast.lane.b32.xlu0 %v188_v8, 320 }
  0x83   :  { %234 = vbcast.lane.b32.xlu1 %v188_v8, 344  ;;  %230 = vbcast.lane.b32.xlu0 %v188_v8, 336 }
  0x87   :  { %242 = vbcast.lane.b32.xlu1 %v188_v8, 360  ;;  %238 = vbcast.lane.b32.xlu0 %v188_v8, 352 }
  0x8b   :  { %250 = vbcast.lane.b32.xlu1 %v188_v8, 376  ;;  %246 = vbcast.lane.b32.xlu0 %v188_v8, 368 }
  0x8f   :  { %261 = vbcast.lane.b32.xlu1 %v255_v10, 264  ;;  %257 = vbcast.lane.b32.xlu0 %v255_v10, 256 }
  0x93   :  { %269 = vbcast.lane.b32.xlu1 %v255_v10, 280  ;;  %265 = vbcast.lane.b32.xlu0 %v255_v10, 272 }
  0x97   :  { %277 = vbcast.lane.b32.xlu1 %v255_v10, 296  ;;  %273 = vbcast.lane.b32.xlu0 %v255_v10, 288 }
  0x9b   :  { %285 = vbcast.lane.b32.xlu1 %v255_v10, 312  ;;  %281 = vbcast.lane.b32.xlu0 %v255_v10, 304 }
  0x9f   :  { %293 = vbcast.lane.b32.xlu1 %v255_v10, 328  ;;  %289 = vbcast.lane.b32.xlu0 %v255_v10, 320 }
  0xa1   :  { %v5363_v11 = vpop.permute.xlu1 %64  ;;  %v5365_v12 = vpop.permute.xlu0 %56 }
  0xa3   :  { %301 = vbcast.lane.b32.xlu1 %v255_v10, 344  ;;  %297 = vbcast.lane.b32.xlu0 %v255_v10, 336 }
  0xa5   :  { %v5367_v13 = vpop.permute.xlu1 %68  ;;  %v5369_v14 = vpop.permute.xlu0 %60 }
  0xa7   :  { %309 = vbcast.lane.b32.xlu1 %v255_v10, 360  ;;  %305 = vbcast.lane.b32.xlu0 %v255_v10, 352 }
  0xa9   :  { %v5372_v16 = vpop.permute.xlu1 %76  ;;  %v5374_v17 = vpop.permute.xlu0 %72 }
  0xab   :  { %317 = vbcast.lane.b32.xlu1 %v255_v10, 376  ;;  %313 = vbcast.lane.b32.xlu0 %v255_v10, 368 }
  0xad   :  { %v5377_v19 = vpop.permute.xlu1 %84  ;;  %v5379_v20 = vpop.permute.xlu0 %80 }
  0xaf   :  { %328 = vbcast.lane.b32.xlu1 %v322_v18, 264  ;;  %324 = vbcast.lane.b32.xlu0 %v322_v18, 256 }
  0xb1   :  { %v5381_v21 = vpop.permute.xlu1 %92  ;;  %v5383_v22 = vpop.permute.xlu0 %88 }
  0xb3   :  { %336 = vbcast.lane.b32.xlu1 %v322_v18, 280  ;;  %332 = vbcast.lane.b32.xlu0 %v322_v18, 272 }
  0xb5   :  { %v5385_v23 = vpop.permute.xlu1 %100  ;;  %v5387_v24 = vpop.permute.xlu0 %96 }
  0xb7   :  { %344 = vbcast.lane.b32.xlu1 %v322_v18, 296  ;;  %340 = vbcast.lane.b32.xlu0 %v322_v18, 288 }
  0xb9   :  { %v5389_v25 = vpop.permute.xlu1 %108  ;;  %v5391_v26 = vpop.permute.xlu0 %104 }
  0xbb   :  { %352 = vbcast.lane.b32.xlu1 %v322_v18, 312  ;;  %348 = vbcast.lane.b32.xlu0 %v322_v18, 304 }
  0xbd   :  { %v5393_v27 = vpop.permute.xlu1 %116  ;;  %v5395_v28 = vpop.permute.xlu0 %112 }
  0xbf   :  { %360 = vbcast.lane.b32.xlu1 %v322_v18, 328  ;;  %356 = vbcast.lane.b32.xlu0 %v322_v18, 320 }
  0xc1   :  { %v5397_v29 = vpop.permute.xlu1 %127  ;;  %v5399_v30 = vpop.permute.xlu0 %123 }
  0xc3   :  { %368 = vbcast.lane.b32.xlu1 %v322_v18, 344  ;;  %364 = vbcast.lane.b32.xlu0 %v322_v18, 336 }
  0xc5   :  { %v5401_v31 = vpop.permute.xlu1 %135  ;;  %v5403_v32 = vpop.permute.xlu0 %131 }
  0xc7   :  { %376 = vbcast.lane.b32.xlu1 %v322_v18, 360  ;;  %372 = vbcast.lane.b32.xlu0 %v322_v18, 352 }
  0xc9   :  { %v5406_v34 = vpop.permute.xlu1 %143  ;;  %v5408_v35 = vpop.permute.xlu0 %139 }
  0xcb   :  { %384 = vbcast.lane.b32.xlu1 %v322_v18, 376  ;;  %380 = vbcast.lane.b32.xlu0 %v322_v18, 368 }
  0xcd   :  { %v5411_v37 = vpop.permute.xlu1 %151  ;;  %v5413_v38 = vpop.permute.xlu0 %147 }
  0xcf   :  { %395 = vbcast.lane.b32.xlu1 %v389_v36, 264  ;;  %391 = vbcast.lane.b32.xlu0 %v389_v36, 256 }
  0xd1   :  { %v5415_v39 = vpop.permute.xlu1 %159  ;;  %v5417_v40 = vpop.permute.xlu0 %155 }
  0xd3   :  { %403 = vbcast.lane.b32.xlu1 %v389_v36, 280  ;;  %399 = vbcast.lane.b32.xlu0 %v389_v36, 272 }
  0xd5   :  { %v5419_v41 = vpop.permute.xlu1 %167  ;;  %v5421_v42 = vpop.permute.xlu0 %163 }
  0xd7   :  { %411 = vbcast.lane.b32.xlu1 %v389_v36, 296  ;;  %407 = vbcast.lane.b32.xlu0 %v389_v36, 288 }
  0xd9   :  { %v5423_v43 = vpop.permute.xlu1 %175  ;;  %v5425_v44 = vpop.permute.xlu0 %171 }
  0xdb   :  { %419 = vbcast.lane.b32.xlu1 %v389_v36, 312  ;;  %415 = vbcast.lane.b32.xlu0 %v389_v36, 304 }
  0xdd   :  { %v5427_v45 = vpop.permute.xlu1 %183  ;;  %v5429_v46 = vpop.permute.xlu0 %179 }
  0xdf   :  { %427 = vbcast.lane.b32.xlu1 %v389_v36, 328  ;;  %423 = vbcast.lane.b32.xlu0 %v389_v36, 320 }
  0xe1   :  { %v5431_v47 = vpop.permute.xlu1 %194  ;;  %v5433_v48 = vpop.permute.xlu0 %190 }
  0xe2   :  { %10721 = vst [vmem:[#allocation18_spill] sm:$0xff] %v5431_v47  ;;  %10722 = vst [vmem:[#allocation19_spill] sm:$0xff] %v5433_v48 }
  0xe3   :  { %435 = vbcast.lane.b32.xlu1 %v389_v36, 344  ;;  %431 = vbcast.lane.b32.xlu0 %v389_v36, 336 }
  0xe5   :  { %v5435_v49 = vpop.permute.xlu1 %202  ;;  %v5437_v50 = vpop.permute.xlu0 %198 }
  0xe6   :  { %10723 = vst [vmem:[#allocation20_spill] sm:$0xff] %v5435_v49  ;;  %10724 = vst [vmem:[#allocation21_spill] sm:$0xff] %v5437_v50 }
  0xe7   :  { %443 = vbcast.lane.b32.xlu1 %v389_v36, 360  ;;  %439 = vbcast.lane.b32.xlu0 %v389_v36, 352 }
  0xe9   :  { %v5440_v52 = vpop.permute.xlu1 %210  ;;  %v5442_v53 = vpop.permute.xlu0 %206 }
  0xea   :  { %10725 = vst [vmem:[#allocation22_spill] sm:$0xff] %v5440_v52  ;;  %10726 = vst [vmem:[#allocation23_spill] sm:$0xff] %v5442_v53 }
  0xeb   :  { %451 = vbcast.lane.b32.xlu1 %v389_v36, 376  ;;  %447 = vbcast.lane.b32.xlu0 %v389_v36, 368  ;;  %v523_v36 = vrot.slane %v5347_v3, %v522_v15 }
  0xed   :  { %v5445_v55 = vpop.permute.xlu1 %218  ;;  %v5447_v56 = vpop.permute.xlu0 %214 }
  0xee   :  { %10727 = vst [vmem:[#allocation24_spill] sm:$0xff] %v5445_v55  ;;  %10728 = vst [vmem:[#allocation25_spill] sm:$0xff] %v5447_v56 }
  0xef   :  { %462 = vbcast.lane.b32.xlu1 %v456_v54, 264  ;;  %458 = vbcast.lane.b32.xlu0 %v456_v54, 256 }
  0xf1   :  { %v5449_v57 = vpop.permute.xlu1 %226  ;;  %v5451_v58 = vpop.permute.xlu0 %222 }
  0xf2   :  { %10729 = vst [vmem:[#allocation26_spill] sm:$0xff] %v5449_v57  ;;  %10730 = vst [vmem:[#allocation27_spill] sm:$0xff] %v5451_v58 }
  0xf3   :  { %470 = vbcast.lane.b32.xlu1 %v456_v54, 280  ;;  %466 = vbcast.lane.b32.xlu0 %v456_v54, 272 }
  0xf5   :  { %v5453_v59 = vpop.permute.xlu1 %234  ;;  %v5455_v60 = vpop.permute.xlu0 %230 }
  0xf6   :  { %10731 = vst [vmem:[#allocation28_spill] sm:$0xff] %v5453_v59  ;;  %10732 = vst [vmem:[#allocation29_spill] sm:$0xff] %v5455_v60 }
  0xf7   :  { %478 = vbcast.lane.b32.xlu1 %v456_v54, 296  ;;  %474 = vbcast.lane.b32.xlu0 %v456_v54, 288 }
  0xf9   :  { %v5457_v61 = vpop.permute.xlu1 %242  ;;  %v5459_v62 = vpop.permute.xlu0 %238 }
  0xfa   :  { %10733 = vst [vmem:[#allocation30_spill] sm:$0xff] %v5457_v61  ;;  %10734 = vst [vmem:[#allocation31_spill] sm:$0xff] %v5459_v62 }
  0xfb   :  { %486 = vbcast.lane.b32.xlu1 %v456_v54, 312  ;;  %482 = vbcast.lane.b32.xlu0 %v456_v54, 304 }
  0xfd   :  { %v5461_v63 = vpop.permute.xlu1 %250  ;;  %v5463_v4 = vpop.permute.xlu0 %246 }
  0xfe   :  { %10735 = vst [vmem:[#allocation32_spill] sm:$0xff] %v5461_v63  ;;  %10736 = vst [vmem:[#allocation33_spill] sm:$0xff] %v5463_v4 }
  0xff   :  { %494 = vbcast.lane.b32.xlu1 %v456_v54, 328  ;;  %490 = vbcast.lane.b32.xlu0 %v456_v54, 320 }
 0x101   :  { %v5465_v6 = vpop.permute.xlu1 %261  ;;  %v5467_v8 = vpop.permute.xlu0 %257 }
 0x102   :  { %10737 = vst [vmem:[#allocation34_spill] sm:$0xff] %v5465_v6  ;;  %10738 = vst [vmem:[#allocation35_spill] sm:$0xff] %v5467_v8 }
 0x103   :  { %502 = vbcast.lane.b32.xlu1 %v456_v54, 344  ;;  %498 = vbcast.lane.b32.xlu0 %v456_v54, 336 }
 0x105   :  { %v5469_v9 = vpop.permute.xlu1 %269  ;;  %v5471_v10 = vpop.permute.xlu0 %265 }
 0x106   :  { %10739 = vst [vmem:[#allocation36_spill] sm:$0xff] %v5469_v9  ;;  %10740 = vst [vmem:[#allocation37_spill] sm:$0xff] %v5471_v10 }
 0x107   :  { %510 = vbcast.lane.b32.xlu1 %v456_v54, 360  ;;  %506 = vbcast.lane.b32.xlu0 %v456_v54, 352 }
 0x109   :  { %v5474_v18 = vpop.permute.xlu1 %277  ;;  %v5476_v33 = vpop.permute.xlu0 %273 }
 0x10a   :  { %10741 = vst [vmem:[#allocation38_spill] sm:$0xff] %v5474_v18  ;;  %10742 = vst [vmem:[#allocation39_spill] sm:$0xff] %v5476_v33 }
 0x10b   :  { %518 = vbcast.lane.b32.xlu1 %v456_v54, 376  ;;  %514 = vbcast.lane.b32.xlu0 %v456_v54, 368 }
 0x10d   :  { %v5479_v51 = vpop.permute.xlu1 %285  ;;  %v5481_v0 = vpop.permute.xlu0 %281 }
 0x10e   :  { %10743 = vst [vmem:[#allocation40_spill] sm:$0xff] %v5479_v51  ;;  %10744 = vst [vmem:[#allocation41_spill] sm:$0xff] %v5481_v0 }
 0x10f   :  { %529 = vbcast.lane.b32.xlu1 %v523_v36, 264  ;;  %525 = vbcast.lane.b32.xlu0 %v523_v36, 256 }
 0x111   :  { %v5483_v9 = vpop.permute.xlu1 %293  ;;  %v5485_v10 = vpop.permute.xlu0 %289 }
 0x112   :  { %10745 = vst [vmem:[#allocation42_spill] sm:$0xff] %v5483_v9  ;;  %10746 = vst [vmem:[#allocation43_spill] sm:$0xff] %v5485_v10 }
 0x113   :  { %537 = vbcast.lane.b32.xlu1 %v523_v36, 280  ;;  %533 = vbcast.lane.b32.xlu0 %v523_v36, 272 }
 0x115   :  { %v5487_v1 = vpop.permute.xlu1 %301  ;;  %v5489_v18 = vpop.permute.xlu0 %297 }
 0x116   :  { %10747 = vst [vmem:[#allocation44_spill] sm:$0xff] %v5487_v1  ;;  %10748 = vst [vmem:[#allocation45_spill] sm:$0xff] %v5489_v18 }
 0x117   :  { %545 = vbcast.lane.b32.xlu1 %v523_v36, 296  ;;  %541 = vbcast.lane.b32.xlu0 %v523_v36, 288 }
 0x119   :  { %v5491_v3 = vpop.permute.xlu1 %309  ;;  %v5493_v54 = vpop.permute.xlu0 %305 }
 0x11a   :  { %10749 = vst [vmem:[#allocation46_spill] sm:$0xff] %v5491_v3  ;;  %10750 = vst [vmem:[#allocation47_spill] sm:$0xff] %v5493_v54 }
 0x11b   :  { %553 = vbcast.lane.b32.xlu1 %v523_v36, 312  ;;  %549 = vbcast.lane.b32.xlu0 %v523_v36, 304 }
 0x11d   :  { %v5495_v15 = vpop.permute.xlu1 %317  ;;  %v5497_v0 = vpop.permute.xlu0 %313 }
 0x11e   :  { %10751 = vst [vmem:[#allocation48_spill] sm:$0xff] %v5495_v15  ;;  %10752 = vst [vmem:[#allocation49_spill] sm:$0xff] %v5497_v0  ;;  %v48_v0 = vld [vmem:[#allocation4] sm:$0x7] }
 0x11f   :  { %561 = vbcast.lane.b32.xlu1 %v523_v36, 328  ;;  %557 = vbcast.lane.b32.xlu0 %v523_v36, 320 }
 0x121   :  { %v5499_v10 = vpop.permute.xlu1 %328  ;;  %v5501_v9 = vpop.permute.xlu0 %324 }
 0x122   :  { %10753 = vst [vmem:[#allocation50_spill] sm:$0xff] %v5499_v10  ;;  %10754 = vst [vmem:[#allocation51_spill] sm:$0xff] %v5501_v9  ;;  %v5514_v10 = vrot.slane %v48_v0, %v5345_v2  ;;  %v5517_v9 = vrot.slane %v48_v0, %v5352_v5 }
 0x123   :  { %569 = vbcast.lane.b32.xlu1 %v523_v36, 344  ;;  %565 = vbcast.lane.b32.xlu0 %v523_v36, 336 }
 0x124   :  { %vm609_vm0 = vcmp.lt.f32.partialorder %v5514_v10, %v5363_v11  ;;  %vm610_vm1 = vcmp.lt.f32.partialorder %v5517_v9, %v5363_v11  ;;  %vm603_vm2 = vcmp.lt.f32.partialorder %v5514_v10, %v5365_v12  ;;  %vm604_vm3 = vcmp.lt.f32.partialorder %v5517_v9, %v5365_v12 }
 0x125   :  { %v5503_v18 = vpop.permute.xlu1 %336  ;;  %v5505_v1 = vpop.permute.xlu0 %332  ;;  %vm612_vm4 = vcmp.lt.f32.partialorder %v5514_v10, %v5367_v13  ;;  %vm613_vm5 = vcmp.lt.f32.partialorder %v5517_v9, %v5367_v13  ;;  %vm606_vm7 = vcmp.lt.f32.partialorder %v5514_v10, %v5369_v14  ;;  %vm607_vm9 = vcmp.lt.f32.partialorder %v5517_v9, %v5369_v14 }
 0x126   :  { %10755 = vst [vmem:[#allocation52_spill] sm:$0xff] %v5503_v18  ;;  %10756 = vst [vmem:[#allocation53_spill] sm:$0xff] %v5505_v1  ;;  %v49_v1 = vld [vmem:[%s10256_s1] sm:$0x7]  ;;  %vm618_vm10 = vcmp.lt.f32.partialorder %v5514_v10, %v5372_v16  ;;  %vm619_vm11 = vcmp.lt.f32.partialorder %v5517_v9, %v5372_v16  ;;  %vm615_vm12 = vcmp.lt.f32.partialorder %v5514_v10, %v5374_v17 }
 0x127   :  { %577 = vbcast.lane.b32.xlu1 %v523_v36, 360  ;;  %573 = vbcast.lane.b32.xlu0 %v523_v36, 352  ;;  %vm616_vm14 = vcmp.lt.f32.partialorder %v5517_v9, %v5374_v17 }
 0x129   :  { %v5507_v54 = vpop.permute.xlu1 %344  ;;  %v5509_v3 = vpop.permute.xlu0 %340 }
 0x12a   :  { %10757 = vst [vmem:[#allocation54_spill] sm:$0xff] %v5507_v54  ;;  %10758 = vst [vmem:[#allocation55_spill] sm:$0xff] %v5509_v3  ;;  %v5527_v3 = vrot.slane %v48_v0, %v5357_v7  ;;  %v5543_v0 = vrot.slane %v49_v1, %v5352_v5  ;;  %v10363_v7 = vmov 0.0  }
 0x12b   :  { %585 = vbcast.lane.b32.xlu1 %v523_v36, 376  ;;  %581 = vbcast.lane.b32.xlu0 %v523_v36, 368  ;;  %v5536_v36 = vrot.slane %v49_v1, %v5345_v2  ;;  %v4806_v2 = vsel %vm610_vm1, 1.0, %v10363_v7  ;;  %v4800_v1 = vsel %vm604_vm3, 1.0, %v10363_v7  ;;  %v5560_v5 = vsel %vm612_vm4, 1.0, %v10363_v7 }
 0x12c   :  { %10763 = vst [vmem:[#allocation60_spill] sm:$0xff] %v5543_v0  ;;  %vm605_vm6 = vcmp.lt.f32.partialorder %v5527_v3, %v5365_v12  ;;  %vm611_vm8 = vcmp.lt.f32.partialorder %v5527_v3, %v5363_v11  ;;  %v5568_v12 = vsel %vm613_vm5, 1.0, %v10363_v7  ;;  %v5575_v11 = vmul.f32 %v4806_v2, %v5543_v0 }
 0x12d   :  { %v5511_v15 = vpop.permute.xlu0 %348  ;;  %v5519_v18 = vpop.permute.xlu1 %352  ;;  %10762 = vst [vmem:[#allocation59_spill] sm:$0xff] %v5536_v36  ;;  %v5582_v8 = vsel %vm605_vm6, 1.0, %v10363_v7  ;;  %v5589_v6 = vmul.f32 %v5560_v5, %v5536_v36  ;;  %v4803_v4 = vsel %vm607_vm9, 1.0, %v10363_v7  ;;  %v5602_v63 = vsel %vm618_vm10, 1.0, %v10363_v7 }
 0x12e   :  { %10759 = vst [vmem:[#allocation56_spill] sm:$0xff] %v5511_v15  ;;  %10760 = vst [vmem:[#allocation57_spill] sm:$0xff] %v5519_v18  ;;  %v4799_v18 = vsel %vm603_vm2, 1.0, %v10363_v7  ;;  %vm608_vm13 = vcmp.lt.f32.partialorder %v5527_v3, %v5369_v14  ;;  %vm614_vm15 = vcmp.lt.f32.partialorder %v5527_v3, %v5367_v13  ;;  %v5618_v62 = vsel %vm619_vm11, 1.0, %v10363_v7 }
 0x12f   :  { %10767 = vst [vmem:[#allocation64_spill] sm:$0xff] %v5575_v11  ;;  %v5578_v33 = vmul.f32 %v4799_v18, %v5536_v36  ;;  %10769 = vst [vmem:[#allocation66_spill] sm:$0xff] %v5582_v8  ;;  %v5594_v11 = vsel %vm611_vm8, 1.0, %v10363_v7  ;;  %vm625_vm1 = vcmp.lt.f32.partialorder %v5517_v9, %v5377_v19  ;;  %vm621_vm2 = vcmp.lt.f32.partialorder %v5514_v10, %v5379_v20 }
 0x130   :  { %10771 = vst [vmem:[#allocation68_spill] sm:$0xff] %v5589_v6  ;;  %10772 = vst [vmem:[#allocation69_spill] sm:$0xff] %v5594_v11  ;;  %v4812_v60 = vsel %vm616_vm14, 1.0, %v10363_v7  ;;  %vm622_vm3 = vcmp.lt.f32.partialorder %v5517_v9, %v5379_v20  ;;  %vm630_vm4 = vcmp.lt.f32.partialorder %v5514_v10, %v5381_v21  ;;  %vm631_vm5 = vcmp.lt.f32.partialorder %v5517_v9, %v5381_v21 }
 0x131   :  { %v5524_v54 = vpop.permute.xlu0 %356  ;;  %v5548_v15 = vpop.permute.xlu1 %360  ;;  %10768 = vst [vmem:[#allocation65_spill] sm:$0xff] %v5578_v33  ;;  %v5598_v33 = vmul.f32 %v5568_v12, %v5543_v0  ;;  %vm627_vm6 = vcmp.lt.f32.partialorder %v5514_v10, %v5383_v22  ;;  %v5670_v57 = vmul.f32 %v4812_v60, %v5543_v0  ;;  %v5673_v56 = vsel %vm622_vm3, 1.0, %v10363_v7 }
 0x132   :  { %10761 = vst [vmem:[#allocation58_spill] sm:$0xff] %v5524_v54  ;;  %v4805_v54 = vsel %vm609_vm0, 1.0, %v10363_v7  ;;  %10764 = vst [vmem:[#allocation61_spill] sm:$0xff] %v5548_v15  ;;  %vm624_vm0 = vcmp.lt.f32.partialorder %v5514_v10, %v5377_v19  ;;  %v5676_v55 = vsel %vm630_vm4, 1.0, %v10363_v7  ;;  %vm628_vm8 = vcmp.lt.f32.partialorder %v5517_v9, %v5383_v22 }
 0x133   :  { %v5565_v15 = vmul.f32 %v4805_v54, %v5536_v36  ;;  %10773 = vst [vmem:[#allocation70_spill] sm:$0xff] %v5598_v33  ;;  %v1756_v33 = vadd.f32 %v4800_v1, %v4799_v18  ;;  %v1764_v61 = vadd.f32 %v4806_v2, %v4805_v54  ;;  %v5631_v18 = vmul.f32 %v5602_v63, %v5536_v36 }
 0x134   :  { %v5645_v54 = vmul.f32 %v5618_v62, %v5543_v0  ;;  %v5648_v2 = vsel %vm624_vm0, 1.0, %v10363_v7  ;;  %10782 = vst [vmem:[#allocation79_spill] sm:$0xff] %v5670_v57  ;;  %vm636_vm9 = vcmp.lt.f32.partialorder %v5514_v10, %v5385_v23  ;;  %v5710_v57 = vmul.f32 %v5673_v56, %v5543_v0 }
 0x135   :  { %v5562_v51 = vpop.permute.xlu0 %364  ;;  %10766 = vst [vmem:[#allocation63_spill] sm:$0xff] %v5565_v15  ;;  %v5585_v15 = vmul.f32 %v4800_v1, %v5543_v0  ;;  %10778 = vst [vmem:[#allocation75_spill] sm:$0xff] %v5631_v18  ;;  %v4811_v1 = vsel %vm615_vm12, 1.0, %v10363_v7  ;;  %v5651_v18 = vsel %vm625_vm1, 1.0, %v10363_v7  ;;  %v5667_v58 = vadd.f32 %v5594_v11, %v1764_v61 }
 0x136   :  { %10765 = vst [vmem:[#allocation62_spill] sm:$0xff] %v5562_v51  ;;  %v4802_v51 = vsel %vm606_vm7, 1.0, %v10363_v7  ;;  %10779 = vst [vmem:[#allocation76_spill] sm:$0xff] %v5645_v54  ;;  %vm617_vm7 = vcmp.lt.f32.partialorder %v5527_v3, %v5374_v17  ;;  %v1757_v54 = vadd.f32 %v5582_v8, %v1756_v33  ;;  %v5687_v61 = vmul.f32 %v5651_v18, %v5543_v0 }
 0x137   :  { %10770 = vst [vmem:[#allocation67_spill] sm:$0xff] %v5585_v15  ;;  %v5606_v15 = vpop.permute.xlu1 %368  ;;  %v5611_v6 = vmul.f32 %v4802_v51, %v5536_v36  ;;  %v5692_v33 = vsel %vm627_vm6, 1.0, %v10363_v7  ;;  %10788 = vst [vmem:[#allocation85_spill] sm:$0xff] %v5710_v57  ;;  %vm637_vm10 = vcmp.lt.f32.partialorder %v5517_v9, %v5385_v23  ;;  %vm620_vm11 = vcmp.lt.f32.partialorder %v5527_v3, %v5372_v16 }
 0x138   :  { %10774 = vst [vmem:[#allocation71_spill] sm:$0xff] %v5606_v15  ;;  %10784 = vst [vmem:[#allocation81_spill] sm:$0xff] %v5687_v61  ;;  %v5706_v61 = vsel %vm608_vm13, 1.0, %v10363_v7  ;;  %v5725_v14 = vsel %vm628_vm8, 1.0, %v10363_v7  ;;  %vm633_vm12 = vcmp.lt.f32.partialorder %v5514_v10, %v5387_v24  ;;  %vm634_vm13 = vcmp.lt.f32.partialorder %v5517_v9, %v5387_v24 }
 0x139   :  { %10775 = vst [vmem:[#allocation72_spill] sm:$0xff] %v5611_v6  ;;  %v5624_v15 = vpop.permute.xlu0 %372  ;;  %v5627_v6 = vmul.f32 %v4803_v4, %v5543_v0  ;;  %10787 = vst [vmem:[#allocation84_spill] sm:$0xff] %v5706_v61  ;;  %vm642_vm14 = vcmp.lt.f32.partialorder %v5514_v10, %v5389_v25  ;;  %vm643_vm0 = vcmp.lt.f32.partialorder %v5517_v9, %v5389_v25  ;;  %v5758_v57 = vsel %vm614_vm15, 1.0, %v10363_v7 }
 0x13a   :  { %10776 = vst [vmem:[#allocation73_spill] sm:$0xff] %v5624_v15  ;;  %v5661_v15 = vsel %vm621_vm2, 1.0, %v10363_v7  ;;  %vm639_vm1 = vcmp.lt.f32.partialorder %v5514_v10, %v5391_v26  ;;  %vm623_vm2 = vcmp.lt.f32.partialorder %v5527_v3, %v5379_v20  ;;  %vm640_vm3 = vcmp.lt.f32.partialorder %v5517_v9, %v5391_v26  ;;  %10793 = vst [vmem:[#allocation90_spill] sm:$0xff] %v5758_v57 }
 0x13b   :  { %10777 = vst [vmem:[#allocation74_spill] sm:$0xff] %v5627_v6  ;;  %v5658_v6 = vmul.f32 %v4811_v1, %v5536_v36  ;;  %v5663_v59 = vpop.permute.xlu1 %376  ;;  %v5698_v8 = vmul.f32 %v5661_v15, %v5536_v36  ;;  %v5765_v53 = vsel %vm633_vm12, 1.0, %v10363_v7  ;;  %v5768_v52 = vsel %vm634_vm13, 1.0, %v10363_v7 }
 0x13c   :  { %10781 = vst [vmem:[#allocation78_spill] sm:$0xff] %v5663_v59  ;;  %v5683_v59 = vmul.f32 %v5648_v2, %v5536_v36  ;;  %vm626_vm4 = vcmp.lt.f32.partialorder %v5527_v3, %v5377_v19  ;;  %vm645_vm15 = vcmp.lt.f32.partialorder %v5514_v10, %v5395_v28  ;;  %v5811_v49 = vmul.f32 %v5765_v53, %v5536_v36 }
 0x13d   :  { %10780 = vst [vmem:[#allocation77_spill] sm:$0xff] %v5658_v6  ;;  %v5679_v6 = vsel %vm631_vm5, 1.0, %v10363_v7  ;;  %v5694_v11 = vpop.permute.xlu0 %380  ;;  %10786 = vst [vmem:[#allocation83_spill] sm:$0xff] %v5698_v8  ;;  %vm629_vm5 = vcmp.lt.f32.partialorder %v5527_v3, %v5383_v22  ;;  %vm646_vm6 = vcmp.lt.f32.partialorder %v5517_v9, %v5395_v28  ;;  %vm648_vm8 = vcmp.lt.f32.partialorder %v5514_v10, %v5393_v27 }
 0x13e   :  { %10783 = vst [vmem:[#allocation80_spill] sm:$0xff] %v5683_v59  ;;  %10785 = vst [vmem:[#allocation82_spill] sm:$0xff] %v5694_v11  ;;  %v1760_v59 = vadd.f32 %v4803_v4, %v4802_v51  ;;  %v5714_v11 = vmul.f32 %v5676_v55, %v5536_v36  ;;  %v5718_v8 = vmul.f32 %v5679_v6, %v5543_v0  ;;  %v5736_v51 = vsel %vm636_vm9, 1.0, %v10363_v7 }
 0x13f   :  { %v5729_v4 = vmul.f32 %v5692_v33, %v5536_v36  ;;  %v5778_v13 = vmul.f32 %v5736_v51, %v5536_v36  ;;  %10798 = vst [vmem:[#allocation95_spill] sm:$0xff] %v5811_v49  ;;  %vm649_vm9 = vcmp.lt.f32.partialorder %v5517_v9, %v5393_v27  ;;  %vm652_vm12 = vcmp.lt.f32.partialorder %v5517_v9, %v5399_v30 }
 0x140   :  { %10789 = vst [vmem:[#allocation86_spill] sm:$0xff] %v5714_v11  ;;  %10790 = vst [vmem:[#allocation87_spill] sm:$0xff] %v5718_v8  ;;  %v5744_v8 = vpop.permute.xlu1 %384  ;;  %v5749_v11 = vsel %vm637_vm10, 1.0, %v10363_v7  ;;  %vm651_vm10 = vcmp.lt.f32.partialorder %v5514_v10, %v5399_v30  ;;  %vm635_vm13 = vcmp.lt.f32.partialorder %v5527_v3, %v5387_v24  ;;  %v5971_v19 = vsel %vm629_vm5, 1.0, %v10363_v7 }
 0x141   :  { %10791 = vst [vmem:[#allocation88_spill] sm:$0xff] %v5729_v4  ;;  %10792 = vst [vmem:[#allocation89_spill] sm:$0xff] %v5744_v8  ;;  %v1761_v4 = vadd.f32 %v5706_v61, %v1760_v59  ;;  %v5762_v8 = vmul.f32 %v5725_v14, %v5543_v0  ;;  %v5770_v50 = vpop.permute.xlu0 %391  ;;  %v1768_v59 = vadd.f32 %v5568_v12, %v5560_v5  ;;  %v5784_v61 = vsel %vm642_vm14, 1.0, %v10363_v7 }
 0x142   :  { %10795 = vst [vmem:[#allocation92_spill] sm:$0xff] %v5770_v50  ;;  %10796 = vst [vmem:[#allocation93_spill] sm:$0xff] %v5778_v13  ;;  %v5796_v5 = vsel %vm639_vm1, 1.0, %v10363_v7  ;;  %v5800_v12 = vmul.f32 %v5749_v11, %v5543_v0  ;;  %v5803_v13 = vsel %vm640_vm3, 1.0, %v10363_v7  ;;  %v1772_v50 = vadd.f32 %v4812_v60, %v4811_v1 }
 0x143   :  { %10794 = vst [vmem:[#allocation91_spill] sm:$0xff] %v5762_v8  ;;  %v5790_v8 = vsel %vm643_vm0, 1.0, %v10363_v7  ;;  %v5827_v60 = vmul.f32 %v5784_v61, %v5536_v36  ;;  %v1769_v48 = vadd.f32 %v5758_v57, %v1768_v59  ;;  %v5844_v17 = vmul.f32 %v5803_v13, %v5543_v0  ;;  %10822 = vst [vmem:[#allocation119_spill] sm:$0xff] %v5971_v19 }
 0x144   :  { %10797 = vst [vmem:[#allocation94_spill] sm:$0xff] %v5800_v12  ;;  %v5823_v12 = vsel %vm617_vm7, 1.0, %v10363_v7  ;;  %v5831_v1 = vmul.f32 %v5790_v8, %v5543_v0  ;;  %v5837_v49 = vpop.permute.xlu1 %395  ;;  %vm632_vm7 = vcmp.lt.f32.partialorder %v5527_v3, %v5381_v21  ;;  %v5858_v59 = vsel %vm646_vm6, 1.0, %v10363_v7 }
 0x145   :  { %10800 = vst [vmem:[#allocation97_spill] sm:$0xff] %v5823_v12  ;;  %10801 = vst [vmem:[#allocation98_spill] sm:$0xff] %v5827_v60  ;;  %v5864_v57 = vpop.permute.xlu0 %399  ;;  %v1773_v60 = vadd.f32 %v5823_v12, %v1772_v50  ;;  %vm654_vm14 = vcmp.lt.f32.partialorder %v5514_v10, %v5397_v29  ;;  %vm655_vm0 = vcmp.lt.f32.partialorder %v5517_v9, %v5397_v29  ;;  %v5881_v50 = vsel %vm649_vm9, 1.0, %v10363_v7 }
 0x146   :  { %10802 = vst [vmem:[#allocation99_spill] sm:$0xff] %v5831_v1  ;;  %10804 = vst [vmem:[#allocation101_spill] sm:$0xff] %v5837_v49  ;;  %v5854_v1 = vsel %vm645_vm15, 1.0, %v10363_v7  ;;  %vm638_vm1 = vcmp.lt.f32.partialorder %v5527_v3, %v5385_v23  ;;  %vm660_vm3 = vcmp.lt.f32.partialorder %v5514_v10, %v5401_v31  ;;  %v5908_v16 = vsel %vm654_vm14, 1.0, %v10363_v7 }
 0x147   :  { %10805 = vst [vmem:[#allocation102_spill] sm:$0xff] %v5844_v17  ;;  %10806 = vst [vmem:[#allocation103_spill] sm:$0xff] %v5864_v57  ;;  %v5878_v17 = vsel %vm648_vm8, 1.0, %v10363_v7  ;;  %v5885_v12 = vmul.f32 %v5854_v1, %v5536_v36  ;;  %vm641_vm15 = vcmp.lt.f32.partialorder %v5527_v3, %v5391_v26  ;;  %v1784_v57 = vadd.f32 %v5651_v18, %v5648_v2 }
 0x148   :  { %10807 = vst [vmem:[#allocation104_spill] sm:$0xff] %v5878_v17  ;;  %10808 = vst [vmem:[#allocation105_spill] sm:$0xff] %v5881_v50  ;;  %v1788_v49 = vadd.f32 %v5725_v14, %v5692_v33  ;;  %v5940_v47 = vsel %vm660_vm3, 1.0, %v10363_v7  ;;  %v5948_v18 = vsel %vm626_vm4, 1.0, %v10363_v7  ;;  %vm657_vm6 = vcmp.lt.f32.partialorder %v5514_v10, %v5403_v32 }
 0x149   :  { %10809 = vst [vmem:[#allocation106_spill] sm:$0xff] %v5885_v12  ;;  %10812 = vst [vmem:[#allocation109_spill] sm:$0xff] %v5908_v16  ;;  %v5921_v12 = vsel %vm623_vm2, 1.0, %v10363_v7  ;;  %vm644_vm2 = vcmp.lt.f32.partialorder %v5527_v3, %v5389_v25  ;;  %vm658_vm8 = vcmp.lt.f32.partialorder %v5517_v9, %v5403_v32  ;;  %vm666_vm9 = vcmp.lt.f32.partialorder %v5514_v10, %v5406_v34 }
 0x14a   :  { %1758 = vadd.xlane.f32.xlu0 %v1757_v54  ;;  %v5815_v54 = vmul.f32 %v5768_v52, %v5543_v0  ;;  %10815 = vst [vmem:[#allocation112_spill] sm:$0xff] %v5921_v12  ;;  %10818 = vst [vmem:[#allocation115_spill] sm:$0xff] %v5940_v47  ;;  %vm667_vm4 = vcmp.lt.f32.partialorder %v5517_v9, %v5406_v34  ;;  %vm647_vm14 = vcmp.lt.f32.partialorder %v5527_v3, %v5395_v28 }
 0x14b   :  { %10820 = vst [vmem:[#allocation117_spill] sm:$0xff] %v5948_v18  ;;  %v1785_v33 = vadd.f32 %v5948_v18, %v1784_v57  ;;  %v1789_v14 = vadd.f32 %v5971_v19, %v1788_v49  ;;  %v5985_v22 = vsel %vm658_vm8, 1.0, %v10363_v7  ;;  %v5996_v49 = vsel %vm632_vm7, 1.0, %v10363_v7 }
 0x14c   :  { %10799 = vst [vmem:[#allocation96_spill] sm:$0xff] %v5815_v54  ;;  %v5835_v54 = vmul.f32 %v5796_v5, %v5536_v36  ;;  %10824 = vst [vmem:[#allocation121_spill] sm:$0xff] %v5985_v22  ;;  %vm650_vm5 = vcmp.lt.f32.partialorder %v5527_v3, %v5393_v27  ;;  %vm673_vm3 = vcmp.lt.f32.partialorder %v5517_v9, %v5411_v37  ;;  %v6029_v57 = vsel %vm635_vm13, 1.0, %v10363_v7 }
 0x14d   :  { %10827 = vst [vmem:[#allocation124_spill] sm:$0xff] %v5996_v49  ;;  %vm670_vm7 = vcmp.lt.f32.partialorder %v5517_v9, %v5413_v38  ;;  %10832 = vst [vmem:[#allocation129_spill] sm:$0xff] %v6029_v57  ;;  %v1804_v19 = vadd.f32 %v5803_v13, %v5796_v5  ;;  %v6043_v24 = vsel %vm673_vm3, 1.0, %v10363_v7  ;;  %vm656_vm13 = vcmp.lt.f32.partialorder %v5527_v3, %v5397_v29 }
 0x14e   :  { %10803 = vst [vmem:[#allocation100_spill] sm:$0xff] %v5835_v54  ;;  %1766 = vadd.xlane.f32.xlu0 %v5667_v58  ;;  %v1776_v58 = vadd.f32 %v5618_v62, %v5602_v63  ;;  %v5891_v54 = vsel %vm620_vm11, 1.0, %v10363_v7  ;;  %v5900_v62 = vsel %vm651_vm10, 1.0, %v10363_v7  ;;  %v5903_v63 = vsel %vm652_vm12, 1.0, %v10363_v7  ;;  %10834 = vst [vmem:[#allocation131_spill] sm:$0xff] %v6043_v24 }
 0x14f   :  { %1762 = vadd.xlane.f32.xlu1 %v1761_v4  ;;  %v1780_v4 = vadd.f32 %v5673_v56, %v5661_v15  ;;  %10810 = vst [vmem:[#allocation107_spill] sm:$0xff] %v5891_v54  ;;  %v5897_v56 = vmul.f32 %v5858_v59, %v5543_v0  ;;  %v5911_v15 = vsel %vm655_vm0, 1.0, %v10363_v7  ;;  %vm661_vm11 = vcmp.lt.f32.partialorder %v5517_v9, %v5401_v31 }
 0x150   :  { %10813 = vst [vmem:[#allocation110_spill] sm:$0xff] %v5911_v15  ;;  %v5937_v20 = vmul.f32 %v5903_v63, %v5543_v0  ;;  %v5953_v2 = vsel %vm661_vm11, 1.0, %v10363_v7  ;;  %vm663_vm10 = vcmp.lt.f32.partialorder %v5514_v10, %v5408_v35  ;;  %vm664_vm12 = vcmp.lt.f32.partialorder %v5517_v9, %v5408_v35 }
 0x151   :  { %10811 = vst [vmem:[#allocation108_spill] sm:$0xff] %v5897_v56  ;;  %v5915_v56 = vpop.permute.xlu1 %403  ;;  %10821 = vst [vmem:[#allocation118_spill] sm:$0xff] %v5953_v2  ;;  %v5988_v0 = vsel %vm666_vm9, 1.0, %v10363_v7  ;;  %vm672_vm0 = vcmp.lt.f32.partialorder %v5514_v10, %v5411_v37  ;;  %vm669_vm11 = vcmp.lt.f32.partialorder %v5514_v10, %v5413_v38  ;;  %v6013_v21 = vsel %vm663_vm10, 1.0, %v10363_v7 }
 0x152   :  { %1770 = vadd.xlane.f32.xlu0 %v1769_v48  ;;  %10814 = vst [vmem:[#allocation111_spill] sm:$0xff] %v5915_v56  ;;  %v1777_v48 = vadd.f32 %v5891_v54, %v1776_v58  ;;  %v5933_v56 = vmul.f32 %v5900_v62, %v5536_v36  ;;  %10817 = vst [vmem:[#allocation114_spill] sm:$0xff] %v5937_v20  ;;  %v5942_v58 = vpop.permute.xlu0 %407  ;;  %v6040_v18 = vsel %vm672_vm0, 1.0, %v10363_v7 }
 0x153   :  { %1774 = vadd.xlane.f32.xlu1 %v1773_v60  ;;  %v1781_v60 = vadd.f32 %v5921_v12, %v1780_v4  ;;  %10819 = vst [vmem:[#allocation116_spill] sm:$0xff] %v5942_v58  ;;  %v1792_v4 = vadd.f32 %v5679_v6, %v5676_v55  ;;  %10825 = vst [vmem:[#allocation122_spill] sm:$0xff] %v5988_v0  ;;  %v6046_v12 = vsel %vm669_vm11, 1.0, %v10363_v7 }
 0x154   :  { %10816 = vst [vmem:[#allocation113_spill] sm:$0xff] %v5933_v56  ;;  %10829 = vst [vmem:[#allocation126_spill] sm:$0xff] %v6013_v21  ;;  %vm678_vm8 = vcmp.lt.f32.partialorder %v5514_v10, %v5415_v39  ;;  %vm679_vm9 = vcmp.lt.f32.partialorder %v5517_v9, %v5415_v39  ;;  %vm684_vm10 = vcmp.lt.f32.partialorder %v5514_v10, %v5419_v41 }
 0x155   :  { %v5990_v36 = vpop.permute.xlu1 %411  ;;  %v1793_v6 = vadd.f32 %v5996_v49, %v1792_v4  ;;  %10833 = vst [vmem:[#allocation130_spill] sm:$0xff] %v6040_v18  ;;  %10835 = vst [vmem:[#allocation132_spill] sm:$0xff] %v6046_v12  ;;  %v6052_v4 = vsel %vm638_vm1, 1.0, %v10363_v7  ;;  %vm676_vm1 = vcmp.lt.f32.partialorder %v5517_v9, %v5417_v40  ;;  %vm659_vm0 = vcmp.lt.f32.partialorder %v5527_v3, %v5403_v32 }
 0x156   :  { %1778 = vadd.xlane.f32.xlu0 %v1777_v48  ;;  %v1796_v48 = vadd.f32 %v5768_v52, %v5765_v53  ;;  %10826 = vst [vmem:[#allocation123_spill] sm:$0xff] %v5990_v36  ;;  %v6001_v52 = vsel %vm667_vm4, 1.0, %v10363_v7  ;;  %v6019_v53 = vsel %vm664_vm12, 1.0, %v10363_v7  ;;  %v6023_v55 = vpop.permute.xlu0 %415  ;;  %10836 = vst [vmem:[#allocation133_spill] sm:$0xff] %v6052_v4  ;;  %vm675_vm4 = vcmp.lt.f32.partialorder %v5514_v10, %v5417_v40 }
 0x157   :  { %1782 = vadd.xlane.f32.xlu1 %v1781_v60  ;;  %v5982_v60 = vsel %vm657_vm6, 1.0, %v10363_v7  ;;  %10828 = vst [vmem:[#allocation125_spill] sm:$0xff] %v6001_v52  ;;  %10830 = vst [vmem:[#allocation127_spill] sm:$0xff] %v6019_v53  ;;  %vm653_vm6 = vcmp.lt.f32.partialorder %v5527_v3, %v5399_v30  ;;  %vm685_vm12 = vcmp.lt.f32.partialorder %v5517_v9, %v5419_v41  ;;  %v6091_v26 = vsel %vm679_vm9, 1.0, %v10363_v7 }
 0x158   :  { %10823 = vst [vmem:[#allocation120_spill] sm:$0xff] %v5982_v60  ;;  %10831 = vst [vmem:[#allocation128_spill] sm:$0xff] %v6023_v55  ;;  %vm681_vm3 = vcmp.lt.f32.partialorder %v5514_v10, %v5421_v42  ;;  %vm682_vm11 = vcmp.lt.f32.partialorder %v5517_v9, %v5421_v42  ;;  %v6122_v25 = vsel %vm684_vm10, 1.0, %v10363_v7  ;;  %vm687_vm9 = vcmp.lt.f32.partialorder %v5514_v10, %v5425_v44 }
 0x159   :  { %v6071_v23 = vpop.permute.xlu1 %419  ;;  %10841 = vst [vmem:[#allocation138_spill] sm:$0xff] %v6091_v26  ;;  %10846 = vst [vmem:[#allocation143_spill] sm:$0xff] %v6122_v25  ;;  %v6150_v28 = vsel %vm682_vm11, 1.0, %v10363_v7  ;;  %vm693_vm10 = vcmp.lt.f32.partialorder %v5514_v10, %v5429_v46 }
 0x15a   :  { %1786 = vadd.xlane.f32.xlu0 %v1785_v33  ;;  %v1797_v33 = vadd.f32 %v6029_v57, %v1796_v48  ;;  %10838 = vst [vmem:[#allocation135_spill] sm:$0xff] %v6071_v23  ;;  %v1808_v48 = vadd.f32 %v5790_v8, %v5784_v61  ;;  %v6094_v57 = vsel %vm675_vm4, 1.0, %v10363_v7  ;;  %v6096_v49 = vpop.permute.xlu0 %423  ;;  %v6110_v8 = vsel %vm676_vm1, 1.0, %v10363_v7  ;;  %10850 = vst [vmem:[#allocation147_spill] sm:$0xff] %v6150_v28 }
 0x15b   :  { %1790 = vadd.xlane.f32.xlu1 %v1789_v14  ;;  %v1800_v14 = vadd.f32 %v5749_v11, %v5736_v51  ;;  %v6057_v11 = vsel %vm670_vm7, 1.0, %v10363_v7  ;;  %v6077_v51 = vsel %vm641_vm15, 1.0, %v10363_v7  ;;  %10842 = vst [vmem:[#allocation139_spill] sm:$0xff] %v6094_v57  ;;  %10843 = vst [vmem:[#allocation140_spill] sm:$0xff] %v6096_v49  ;;  %vm662_vm15 = vcmp.lt.f32.partialorder %v5527_v3, %v5401_v31  ;;  %v10876_v31 = vld [vmem:[#allocation22_spill] sm:$0xff] }
 0x15c   :  { %10837 = vst [vmem:[#allocation134_spill] sm:$0xff] %v6057_v11  ;;  %10839 = vst [vmem:[#allocation136_spill] sm:$0xff] %v6077_v51  ;;  %v1805_v5 = vadd.f32 %v6077_v51, %v1804_v19  ;;  %v6102_v19 = vsel %vm644_vm2, 1.0, %v10363_v7  ;;  %vm690_vm7 = vcmp.lt.f32.partialorder %v5514_v10, %v5423_v43  ;;  %v6128_v61 = vsel %vm685_vm12, 1.0, %v10363_v7 }
 0x15d   :  { %v1801_v13 = vadd.f32 %v6052_v4, %v1800_v14  ;;  %10844 = vst [vmem:[#allocation141_spill] sm:$0xff] %v6102_v19  ;;  %10845 = vst [vmem:[#allocation142_spill] sm:$0xff] %v6110_v8  ;;  %vm691_vm2 = vcmp.lt.f32.partialorder %v5517_v9, %v5423_v43  ;;  %v6147_v51 = vsel %vm681_vm3, 1.0, %v10363_v7  ;;  %v6153_v4 = vsel %vm690_vm7, 1.0, %v10363_v7  ;;  %v6155_v54 = vpop.permute.xlu1 %427 }
 0x15e   :  { %1794 = vadd.xlane.f32.xlu0 %v1793_v6  ;;  %v1812_v6 = vadd.f32 %v5858_v59, %v5854_v1  ;;  %10847 = vst [vmem:[#allocation144_spill] sm:$0xff] %v6128_v61  ;;  %v6136_v1 = vsel %vm647_vm14, 1.0, %v10363_v7  ;;  %v1809_v59 = vadd.f32 %v6102_v19, %v1808_v48  ;;  %10849 = vst [vmem:[#allocation146_spill] sm:$0xff] %v6147_v51  ;;  %v6161_v48 = vsel %vm650_vm5, 1.0, %v10363_v7  ;;  %v6180_v27 = vpop.permute.xlu0 %431 }
 0x15f   :  { %1798 = vadd.xlane.f32.xlu1 %v1797_v33  ;;  %v6088_v33 = vsel %vm678_vm8, 1.0, %v10363_v7  ;;  %10848 = vst [vmem:[#allocation145_spill] sm:$0xff] %v6136_v1  ;;  %vm665_vm8 = vcmp.lt.f32.partialorder %v5527_v3, %v5408_v35  ;;  %10851 = vst [vmem:[#allocation148_spill] sm:$0xff] %v6153_v4  ;;  %vm668_vm14 = vcmp.lt.f32.partialorder %v5527_v3, %v5406_v34  ;;  %v6197_v19 = vsel %vm687_vm9, 1.0, %v10363_v7 }
 0x160   :  { %10840 = vst [vmem:[#allocation137_spill] sm:$0xff] %v6088_v33  ;;  %v1813_v14 = vadd.f32 %v6136_v1, %v1812_v6  ;;  %10852 = vst [vmem:[#allocation149_spill] sm:$0xff] %v6155_v54  ;;  %vm688_vm4 = vcmp.lt.f32.partialorder %v5517_v9, %v5425_v44  ;;  %vm696_vm1 = vcmp.lt.f32.partialorder %v5514_v10, %v5427_v45  ;;  %v6226_v29 = vsel %vm693_vm10, 1.0, %v10363_v7 }
 0x161   :  { %10853 = vst [vmem:[#allocation150_spill] sm:$0xff] %v6161_v48  ;;  %vm697_vm5 = vcmp.lt.f32.partialorder %v5517_v9, %v5427_v45  ;;  %vm694_vm12 = vcmp.lt.f32.partialorder %v5517_v9, %v5429_v46  ;;  %10855 = vst [vmem:[#allocation152_spill] sm:$0xff] %v6180_v27  ;;  %vm671_vm3 = vcmp.lt.f32.partialorder %v5527_v3, %v5413_v38  ;;  %v6200_v30 = vsel %vm688_vm4, 1.0, %v10363_v7 }
 0x162   :  { %1802 = vadd.xlane.f32.xlu0 %v1801_v13  ;;  %v1816_v13 = vadd.f32 %v5881_v50, %v5878_v17  ;;  %v1828_v1 = vadd.f32 %v5985_v22, %v5982_v60  ;;  %10857 = vst [vmem:[#allocation154_spill] sm:$0xff] %v6197_v19  ;;  %10858 = vst [vmem:[#allocation155_spill] sm:$0xff] %v6200_v30  ;;  %v6203_v50 = vsel %vm696_vm1, 1.0, %v10363_v7  ;;  %v10863_v22 = vld [vmem:[#allocation19_spill] sm:$0xff]  ;;  %v6232_v60 = vsel %vm694_vm12, 1.0, %v10363_v7  ;;  %v6261_v27 = vpop.permute.xlu0 %439 }
 0x163   :  { %1806 = vadd.xlane.f32.xlu1 %v1805_v5  ;;  %v1820_v5 = vadd.f32 %v5903_v63, %v5900_v62  ;;  %v6166_v62 = vsel %vm691_vm2, 1.0, %v10363_v7  ;;  %v6186_v63 = vsel %vm653_vm6, 1.0, %v10363_v7  ;;  %10859 = vst [vmem:[#allocation156_spill] sm:$0xff] %v6203_v50  ;;  %vm674_vm6 = vcmp.lt.f32.partialorder %v5527_v3, %v5411_v37  ;;  %10865 = vst [vmem:[#allocation19_spill] sm:$0xff] %v6232_v60  ;;  %v10897_v37 = vld [vmem:[#allocation27_spill] sm:$0xff] }
 0x164   :  { %10854 = vst [vmem:[#allocation151_spill] sm:$0xff] %v6166_v62  ;;  %10856 = vst [vmem:[#allocation153_spill] sm:$0xff] %v6186_v63  ;;  %v1817_v6 = vadd.f32 %v6161_v48, %v1816_v13  ;;  %v6209_v13 = vsel %vm656_vm13, 1.0, %v10363_v7  ;;  %vm699_vm2 = vcmp.lt.f32.partialorder %v5514_v10, %v10863_v22  ;;  %vm700_vm13 = vcmp.lt.f32.partialorder %v5517_v9, %v10863_v22  ;;  %v6236_v48 = vpop.permute.xlu1 %435 }
 0x165   :  { %10860 = vst [vmem:[#allocation157_spill] sm:$0xff] %v6209_v13  ;;  %10866 = vst [vmem:[#allocation159_spill] sm:$0xff] %v6236_v48  ;;  %vm677_vm9 = vcmp.lt.f32.partialorder %v5527_v3, %v5417_v40  ;;  %v1836_v17 = vadd.f32 %v6019_v53, %v6013_v21  ;;  %v6259_v56 = vsel %vm699_vm2, 1.0, %v10363_v7  ;;  %v10875_v53 = vld [vmem:[#allocation21_spill] sm:$0xff]  ;;  %vm714_vm10 = vcmp.lt.f32.partialorder %v5514_v10, %v10876_v31 }
 0x166   :  { %1810 = vadd.xlane.f32.xlu0 %v1809_v59  ;;  %v1821_v59 = vadd.f32 %v6186_v63, %v1820_v5  ;;  %v6214_v5 = vsel %vm697_vm5, 1.0, %v10363_v7  ;;  %v10862_v63 = vld [vmem:[#allocation18_spill] sm:$0xff]  ;;  %10870 = vst [vmem:[#allocation163_spill] sm:$0xff] %v6259_v56  ;;  %10871 = vst [vmem:[#allocation164_spill] sm:$0xff] %v6261_v27  ;;  %vm705_vm5 = vcmp.lt.f32.partialorder %v5514_v10, %v10875_v53  ;;  %v6290_v21 = vsel %vm665_vm8, 1.0, %v10363_v7 }
 0x167   :  { %1814 = vadd.xlane.f32.xlu1 %v1813_v14  ;;  %v1824_v14 = vadd.f32 %v5911_v15, %v5908_v16  ;;  %10861 = vst [vmem:[#allocation158_spill] sm:$0xff] %v6214_v5  ;;  %vm702_vm11 = vcmp.lt.f32.partialorder %v5514_v10, %v10862_v63  ;;  %vm703_vm7 = vcmp.lt.f32.partialorder %v5517_v9, %v10862_v63  ;;  %10864 = vst [vmem:[#allocation18_spill] sm:$0xff] %v6226_v29 }
 0x168   :  { %v1832_v16 = vadd.f32 %v5953_v2, %v5940_v47  ;;  %v6253_v20 = vsel %vm702_vm11, 1.0, %v10363_v7  ;;  %v6256_v32 = vsel %vm703_vm7, 1.0, %v10363_v7  ;;  %vm715_vm12 = vcmp.lt.f32.partialorder %v5517_v9, %v10876_v31  ;;  %v6309_v48 = vpop.permute.xlu1 %443 }
 0x169   :  { %10868 = vst [vmem:[#allocation161_spill] sm:$0xff] %v6253_v20  ;;  %10869 = vst [vmem:[#allocation162_spill] sm:$0xff] %v6256_v32  ;;  %vm683_vm11 = vcmp.lt.f32.partialorder %v5527_v3, %v5421_v42  ;;  %v1844_v2 = vadd.f32 %v6057_v11, %v6046_v12  ;;  %v6307_v27 = vsel %vm705_vm5, 1.0, %v10363_v7  ;;  %vm686_vm8 = vcmp.lt.f32.partialorder %v5527_v3, %v5419_v41  ;;  %v10885_v11 = vld [vmem:[#allocation24_spill] sm:$0xff] }
 0x16a   :  { %1818 = vadd.xlane.f32.xlu0 %v1817_v6  ;;  %v6242_v6 = vsel %vm659_vm0, 1.0, %v10363_v7  ;;  %vm680_vm0 = vcmp.lt.f32.partialorder %v5527_v3, %v5415_v39  ;;  %10880 = vst [vmem:[#allocation167_spill] sm:$0xff] %v6307_v27  ;;  %10881 = vst [vmem:[#allocation168_spill] sm:$0xff] %v6309_v48  ;;  %v6332_v34 = vsel %vm714_vm10, 1.0, %v10363_v7  ;;  %v6338_v12 = vsel %vm715_vm12, 1.0, %v10363_v7  ;;  %v10920_v41 = vld [vmem:[#allocation32_spill] sm:$0xff] }
 0x16b   :  { %1822 = vadd.xlane.f32.xlu1 %v1821_v59  ;;  %10867 = vst [vmem:[#allocation160_spill] sm:$0xff] %v6242_v6  ;;  %v1825_v59 = vadd.f32 %v6209_v13, %v1824_v14  ;;  %v1829_v15 = vadd.f32 %v6242_v6, %v1828_v1  ;;  %v6267_v1 = vsel %vm662_vm15, 1.0, %v10363_v7  ;;  %v6272_v14 = vsel %vm700_vm13, 1.0, %v10363_v7  ;;  %v10874_v6 = vld [vmem:[#allocation20_spill] sm:$0xff]  ;;  %10887 = vst [vmem:[#allocation24_spill] sm:$0xff] %v6338_v12 }
 0x16c   :  { %10872 = vst [vmem:[#allocation165_spill] sm:$0xff] %v6267_v1  ;;  %10873 = vst [vmem:[#allocation166_spill] sm:$0xff] %v6272_v14  ;;  %vm708_vm4 = vcmp.lt.f32.partialorder %v5514_v10, %v10874_v6  ;;  %vm709_vm1 = vcmp.lt.f32.partialorder %v5517_v9, %v10874_v6  ;;  %vm706_vm15 = vcmp.lt.f32.partialorder %v5517_v9, %v10875_v53 }
 0x16d   :  { %10877 = vst [vmem:[#allocation20_spill] sm:$0xff] %v6290_v21  ;;  %v1840_v13 = vadd.f32 %v6001_v52, %v5988_v0  ;;  %v6301_v47 = vsel %vm708_vm4, 1.0, %v10363_v7  ;;  %v6304_v35 = vsel %vm709_vm1, 1.0, %v10363_v7  ;;  %vm720_vm13 = vcmp.lt.f32.partialorder %v5514_v10, %v10885_v11 }
 0x16e   :  { %1826 = vadd.xlane.f32.xlu0 %v1825_v59  ;;  %v1837_v59 = vadd.f32 %v6290_v21, %v1836_v17  ;;  %10878 = vst [vmem:[#allocation21_spill] sm:$0xff] %v6301_v47  ;;  %10879 = vst [vmem:[#allocation22_spill] sm:$0xff] %v6304_v35  ;;  %v6315_v17 = vsel %vm668_vm14, 1.0, %v10363_v7  ;;  %v10884_v21 = vld [vmem:[#allocation23_spill] sm:$0xff]  ;;  %vm721_vm14 = vcmp.lt.f32.partialorder %v5517_v9, %v10885_v11  ;;  %v6365_v49 = vsel %vm720_vm13, 1.0, %v10363_v7 }
 0x16f   :  { %1830 = vadd.xlane.f32.xlu1 %v1829_v15  ;;  %v1833_v15 = vadd.f32 %v6267_v1, %v1832_v16  ;;  %10882 = vst [vmem:[#allocation169_spill] sm:$0xff] %v6315_v17  ;;  %v6320_v16 = vsel %vm706_vm15, 1.0, %v10363_v7  ;;  %vm711_vm7 = vcmp.lt.f32.partialorder %v5514_v10, %v10884_v21  ;;  %vm712_vm2 = vcmp.lt.f32.partialorder %v5517_v9, %v10884_v21  ;;  %v6342_v1 = vpop.permute.xlu0 %447 }
 0x170   :  { %10883 = vst [vmem:[#allocation170_spill] sm:$0xff] %v6320_v16  ;;  %10886 = vst [vmem:[#allocation23_spill] sm:$0xff] %v6332_v34  ;;  %vm689_vm4 = vcmp.lt.f32.partialorder %v5527_v3, %v5425_v44  ;;  %v1848_v0 = vadd.f32 %v6043_v24, %v6040_v18  ;;  %v1852_v48 = vadd.f32 %v6110_v8, %v6094_v57  ;;  %v6362_v38 = vsel %vm712_vm2, 1.0, %v10363_v7  ;;  %v10896_v8 = vld [vmem:[#allocation26_spill] sm:$0xff] }
 0x171   :  { %10888 = vst [vmem:[#allocation171_spill] sm:$0xff] %v6342_v1  ;;  %v6359_v1 = vsel %vm711_vm7, 1.0, %v10363_v7  ;;  %10891 = vst [vmem:[#allocation174_spill] sm:$0xff] %v6362_v38  ;;  %vm726_vm15 = vcmp.lt.f32.partialorder %v5514_v10, %v10896_v8  ;;  %vm723_vm10 = vcmp.lt.f32.partialorder %v5514_v10, %v10897_v37  ;;  %vm724_vm12 = vcmp.lt.f32.partialorder %v5517_v9, %v10897_v37 }
 0x172   :  { %1834 = vadd.xlane.f32.xlu0 %v1833_v15  ;;  %v6348_v15 = vsel %vm671_vm3, 1.0, %v10363_v7  ;;  %10890 = vst [vmem:[#allocation173_spill] sm:$0xff] %v6359_v1  ;;  %10892 = vst [vmem:[#allocation175_spill] sm:$0xff] %v6365_v49  ;;  %vm692_vm3 = vcmp.lt.f32.partialorder %v5527_v3, %v5423_v43  ;;  %v10899_v57 = vmov 0.0   ;;  %vm695_vm7 = vcmp.lt.f32.partialorder %v5527_v3, %v5429_v46 }
 0x173   :  { %1838 = vadd.xlane.f32.xlu1 %v1837_v59  ;;  %10889 = vst [vmem:[#allocation172_spill] sm:$0xff] %v6348_v15  ;;  %v1841_v59 = vadd.f32 %v6315_v17, %v1840_v13  ;;  %v1845_v52 = vadd.f32 %v6348_v15, %v1844_v2  ;;  %v6371_v2 = vsel %vm674_vm6, 1.0, %v10363_v7  ;;  %v6376_v13 = vsel %vm721_vm14, 1.0, %v10363_v7  ;;  %v10895_v15 = vld [vmem:[#allocation25_spill] sm:$0xff]  ;;  %v6390_v7 = vpop.permute.xlu1 %451  ;;  %v6415_v55 = vpop.permute.xlu0 %458 }
 0x174   :  { %10893 = vst [vmem:[#allocation176_spill] sm:$0xff] %v6371_v2  ;;  %10894 = vst [vmem:[#allocation177_spill] sm:$0xff] %v6376_v13  ;;  %vm717_vm1 = vcmp.lt.f32.partialorder %v5514_v10, %v10895_v15  ;;  %vm718_vm5 = vcmp.lt.f32.partialorder %v5517_v9, %v10895_v15  ;;  %vm727_vm6 = vcmp.lt.f32.partialorder %v5517_v9, %v10896_v8  ;;  %v6396_v17 = vsel %vm677_vm9, 1.0, %v10899_v57 }
 0x175   :  { %10898 = vst [vmem:[#allocation25_spill] sm:$0xff] %v6390_v7  ;;  %10900 = vst [vmem:[#allocation26_spill] sm:$0xff] %v6396_v17  ;;  %v1856_v24 = vadd.f32 %v6091_v26, %v6088_v33  ;;  %v1860_v18 = vadd.f32 %v6150_v28, %v6147_v51  ;;  %v6407_v7 = vsel %vm717_vm1, 1.0, %v10899_v57  ;;  %v6410_v40 = vsel %vm718_vm5, 1.0, %v10899_v57  ;;  %v10908_v28 = vld [vmem:[#allocation29_spill] sm:$0xff] }
 0x176   :  { %1842 = vadd.xlane.f32.xlu0 %v1841_v59  ;;  %v1853_v59 = vadd.f32 %v6396_v17, %v1852_v48  ;;  %10901 = vst [vmem:[#allocation27_spill] sm:$0xff] %v6407_v7  ;;  %10902 = vst [vmem:[#allocation178_spill] sm:$0xff] %v6410_v40  ;;  %v6413_v54 = vsel %vm726_vm15, 1.0, %v10899_v57  ;;  %vm698_vm9 = vcmp.lt.f32.partialorder %v5527_v3, %v5427_v45  ;;  %v6429_v48 = vsel %vm727_vm6, 1.0, %v10899_v57  ;;  %v10907_v17 = vld [vmem:[#allocation28_spill] sm:$0xff]  ;;  %v10942_v45 = vld [vmem:[#allocation37_spill] sm:$0xff] }
 0x177   :  { %1846 = vadd.xlane.f32.xlu1 %v1845_v52  ;;  %v1849_v52 = vadd.f32 %v6371_v2, %v1848_v0  ;;  %10903 = vst [vmem:[#allocation179_spill] sm:$0xff] %v6413_v54  ;;  %10904 = vst [vmem:[#allocation180_spill] sm:$0xff] %v6415_v55  ;;  %v6421_v0 = vsel %vm680_vm0, 1.0, %v10899_v57  ;;  %vm732_vm2 = vcmp.lt.f32.partialorder %v5514_v10, %v10907_v17  ;;  %v6441_v39 = vsel %vm723_vm10, 1.0, %v10899_v57  ;;  %v6474_v58 = vpop.permute.xlu1 %462 }
 0x178   :  { %10905 = vst [vmem:[#allocation181_spill] sm:$0xff] %v6421_v0  ;;  %10906 = vst [vmem:[#allocation182_spill] sm:$0xff] %v6429_v48  ;;  %vm733_vm13 = vcmp.lt.f32.partialorder %v5517_v9, %v10907_v17  ;;  %vm729_vm14 = vcmp.lt.f32.partialorder %v5514_v10, %v10908_v28  ;;  %v6447_v51 = vsel %vm724_vm12, 1.0, %v10899_v57  ;;  %vm730_vm0 = vcmp.lt.f32.partialorder %v5517_v9, %v10908_v28 }
 0x179   :  { %10909 = vst [vmem:[#allocation28_spill] sm:$0xff] %v6441_v39  ;;  %10910 = vst [vmem:[#allocation29_spill] sm:$0xff] %v6447_v51  ;;  %vm701_vm1 = vcmp.lt.f32.partialorder %v5527_v3, %v10863_v22  ;;  %v1864_v26 = vadd.f32 %v6128_v61, %v6122_v25  ;;  %v1868_v33 = vadd.f32 %v6200_v30, %v6197_v19  ;;  %v6466_v55 = vsel %vm732_vm2, 1.0, %v10899_v57  ;;  %v10919_v30 = vld [vmem:[#allocation31_spill] sm:$0xff]  ;;  %v6499_v19 = vpop.permute.xlu0 %466 }
 0x17a   :  { %1850 = vadd.xlane.f32.xlu0 %v1849_v52  ;;  %v6455_v52 = vsel %vm683_vm11, 1.0, %v10899_v57  ;;  %10912 = vst [vmem:[#allocation184_spill] sm:$0xff] %v6466_v55  ;;  %v6469_v42 = vsel %vm733_vm13, 1.0, %v10899_v57  ;;  %v6472_v23 = vsel %vm729_vm14, 1.0, %v10899_v57  ;;  %10915 = vst [vmem:[#allocation187_spill] sm:$0xff] %v6474_v58  ;;  %vm704_vm11 = vcmp.lt.f32.partialorder %v5527_v3, %v10862_v63 }
 0x17b   :  { %1854 = vadd.xlane.f32.xlu1 %v1853_v59  ;;  %10911 = vst [vmem:[#allocation183_spill] sm:$0xff] %v6455_v52  ;;  %v1857_v59 = vadd.f32 %v6421_v0, %v1856_v24  ;;  %v1861_v2 = vadd.f32 %v6455_v52, %v1860_v18  ;;  %10913 = vst [vmem:[#allocation185_spill] sm:$0xff] %v6469_v42  ;;  %v6480_v18 = vsel %vm686_vm8, 1.0, %v10899_v57  ;;  %v6485_v24 = vsel %vm730_vm0, 1.0, %v10899_v57  ;;  %v10918_v52 = vld [vmem:[#allocation30_spill] sm:$0xff] }
 0x17c   :  { %10914 = vst [vmem:[#allocation186_spill] sm:$0xff] %v6472_v23  ;;  %10916 = vst [vmem:[#allocation188_spill] sm:$0xff] %v6480_v18  ;;  %vm738_vm5 = vcmp.lt.f32.partialorder %v5514_v10, %v10918_v52  ;;  %vm739_vm15 = vcmp.lt.f32.partialorder %v5517_v9, %v10918_v52  ;;  %vm735_vm6 = vcmp.lt.f32.partialorder %v5514_v10, %v10919_v30  ;;  %v6505_v0 = vsel %vm689_vm4, 1.0, %v10899_v57 }
 0x17d   :  { %10917 = vst [vmem:[#allocation189_spill] sm:$0xff] %v6485_v24  ;;  %vm736_vm8 = vcmp.lt.f32.partialorder %v5517_v9, %v10919_v30  ;;  %vm744_vm10 = vcmp.lt.f32.partialorder %v5514_v10, %v10920_v41  ;;  %vm745_vm12 = vcmp.lt.f32.partialorder %v5517_v9, %v10920_v41  ;;  %10921 = vst [vmem:[#allocation30_spill] sm:$0xff] %v6499_v19  ;;  %v6516_v19 = vsel %vm738_vm5, 1.0, %v10899_v57 }
 0x17e   :  { %1858 = vadd.xlane.f32.xlu0 %v1857_v59  ;;  %10922 = vst [vmem:[#allocation31_spill] sm:$0xff] %v6505_v0  ;;  %vm707_vm2 = vcmp.lt.f32.partialorder %v5527_v3, %v10875_v53  ;;  %v1869_v59 = vadd.f32 %v6505_v0, %v1868_v33  ;;  %v1872_v61 = vadd.f32 %v6166_v62, %v6153_v4  ;;  %10923 = vst [vmem:[#allocation32_spill] sm:$0xff] %v6516_v19  ;;  %v10928_v0 = vld [vmem:[#allocation33_spill] sm:$0xff] }
 0x17f   :  { %1862 = vadd.xlane.f32.xlu1 %v1861_v2  ;;  %v1865_v2 = vadd.f32 %v6480_v18, %v1864_v26  ;;  %v1876_v25 = vadd.f32 %v6232_v60, %v6226_v29  ;;  %v6519_v44 = vsel %vm739_vm15, 1.0, %v10899_v57  ;;  %v6522_v58 = vsel %vm735_vm6, 1.0, %v10899_v57  ;;  %v10929_v60 = vld [vmem:[#allocation34_spill] sm:$0xff]  ;;  %v6555_v18 = vpop.permute.xlu1 %470 }
 0x180   :  { %10924 = vst [vmem:[#allocation190_spill] sm:$0xff] %v6519_v44  ;;  %10925 = vst [vmem:[#allocation191_spill] sm:$0xff] %v6522_v58  ;;  %v6528_v33 = vsel %vm692_vm3, 1.0, %v10899_v57  ;;  %vm710_vm4 = vcmp.lt.f32.partialorder %v5527_v3, %v10874_v6  ;;  %v6533_v26 = vsel %vm736_vm8, 1.0, %v10899_v57  ;;  %vm741_vm13 = vcmp.lt.f32.partialorder %v5514_v10, %v10928_v0  ;;  %v10963_v6 = vld [vmem:[#allocation42_spill] sm:$0xff] }
 0x181   :  { %10926 = vst [vmem:[#allocation192_spill] sm:$0xff] %v6528_v33  ;;  %10927 = vst [vmem:[#allocation193_spill] sm:$0xff] %v6533_v26  ;;  %vm742_vm14 = vcmp.lt.f32.partialorder %v5517_v9, %v10928_v0  ;;  %vm750_vm0 = vcmp.lt.f32.partialorder %v5514_v10, %v10929_v60  ;;  %v6545_v43 = vsel %vm744_vm10, 1.0, %v10899_v57  ;;  %v6551_v29 = vsel %vm745_vm12, 1.0, %v10899_v57 }
 0x182   :  { %1866 = vadd.xlane.f32.xlu0 %v1865_v2  ;;  %10930 = vst [vmem:[#allocation33_spill] sm:$0xff] %v6545_v43  ;;  %10931 = vst [vmem:[#allocation34_spill] sm:$0xff] %v6551_v29  ;;  %vm751_vm3 = vcmp.lt.f32.partialorder %v5517_v9, %v10929_v60  ;;  %v6561_v2 = vsel %vm695_vm7, 1.0, %v10899_v57  ;;  %vm713_vm5 = vcmp.lt.f32.partialorder %v5527_v3, %v10884_v21  ;;  %v6575_v46 = vsel %vm742_vm14, 1.0, %v10899_v57  ;;  %v6580_v43 = vpop.permute.xlu0 %474 }
 0x183   :  { %1870 = vadd.xlane.f32.xlu1 %v1869_v59  ;;  %10932 = vst [vmem:[#allocation194_spill] sm:$0xff] %v6555_v18  ;;  %10933 = vst [vmem:[#allocation195_spill] sm:$0xff] %v6561_v2  ;;  %v1873_v59 = vadd.f32 %v6528_v33, %v1872_v61  ;;  %v1877_v62 = vadd.f32 %v6561_v2, %v1876_v25  ;;  %v1880_v4 = vadd.f32 %v6214_v5, %v6203_v50  ;;  %v10940_v2 = vld [vmem:[#allocation35_spill] sm:$0xff] }
 0x184   :  { %v1884_v36 = vadd.f32 %v6272_v14, %v6259_v56  ;;  %v6572_v18 = vsel %vm741_vm13, 1.0, %v10899_v57  ;;  %10935 = vst [vmem:[#allocation197_spill] sm:$0xff] %v6575_v46  ;;  %v6578_v29 = vsel %vm750_vm0, 1.0, %v10899_v57  ;;  %10937 = vst [vmem:[#allocation199_spill] sm:$0xff] %v6580_v43  ;;  %v6586_v25 = vsel %vm698_vm9, 1.0, %v10899_v57  ;;  %v10941_v14 = vld [vmem:[#allocation36_spill] sm:$0xff] }
 0x185   :  { %10934 = vst [vmem:[#allocation196_spill] sm:$0xff] %v6572_v18  ;;  %10936 = vst [vmem:[#allocation198_spill] sm:$0xff] %v6578_v29  ;;  %vm716_vm7 = vcmp.lt.f32.partialorder %v5527_v3, %v10876_v31  ;;  %v6591_v61 = vsel %vm751_vm3, 1.0, %v10899_v57  ;;  %vm747_vm15 = vcmp.lt.f32.partialorder %v5514_v10, %v10940_v2  ;;  %vm748_vm6 = vcmp.lt.f32.partialorder %v5517_v9, %v10940_v2  ;;  %v10975_v31 = vld [vmem:[#allocation44_spill] sm:$0xff] }
 0x186   :  { %10938 = vst [vmem:[#allocation200_spill] sm:$0xff] %v6586_v25  ;;  %10939 = vst [vmem:[#allocation201_spill] sm:$0xff] %v6591_v61  ;;  %vm756_vm8 = vcmp.lt.f32.partialorder %v5514_v10, %v10941_v14  ;;  %1874 = vadd.xlane.f32.xlu0 %v1873_v59  ;;  %vm757_vm9 = vcmp.lt.f32.partialorder %v5517_v9, %v10941_v14  ;;  %vm753_vm10 = vcmp.lt.f32.partialorder %v5514_v10, %v10942_v45  ;;  %v6628_v61 = vpop.permute.xlu1 %478 }
 0x187   :  { %1878 = vadd.xlane.f32.xlu1 %v1877_v62  ;;  %vm754_vm12 = vcmp.lt.f32.partialorder %v5517_v9, %v10942_v45  ;;  %v6609_v56 = vsel %vm701_vm1, 1.0, %v10899_v57  ;;  %vm719_vm13 = vcmp.lt.f32.partialorder %v5527_v3, %v10895_v15  ;;  %v1881_v62 = vadd.f32 %v6586_v25, %v1880_v4  ;;  %10947 = vst [vmem:[#allocation203_spill] sm:$0xff] %v6628_v61  ;;  %v6661_v25 = vpop.permute.xlu0 %482 }
 0x188   :  { %10943 = vst [vmem:[#allocation35_spill] sm:$0xff] %v6609_v56  ;;  %v1885_v59 = vadd.f32 %v6609_v56, %v1884_v36  ;;  %v1888_v33 = vadd.f32 %v6256_v32, %v6253_v20  ;;  %v1892_v5 = vadd.f32 %v6320_v16, %v6307_v27  ;;  %v6620_v50 = vsel %vm747_vm15, 1.0, %v10899_v57  ;;  %v10950_v56 = vld [vmem:[#allocation38_spill] sm:$0xff]  ;;  %v10951_v16 = vld [vmem:[#allocation39_spill] sm:$0xff]  ;;  %10954 = vst [vmem:[#allocation206_spill] sm:$0xff] %v6661_v25 }
 0x189   :  { %10944 = vst [vmem:[#allocation36_spill] sm:$0xff] %v6620_v50  ;;  %v6623_v22 = vsel %vm748_vm6, 1.0, %v10899_v57  ;;  %v6626_v43 = vsel %vm756_vm8, 1.0, %v10899_v57  ;;  %v6634_v36 = vsel %vm704_vm11, 1.0, %v10899_v57  ;;  %vm722_vm1 = vcmp.lt.f32.partialorder %v5527_v3, %v10885_v11 }
 0x18a   :  { %10945 = vst [vmem:[#allocation37_spill] sm:$0xff] %v6623_v22  ;;  %10946 = vst [vmem:[#allocation202_spill] sm:$0xff] %v6626_v43  ;;  %v6639_v4 = vsel %vm757_vm9, 1.0, %v10899_v57  ;;  %vm762_vm14 = vcmp.lt.f32.partialorder %v5514_v10, %v10950_v56  ;;  %vm763_vm0 = vcmp.lt.f32.partialorder %v5517_v9, %v10950_v56  ;;  %vm759_vm3 = vcmp.lt.f32.partialorder %v5514_v10, %v10951_v16 }
 0x18b   :  { %10948 = vst [vmem:[#allocation204_spill] sm:$0xff] %v6634_v36  ;;  %10949 = vst [vmem:[#allocation205_spill] sm:$0xff] %v6639_v4  ;;  %1882 = vadd.xlane.f32.xlu0 %v1881_v62  ;;  %1886 = vadd.xlane.f32.xlu1 %v1885_v59  ;;  %v6651_v63 = vsel %vm753_vm10, 1.0, %v10899_v57  ;;  %v6657_v27 = vsel %vm754_vm12, 1.0, %v10899_v57  ;;  %vm760_vm11 = vcmp.lt.f32.partialorder %v5517_v9, %v10951_v16  ;;  %v6667_v62 = vsel %vm707_vm2, 1.0, %v10899_v57 }
 0x18c   :  { %10952 = vst [vmem:[#allocation38_spill] sm:$0xff] %v6651_v63  ;;  %10953 = vst [vmem:[#allocation39_spill] sm:$0xff] %v6657_v27  ;;  %vm725_vm15 = vcmp.lt.f32.partialorder %v5527_v3, %v10897_v37  ;;  %v1889_v59 = vadd.f32 %v6634_v36, %v1888_v33  ;;  %v1893_v32 = vadd.f32 %v6667_v62, %v1892_v5  ;;  %v6678_v25 = vsel %vm762_vm14, 1.0, %v10899_v57 }
 0x18d   :  { %10955 = vst [vmem:[#allocation207_spill] sm:$0xff] %v6667_v62  ;;  %v1896_v20 = vadd.f32 %v6304_v35, %v6301_v47  ;;  %v1900_v61 = vadd.f32 %v6362_v38, %v6359_v1  ;;  %10956 = vst [vmem:[#allocation208_spill] sm:$0xff] %v6678_v25  ;;  %v6681_v53 = vsel %vm763_vm0, 1.0, %v10899_v57  ;;  %v6684_v4 = vsel %vm759_vm3, 1.0, %v10899_v57  ;;  %v10961_v62 = vld [vmem:[#allocation40_spill] sm:$0xff]  ;;  %v10962_v38 = vld [vmem:[#allocation41_spill] sm:$0xff]  ;;  %v6707_v1 = vpop.permute.xlu1 %486  ;;  %v6730_v25 = vpop.permute.xlu0 %490 }
 0x18e   :  { %10957 = vst [vmem:[#allocation209_spill] sm:$0xff] %v6681_v53  ;;  %10958 = vst [vmem:[#allocation210_spill] sm:$0xff] %v6684_v4  ;;  %v6690_v5 = vsel %vm710_vm4, 1.0, %v10899_v57  ;;  %v6693_v33 = vsel %vm760_vm11, 1.0, %v10899_v57  ;;  %vm768_vm2 = vcmp.lt.f32.partialorder %v5514_v10, %v10961_v62  ;;  %vm769_vm6 = vcmp.lt.f32.partialorder %v5517_v9, %v10961_v62 }
 0x18f   :  { %10959 = vst [vmem:[#allocation211_spill] sm:$0xff] %v6690_v5  ;;  %10960 = vst [vmem:[#allocation212_spill] sm:$0xff] %v6693_v33  ;;  %vm765_vm8 = vcmp.lt.f32.partialorder %v5514_v10, %v10962_v38  ;;  %1890 = vadd.xlane.f32.xlu0 %v1889_v59  ;;  %1894 = vadd.xlane.f32.xlu1 %v1893_v32  ;;  %vm766_vm9 = vcmp.lt.f32.partialorder %v5517_v9, %v10962_v38  ;;  %v6713_v36 = vsel %vm713_vm5, 1.0, %v10899_v57 }
 0x190   :  { %vm774_vm4 = vcmp.lt.f32.partialorder %v5514_v10, %v10963_v6  ;;  %vm775_vm10 = vcmp.lt.f32.partialorder %v5517_v9, %v10963_v6  ;;  %10964 = vst [vmem:[#allocation40_spill] sm:$0xff] %v6707_v1  ;;  %10965 = vst [vmem:[#allocation41_spill] sm:$0xff] %v6713_v36  ;;  %v1897_v59 = vadd.f32 %v6690_v5, %v1896_v20  ;;  %v6722_v53 = vsel %vm768_vm2, 1.0, %v10899_v57 }
 0x191   :  { %v1901_v32 = vadd.f32 %v6713_v36, %v1900_v61  ;;  %v1904_v35 = vadd.f32 %v6338_v12, %v6332_v34  ;;  %v1908_v47 = vadd.f32 %v6410_v40, %v6407_v7  ;;  %10966 = vst [vmem:[#allocation42_spill] sm:$0xff] %v6722_v53  ;;  %v6725_v1 = vsel %vm769_vm6, 1.0, %v10899_v57  ;;  %10969 = vst [vmem:[#allocation215_spill] sm:$0xff] %v6730_v25  ;;  %v10974_v7 = vld [vmem:[#allocation43_spill] sm:$0xff]  ;;  %v6776_v15 = vpop.permute.xlu1 %494 }
 0x192   :  { %10967 = vst [vmem:[#allocation213_spill] sm:$0xff] %v6725_v1  ;;  %v6728_v21 = vsel %vm765_vm8, 1.0, %v10899_v57  ;;  %v6736_v20 = vsel %vm716_vm7, 1.0, %v10899_v57  ;;  %vm728_vm5 = vcmp.lt.f32.partialorder %v5527_v3, %v10896_v8  ;;  %v6741_v61 = vsel %vm766_vm9, 1.0, %v10899_v57 }
 0x193   :  { %10968 = vst [vmem:[#allocation214_spill] sm:$0xff] %v6728_v21  ;;  %10970 = vst [vmem:[#allocation216_spill] sm:$0xff] %v6736_v20  ;;  %v6744_v36 = vsel %vm774_vm4, 1.0, %v10899_v57  ;;  %v6747_v40 = vsel %vm775_vm10, 1.0, %v10899_v57  ;;  %vm771_vm12 = vcmp.lt.f32.partialorder %v5514_v10, %v10974_v7  ;;  %1898 = vadd.xlane.f32.xlu0 %v1897_v59  ;;  %1902 = vadd.xlane.f32.xlu1 %v1901_v32  ;;  %v6761_v5 = vsel %vm719_vm13, 1.0, %v10899_v57 }
 0x194   :  { %10971 = vst [vmem:[#allocation217_spill] sm:$0xff] %v6741_v61  ;;  %10972 = vst [vmem:[#allocation218_spill] sm:$0xff] %v6744_v36  ;;  %vm772_vm7 = vcmp.lt.f32.partialorder %v5517_v9, %v10974_v7  ;;  %vm780_vm14 = vcmp.lt.f32.partialorder %v5514_v10, %v10975_v31  ;;  %vm781_vm0 = vcmp.lt.f32.partialorder %v5517_v9, %v10975_v31  ;;  %v6770_v25 = vsel %vm771_vm12, 1.0, %v10899_v57 }
 0x195   :  { %10973 = vst [vmem:[#allocation219_spill] sm:$0xff] %v6747_v40  ;;  %10976 = vst [vmem:[#allocation43_spill] sm:$0xff] %v6761_v5  ;;  %v1905_v12 = vadd.f32 %v6736_v20, %v1904_v35  ;;  %v1909_v59 = vadd.f32 %v6761_v5, %v1908_v47  ;;  %v1912_v32 = vadd.f32 %v6376_v13, %v6365_v49  ;;  %v10978_v40 = vld [vmem:[#allocation45_spill] sm:$0xff]  ;;  %v6782_v47 = vsel %vm722_vm1, 1.0, %v10899_v57  ;;  %v10982_v5 = vld [vmem:[#allocation46_spill] sm:$0xff]  ;;  %v6811_v20 = vpop.permute.xlu0 %498 }
 0x196   :  { %v1916_v34 = vadd.f32 %v6447_v51, %v6441_v39  ;;  %10977 = vst [vmem:[#allocation44_spill] sm:$0xff] %v6770_v25  ;;  %vm777_vm3 = vcmp.lt.f32.partialorder %v5514_v10, %v10978_v40  ;;  %vm778_vm13 = vcmp.lt.f32.partialorder %v5517_v9, %v10978_v40  ;;  %10979 = vst [vmem:[#allocation45_spill] sm:$0xff] %v6776_v15  ;;  %v6789_v35 = vsel %vm772_vm7, 1.0, %v10899_v57  ;;  %v10983_v51 = vld [vmem:[#allocation47_spill] sm:$0xff]  ;;  %v10989_v13 = vld [vmem:[#allocation48_spill] sm:$0xff] }
 0x197   :  { %10980 = vst [vmem:[#allocation220_spill] sm:$0xff] %v6782_v47  ;;  %vm734_vm11 = vcmp.lt.f32.partialorder %v5527_v3, %v10907_v17  ;;  %vm731_vm2 = vcmp.lt.f32.partialorder %v5527_v3, %v10908_v28  ;;  %10981 = vst [vmem:[#allocation221_spill] sm:$0xff] %v6789_v35  ;;  %vm786_vm6 = vcmp.lt.f32.partialorder %v5514_v10, %v10982_v5  ;;  %1906 = vadd.xlane.f32.xlu0 %v1905_v12 }
 0x198   :  { %vm787_vm8 = vcmp.lt.f32.partialorder %v5517_v9, %v10982_v5  ;;  %vm783_vm9 = vcmp.lt.f32.partialorder %v5514_v10, %v10983_v51  ;;  %1910 = vadd.xlane.f32.xlu1 %v1909_v59  ;;  %v6801_v11 = vsel %vm780_vm14, 1.0, %v10899_v57  ;;  %v6807_v39 = vsel %vm781_vm0, 1.0, %v10899_v57  ;;  %10986 = vst [vmem:[#allocation222_spill] sm:$0xff] %v6811_v20 }
 0x199   :  { %10984 = vst [vmem:[#allocation46_spill] sm:$0xff] %v6801_v11  ;;  %10985 = vst [vmem:[#allocation47_spill] sm:$0xff] %v6807_v39  ;;  %vm784_vm1 = vcmp.lt.f32.partialorder %v5517_v9, %v10983_v51  ;;  %v6817_v12 = vsel %vm725_vm15, 1.0, %v10899_v57  ;;  %v6823_v59 = vsel %vm777_vm3, 1.0, %v10899_v57  ;;  %vm792_vm4 = vcmp.lt.f32.partialorder %v5514_v10, %v10989_v13 }
 0x19a   :  { %10987 = vst [vmem:[#allocation223_spill] sm:$0xff] %v6817_v12  ;;  %10988 = vst [vmem:[#allocation224_spill] sm:$0xff] %v6823_v59  ;;  %v1913_v49 = vadd.f32 %v6782_v47, %v1912_v32  ;;  %v1917_v15 = vadd.f32 %v6817_v12, %v1916_v34  ;;  %v6833_v37 = vsel %vm778_vm13, 1.0, %v10899_v57  ;;  %v6836_v20 = vsel %vm786_vm6, 1.0, %v10899_v57  ;;  %v10995_v32 = vld [vmem:[#allocation49_spill] sm:$0xff]  ;;  %v10997_v47 = vld [vmem:[#allocation50_spill] sm:$0xff] }
 0x19b   :  { %10990 = vst [vmem:[#allocation48_spill] sm:$0xff] %v6833_v37  ;;  %10991 = vst [vmem:[#allocation225_spill] sm:$0xff] %v6836_v20  ;;  %v6839_v39 = vsel %vm787_vm8, 1.0, %v10899_v57  ;;  %v6842_v11 = vsel %vm783_vm9, 1.0, %v10899_v57  ;;  %vm740_vm15 = vcmp.lt.f32.partialorder %v5527_v3, %v10918_v52  ;;  %vm737_vm10 = vcmp.lt.f32.partialorder %v5527_v3, %v10919_v30  ;;  %v6866_v20 = vpop.permute.xlu1 %502 }
 0x19c   :  { %10992 = vst [vmem:[#allocation226_spill] sm:$0xff] %v6839_v39  ;;  %10993 = vst [vmem:[#allocation227_spill] sm:$0xff] %v6842_v11  ;;  %v6849_v34 = vsel %vm784_vm1, 1.0, %v10899_v57  ;;  %vm793_vm12 = vcmp.lt.f32.partialorder %v5517_v9, %v10989_v13  ;;  %vm789_vm7 = vcmp.lt.f32.partialorder %v5514_v10, %v10995_v32  ;;  %vm790_vm14 = vcmp.lt.f32.partialorder %v5517_v9, %v10995_v32  ;;  %v10998_v39 = vld [vmem:[#allocation51_spill] sm:$0xff]  ;;  %v6885_v11 = vpop.permute.xlu0 %506 }
 0x19d   :  { %10994 = vst [vmem:[#allocation228_spill] sm:$0xff] %v6849_v34  ;;  %1914 = vadd.xlane.f32.xlu0 %v1913_v49  ;;  %1918 = vadd.xlane.f32.xlu1 %v1917_v15  ;;  %v6858_v12 = vsel %vm792_vm4, 1.0, %v10899_v57  ;;  %vm798_vm0 = vcmp.lt.f32.partialorder %v5514_v10, %v10997_v47  ;;  %vm799_vm3 = vcmp.lt.f32.partialorder %v5517_v9, %v10997_v47  ;;  %10999 = vst [vmem:[#allocation50_spill] sm:$0xff] %v6866_v20  ;;  %v11000_v34 = vld [vmem:[#allocation52_spill] sm:$0xff] }
 0x19e   :  { %10996 = vst [vmem:[#allocation49_spill] sm:$0xff] %v6858_v12  ;;  %vm795_vm13 = vcmp.lt.f32.partialorder %v5514_v10, %v10998_v39  ;;  %vm796_vm6 = vcmp.lt.f32.partialorder %v5517_v9, %v10998_v39  ;;  %vm804_vm8 = vcmp.lt.f32.partialorder %v5514_v10, %v11000_v34  ;;  %vm805_vm9 = vcmp.lt.f32.partialorder %v5517_v9, %v11000_v34 }
 0x19f   :  { %v1920_v49 = vadd.f32 %v6429_v48, %v6413_v54  ;;  %v6877_v15 = vsel %vm793_vm12, 1.0, %v10899_v57  ;;  %v6880_v12 = vsel %vm789_vm7, 1.0, %v10899_v57  ;;  %v6883_v20 = vsel %vm790_vm14, 1.0, %v10899_v57  ;;  %11004 = vst [vmem:[#allocation232_spill] sm:$0xff] %v6885_v11 }
 0x1a0   :  { %11001 = vst [vmem:[#allocation229_spill] sm:$0xff] %v6877_v15  ;;  %11002 = vst [vmem:[#allocation230_spill] sm:$0xff] %v6880_v12  ;;  %v6891_v39 = vsel %vm728_vm5, 1.0, %v10899_v57  ;;  %vm746_vm1 = vcmp.lt.f32.partialorder %v5527_v3, %v10920_v41  ;;  %vm743_vm4 = vcmp.lt.f32.partialorder %v5527_v3, %v10928_v0  ;;  %v6898_v48 = vsel %vm798_vm0, 1.0, %v10899_v57  ;;  %v11009_v15 = vld [vmem:[#allocation53_spill] sm:$0xff] }
 0x1a1   :  { %11003 = vst [vmem:[#allocation231_spill] sm:$0xff] %v6883_v20  ;;  %11005 = vst [vmem:[#allocation233_spill] sm:$0xff] %v6891_v39  ;;  %v6901_v54 = vsel %vm799_vm3, 1.0, %v10899_v57  ;;  %v6904_v11 = vsel %vm795_vm13, 1.0, %v10899_v57  ;;  %vm801_vm12 = vcmp.lt.f32.partialorder %v5514_v10, %v11009_v15  ;;  %v6909_v8 = vsel %vm796_vm6, 1.0, %v10899_v57 }
 0x1a2   :  { %11006 = vst [vmem:[#allocation234_spill] sm:$0xff] %v6898_v48  ;;  %11007 = vst [vmem:[#allocation235_spill] sm:$0xff] %v6901_v54  ;;  %v6912_v20 = vsel %vm804_vm8, 1.0, %v10899_v57  ;;  %v6915_v12 = vsel %vm805_vm9, 1.0, %v10899_v57  ;;  %vm802_vm5 = vcmp.lt.f32.partialorder %v5517_v9, %v11009_v15  ;;  %v11013_v48 = vld [vmem:[#allocation54_spill] sm:$0xff]  ;;  %v1921_v54 = vadd.f32 %v6891_v39, %v1920_v49  ;;  %v11018_v39 = vld [vmem:[#allocation55_spill] sm:$0xff] }
 0x1a3   :  { %11008 = vst [vmem:[#allocation236_spill] sm:$0xff] %v6904_v11  ;;  %11010 = vst [vmem:[#allocation53_spill] sm:$0xff] %v6909_v8  ;;  %vm810_vm7 = vcmp.lt.f32.partialorder %v5514_v10, %v11013_v48  ;;  %vm811_vm14 = vcmp.lt.f32.partialorder %v5517_v9, %v11013_v48  ;;  %v1924_v8 = vadd.f32 %v6485_v24, %v6472_v23  ;;  %v6927_v11 = vsel %vm801_vm12, 1.0, %v10899_v57 }
 0x1a4   :  { %11011 = vst [vmem:[#allocation237_spill] sm:$0xff] %v6912_v20  ;;  %11012 = vst [vmem:[#allocation238_spill] sm:$0xff] %v6915_v12  ;;  %v6929_v20 = vpop.permute.xlu1 %510  ;;  %v6935_v12 = vsel %vm731_vm2, 1.0, %v10899_v57  ;;  %v6941_v34 = vsel %vm734_vm11, 1.0, %v10899_v57  ;;  %v1928_v49 = vadd.f32 %v6469_v42, %v6466_v55  ;;  %vm752_vm0 = vcmp.lt.f32.partialorder %v5527_v3, %v10929_v60  ;;  %1922 = vadd.xlane.f32.xlu0 %v1921_v54 }
 0x1a5   :  { %11014 = vst [vmem:[#allocation54_spill] sm:$0xff] %v6927_v11  ;;  %11015 = vst [vmem:[#allocation239_spill] sm:$0xff] %v6929_v20  ;;  %vm749_vm3 = vcmp.lt.f32.partialorder %v5527_v3, %v10940_v2  ;;  %vm807_vm13 = vcmp.lt.f32.partialorder %v5514_v10, %v11018_v39  ;;  %vm808_vm2 = vcmp.lt.f32.partialorder %v5517_v9, %v11018_v39  ;;  %v6960_v42 = vsel %vm802_vm5, 1.0, %v10899_v57 }
 0x1a6   :  { %11016 = vst [vmem:[#allocation240_spill] sm:$0xff] %v6935_v12  ;;  %11017 = vst [vmem:[#allocation241_spill] sm:$0xff] %v6941_v34  ;;  %v1925_v28 = vadd.f32 %v6935_v12, %v1924_v8  ;;  %v1932_v17 = vadd.f32 %v6533_v26, %v6522_v58  ;;  %v6966_v24 = vsel %vm810_vm7, 1.0, %v10899_v57  ;;  %v6972_v54 = vsel %vm811_vm14, 1.0, %v10899_v57  ;;  %v11022_v8 = vld [vmem:[#allocation57_spill] sm:$0xff]  ;;  %v6976_v12 = vpop.permute.xlu0 %514  ;;  %v11024_v26 = vld [vmem:[#allocation56_spill] sm:$0xff] }
 0x1a7   :  { %11019 = vst [vmem:[#allocation55_spill] sm:$0xff] %v6960_v42  ;;  %11020 = vst [vmem:[#allocation242_spill] sm:$0xff] %v6966_v24  ;;  %vm816_vm11 = vcmp.lt.f32.partialorder %v5514_v10, %v11022_v8  ;;  %vm817_vm6 = vcmp.lt.f32.partialorder %v5517_v9, %v11022_v8  ;;  %vm813_vm8 = vcmp.lt.f32.partialorder %v5514_v10, %v11024_v26  ;;  %v6986_v55 = vsel %vm807_vm13, 1.0, %v10899_v57 }
 0x1a8   :  { %11021 = vst [vmem:[#allocation243_spill] sm:$0xff] %v6972_v54  ;;  %11023 = vst [vmem:[#allocation57_spill] sm:$0xff] %v6976_v12  ;;  %1926 = vadd.xlane.f32.xlu1 %v1925_v28  ;;  %v1929_v58 = vadd.f32 %v6941_v34, %v1928_v49  ;;  %v1936_v23 = vadd.f32 %v6519_v44, %v6516_v19  ;;  %v6989_v20 = vsel %vm808_vm2, 1.0, %v10899_v57  ;;  %v6995_v12 = vsel %vm737_vm10, 1.0, %v10899_v57  ;;  %v11029_v28 = vld [vmem:[#allocation61_spill] sm:$0xff]  ;;  %v11036_v19 = vld [vmem:[#allocation34_spill] sm:$0xff] }
 0x1a9   :  { %11025 = vst [vmem:[#allocation56_spill] sm:$0xff] %v6986_v55  ;;  %11026 = vst [vmem:[#allocation244_spill] sm:$0xff] %v6989_v20  ;;  %v7001_v49 = vsel %vm740_vm15, 1.0, %v10899_v57  ;;  %vm758_vm9 = vcmp.lt.f32.partialorder %v5527_v3, %v10941_v14  ;;  %vm755_vm12 = vcmp.lt.f32.partialorder %v5527_v3, %v10942_v45  ;;  %vm814_vm5 = vcmp.lt.f32.partialorder %v5517_v9, %v11024_v26 }
 0x1aa   :  { %11027 = vst [vmem:[#allocation245_spill] sm:$0xff] %v6995_v12  ;;  %11028 = vst [vmem:[#allocation246_spill] sm:$0xff] %v7001_v49  ;;  %vm822_vm7 = vcmp.lt.f32.partialorder %v5514_v10, %v11029_v28  ;;  %1930 = vadd.xlane.f32.xlu0 %v1929_v58  ;;  %v1933_v30 = vadd.f32 %v6995_v12, %v1932_v17  ;;  %v1940_v52 = vadd.f32 %v6575_v46, %v6572_v18  ;;  %v7034_v17 = vpop.permute.xlu1 %518  ;;  %v11034_v12 = vld [vmem:[#allocation58_spill] sm:$0xff]  ;;  %v11035_v18 = vld [vmem:[#allocation33_spill] sm:$0xff]  ;;  %v7049_v54 = vpop.permute.xlu0 %525 }
 0x1ab   :  { %v7018_v34 = vsel %vm816_vm11, 1.0, %v10899_v57  ;;  %v7024_v44 = vsel %vm817_vm6, 1.0, %v10899_v57  ;;  %v7030_v58 = vsel %vm813_vm8, 1.0, %v10899_v57  ;;  %vm823_vm15 = vcmp.lt.f32.partialorder %v5517_v9, %v11029_v28  ;;  %11033 = vst [vmem:[#allocation249_spill] sm:$0xff] %v7034_v17  ;;  %11039 = vst [vmem:[#allocation251_spill] sm:$0xff] %v7049_v54 }
 0x1ac   :  { %11030 = vst [vmem:[#allocation61_spill] sm:$0xff] %v7018_v34  ;;  %11031 = vst [vmem:[#allocation247_spill] sm:$0xff] %v7024_v44  ;;  %vm819_vm10 = vcmp.lt.f32.partialorder %v5514_v10, %v11034_v12  ;;  %vm820_vm14 = vcmp.lt.f32.partialorder %v5517_v9, %v11034_v12  ;;  %1934 = vadd.xlane.f32.xlu1 %v1933_v30  ;;  %v1937_v46 = vadd.f32 %v7001_v49, %v1936_v23  ;;  %v11042_v30 = vld [vmem:[#allocation71_spill] sm:$0xff] }
 0x1ad   :  { %11032 = vst [vmem:[#allocation248_spill] sm:$0xff] %v7030_v58  ;;  %v1944_v44 = vadd.f32 %v11036_v19, %v11035_v18  ;;  %v7044_v34 = vsel %vm814_vm5, 1.0, %v10899_v57  ;;  %v7047_v58 = vsel %vm822_vm7, 1.0, %v10899_v57  ;;  %v7055_v17 = vsel %vm743_vm4, 1.0, %v10899_v57 }
 0x1ae   :  { %11037 = vst [vmem:[#allocation58_spill] sm:$0xff] %v7044_v34  ;;  %11038 = vst [vmem:[#allocation250_spill] sm:$0xff] %v7047_v58  ;;  %v7061_v23 = vsel %vm746_vm1, 1.0, %v10899_v57  ;;  %vm764_vm13 = vcmp.lt.f32.partialorder %v5527_v3, %v10950_v56  ;;  %vm761_vm2 = vcmp.lt.f32.partialorder %v5527_v3, %v10951_v16  ;;  %vm828_vm11 = vcmp.lt.f32.partialorder %v5514_v10, %v11042_v30  ;;  %v7107_v58 = vpop.permute.xlu1 %529 }
 0x1af   :  { %11040 = vst [vmem:[#allocation252_spill] sm:$0xff] %v7055_v17  ;;  %11041 = vst [vmem:[#allocation253_spill] sm:$0xff] %v7061_v23  ;;  %vm829_vm6 = vcmp.lt.f32.partialorder %v5517_v9, %v11042_v30  ;;  %1938 = vadd.xlane.f32.xlu0 %v1937_v46  ;;  %v1941_v0 = vadd.f32 %v7055_v17, %v1940_v52  ;;  %v1948_v41 = vadd.f32 %v6623_v22, %v6620_v50  ;;  %v11046_v52 = vld [vmem:[#allocation62_spill] sm:$0xff]  ;;  %v11048_v50 = vld [vmem:[#allocation201_spill] sm:$0xff] }
 0x1b0   :  { %v7078_v49 = vsel %vm823_vm15, 1.0, %v10899_v57  ;;  %v7084_v19 = vsel %vm819_vm10, 1.0, %v10899_v57  ;;  %v7090_v46 = vsel %vm820_vm14, 1.0, %v10899_v57  ;;  %vm825_vm1 = vcmp.lt.f32.partialorder %v5514_v10, %v11046_v52  ;;  %v11047_v17 = vld [vmem:[#allocation78_spill] sm:$0xff]  ;;  %11051 = vst [vmem:[#allocation256_spill] sm:$0xff] %v7107_v58 }
 0x1b1   :  { %11043 = vst [vmem:[#allocation71_spill] sm:$0xff] %v7078_v49  ;;  %11044 = vst [vmem:[#allocation254_spill] sm:$0xff] %v7084_v19  ;;  %vm826_vm4 = vcmp.lt.f32.partialorder %v5517_v9, %v11046_v52  ;;  %vm834_vm8 = vcmp.lt.f32.partialorder %v5514_v10, %v11047_v17  ;;  %1942 = vadd.xlane.f32.xlu1 %v1941_v0  ;;  %v1945_v22 = vadd.f32 %v7061_v23, %v1944_v44  ;;  %v11054_v0 = vld [vmem:[#allocation73_spill] sm:$0xff] }
 0x1b2   :  { %11045 = vst [vmem:[#allocation255_spill] sm:$0xff] %v7090_v46  ;;  %v1952_v18 = vadd.f32 %v11048_v50, %v6578_v29  ;;  %v7102_v54 = vsel %vm828_vm11, 1.0, %v10899_v57  ;;  %v7105_v49 = vsel %vm829_vm6, 1.0, %v10899_v57  ;;  %v7113_v46 = vsel %vm749_vm3, 1.0, %v10899_v57 }
 0x1b3   :  { %11049 = vst [vmem:[#allocation62_spill] sm:$0xff] %v7102_v54  ;;  %11050 = vst [vmem:[#allocation78_spill] sm:$0xff] %v7105_v49  ;;  %v7119_v44 = vsel %vm752_vm0, 1.0, %v10899_v57  ;;  %vm770_vm5 = vcmp.lt.f32.partialorder %v5527_v3, %v10961_v62  ;;  %vm767_vm7 = vcmp.lt.f32.partialorder %v5527_v3, %v10962_v38  ;;  %vm835_vm15 = vcmp.lt.f32.partialorder %v5517_v9, %v11047_v17 }
 0x1b4   :  { %11052 = vst [vmem:[#allocation257_spill] sm:$0xff] %v7113_v46  ;;  %11053 = vst [vmem:[#allocation258_spill] sm:$0xff] %v7119_v44  ;;  %vm831_vm10 = vcmp.lt.f32.partialorder %v5514_v10, %v11054_v0  ;;  %1946 = vadd.xlane.f32.xlu0 %v1945_v22  ;;  %v1949_v2 = vadd.f32 %v7113_v46, %v1948_v41  ;;  %v1956_v60 = vadd.f32 %v6657_v27, %v6651_v63  ;;  %v7152_v41 = vpop.permute.xlu0 %533  ;;  %v11059_v46 = vld [vmem:[#allocation89_spill] sm:$0xff] }
 0x1b5   :  { %v7136_v23 = vsel %vm825_vm1, 1.0, %v10899_v57  ;;  %v7142_v50 = vsel %vm826_vm4, 1.0, %v10899_v57  ;;  %v7148_v22 = vsel %vm834_vm8, 1.0, %v10899_v57  ;;  %vm832_vm0 = vcmp.lt.f32.partialorder %v5517_v9, %v11054_v0  ;;  %11058 = vst [vmem:[#allocation261_spill] sm:$0xff] %v7152_v41  ;;  %v11060_v63 = vld [vmem:[#allocation205_spill] sm:$0xff] }
 0x1b6   :  { %11055 = vst [vmem:[#allocation73_spill] sm:$0xff] %v7136_v23  ;;  %11056 = vst [vmem:[#allocation259_spill] sm:$0xff] %v7142_v50  ;;  %vm840_vm3 = vcmp.lt.f32.partialorder %v5514_v10, %v11059_v46  ;;  %vm841_vm14 = vcmp.lt.f32.partialorder %v5517_v9, %v11059_v46  ;;  %1950 = vadd.xlane.f32.xlu1 %v1949_v2  ;;  %v1953_v27 = vadd.f32 %v7119_v44, %v1952_v18  ;;  %v11065_v2 = vld [vmem:[#allocation82_spill] sm:$0xff] }
 0x1b7   :  { %11057 = vst [vmem:[#allocation260_spill] sm:$0xff] %v7148_v22  ;;  %v1960_v29 = vadd.f32 %v11060_v63, %v6626_v43  ;;  %v7162_v58 = vsel %vm835_vm15, 1.0, %v10899_v57  ;;  %v7165_v22 = vsel %vm831_vm10, 1.0, %v10899_v57  ;;  %v7171_v41 = vsel %vm755_vm12, 1.0, %v10899_v57  ;;  %v11072_v43 = vld [vmem:[#allocation208_spill] sm:$0xff] }
 0x1b8   :  { %11061 = vst [vmem:[#allocation89_spill] sm:$0xff] %v7162_v58  ;;  %11062 = vst [vmem:[#allocation262_spill] sm:$0xff] %v7165_v22  ;;  %v7177_v18 = vsel %vm758_vm9, 1.0, %v10899_v57  ;;  %vm776_vm11 = vcmp.lt.f32.partialorder %v5527_v3, %v10963_v6  ;;  %vm773_vm6 = vcmp.lt.f32.partialorder %v5527_v3, %v10974_v7  ;;  %vm837_vm1 = vcmp.lt.f32.partialorder %v5514_v10, %v11065_v2  ;;  %v7225_v22 = vpop.permute.xlu0 %541 }
 0x1b9   :  { %11063 = vst [vmem:[#allocation263_spill] sm:$0xff] %v7171_v41  ;;  %11064 = vst [vmem:[#allocation264_spill] sm:$0xff] %v7177_v18  ;;  %vm838_vm4 = vcmp.lt.f32.partialorder %v5517_v9, %v11065_v2  ;;  %1954 = vadd.xlane.f32.xlu0 %v1953_v27  ;;  %v1957_v45 = vadd.f32 %v7171_v41, %v1956_v60  ;;  %v1964_v14 = vadd.f32 %v6693_v33, %v6684_v4  ;;  %v11069_v60 = vld [vmem:[#allocation101_spill] sm:$0xff]  ;;  %v7210_v41 = vpop.permute.xlu1 %537  ;;  %v11071_v33 = vld [vmem:[#allocation92_spill] sm:$0xff] }
 0x1ba   :  { %v7194_v44 = vsel %vm832_vm0, 1.0, %v10899_v57  ;;  %v7200_v63 = vsel %vm840_vm3, 1.0, %v10899_v57  ;;  %v7206_v27 = vsel %vm841_vm14, 1.0, %v10899_v57  ;;  %vm846_vm9 = vcmp.lt.f32.partialorder %v5514_v10, %v11069_v60  ;;  %11070 = vst [vmem:[#allocation101_spill] sm:$0xff] %v7210_v41  ;;  %11076 = vst [vmem:[#allocation268_spill] sm:$0xff] %v7225_v22 }
 0x1bb   :  { %11066 = vst [vmem:[#allocation82_spill] sm:$0xff] %v7194_v44  ;;  %11067 = vst [vmem:[#allocation265_spill] sm:$0xff] %v7200_v63  ;;  %vm847_vm12 = vcmp.lt.f32.partialorder %v5517_v9, %v11069_v60  ;;  %vm843_vm8 = vcmp.lt.f32.partialorder %v5514_v10, %v11071_v33  ;;  %1958 = vadd.xlane.f32.xlu1 %v1957_v45  ;;  %v1961_v4 = vadd.f32 %v7177_v18, %v1960_v29  ;;  %v11073_v63 = vld [vmem:[#allocation209_spill] sm:$0xff]  ;;  %v11079_v45 = vld [vmem:[#allocation111_spill] sm:$0xff] }
 0x1bc   :  { %11068 = vst [vmem:[#allocation266_spill] sm:$0xff] %v7206_v27  ;;  %v1968_v58 = vadd.f32 %v11073_v63, %v11072_v43  ;;  %v7220_v44 = vsel %vm837_vm1, 1.0, %v10899_v57  ;;  %v7223_v27 = vsel %vm838_vm4, 1.0, %v10899_v57  ;;  %v7231_v41 = vsel %vm761_vm2, 1.0, %v10899_v57 }
 0x1bd   :  { %11074 = vst [vmem:[#allocation92_spill] sm:$0xff] %v7220_v44  ;;  %11075 = vst [vmem:[#allocation267_spill] sm:$0xff] %v7223_v27  ;;  %v7237_v29 = vsel %vm764_vm13, 1.0, %v10899_v57  ;;  %vm782_vm15 = vcmp.lt.f32.partialorder %v5527_v3, %v10975_v31  ;;  %vm779_vm10 = vcmp.lt.f32.partialorder %v5527_v3, %v10978_v40  ;;  %vm844_vm0 = vcmp.lt.f32.partialorder %v5517_v9, %v11071_v33  ;;  %v7283_v22 = vpop.permute.xlu1 %545 }
 0x1be   :  { %11077 = vst [vmem:[#allocation269_spill] sm:$0xff] %v7231_v41  ;;  %11078 = vst [vmem:[#allocation270_spill] sm:$0xff] %v7237_v29  ;;  %vm852_vm3 = vcmp.lt.f32.partialorder %v5514_v10, %v11079_v45  ;;  %1962 = vadd.xlane.f32.xlu0 %v1961_v4  ;;  %v1965_v16 = vadd.f32 %v7231_v41, %v1964_v14  ;;  %v1972_v56 = vadd.f32 %v6741_v61, %v6728_v21  ;;  %v11083_v14 = vld [vmem:[#allocation103_spill] sm:$0xff] }
 0x1bf   :  { %v7254_v18 = vsel %vm846_vm9, 1.0, %v10899_v57  ;;  %v7260_v63 = vsel %vm847_vm12, 1.0, %v10899_v57  ;;  %v7266_v4 = vsel %vm843_vm8, 1.0, %v10899_v57  ;;  %vm853_vm13 = vcmp.lt.f32.partialorder %v5517_v9, %v11079_v45  ;;  %11086 = vst [vmem:[#allocation274_spill] sm:$0xff] %v7283_v22 }
 0x1c0   :  { %11080 = vst [vmem:[#allocation111_spill] sm:$0xff] %v7254_v18  ;;  %11081 = vst [vmem:[#allocation271_spill] sm:$0xff] %v7260_v63  ;;  %vm849_vm2 = vcmp.lt.f32.partialorder %v5514_v10, %v11083_v14  ;;  %vm850_vm14 = vcmp.lt.f32.partialorder %v5517_v9, %v11083_v14  ;;  %1966 = vadd.xlane.f32.xlu1 %v1965_v16  ;;  %v1969_v41 = vadd.f32 %v7237_v29, %v1968_v58  ;;  %v11089_v16 = vld [vmem:[#allocation123_spill] sm:$0xff] }
 0x1c1   :  { %11082 = vst [vmem:[#allocation272_spill] sm:$0xff] %v7266_v4  ;;  %v1976_v61 = vadd.f32 %v6725_v1, %v6722_v53  ;;  %v7278_v21 = vsel %vm844_vm0, 1.0, %v10899_v57  ;;  %v7281_v43 = vsel %vm852_vm3, 1.0, %v10899_v57  ;;  %v7289_v63 = vsel %vm767_vm7, 1.0, %v10899_v57  ;;  %v11096_v53 = vld [vmem:[#allocation219_spill] sm:$0xff] }
 0x1c2   :  { %11084 = vst [vmem:[#allocation103_spill] sm:$0xff] %v7278_v21  ;;  %11085 = vst [vmem:[#allocation273_spill] sm:$0xff] %v7281_v43  ;;  %v7295_v58 = vsel %vm770_vm5, 1.0, %v10899_v57  ;;  %vm788_vm1 = vcmp.lt.f32.partialorder %v5527_v3, %v10982_v5  ;;  %vm785_vm4 = vcmp.lt.f32.partialorder %v5527_v3, %v10983_v51  ;;  %vm858_vm9 = vcmp.lt.f32.partialorder %v5514_v10, %v11089_v16 }
 0x1c3   :  { %11087 = vst [vmem:[#allocation275_spill] sm:$0xff] %v7289_v63  ;;  %11088 = vst [vmem:[#allocation276_spill] sm:$0xff] %v7295_v58  ;;  %vm859_vm12 = vcmp.lt.f32.partialorder %v5517_v9, %v11089_v16  ;;  %1970 = vadd.xlane.f32.xlu0 %v1969_v41  ;;  %v1973_v38 = vadd.f32 %v7289_v63, %v1972_v56  ;;  %v1980_v62 = vadd.f32 %v6789_v35, %v6770_v25  ;;  %v11093_v56 = vld [vmem:[#allocation116_spill] sm:$0xff]  ;;  %v7328_v63 = vpop.permute.xlu0 %549  ;;  %v11095_v35 = vld [vmem:[#allocation135_spill] sm:$0xff] }
 0x1c4   :  { %v7312_v29 = vsel %vm853_vm13, 1.0, %v10899_v57  ;;  %v7318_v1 = vsel %vm849_vm2, 1.0, %v10899_v57  ;;  %v7324_v41 = vsel %vm850_vm14, 1.0, %v10899_v57  ;;  %vm855_vm5 = vcmp.lt.f32.partialorder %v5514_v10, %v11093_v56  ;;  %11094 = vst [vmem:[#allocation116_spill] sm:$0xff] %v7328_v63 }
 0x1c5   :  { %11090 = vst [vmem:[#allocation123_spill] sm:$0xff] %v7312_v29  ;;  %11091 = vst [vmem:[#allocation277_spill] sm:$0xff] %v7318_v1  ;;  %vm856_vm7 = vcmp.lt.f32.partialorder %v5517_v9, %v11093_v56  ;;  %vm864_vm8 = vcmp.lt.f32.partialorder %v5514_v10, %v11095_v35  ;;  %1974 = vadd.xlane.f32.xlu1 %v1973_v38  ;;  %v1977_v25 = vadd.f32 %v7295_v58, %v1976_v61  ;;  %v11101_v38 = vld [vmem:[#allocation128_spill] sm:$0xff] }
 0x1c6   :  { %11092 = vst [vmem:[#allocation278_spill] sm:$0xff] %v7324_v41  ;;  %v1984_v22 = vadd.f32 %v11096_v53, %v6744_v36  ;;  %v7338_v29 = vsel %vm858_vm9, 1.0, %v10899_v57  ;;  %v7341_v43 = vsel %vm859_vm12, 1.0, %v10899_v57  ;;  %v7347_v63 = vsel %vm773_vm6, 1.0, %v10899_v57  ;;  %v11108_v36 = vld [vmem:[#allocation47_spill] sm:$0xff] }
 0x1c7   :  { %11097 = vst [vmem:[#allocation135_spill] sm:$0xff] %v7338_v29  ;;  %11098 = vst [vmem:[#allocation279_spill] sm:$0xff] %v7341_v43  ;;  %v7353_v61 = vsel %vm776_vm11, 1.0, %v10899_v57  ;;  %vm794_vm0 = vcmp.lt.f32.partialorder %v5527_v3, %v10989_v13  ;;  %vm791_vm3 = vcmp.lt.f32.partialorder %v5527_v3, %v10995_v32  ;;  %vm865_vm13 = vcmp.lt.f32.partialorder %v5517_v9, %v11095_v35 }
 0x1c8   :  { %11099 = vst [vmem:[#allocation280_spill] sm:$0xff] %v7347_v63  ;;  %11100 = vst [vmem:[#allocation281_spill] sm:$0xff] %v7353_v61  ;;  %vm861_vm2 = vcmp.lt.f32.partialorder %v5514_v10, %v11101_v38  ;;  %1978 = vadd.xlane.f32.xlu0 %v1977_v25  ;;  %v1981_v7 = vadd.f32 %v7347_v63, %v1980_v62  ;;  %v1988_v6 = vadd.f32 %v6833_v37, %v6823_v59  ;;  %v7386_v62 = vpop.permute.xlu1 %553  ;;  %v11106_v63 = vld [vmem:[#allocation149_spill] sm:$0xff]  ;;  %v11107_v59 = vld [vmem:[#allocation46_spill] sm:$0xff] }
 0x1c9   :  { %v7370_v58 = vsel %vm855_vm5, 1.0, %v10899_v57  ;;  %v7376_v53 = vsel %vm856_vm7, 1.0, %v10899_v57  ;;  %v7382_v25 = vsel %vm864_vm8, 1.0, %v10899_v57  ;;  %vm862_vm11 = vcmp.lt.f32.partialorder %v5517_v9, %v11101_v38  ;;  %11105 = vst [vmem:[#allocation284_spill] sm:$0xff] %v7386_v62 }
 0x1ca   :  { %11102 = vst [vmem:[#allocation128_spill] sm:$0xff] %v7370_v58  ;;  %11103 = vst [vmem:[#allocation282_spill] sm:$0xff] %v7376_v53  ;;  %vm870_vm6 = vcmp.lt.f32.partialorder %v5514_v10, %v11106_v63  ;;  %vm871_vm14 = vcmp.lt.f32.partialorder %v5517_v9, %v11106_v63  ;;  %1982 = vadd.xlane.f32.xlu1 %v1981_v7  ;;  %v1985_v37 = vadd.f32 %v7353_v61, %v1984_v22  ;;  %v7401_v53 = vpop.permute.xlu0 %557  ;;  %v11114_v7 = vld [vmem:[#allocation51_spill] sm:$0xff]  ;;  %v11115_v61 = vld [vmem:[#allocation140_spill] sm:$0xff] }
 0x1cb   :  { %11104 = vst [vmem:[#allocation283_spill] sm:$0xff] %v7382_v25  ;;  %v1992_v43 = vadd.f32 %v11108_v36, %v11107_v59  ;;  %v7396_v29 = vsel %vm865_vm13, 1.0, %v10899_v57  ;;  %v7399_v25 = vsel %vm861_vm2, 1.0, %v10899_v57  ;;  %11111 = vst [vmem:[#allocation286_spill] sm:$0xff] %v7401_v53  ;;  %v7407_v62 = vsel %vm779_vm10, 1.0, %v10899_v57  ;;  %v11116_v36 = vld [vmem:[#allocation227_spill] sm:$0xff] }
 0x1cc   :  { %11109 = vst [vmem:[#allocation149_spill] sm:$0xff] %v7396_v29  ;;  %11110 = vst [vmem:[#allocation285_spill] sm:$0xff] %v7399_v25  ;;  %v7413_v22 = vsel %vm782_vm15, 1.0, %v10899_v57  ;;  %vm800_vm9 = vcmp.lt.f32.partialorder %v5527_v3, %v10997_v47  ;;  %vm797_vm12 = vcmp.lt.f32.partialorder %v5527_v3, %v11114_v7  ;;  %vm867_vm5 = vcmp.lt.f32.partialorder %v5514_v10, %v11115_v61  ;;  %v11117_v59 = vld [vmem:[#allocation228_spill] sm:$0xff]  ;;  %v7459_v58 = vpop.permute.xlu1 %561 }
 0x1cd   :  { %11112 = vst [vmem:[#allocation287_spill] sm:$0xff] %v7407_v62  ;;  %11113 = vst [vmem:[#allocation288_spill] sm:$0xff] %v7413_v22  ;;  %vm868_vm7 = vcmp.lt.f32.partialorder %v5517_v9, %v11115_v61  ;;  %1986 = vadd.xlane.f32.xlu0 %v1985_v37  ;;  %v1989_v40 = vadd.f32 %v7407_v62, %v1988_v6  ;;  %v1996_v31 = vadd.f32 %v11117_v59, %v11116_v36  ;;  %v11121_v6 = vld [vmem:[#allocation159_spill] sm:$0xff]  ;;  %v11122_v62 = vld [vmem:[#allocation152_spill] sm:$0xff] }
 0x1ce   :  { %v7430_v53 = vsel %vm862_vm11, 1.0, %v10899_v57  ;;  %v7436_v29 = vsel %vm870_vm6, 1.0, %v10899_v57  ;;  %v7442_v37 = vsel %vm871_vm14, 1.0, %v10899_v57  ;;  %vm876_vm15 = vcmp.lt.f32.partialorder %v5514_v10, %v11121_v6  ;;  %v11123_v36 = vld [vmem:[#allocation225_spill] sm:$0xff]  ;;  %11127 = vst [vmem:[#allocation291_spill] sm:$0xff] %v7459_v58 }
 0x1cf   :  { %11118 = vst [vmem:[#allocation51_spill] sm:$0xff] %v7430_v53  ;;  %11119 = vst [vmem:[#allocation289_spill] sm:$0xff] %v7436_v29  ;;  %vm877_vm10 = vcmp.lt.f32.partialorder %v5517_v9, %v11121_v6  ;;  %vm873_vm8 = vcmp.lt.f32.partialorder %v5514_v10, %v11122_v62  ;;  %1990 = vadd.xlane.f32.xlu1 %v1989_v40  ;;  %v1993_v59 = vadd.f32 %v7413_v22, %v1992_v43  ;;  %v11124_v29 = vld [vmem:[#allocation226_spill] sm:$0xff]  ;;  %v11130_v40 = vld [vmem:[#allocation52_spill] sm:$0xff] }
 0x1d0   :  { %11120 = vst [vmem:[#allocation290_spill] sm:$0xff] %v7442_v37  ;;  %v2000_v53 = vadd.f32 %v11124_v29, %v11123_v36  ;;  %v7454_v25 = vsel %vm867_vm5, 1.0, %v10899_v57  ;;  %v7457_v37 = vsel %vm868_vm7, 1.0, %v10899_v57  ;;  %v7465_v61 = vsel %vm785_vm4, 1.0, %v10899_v57  ;;  %v11131_v22 = vld [vmem:[#allocation168_spill] sm:$0xff]  ;;  %v11132_v29 = vld [vmem:[#allocation230_spill] sm:$0xff] }
 0x1d1   :  { %11125 = vst [vmem:[#allocation159_spill] sm:$0xff] %v7454_v25  ;;  %11126 = vst [vmem:[#allocation152_spill] sm:$0xff] %v7457_v37  ;;  %v7471_v43 = vsel %vm788_vm1, 1.0, %v10899_v57  ;;  %vm806_vm13 = vcmp.lt.f32.partialorder %v5527_v3, %v11130_v40  ;;  %vm803_vm2 = vcmp.lt.f32.partialorder %v5527_v3, %v11009_v15  ;;  %vm874_vm11 = vcmp.lt.f32.partialorder %v5517_v9, %v11122_v62  ;;  %v11133_v36 = vld [vmem:[#allocation231_spill] sm:$0xff] }
 0x1d2   :  { %11128 = vst [vmem:[#allocation292_spill] sm:$0xff] %v7465_v61  ;;  %11129 = vst [vmem:[#allocation293_spill] sm:$0xff] %v7471_v43  ;;  %vm882_vm6 = vcmp.lt.f32.partialorder %v5514_v10, %v11131_v22  ;;  %1994 = vadd.xlane.f32.xlu0 %v1993_v59  ;;  %v1997_v51 = vadd.f32 %v7465_v61, %v1996_v31  ;;  %v2004_v5 = vadd.f32 %v11133_v36, %v11132_v29  ;;  %v7504_v31 = vpop.permute.xlu0 %565  ;;  %v11138_v61 = vld [vmem:[#allocation164_spill] sm:$0xff]  ;;  %v11139_v29 = vld [vmem:[#allocation49_spill] sm:$0xff] }
 0x1d3   :  { %v7488_v58 = vsel %vm876_vm15, 1.0, %v10899_v57  ;;  %v7494_v37 = vsel %vm877_vm10, 1.0, %v10899_v57  ;;  %v7500_v59 = vsel %vm873_vm8, 1.0, %v10899_v57  ;;  %vm883_vm1 = vcmp.lt.f32.partialorder %v5517_v9, %v11131_v22  ;;  %11137 = vst [vmem:[#allocation295_spill] sm:$0xff] %v7504_v31 }
 0x1d4   :  { %11134 = vst [vmem:[#allocation52_spill] sm:$0xff] %v7488_v58  ;;  %11135 = vst [vmem:[#allocation168_spill] sm:$0xff] %v7494_v37  ;;  %vm879_vm4 = vcmp.lt.f32.partialorder %v5514_v10, %v11138_v61  ;;  %vm880_vm14 = vcmp.lt.f32.partialorder %v5517_v9, %v11138_v61  ;;  %1998 = vadd.xlane.f32.xlu1 %v1997_v51  ;;  %v2001_v36 = vadd.f32 %v7471_v43, %v2000_v53  ;;  %v11140_v37 = vld [vmem:[#allocation229_spill] sm:$0xff]  ;;  %v11146_v43 = vld [vmem:[#allocation236_spill] sm:$0xff] }
 0x1d5   :  { %11136 = vst [vmem:[#allocation294_spill] sm:$0xff] %v7500_v59  ;;  %v2008_v58 = vadd.f32 %v11140_v37, %v11139_v29  ;;  %v7514_v25 = vsel %vm874_vm11, 1.0, %v10899_v57  ;;  %v7517_v59 = vsel %vm882_vm6, 1.0, %v10899_v57  ;;  %v7523_v31 = vsel %vm791_vm3, 1.0, %v10899_v57  ;;  %v11145_v51 = vld [vmem:[#allocation25_spill] sm:$0xff] }
 0x1d6   :  { %11141 = vst [vmem:[#allocation296_spill] sm:$0xff] %v7514_v25  ;;  %11142 = vst [vmem:[#allocation297_spill] sm:$0xff] %v7517_v59  ;;  %v7529_v53 = vsel %vm794_vm0, 1.0, %v10899_v57  ;;  %vm812_vm5 = vcmp.lt.f32.partialorder %v5527_v3, %v11013_v48  ;;  %vm809_vm7 = vcmp.lt.f32.partialorder %v5527_v3, %v11018_v39  ;;  %vm888_vm15 = vcmp.lt.f32.partialorder %v5514_v10, %v11145_v51  ;;  %v11147_v37 = vld [vmem:[#allocation53_spill] sm:$0xff]  ;;  %v7587_v61 = vpop.permute.xlu0 %573  ;;  %v11187_v48 = vld [vmem:[#allocation255_spill] sm:$0xff] }
 0x1d7   :  { %11143 = vst [vmem:[#allocation298_spill] sm:$0xff] %v7523_v31  ;;  %11144 = vst [vmem:[#allocation299_spill] sm:$0xff] %v7529_v53  ;;  %vm889_vm10 = vcmp.lt.f32.partialorder %v5517_v9, %v11145_v51  ;;  %2002 = vadd.xlane.f32.xlu0 %v2001_v36  ;;  %v2005_v32 = vadd.f32 %v7523_v31, %v2004_v5  ;;  %v2012_v13 = vadd.f32 %v11147_v37, %v11146_v43  ;;  %v11151_v5 = vld [vmem:[#allocation171_spill] sm:$0xff]  ;;  %v7562_v31 = vpop.permute.xlu1 %569 }
 0x1d8   :  { %v7546_v29 = vsel %vm883_vm1, 1.0, %v10899_v57  ;;  %v7552_v59 = vsel %vm879_vm4, 1.0, %v10899_v57  ;;  %v7558_v36 = vsel %vm880_vm14, 1.0, %v10899_v57  ;;  %vm885_vm0 = vcmp.lt.f32.partialorder %v5514_v10, %v11151_v5  ;;  %11152 = vst [vmem:[#allocation171_spill] sm:$0xff] %v7562_v31  ;;  %v11153_v37 = vld [vmem:[#allocation187_spill] sm:$0xff]  ;;  %11158 = vst [vmem:[#allocation303_spill] sm:$0xff] %v7587_v61 }
 0x1d9   :  { %11148 = vst [vmem:[#allocation25_spill] sm:$0xff] %v7546_v29  ;;  %11149 = vst [vmem:[#allocation300_spill] sm:$0xff] %v7552_v59  ;;  %vm818_vm3 = vcmp.lt.f32.partialorder %v5527_v3, %v11022_v8  ;;  %vm815_vm8 = vcmp.lt.f32.partialorder %v5527_v3, %v11024_v26  ;;  %vm886_vm11 = vcmp.lt.f32.partialorder %v5517_v9, %v11151_v5  ;;  %2006 = vadd.xlane.f32.xlu1 %v2005_v32  ;;  %v11154_v29 = vld [vmem:[#allocation234_spill] sm:$0xff]  ;;  %v11164_v61 = vld [vmem:[#allocation180_spill] sm:$0xff] }
 0x1da   :  { %11150 = vst [vmem:[#allocation301_spill] sm:$0xff] %v7558_v36  ;;  %vm894_vm6 = vcmp.lt.f32.partialorder %v5514_v10, %v11153_v37  ;;  %v2009_v43 = vadd.f32 %v7529_v53, %v2008_v58  ;;  %v11155_v36 = vld [vmem:[#allocation235_spill] sm:$0xff]  ;;  %v7579_v31 = vsel %vm888_vm15, 1.0, %v10899_v57  ;;  %v7585_v25 = vsel %vm889_vm10, 1.0, %v10899_v57 }
 0x1db   :  { %v2016_v59 = vadd.f32 %v11155_v36, %v11154_v29  ;;  %11156 = vst [vmem:[#allocation187_spill] sm:$0xff] %v7579_v31  ;;  %11157 = vst [vmem:[#allocation302_spill] sm:$0xff] %v7585_v25  ;;  %v7593_v58 = vsel %vm797_vm12, 1.0, %v10899_v57  ;;  %v7599_v32 = vsel %vm800_vm9, 1.0, %v10899_v57  ;;  %vm821_vm1 = vcmp.lt.f32.partialorder %v5527_v3, %v11034_v12  ;;  %v11169_v25 = vld [vmem:[#allocation30_spill] sm:$0xff]  ;;  %v7641_v31 = vpop.permute.xlu1 %577 }
 0x1dc   :  { %11159 = vst [vmem:[#allocation304_spill] sm:$0xff] %v7593_v58  ;;  %11160 = vst [vmem:[#allocation305_spill] sm:$0xff] %v7599_v32  ;;  %v7604_v53 = vsel %vm885_vm0, 1.0, %v10899_v57  ;;  %vm895_vm4 = vcmp.lt.f32.partialorder %v5517_v9, %v11153_v37  ;;  %2010 = vadd.xlane.f32.xlu0 %v2009_v43  ;;  %v2013_v7 = vadd.f32 %v7593_v58, %v2012_v13  ;;  %v7615_v47 = vsel %vm886_vm11, 1.0, %v10899_v57  ;;  %v11165_v43 = vld [vmem:[#allocation194_spill] sm:$0xff]  ;;  %v11166_v58 = vld [vmem:[#allocation237_spill] sm:$0xff] }
 0x1dd   :  { %11161 = vst [vmem:[#allocation306_spill] sm:$0xff] %v7604_v53  ;;  %v2020_v36 = vadd.f32 %v6960_v42, %v6927_v11  ;;  %11162 = vst [vmem:[#allocation307_spill] sm:$0xff] %v7615_v47  ;;  %v7621_v29 = vsel %vm894_vm6, 1.0, %v10899_v57  ;;  %vm891_vm9 = vcmp.lt.f32.partialorder %v5514_v10, %v11164_v61  ;;  %vm892_vm12 = vcmp.lt.f32.partialorder %v5517_v9, %v11164_v61  ;;  %v11167_v42 = vld [vmem:[#allocation238_spill] sm:$0xff] }
 0x1de   :  { %11163 = vst [vmem:[#allocation308_spill] sm:$0xff] %v7621_v29  ;;  %vm824_vm14 = vcmp.lt.f32.partialorder %v5527_v3, %v11029_v28  ;;  %vm900_vm15 = vcmp.lt.f32.partialorder %v5514_v10, %v11165_v43  ;;  %vm901_vm10 = vcmp.lt.f32.partialorder %v5517_v9, %v11165_v43  ;;  %2014 = vadd.xlane.f32.xlu1 %v2013_v7  ;;  %v7637_v29 = vsel %vm895_vm4, 1.0, %v10899_v57 }
 0x1df   :  { %v2017_v13 = vadd.f32 %v7599_v32, %v2016_v59  ;;  %v2024_v11 = vadd.f32 %v11167_v42, %v11166_v58  ;;  %11168 = vst [vmem:[#allocation180_spill] sm:$0xff] %v7637_v29  ;;  %vm897_vm0 = vcmp.lt.f32.partialorder %v5514_v10, %v11169_v25  ;;  %11170 = vst [vmem:[#allocation194_spill] sm:$0xff] %v7641_v31  ;;  %v7647_v47 = vsel %vm803_vm2, 1.0, %v10899_v57 }
 0x1e0   :  { %11171 = vst [vmem:[#allocation30_spill] sm:$0xff] %v7647_v47  ;;  %v7653_v59 = vsel %vm806_vm13, 1.0, %v10899_v57  ;;  %vm827_vm11 = vcmp.lt.f32.partialorder %v5527_v3, %v11046_v52  ;;  %v7658_v7 = vsel %vm891_vm9, 1.0, %v10899_v57  ;;  %v2021_v32 = vadd.f32 %v7647_v47, %v2020_v36 }
 0x1e1   :  { %11172 = vst [vmem:[#allocation309_spill] sm:$0xff] %v7653_v59  ;;  %11173 = vst [vmem:[#allocation310_spill] sm:$0xff] %v7658_v7  ;;  %2018 = vadd.xlane.f32.xlu0 %v2017_v13  ;;  %v2028_v15 = vadd.f32 %v6989_v20, %v6986_v55  ;;  %v11174_v42 = vlaneseq  ;;  %vm830_vm2 = vcmp.lt.f32.partialorder %v5527_v3, %v11042_v30  ;;  %v7672_v40 = vsel %vm892_vm12, 1.0, %v10899_v57  ;;  %v7688_v13 = vpop.permute.xlu0 %581  ;;  %v11180_v55 = vld [vmem:[#allocation243_spill] sm:$0xff] }
 0x1e2   :  { %11175 = vst [vmem:[#allocation311_spill] sm:$0xff] %v7672_v40  ;;  %v7678_v36 = vsel %vm900_vm15, 1.0, %v10899_v57  ;;  %vm898_vm13 = vcmp.lt.f32.partialorder %v5517_v9, %v11169_v25  ;;  %11178 = vst [vmem:[#allocation314_spill] sm:$0xff] %v7688_v13  ;;  %v7694_v47 = vsel %vm897_vm0, 1.0, %v10899_v57  ;;  %2022 = vadd.xlane.f32.xlu1 %v2021_v32  ;;  %v2025_v20 = vadd.f32 %v7653_v59, %v2024_v11  ;;  %v11183_v32 = vld [vmem:[#allocation248_spill] sm:$0xff] }
 0x1e3   :  { %v7664_v58 = vand.u32 127, %v11174_v42  ;;  %11176 = vst [vmem:[#allocation312_spill] sm:$0xff] %v7678_v36  ;;  %v7684_v42 = vsel %vm901_vm10, 1.0, %v10899_v57  ;;  %11179 = vst [vmem:[#allocation315_spill] sm:$0xff] %v7694_v47  ;;  %v2032_v31 = vadd.f32 %v11180_v55, %v6966_v24  ;;  %v7710_v13 = vsel %vm812_vm5, 1.0, %v10899_v57  ;;  %v11184_v55 = vld [vmem:[#allocation203_spill] sm:$0xff] }
 0x1e4   :  { %11177 = vst [vmem:[#allocation313_spill] sm:$0xff] %v7684_v42  ;;  %v7704_v42 = vsel %vm809_vm7, 1.0, %v10899_v57  ;;  %11182 = vst [vmem:[#allocation317_spill] sm:$0xff] %v7710_v13  ;;  %v2036_v11 = vadd.f32 %v7044_v34, %v11183_v32  ;;  %vm833_vm6 = vcmp.lt.f32.partialorder %v5527_v3, %v11054_v0  ;;  %vm906_vm4 = vcmp.lt.f32.partialorder %v5514_v10, %v11184_v55  ;;  %v11185_v24 = vld [vmem:[#allocation61_spill] sm:$0xff]  ;;  %v11186_v47 = vld [vmem:[#allocation247_spill] sm:$0xff]  ;;  %v7730_v32 = vpop.permute.xlu1 %585 }
 0x1e5   :  { %v2402_v36 = vadd.s32 4294967288, %v7664_v58  ;;  %11181 = vst [vmem:[#allocation316_spill] sm:$0xff] %v7704_v42  ;;  %v2409_v59 = vadd.s32 4294967280, %v7664_v58  ;;  %2026 = vadd.xlane.f32.xlu0 %v2025_v20  ;;  %v2029_v39 = vadd.f32 %v7704_v42, %v2028_v15  ;;  %v2040_v29 = vadd.f32 %v11186_v47, %v11185_v24  ;;  %11189 = vst [vmem:[#allocation318_spill] sm:$0xff] %v7730_v32  ;;  %v1759_v15 = vpop.xlane.xlu0 %1758  ;;  %v11192_v47 = vld [vmem:[#allocation16_spill] sm:$0xff] }
 0x1e6   :  { %v2044_v40 = vadd.f32 %v11187_v48, %v7084_v19  ;;  %v7728_v34 = vsel %vm898_vm13, 1.0, %v10899_v57  ;;  %v7736_v20 = vsel %vm815_vm8, 1.0, %v10899_v57  ;;  %v7742_v48 = vsel %vm818_vm3, 1.0, %v10899_v57 }
 0x1e7   :  { %11188 = vst [vmem:[#allocation203_spill] sm:$0xff] %v7728_v34  ;;  %11190 = vst [vmem:[#allocation319_spill] sm:$0xff] %v7736_v20  ;;  %v2416_v19 = vadd.s32 4294967272, %v7664_v58  ;;  %vm836_vm5 = vcmp.lt.f32.partialorder %v5527_v3, %v11047_v17  ;;  %2030 = vadd.xlane.f32.xlu1 %v2029_v39  ;;  %v2033_v42 = vadd.f32 %v7710_v13, %v2032_v31  ;;  %v2423_v32 = vadd.s32 4294967264, %v7664_v58 }
 0x1e8   :  { %11191 = vst [vmem:[#allocation320_spill] sm:$0xff] %v7742_v48  ;;  %v7750_v26 = vsub.s32 %v7664_v58, %v11192_v47  ;;  %v7753_v24 = vsub.s32 %v2402_v36, %v11192_v47  ;;  %v7760_v8 = vsel %vm906_vm4, 1.0, %v10899_v57  ;;  %v2037_v34 = vadd.f32 %v7736_v20, %v2036_v11  ;;  %v11196_v11 = vld [vmem:[#allocation71_spill] sm:$0xff]  ;;  %v1763_v7 = vpop.xlane.xlu1 %1762 }
 0x1e9   :  { %11193 = vst [vmem:[#allocation16_spill] sm:$0xff] %v7760_v8  ;;  %v7767_v31 = vsel %vm821_vm1, 1.0, %v10899_v57  ;;  %v7770_v39 = vsub.s32 %v2409_v59, %v11192_v47  ;;  %vm839_vm7 = vcmp.lt.f32.partialorder %v5527_v3, %v11065_v2  ;;  %2034 = vadd.xlane.f32.xlu0 %v2033_v42  ;;  %v2041_v36 = vadd.f32 %v7742_v48, %v2040_v29  ;;  %v11195_v8 = vld [vmem:[#allocation250_spill] sm:$0xff]  ;;  %v1767_v12 = vpop.xlane.xlu0 %1766 }
 0x1ea   :  { %11194 = vst [vmem:[#allocation321_spill] sm:$0xff] %v7767_v31  ;;  %v2045_v13 = vadd.f32 %v7767_v31, %v2044_v40  ;;  %vm10636_vm3 = vcmask 130112   ;;  %v2048_v20 = vadd.f32 %v11196_v11, %v11195_v8  ;;  %vm842_vm8 = vcmp.lt.f32.partialorder %v5527_v3, %v11059_v46 }
 0x1eb   :  { %v7784_v59 = vsel %vm824_vm14, 1.0, %v10899_v57  ;;  %vm10635_vm1 = vcmask 195712   ;;  %v7787_v29 = vsub.s32 %v2416_v19, %v11192_v47  ;;  %v2430_v40 = vadd.s32 4294967256, %v7664_v58  ;;  %2038 = vadd.xlane.f32.xlu1 %v2037_v34 }
 0x1ec   :  { %11197 = vst [vmem:[#allocation322_spill] sm:$0xff] %v7784_v59  ;;  %v2401_v42 = vrot.slane %v1759_v15, %v7750_v26  ;;  %v2406_v31 = vrot.slane %v1763_v7, %v7753_v24  ;;  %v7793_v48 = vsub.s32 %v2423_v32, %v11192_v47  ;;  %v2437_v11 = vadd.s32 4294967248, %v7664_v58 }
 0x1ed   :  { %v2413_v28 = vrot.slane %v1767_v12, %v7770_v39  ;;  %v7801_v19 = vsel %vm827_vm11, 1.0, %v10899_v57  ;;  %v2052_v34 = vadd.f32 %v7142_v50, %v7136_v23  ;;  %v2056_v15 = vadd.f32 %v7105_v49, %v7102_v54  ;;  %2042 = vadd.xlane.f32.xlu0 %v2041_v36  ;;  %v1771_v50 = vpop.xlane.xlu0 %1770  ;;  %v1775_v49 = vpop.xlane.xlu1 %1774  ;;  %v11204_v23 = vld [vmem:[#allocation89_spill] sm:$0xff] }
 0x1ee   :  { %11198 = vst [vmem:[#allocation323_spill] sm:$0xff] %v7801_v19  ;;  %vm845_vm9 = vcmp.lt.f32.partialorder %v5527_v3, %v11071_v33  ;;  %v2408_v7 = vsel %vm10636_vm3, %v2406_v31, %v2401_v42  ;;  %v2049_v32 = vadd.f32 %v7784_v59, %v2048_v20  ;;  %vm10639_vm12 = vcmask 261312   ;;  %v11202_v59 = vld [vmem:[#allocation82_spill] sm:$0xff] }
 0x1ef   :  { %v7815_v52 = vsel %vm830_vm2, 1.0, %v10899_v57  ;;  %v2415_v12 = vsel %vm10635_vm1, %v2413_v28, %v2408_v7  ;;  %vm10616_vm14 = vcmask 326912   ;;  %v7819_v54 = vsub.s32 %v2430_v40, %v11192_v47  ;;  %2046 = vadd.xlane.f32.xlu1 %v2045_v13  ;;  %v11201_v13 = vld [vmem:[#allocation262_spill] sm:$0xff] }
 0x1f0   :  { %11199 = vst [vmem:[#allocation324_spill] sm:$0xff] %v7815_v52  ;;  %v2444_v36 = vadd.s32 4294967240, %v7664_v58  ;;  %vm848_vm15 = vcmp.lt.f32.partialorder %v5527_v3, %v11069_v60  ;;  %v2420_v20 = vrot.slane %v1771_v50, %v7787_v29  ;;  %v2427_v30 = vrot.slane %v1775_v49, %v7793_v48 }
 0x1f1   :  { %v7827_v31 = vsub.s32 %v2437_v11, %v11192_v47  ;;  %v2451_v42 = vadd.s32 4294967232, %v7664_v58  ;;  %v2053_v28 = vadd.f32 %v7801_v19, %v2052_v34  ;;  %v2057_v40 = vadd.f32 %v7815_v52, %v2056_v15  ;;  %2050 = vadd.xlane.f32.xlu0 %v2049_v32  ;;  %v11203_v11 = vld [vmem:[#allocation260_spill] sm:$0xff]  ;;  %v1779_v15 = vpop.xlane.xlu0 %1778  ;;  %v1783_v19 = vpop.xlane.xlu1 %1782 }
 0x1f2   :  { %v7836_v7 = vsel %vm833_vm6, 1.0, %v10899_v57  ;;  %v2060_v50 = vadd.f32 %v11202_v59, %v11201_v13  ;;  %v2422_v49 = vsel %vm10639_vm12, %v2420_v20, %v2415_v12  ;;  %vm10613_vm10 = vcmask 392512   ;;  %v11244_v59 = vld [vmem:[#allocation79_spill] sm:$0xff] }
 0x1f3   :  { %11200 = vst [vmem:[#allocation325_spill] sm:$0xff] %v7836_v7  ;;  %vm10608_vm0 = vcmask 458112   ;;  %v2064_v8 = vadd.f32 %v11204_v23, %v11203_v11  ;;  %v2429_v34 = vsel %vm10616_vm14, %v2427_v30, %v2422_v49  ;;  %v7848_v0 = vsel %vm836_vm5, 1.0, %v10899_v57  ;;  %2054 = vadd.xlane.f32.xlu1 %v2053_v28  ;;  %v11207_v23 = vld [vmem:[#allocation265_spill] sm:$0xff] }
 0x1f4   :  { %11205 = vst [vmem:[#allocation326_spill] sm:$0xff] %v7848_v0  ;;  %v7851_v52 = vsub.s32 %v2444_v36, %v11192_v47  ;;  %v2458_v32 = vadd.s32 4294967224, %v7664_v58  ;;  %vm854_vm11 = vcmp.lt.f32.partialorder %v5527_v3, %v11079_v45  ;;  %v2434_v12 = vrot.slane %v1779_v15, %v7819_v54  ;;  %v11208_v15 = vld [vmem:[#allocation266_spill] sm:$0xff] }
 0x1f5   :  { %v2441_v20 = vrot.slane %v1783_v19, %v7827_v31  ;;  %v7859_v30 = vsub.s32 %v2451_v42, %v11192_v47  ;;  %v2465_v17 = vadd.s32 4294967216, %v7664_v58  ;;  %v2061_v49 = vadd.f32 %v7836_v7, %v2060_v50  ;;  %2058 = vadd.xlane.f32.xlu0 %v2057_v40  ;;  %v1787_v7 = vpop.xlane.xlu0 %1786 }
 0x1f6   :  { %v7867_v36 = vsel %vm839_vm7, 1.0, %v10899_v57  ;;  %v2068_v28 = vadd.f32 %v7223_v27, %v7220_v44  ;;  %v2072_v11 = vadd.f32 %v11208_v15, %v11207_v23  ;;  %vm851_vm2 = vcmp.lt.f32.partialorder %v5527_v3, %v11083_v14  ;;  %v1791_v15 = vpop.xlane.xlu1 %1790  ;;  %v11225_v27 = vld [vmem:[#allocation67_spill] sm:$0xff] }
 0x1f7   :  { %11206 = vst [vmem:[#allocation327_spill] sm:$0xff] %v7867_v36  ;;  %vm907_vm13 = vcmp.lt.f32.partialorder %v5517_v9, %v11184_v55  ;;  %v2436_v19 = vsel %vm10613_vm10, %v2434_v12, %v2429_v34  ;;  %v2065_v42 = vadd.f32 %v7848_v0, %v2064_v8  ;;  %vm10612_vm6 = vcmask 523712   ;;  %2062 = vadd.xlane.f32.xlu1 %v2061_v49  ;;  %v11224_v0 = vld [vmem:[#allocation65_spill] sm:$0xff] }
 0x1f8   :  { %v7883_v2 = vsel %vm842_vm8, 1.0, %v10899_v57  ;;  %v2443_v50 = vsel %vm10608_vm0, %v2441_v20, %v2436_v19  ;;  %vm10611_vm4 = vcmask 589312   ;;  %v7887_v23 = vsub.s32 %v2458_v32, %v11192_v47 }
 0x1f9   :  { %11209 = vst [vmem:[#allocation328_spill] sm:$0xff] %v7883_v2  ;;  %v2472_v40 = vadd.s32 4294967208, %v7664_v58  ;;  %v2448_v8 = vrot.slane %v1787_v7, %v7851_v52  ;;  %v2455_v34 = vrot.slane %v1791_v15, %v7859_v30  ;;  %v7893_v12 = vsub.s32 %v2465_v17, %v11192_v47  ;;  %2066 = vadd.xlane.f32.xlu0 %v2065_v42 }
 0x1fa   :  { %v2479_v46 = vadd.s32 4294967200, %v7664_v58  ;;  %v2069_v20 = vadd.f32 %v7867_v36, %v2068_v28  ;;  %v2073_v19 = vadd.f32 %v7883_v2, %v2072_v11  ;;  %v7902_v32 = vsel %vm845_vm9, 1.0, %v10899_v57  ;;  %v11211_v11 = vld [vmem:[#allocation271_spill] sm:$0xff]  ;;  %v1795_v28 = vpop.xlane.xlu0 %1794  ;;  %v1799_v15 = vpop.xlane.xlu1 %1798 }
 0x1fb   :  { %11210 = vst [vmem:[#allocation329_spill] sm:$0xff] %v7902_v32  ;;  %v2076_v7 = vadd.f32 %v7278_v21, %v7266_v4  ;;  %vm860_vm5 = vcmp.lt.f32.partialorder %v5527_v3, %v11089_v16  ;;  %vm857_vm7 = vcmp.lt.f32.partialorder %v5527_v3, %v11093_v56  ;;  %v2450_v17 = vsel %vm10612_vm6, %v2448_v8, %v2443_v50 }
 0x1fc   :  { %vm2463_vm8 = vcmask 654912   ;;  %vm2470_vm0 = vcmask 720512   ;;  %v2080_v49 = vadd.f32 %v11211_v11, %v7254_v18  ;;  %v2457_v33 = vsel %vm10611_vm4, %v2455_v34, %v2450_v17  ;;  %2070 = vadd.xlane.f32.xlu1 %v2069_v20  ;;  %v11213_v11 = vld [vmem:[#allocation199_spill] sm:$0xff] }
 0x1fd   :  { %v7918_v36 = vsel %vm848_vm15, 1.0, %v10899_v57  ;;  %v7921_v2 = vsub.s32 %v2472_v40, %v11192_v47  ;;  %v2486_v42 = vadd.s32 4294967192, %v7664_v58  ;;  %v2462_v50 = vrot.slane %v1795_v28, %v7887_v23  ;;  %2074 = vadd.xlane.f32.xlu0 %v2073_v19  ;;  %v11214_v28 = vld [vmem:[#allocation273_spill] sm:$0xff] }
 0x1fe   :  { %11212 = vst [vmem:[#allocation330_spill] sm:$0xff] %v7918_v36  ;;  %v2469_v8 = vrot.slane %v1799_v15, %v7893_v12  ;;  %v7927_v34 = vsub.s32 %v2479_v46, %v11192_v47  ;;  %v2493_v17 = vadd.s32 4294967184, %v7664_v58  ;;  %vm903_vm9 = vcmp.lt.f32.partialorder %v5514_v10, %v11213_v11  ;;  %v11215_v15 = vld [vmem:[#allocation123_spill] sm:$0xff] }
 0x1ff   :  { %vm904_vm15 = vcmp.lt.f32.partialorder %v5517_v9, %v11213_v11  ;;  %v2077_v60 = vadd.f32 %v7902_v32, %v2076_v7  ;;  %v2084_v40 = vadd.f32 %v7324_v41, %v7318_v1  ;;  %vm866_vm4 = vcmp.lt.f32.partialorder %v5527_v3, %v11095_v35  ;;  %v1803_v32 = vpop.xlane.xlu0 %1802  ;;  %v1807_v41 = vpop.xlane.xlu1 %1806 }
 0x200   :  { %vm863_vm6 = vcmp.lt.f32.partialorder %v5527_v3, %v11101_v38  ;;  %v2464_v46 = vsel %vm2463_vm8, %v2462_v50, %v2457_v33  ;;  %v2081_v20 = vadd.f32 %v7918_v36, %v2080_v49  ;;  %vm10675_vm10 = vcmask 786112   ;;  %v11256_v38 = vld [vmem:[#allocation164_spill] sm:$0xff] }
 0x201   :  { %v2088_v18 = vadd.f32 %v11215_v15, %v11214_v28  ;;  %v2471_v7 = vsel %vm2470_vm0, %v2469_v8, %v2464_v46  ;;  %vm10625_vm14 = vcmask 851712   ;;  %v7950_v1 = vsel %vm854_vm11, 1.0, %v10899_v57  ;;  %2078 = vadd.xlane.f32.xlu1 %v2077_v60  ;;  %v11222_v15 = vld [vmem:[#allocation128_spill] sm:$0xff]  ;;  %v11223_v28 = vld [vmem:[#allocation282_spill] sm:$0xff] }
 0x202   :  { %11216 = vst [vmem:[#allocation199_spill] sm:$0xff] %v7950_v1  ;;  %v7953_v19 = vsub.s32 %v2486_v42, %v11192_v47  ;;  %v2476_v49 = vrot.slane %v1803_v32, %v7921_v2  ;;  %v2483_v33 = vrot.slane %v1807_v41, %v7927_v34  ;;  %v7958_v50 = vsub.s32 %v2493_v17, %v11192_v47  ;;  %v11221_v32 = vld [vmem:[#allocation140_spill] sm:$0xff] }
 0x203   :  { %v2500_v8 = vadd.s32 4294967176, %v7664_v58  ;;  %v7965_v45 = vsel %vm907_vm13, 1.0, %v10899_v57  ;;  %v7971_v42 = vsel %vm903_vm9, 1.0, %v10899_v57  ;;  %v7977_v41 = vsel %vm904_vm15, 1.0, %v10899_v57  ;;  %2082 = vadd.xlane.f32.xlu0 %v2081_v20  ;;  %v1811_v21 = vpop.xlane.xlu0 %1810  ;;  %v1815_v4 = vpop.xlane.xlu1 %1814 }
 0x204   :  { %11217 = vst [vmem:[#allocation331_spill] sm:$0xff] %v7965_v45  ;;  %11218 = vst [vmem:[#allocation332_spill] sm:$0xff] %v7971_v42  ;;  %v7983_v58 = vsel %vm851_vm2, 1.0, %v10899_v57  ;;  %vm872_vm11 = vcmp.lt.f32.partialorder %v5527_v3, %v11106_v63  ;;  %vm869_vm13 = vcmp.lt.f32.partialorder %v5527_v3, %v11221_v32  ;;  %v2478_v60 = vsel %vm10675_vm10, %v2476_v49, %v2471_v7  ;;  %v11227_v7 = vld [vmem:[#allocation135_spill] sm:$0xff] }
 0x205   :  { %11219 = vst [vmem:[#allocation333_spill] sm:$0xff] %v7977_v41  ;;  %11220 = vst [vmem:[#allocation334_spill] sm:$0xff] %v7983_v58  ;;  %v2085_v17 = vadd.f32 %v7983_v58, %v2084_v40  ;;  %v2089_v46 = vadd.f32 %v7950_v1, %v2088_v18  ;;  %v2092_v36 = vadd.f32 %v11223_v28, %v11222_v15  ;;  %vm10628_vm2 = vcmask 917312   ;;  %v11228_v18 = vld [vmem:[#allocation279_spill] sm:$0xff] }
 0x206   :  { %v2485_v14 = vsel %vm10625_vm14, %v2483_v33, %v2478_v60  ;;  %vm10629_vm9 = vcmask 982912   ;;  %v7997_v44 = vadd.f32 %v11225_v27, %v11224_v0  ;;  %v2490_v40 = vrot.slane %v1811_v21, %v7953_v19  ;;  %v11231_v21 = vld [vmem:[#allocation72_spill] sm:$0xff] }
 0x207   :  { %2086 = vadd.xlane.f32.xlu1 %v2085_v17  ;;  %v2497_v20 = vrot.slane %v1815_v4, %v7958_v50  ;;  %v2096_v49 = vadd.f32 %v11228_v18, %v11227_v7  ;;  %v8004_v28 = vsub.s32 %v2500_v8, %v11192_v47  ;;  %v8010_v33 = vsel %vm857_vm7, 1.0, %v10899_v57  ;;  %v11232_v4 = vld [vmem:[#allocation74_spill] sm:$0xff]  ;;  %v11234_v17 = vld [vmem:[#allocation63_spill] sm:$0xff]  ;;  %v11235_v60 = vld [vmem:[#allocation64_spill] sm:$0xff]  ;;  %2090 = vadd.xlane.f32.xlu0 %v2089_v46  ;;  %v1819_v1 = vpop.xlane.xlu0 %1818  ;;  %v1823_v58 = vpop.xlane.xlu1 %1822 }
 0x208   :  { %11226 = vst [vmem:[#allocation140_spill] sm:$0xff] %v7997_v44  ;;  %11229 = vst [vmem:[#allocation65_spill] sm:$0xff] %v8010_v33  ;;  %v8016_v27 = vsel %vm860_vm5, 1.0, %v10899_v57  ;;  %v8020_v0 = vadd.f32 %v11232_v4, %v11231_v21  ;;  %v8024_v47 = vadd.f32 %v11235_v60, %v11234_v17  ;;  %vm878_vm15 = vcmp.lt.f32.partialorder %v5527_v3, %v11121_v6  ;;  %v11237_v8 = vld [vmem:[#allocation285_spill] sm:$0xff]  ;;  %v11238_v18 = vld [vmem:[#allocation51_spill] sm:$0xff] }
 0x209   :  { %11230 = vst [vmem:[#allocation67_spill] sm:$0xff] %v8016_v27  ;;  %vm875_vm7 = vcmp.lt.f32.partialorder %v5527_v3, %v11122_v62  ;;  %v2093_v56 = vadd.f32 %v8010_v33, %v2092_v36  ;;  %v2492_v16 = vsel %vm10628_vm2, %v2490_v40, %v2485_v14  ;;  %v2100_v7 = vadd.f32 %v11238_v18, %v11237_v8  ;;  %v11239_v21 = vld [vmem:[#allocation68_spill] sm:$0xff]  ;;  %v11240_v4 = vld [vmem:[#allocation70_spill] sm:$0xff]  ;;  %v11243_v46 = vld [vmem:[#allocation77_spill] sm:$0xff] }
 0x20a   :  { %11233 = vst [vmem:[#allocation72_spill] sm:$0xff] %v8020_v0  ;;  %11236 = vst [vmem:[#allocation74_spill] sm:$0xff] %v8024_v47  ;;  %v8036_v15 = vadd.f32 %v11240_v4, %v11239_v21  ;;  %v11242_v17 = vld [vmem:[#allocation40_spill] sm:$0xff]  ;;  %v2499_v60 = vsel %vm10629_vm9, %v2497_v20, %v2492_v16  ;;  %vm10640_vm14 = vcmask 1048512   ;;  %v8043_v36 = vadd.f32 %v11244_v59, %v11243_v46  ;;  %v11246_v21 = vld [vmem:[#allocation283_spill] sm:$0xff] }
 0x20b   :  { %vm912_vm5 = vcmp.lt.f32.partialorder %v5514_v10, %v11242_v17  ;;  %vm913_vm2 = vcmp.lt.f32.partialorder %v5517_v9, %v11242_v17  ;;  %2094 = vadd.xlane.f32.xlu1 %v2093_v56  ;;  %v2097_v14 = vadd.f32 %v8016_v27, %v2096_v49  ;;  %v2504_v40 = vrot.slane %v1819_v1, %v8004_v28  ;;  %v11247_v4 = vld [vmem:[#allocation149_spill] sm:$0xff]  ;;  %v11250_v56 = vld [vmem:[#allocation75_spill] sm:$0xff]  ;;  %v11251_v16 = vld [vmem:[#allocation76_spill] sm:$0xff] }
 0x20c   :  { %11241 = vst [vmem:[#allocation63_spill] sm:$0xff] %v8036_v15  ;;  %11245 = vst [vmem:[#allocation64_spill] sm:$0xff] %v8043_v36  ;;  %v2104_v18 = vadd.f32 %v11247_v4, %v11246_v21  ;;  %v8055_v20 = vsel %vm863_vm6, 1.0, %v10899_v57  ;;  %v8061_v59 = vsel %vm866_vm4, 1.0, %v10899_v57  ;;  %v8065_v49 = vadd.f32 %v11251_v16, %v11250_v56  ;;  %v11253_v1 = vld [vmem:[#allocation83_spill] sm:$0xff]  ;;  %v11254_v46 = vld [vmem:[#allocation85_spill] sm:$0xff] }
 0x20d   :  { %11248 = vst [vmem:[#allocation68_spill] sm:$0xff] %v8055_v20  ;;  %11249 = vst [vmem:[#allocation70_spill] sm:$0xff] %v8061_v59  ;;  %v8069_v8 = vadd.f32 %v11254_v46, %v11253_v1  ;;  %vm884_vm9 = vcmp.lt.f32.partialorder %v5527_v3, %v11131_v22  ;;  %vm881_vm6 = vcmp.lt.f32.partialorder %v5527_v3, %v11256_v38  ;;  %2098 = vadd.xlane.f32.xlu0 %v2097_v14  ;;  %v11257_v21 = vld [vmem:[#allocation159_spill] sm:$0xff]  ;;  %v11258_v27 = vld [vmem:[#allocation152_spill] sm:$0xff]  ;;  %v1831_v14 = vpop.xlane.xlu1 %1830 }
 0x20e   :  { %11252 = vst [vmem:[#allocation40_spill] sm:$0xff] %v8065_v49  ;;  %v2101_v4 = vadd.f32 %v8055_v20, %v2100_v7  ;;  %v8077_v35 = vsel %vm10640_vm14, %v2504_v40, %v2499_v60  ;;  %v2108_v56 = vadd.f32 %v11258_v27, %v11257_v21  ;;  %v11259_v16 = vld [vmem:[#allocation80_spill] sm:$0xff]  ;;  %v11260_v33 = vld [vmem:[#allocation81_spill] sm:$0xff]  ;;  %v8089_v1 = vsel %vm912_vm5, 1.0, %v10899_v57  ;;  %v1827_v60 = vpop.xlane.xlu0 %1826  ;;  %v11265_v46 = vld [vmem:[#allocation290_spill] sm:$0xff] }
 0x20f   :  { %11255 = vst [vmem:[#allocation77_spill] sm:$0xff] %v8069_v8  ;;  %v8083_v13 = vadd.f32 %v11260_v33, %v11259_v16  ;;  %11262 = vst [vmem:[#allocation75_spill] sm:$0xff] %v8089_v1  ;;  %v8095_v7 = vsel %vm913_vm2, 1.0, %v10899_v57  ;;  %v11264_v40 = vld [vmem:[#allocation289_spill] sm:$0xff]  ;;  %v11266_v21 = vld [vmem:[#allocation88_spill] sm:$0xff]  ;;  %v2510_v20 = vrot.slane %v1823_v58, %v7750_v26  ;;  %v2514_v8 = vrot.slane %v1827_v60, %v7753_v24 }
 0x210   :  { %11263 = vst [vmem:[#allocation76_spill] sm:$0xff] %v8095_v7  ;;  %v2112_v27 = vadd.f32 %v11265_v46, %v11264_v40  ;;  %v11267_v33 = vld [vmem:[#allocation91_spill] sm:$0xff]  ;;  %2102 = vadd.xlane.f32.xlu1 %v2101_v4  ;;  %v2519_v49 = vrot.slane %v1831_v14, %v7770_v39  ;;  %v8111_v36 = vsel %vm869_vm13, 1.0, %v10899_v57  ;;  %v11271_v4 = vld [vmem:[#allocation86_spill] sm:$0xff]  ;;  %v11275_v60 = vld [vmem:[#allocation96_spill] sm:$0xff]  ;;  %vm890_vm4 = vcmp.lt.f32.partialorder %v5527_v3, %v11145_v51 }
 0x211   :  { %11261 = vst [vmem:[#allocation79_spill] sm:$0xff] %v8083_v13  ;;  %v8101_v16 = vadd.f32 %v11267_v33, %v11266_v21  ;;  %v2105_v13 = vadd.f32 %v8061_v59, %v2104_v18  ;;  %11269 = vst [vmem:[#allocation85_spill] sm:$0xff] %v8111_v36  ;;  %v8117_v21 = vsel %vm872_vm11, 1.0, %v10899_v57  ;;  %v11272_v58 = vld [vmem:[#allocation87_spill] sm:$0xff]  ;;  %vm887_vm13 = vcmp.lt.f32.partialorder %v5527_v3, %v11151_v5  ;;  %v11277_v14 = vld [vmem:[#allocation294_spill] sm:$0xff] }
 0x212   :  { %11270 = vst [vmem:[#allocation164_spill] sm:$0xff] %v8117_v21  ;;  %v8121_v33 = vadd.f32 %v11272_v58, %v11271_v4  ;;  %v11274_v18 = vld [vmem:[#allocation95_spill] sm:$0xff]  ;;  %v2109_v32 = vadd.f32 %v8111_v36, %v2108_v56  ;;  %v2515_v63 = vsel %vm10636_vm3, %v2514_v8, %v2510_v20  ;;  %v11278_v40 = vld [vmem:[#allocation296_spill] sm:$0xff]  ;;  %v11279_v4 = vld [vmem:[#allocation93_spill] sm:$0xff]  ;;  %v2113_v20 = vadd.f32 %v8117_v21, %v2112_v27 }
 0x213   :  { %11268 = vst [vmem:[#allocation83_spill] sm:$0xff] %v8101_v16  ;;  %v8125_v46 = vadd.f32 %v11275_v60, %v11274_v18  ;;  %2106 = vadd.xlane.f32.xlu0 %v2105_v13  ;;  %v2116_v59 = vadd.f32 %v11278_v40, %v11277_v14  ;;  %v11280_v58 = vld [vmem:[#allocation94_spill] sm:$0xff]  ;;  %v2520_v60 = vsel %vm10635_vm1, %v2519_v49, %v2515_v63  ;;  %v1835_v13 = vpop.xlane.xlu0 %1834  ;;  %v11283_v56 = vld [vmem:[#allocation100_spill] sm:$0xff]  ;;  %v8157_v49 = vsel %vm875_vm7, 1.0, %v10899_v57  ;;  %v11340_v47 = vld [vmem:[#allocation313_spill] sm:$0xff] }
 0x214   :  { %11273 = vst [vmem:[#allocation80_spill] sm:$0xff] %v8121_v33  ;;  %v8137_v33 = vadd.f32 %v11280_v58, %v11279_v4  ;;  %v11282_v18 = vld [vmem:[#allocation206_spill] sm:$0xff]  ;;  %2110 = vadd.xlane.f32.xlu1 %v2109_v32  ;;  %v2524_v4 = vrot.slane %v1835_v13, %v7787_v29  ;;  %v11286_v40 = vld [vmem:[#allocation52_spill] sm:$0xff]  ;;  %11288 = vst [vmem:[#allocation86_spill] sm:$0xff] %v8157_v49  ;;  %vm896_vm5 = vcmp.lt.f32.partialorder %v5527_v3, %v11153_v37  ;;  %vm11300_vm3 = vcmask 326912  }
 0x215   :  { %11276 = vst [vmem:[#allocation81_spill] sm:$0xff] %v8125_v46  ;;  %vm909_vm11 = vcmp.lt.f32.partialorder %v5514_v10, %v11282_v18  ;;  %vm910_vm2 = vcmp.lt.f32.partialorder %v5517_v9, %v11282_v18  ;;  %v1839_v46 = vpop.xlane.xlu1 %1838  ;;  %v11284_v36 = vld [vmem:[#allocation102_spill] sm:$0xff]  ;;  %v11287_v14 = vld [vmem:[#allocation168_spill] sm:$0xff]  ;;  %v11291_v32 = vld [vmem:[#allocation99_spill] sm:$0xff]  ;;  %vm893_vm7 = vcmp.lt.f32.partialorder %v5527_v3, %v11164_v61  ;;  %v2117_v6 = vadd.f32 %v8157_v49, %v2116_v59 }
 0x216   :  { %11281 = vst [vmem:[#allocation88_spill] sm:$0xff] %v8137_v33  ;;  %v8146_v8 = vadd.f32 %v11284_v36, %v11283_v56  ;;  %v2529_v58 = vrot.slane %v1839_v46, %v7793_v48  ;;  %v2120_v33 = vadd.f32 %v11287_v14, %v11286_v40  ;;  %v8163_v36 = vsel %vm878_vm15, 1.0, %v10899_v57  ;;  %v11290_v27 = vld [vmem:[#allocation98_spill] sm:$0xff]  ;;  %v11294_v13 = vld [vmem:[#allocation108_spill] sm:$0xff]  ;;  %v11299_v14 = vld [vmem:[#allocation45_spill] sm:$0xff] }
 0x217   :  { %11289 = vst [vmem:[#allocation87_spill] sm:$0xff] %v8163_v36  ;;  %v8167_v63 = vadd.f32 %v11291_v32, %v11290_v27  ;;  %v11293_v46 = vld [vmem:[#allocation106_spill] sm:$0xff]  ;;  %v8181_v62 = vsel %vm909_vm11, 1.0, %v10899_v57  ;;  %2114 = vadd.xlane.f32.xlu0 %v2113_v20  ;;  %v2525_v27 = vsel %vm10639_vm12, %v2524_v4, %v2520_v60  ;;  %v11297_v32 = vld [vmem:[#allocation300_spill] sm:$0xff]  ;;  %vm918_vm15 = vcmp.lt.f32.partialorder %v5514_v10, %v11299_v14  ;;  %v1843_v21 = vpop.xlane.xlu0 %1842  ;;  %v11334_v61 = vld [vmem:[#allocation315_spill] sm:$0xff] }
 0x218   :  { %11285 = vst [vmem:[#allocation91_spill] sm:$0xff] %v8146_v8  ;;  %v8171_v56 = vadd.f32 %v11294_v13, %v11293_v46  ;;  %11296 = vst [vmem:[#allocation93_spill] sm:$0xff] %v8181_v62  ;;  %v11298_v46 = vld [vmem:[#allocation301_spill] sm:$0xff]  ;;  %vm919_vm1 = vcmp.lt.f32.partialorder %v5517_v9, %v11299_v14  ;;  %v2530_v40 = vsel %vm11300_vm3, %v2529_v58, %v2525_v27  ;;  %v11302_v8 = vld [vmem:[#allocation114_spill] sm:$0xff]  ;;  %2118 = vadd.xlane.f32.xlu1 %v2117_v6  ;;  %vm11315_vm14 = vcmask 458112  }
 0x219   :  { %11292 = vst [vmem:[#allocation95_spill] sm:$0xff] %v8167_v63  ;;  %v2124_v13 = vadd.f32 %v11298_v46, %v11297_v32  ;;  %v11301_v63 = vld [vmem:[#allocation113_spill] sm:$0xff]  ;;  %v2121_v59 = vadd.f32 %v8163_v36, %v2120_v33  ;;  %v2534_v60 = vrot.slane %v1843_v21, %v7819_v54  ;;  %v8205_v58 = vsel %vm910_vm2, 1.0, %v10899_v57  ;;  %v11307_v27 = vld [vmem:[#allocation215_spill] sm:$0xff]  ;;  %v11339_v15 = vld [vmem:[#allocation312_spill] sm:$0xff] }
 0x21a   :  { %11295 = vst [vmem:[#allocation96_spill] sm:$0xff] %v8171_v56  ;;  %v1847_v56 = vpop.xlane.xlu1 %1846  ;;  %v8194_v20 = vadd.f32 %v11302_v8, %v11301_v63  ;;  %v11304_v46 = vld [vmem:[#allocation297_spill] sm:$0xff]  ;;  %11306 = vst [vmem:[#allocation206_spill] sm:$0xff] %v8205_v58  ;;  %vm915_vm3 = vcmp.lt.f32.partialorder %v5514_v10, %v11307_v27  ;;  %v8213_v33 = vsel %vm881_vm6, 1.0, %v10899_v57  ;;  %v8219_v21 = vsel %vm884_vm9, 1.0, %v10899_v57  ;;  %v11311_v63 = vld [vmem:[#allocation307_spill] sm:$0xff] }
 0x21b   :  { %v2539_v4 = vrot.slane %v1847_v56, %v7827_v31  ;;  %v11305_v32 = vld [vmem:[#allocation25_spill] sm:$0xff]  ;;  %11308 = vst [vmem:[#allocation100_spill] sm:$0xff] %v8213_v33  ;;  %11309 = vst [vmem:[#allocation102_spill] sm:$0xff] %v8219_v21  ;;  %vm902_vm11 = vcmp.lt.f32.partialorder %v5527_v3, %v11165_v43  ;;  %vm899_vm2 = vcmp.lt.f32.partialorder %v5527_v3, %v11169_v25  ;;  %2122 = vadd.xlane.f32.xlu0 %v2121_v59  ;;  %vm11310_vm6 = vcmask 392512   ;;  %v11314_v59 = vld [vmem:[#allocation50_spill] sm:$0xff] }
 0x21c   :  { %11303 = vst [vmem:[#allocation94_spill] sm:$0xff] %v8194_v20  ;;  %v2128_v49 = vadd.f32 %v11305_v32, %v11304_v46  ;;  %vm916_vm12 = vcmp.lt.f32.partialorder %v5517_v9, %v11307_v27  ;;  %v2125_v38 = vadd.f32 %v8213_v33, %v2124_v13  ;;  %v2535_v8 = vsel %vm11310_vm6, %v2534_v60, %v2530_v40  ;;  %v1851_v13 = vpop.xlane.xlu0 %1850  ;;  %v11316_v32 = vld [vmem:[#allocation187_spill] sm:$0xff]  ;;  %v11317_v46 = vld [vmem:[#allocation302_spill] sm:$0xff] }
 0x21d   :  { %v2132_v56 = vadd.f32 %v11311_v63, %v7604_v53  ;;  %v8235_v22 = vsel %vm918_vm15, 1.0, %v10899_v57  ;;  %v8241_v6 = vsel %vm919_vm1, 1.0, %v10899_v57  ;;  %vm924_vm9 = vcmp.lt.f32.partialorder %v5514_v10, %v11314_v59 }
 0x21e   :  { %11312 = vst [vmem:[#allocation98_spill] sm:$0xff] %v8235_v22  ;;  %11313 = vst [vmem:[#allocation99_spill] sm:$0xff] %v8241_v6  ;;  %v2540_v40 = vsel %vm11315_vm14, %v2539_v4, %v2535_v8  ;;  %v1855_v60 = vpop.xlane.xlu1 %1854  ;;  %2126 = vadd.xlane.f32.xlu1 %v2125_v38  ;;  %v2129_v63 = vadd.f32 %v8219_v21, %v2128_v49  ;;  %v2544_v53 = vrot.slane %v1851_v13, %v7851_v52  ;;  %v11323_v13 = vld [vmem:[#allocation310_spill] sm:$0xff] }
 0x21f   :  { %v2549_v33 = vrot.slane %v1855_v60, %v7859_v30  ;;  %v2136_v36 = vadd.f32 %v11317_v46, %v11316_v32  ;;  %v8255_v20 = vsel %vm915_vm3, 1.0, %v10899_v57  ;;  %v8261_v4 = vsel %vm916_vm12, 1.0, %v10899_v57  ;;  %v11324_v60 = vld [vmem:[#allocation311_spill] sm:$0xff]  ;;  %v11326_v32 = vld [vmem:[#allocation222_spill] sm:$0xff] }
 0x220   :  { %11318 = vst [vmem:[#allocation106_spill] sm:$0xff] %v8255_v20  ;;  %11319 = vst [vmem:[#allocation108_spill] sm:$0xff] %v8261_v4  ;;  %v8267_v49 = vsel %vm887_vm13, 1.0, %v10899_v57  ;;  %v8273_v38 = vsel %vm890_vm4, 1.0, %v10899_v57  ;;  %vm908_vm1 = vcmp.lt.f32.partialorder %v5527_v3, %v11184_v55  ;;  %vm905_vm14 = vcmp.lt.f32.partialorder %v5527_v3, %v11213_v11  ;;  %2130 = vadd.xlane.f32.xlu0 %v2129_v63 }
 0x221   :  { %11320 = vst [vmem:[#allocation45_spill] sm:$0xff] %v8267_v49  ;;  %11321 = vst [vmem:[#allocation113_spill] sm:$0xff] %v8273_v38  ;;  %vm925_vm12 = vcmp.lt.f32.partialorder %v5517_v9, %v11314_v59  ;;  %v2133_v5 = vadd.f32 %v8267_v49, %v2132_v56  ;;  %vm11322_vm13 = vcmask 523712   ;;  %v2140_v46 = vadd.f32 %v11324_v60, %v11323_v13  ;;  %v1859_v56 = vpop.xlane.xlu0 %1858  ;;  %v11328_v60 = vld [vmem:[#allocation308_spill] sm:$0xff] }
 0x222   :  { %v2545_v8 = vsel %vm11322_vm13, %v2544_v53, %v2540_v40  ;;  %v8289_v51 = vsel %vm924_vm9, 1.0, %v10899_v57  ;;  %vm921_vm4 = vcmp.lt.f32.partialorder %v5514_v10, %v11326_v32  ;;  %vm922_vm15 = vcmp.lt.f32.partialorder %v5517_v9, %v11326_v32  ;;  %v1863_v49 = vpop.xlane.xlu1 %1862  ;;  %v11329_v13 = vld [vmem:[#allocation180_spill] sm:$0xff] }
 0x223   :  { %11325 = vst [vmem:[#allocation114_spill] sm:$0xff] %v8289_v51  ;;  %vm11327_vm3 = vcmask 589312   ;;  %2134 = vadd.xlane.f32.xlu1 %v2133_v5  ;;  %v2137_v53 = vadd.f32 %v8273_v38, %v2136_v36  ;;  %v2554_v40 = vrot.slane %v1859_v56, %v7887_v23  ;;  %v2559_v21 = vrot.slane %v1863_v49, %v7893_v12  ;;  %v11335_v38 = vld [vmem:[#allocation203_spill] sm:$0xff] }
 0x224   :  { %v2550_v63 = vsel %vm11327_vm3, %v2549_v33, %v2545_v8  ;;  %v2144_v16 = vadd.f32 %v11329_v13, %v11328_v60  ;;  %vm914_vm6 = vcmp.lt.f32.partialorder %v5527_v3, %v11242_v17  ;;  %v8307_v33 = vsel %vm925_vm12, 1.0, %v10899_v57  ;;  %v11331_v8 = vld [vmem:[#allocation239_spill] sm:$0xff] }
 0x225   :  { %11330 = vst [vmem:[#allocation215_spill] sm:$0xff] %v8307_v33  ;;  %vm930_vm9 = vcmp.lt.f32.partialorder %v5514_v10, %v11331_v8  ;;  %v8315_v36 = vsel %vm893_vm7, 1.0, %v10899_v57  ;;  %v8321_v49 = vsel %vm896_vm5, 1.0, %v10899_v57  ;;  %vm911_vm13 = vcmp.lt.f32.partialorder %v5527_v3, %v11282_v18  ;;  %2138 = vadd.xlane.f32.xlu0 %v2137_v53  ;;  %v11338_v53 = vld [vmem:[#allocation232_spill] sm:$0xff]  ;;  %v11362_v18 = vld [vmem:[#allocation251_spill] sm:$0xff] }
 0x226   :  { %11332 = vst [vmem:[#allocation50_spill] sm:$0xff] %v8315_v36  ;;  %11333 = vst [vmem:[#allocation222_spill] sm:$0xff] %v8321_v49  ;;  %vm931_vm12 = vcmp.lt.f32.partialorder %v5517_v9, %v11331_v8  ;;  %v2141_v5 = vadd.f32 %v8315_v36, %v2140_v46  ;;  %v2555_v56 = vsel %vm2463_vm8, %v2554_v40, %v2550_v63  ;;  %v8335_v37 = vsel %vm921_vm4, 1.0, %v10899_v57  ;;  %v1867_v63 = vpop.xlane.xlu0 %1866  ;;  %v1871_v40 = vpop.xlane.xlu1 %1870 }
 0x227   :  { %v2148_v13 = vadd.f32 %v11335_v38, %v11334_v61  ;;  %11336 = vst [vmem:[#allocation239_spill] sm:$0xff] %v8335_v37  ;;  %v8341_v60 = vsel %vm922_vm15, 1.0, %v10899_v57  ;;  %vm927_vm5 = vcmp.lt.f32.partialorder %v5514_v10, %v11338_v53  ;;  %v2560_v46 = vsel %vm2470_vm0, %v2559_v21, %v2555_v56 }
 0x228   :  { %11337 = vst [vmem:[#allocation335_spill] sm:$0xff] %v8341_v60  ;;  %2142 = vadd.xlane.f32.xlu1 %v2141_v5  ;;  %v2145_v36 = vadd.f32 %v8321_v49, %v2144_v16  ;;  %v2564_v38 = vrot.slane %v1867_v63, %v7921_v2  ;;  %v2569_v61 = vrot.slane %v1871_v40, %v7927_v34  ;;  %v8355_v44 = vsel %vm930_vm9, 1.0, %v10899_v57  ;;  %v11345_v40 = vld [vmem:[#allocation249_spill] sm:$0xff] }
 0x229   :  { %v2152_v0 = vadd.f32 %v11340_v47, %v11339_v15  ;;  %11341 = vst [vmem:[#allocation232_spill] sm:$0xff] %v8355_v44  ;;  %v8361_v21 = vsel %vm931_vm12, 1.0, %v10899_v57  ;;  %v8367_v16 = vsel %vm899_vm2, 1.0, %v10899_v57  ;;  %v8373_v5 = vsel %vm902_vm11, 1.0, %v10899_v57  ;;  %v11349_v49 = vld [vmem:[#allocation57_spill] sm:$0xff] }
 0x22a   :  { %11342 = vst [vmem:[#allocation336_spill] sm:$0xff] %v8361_v21  ;;  %11343 = vst [vmem:[#allocation337_spill] sm:$0xff] %v8367_v16  ;;  %vm920_vm7 = vcmp.lt.f32.partialorder %v5527_v3, %v11299_v14  ;;  %vm917_vm4 = vcmp.lt.f32.partialorder %v5527_v3, %v11307_v27  ;;  %vm928_vm15 = vcmp.lt.f32.partialorder %v5517_v9, %v11338_v53  ;;  %2146 = vadd.xlane.f32.xlu0 %v2145_v36  ;;  %vm11346_vm3 = vcmask 851712   ;;  %v1879_v47 = vpop.xlane.xlu1 %1878 }
 0x22b   :  { %v2149_v25 = vadd.f32 %v8367_v16, %v2148_v13  ;;  %v2565_v56 = vsel %vm10675_vm10, %v2564_v38, %v2560_v46  ;;  %v2156_v63 = vadd.f32 %v7977_v41, %v7971_v42  ;;  %v8389_v43 = vsel %vm927_vm5, 1.0, %v10899_v57  ;;  %v1875_v13 = vpop.xlane.xlu0 %1874  ;;  %v11347_v42 = vld [vmem:[#allocation16_spill] sm:$0xff] }
 0x22c   :  { %11344 = vst [vmem:[#allocation338_spill] sm:$0xff] %v8389_v43  ;;  %vm936_vm11 = vcmp.lt.f32.partialorder %v5514_v10, %v11345_v40  ;;  %vm937_vm2 = vcmp.lt.f32.partialorder %v5517_v9, %v11345_v40  ;;  %v2570_v36 = vsel %vm11346_vm3, %v2569_v61, %v2565_v56  ;;  %v2153_v38 = vadd.f32 %v8373_v5, %v2152_v0 }
 0x22d   :  { %2150 = vadd.xlane.f32.xlu1 %v2149_v25  ;;  %v2574_v46 = vrot.slane %v1875_v13, %v7953_v19  ;;  %v2579_v41 = vrot.slane %v1879_v47, %v7958_v50  ;;  %v2160_v15 = vadd.f32 %v7965_v45, %v11347_v42  ;;  %v8405_v16 = vsel %vm928_vm15, 1.0, %v10899_v57 }
 0x22e   :  { %11348 = vst [vmem:[#allocation249_spill] sm:$0xff] %v8405_v16  ;;  %vm933_vm9 = vcmp.lt.f32.partialorder %v5514_v10, %v11349_v49  ;;  %v8413_v0 = vsel %vm905_vm14, 1.0, %v10899_v57  ;;  %v8419_v47 = vsel %vm908_vm1, 1.0, %v10899_v57  ;;  %vm926_vm12 = vcmp.lt.f32.partialorder %v5527_v3, %v11314_v59  ;;  %2154 = vadd.xlane.f32.xlu0 %v2153_v38  ;;  %v1887_v38 = vpop.xlane.xlu1 %1886 }
 0x22f   :  { %11350 = vst [vmem:[#allocation57_spill] sm:$0xff] %v8413_v0  ;;  %11351 = vst [vmem:[#allocation339_spill] sm:$0xff] %v8419_v47  ;;  %vm923_vm5 = vcmp.lt.f32.partialorder %v5527_v3, %v11326_v32  ;;  %vm934_vm15 = vcmp.lt.f32.partialorder %v5517_v9, %v11349_v49  ;;  %v2157_v11 = vadd.f32 %v8413_v0, %v2156_v63  ;;  %vm11352_vm14 = vcmask 917312   ;;  %v1883_v63 = vpop.xlane.xlu0 %1882 }
 0x230   :  { %v2575_v61 = vsel %vm11352_vm14, %v2574_v46, %v2570_v36  ;;  %v2164_v25 = vadd.f32 %v8205_v58, %v8181_v62  ;;  %v8435_v55 = vsel %vm936_vm11, 1.0, %v10899_v57  ;;  %v8441_v56 = vsel %vm937_vm2, 1.0, %v10899_v57 }
 0x231   :  { %11353 = vst [vmem:[#allocation340_spill] sm:$0xff] %v8435_v55  ;;  %11354 = vst [vmem:[#allocation341_spill] sm:$0xff] %v8441_v56  ;;  %vm11355_vm1 = vcmask 982912   ;;  %v2168_v36 = vadd.f32 %v8095_v7, %v8089_v1  ;;  %2158 = vadd.xlane.f32.xlu1 %v2157_v11  ;;  %v2161_v46 = vadd.f32 %v8419_v47, %v2160_v15  ;;  %vm10665_vm3 = vcmask 1041409   ;;  %v11359_v11 = vld [vmem:[#allocation256_spill] sm:$0xff] }
 0x232   :  { %v2580_v13 = vsel %vm11355_vm1, %v2579_v41, %v2575_v61  ;;  %v2584_v58 = vrot.slane %v1883_v63, %v8004_v28  ;;  %v8452_v62 = vsel %vm914_vm6, 1.0, %v10899_v57  ;;  %v8458_v41 = vsel %vm933_vm9, 1.0, %v10899_v57  ;;  %v1895_v0 = vpop.xlane.xlu1 %1894 }
 0x233   :  { %11356 = vst [vmem:[#allocation342_spill] sm:$0xff] %v8452_v62  ;;  %11357 = vst [vmem:[#allocation343_spill] sm:$0xff] %v8458_v41  ;;  %v8464_v15 = vsel %vm934_vm15, 1.0, %v10899_v57  ;;  %vm942_vm11 = vcmp.lt.f32.partialorder %v5514_v10, %v11359_v11  ;;  %v8472_v17 = vsel %vm911_vm13, 1.0, %v10899_v57  ;;  %vm932_vm6 = vcmp.lt.f32.partialorder %v5527_v3, %v11331_v8  ;;  %2162 = vadd.xlane.f32.xlu0 %v2161_v46  ;;  %v1891_v46 = vpop.xlane.xlu0 %1890 }
 0x234   :  { %11358 = vst [vmem:[#allocation344_spill] sm:$0xff] %v8464_v15  ;;  %11360 = vst [vmem:[#allocation256_spill] sm:$0xff] %v8472_v17  ;;  %vm929_vm2 = vcmp.lt.f32.partialorder %v5527_v3, %v11338_v53  ;;  %vm943_vm9 = vcmp.lt.f32.partialorder %v5517_v9, %v11359_v11  ;;  %v2165_v61 = vadd.f32 %v8472_v17, %v2164_v25  ;;  %vm11361_vm15 = vcmask 1048512  }
 0x235   :  { %v2585_v63 = vsel %vm11361_vm15, %v2584_v58, %v2580_v13  ;;  %v2172_v7 = vadd.f32 %v8261_v4, %v8255_v20  ;;  %vm939_vm13 = vcmp.lt.f32.partialorder %v5514_v10, %v11362_v18  ;;  %vm940_vm14 = vcmp.lt.f32.partialorder %v5517_v9, %v11362_v18  ;;  %v11368_v20 = vld [vmem:[#allocation261_spill] sm:$0xff] }
 0x236   :  { %v8490_v1 = vsel %vm10665_vm3, %v2585_v63, %v8077_v35  ;;  %v2169_v47 = vadd.f32 %v8452_v62, %v2168_v36  ;;  %2166 = vadd.xlane.f32.xlu1 %v2165_v61  ;;  %v2589_v58 = vrot.slane %v1887_v38, %v7750_v26  ;;  %v2593_v25 = vrot.slane %v1891_v46, %v7753_v24  ;;  %v11365_v61 = vld [vmem:[#allocation101_spill] sm:$0xff] }
 0x237   :  { %v2598_v13 = vrot.slane %v1895_v0, %v7770_v39  ;;  %v2176_v4 = vadd.f32 %v8241_v6, %v8235_v22  ;;  %v8502_v35 = vsel %vm942_vm11, 1.0, %v10899_v57  ;;  %v8508_v36 = vsel %vm943_vm9, 1.0, %v10899_v57 }
 0x238   :  { %v8514_v0 = vsel %vm917_vm4, 1.0, %v10899_v57  ;;  %v8520_v38 = vsel %vm920_vm7, 1.0, %v10899_v57  ;;  %vm938_vm1 = vcmp.lt.f32.partialorder %v5527_v3, %v11345_v40  ;;  %vm935_vm11 = vcmp.lt.f32.partialorder %v5527_v3, %v11349_v49  ;;  %2170 = vadd.xlane.f32.xlu0 %v2169_v47  ;;  %v1899_v47 = vpop.xlane.xlu0 %1898 }
 0x239   :  { %11363 = vst [vmem:[#allocation251_spill] sm:$0xff] %v8514_v0  ;;  %11364 = vst [vmem:[#allocation345_spill] sm:$0xff] %v8520_v38  ;;  %vm948_vm9 = vcmp.lt.f32.partialorder %v5514_v10, %v11365_v61  ;;  %v2173_v27 = vadd.f32 %v8514_v0, %v2172_v7  ;;  %vm11366_vm4 = vcmask 130112   ;;  %v2180_v46 = vadd.f32 %v8341_v60, %v8335_v37 }
 0x23a   :  { %v2594_v63 = vsel %vm11366_vm4, %v2593_v25, %v2589_v58  ;;  %v8536_v14 = vsel %vm939_vm13, 1.0, %v10899_v57  ;;  %v8542_v6 = vsel %vm940_vm14, 1.0, %v10899_v57  ;;  %vm949_vm7 = vcmp.lt.f32.partialorder %v5517_v9, %v11365_v61  ;;  %v1903_v58 = vpop.xlane.xlu1 %1902 }
 0x23b   :  { %vm11367_vm15 = vcmask 195712   ;;  %2174 = vadd.xlane.f32.xlu1 %v2173_v27  ;;  %v2177_v25 = vadd.f32 %v8520_v38, %v2176_v4  ;;  %v2603_v60 = vrot.slane %v1899_v47, %v7787_v29  ;;  %v2608_v37 = vrot.slane %v1903_v58, %v7793_v48  ;;  %v11372_v47 = vld [vmem:[#allocation274_spill] sm:$0xff] }
 0x23c   :  { %v2599_v7 = vsel %vm11367_vm15, %v2598_v13, %v2594_v63  ;;  %v2184_v0 = vadd.f32 %v8307_v33, %v8289_v51  ;;  %v8556_v22 = vsel %vm948_vm9, 1.0, %v10899_v57  ;;  %vm945_vm13 = vcmp.lt.f32.partialorder %v5514_v10, %v11368_v20  ;;  %v11396_v51 = vld [vmem:[#allocation171_spill] sm:$0xff] }
 0x23d   :  { %v8564_v4 = vsel %vm923_vm5, 1.0, %v10899_v57  ;;  %v8570_v13 = vsel %vm926_vm12, 1.0, %v10899_v57  ;;  %vm944_vm14 = vcmp.lt.f32.partialorder %v5527_v3, %v11359_v11  ;;  %vm941_vm9 = vcmp.lt.f32.partialorder %v5527_v3, %v11362_v18  ;;  %2178 = vadd.xlane.f32.xlu0 %v2177_v25 }
 0x23e   :  { %11369 = vst [vmem:[#allocation101_spill] sm:$0xff] %v8564_v4  ;;  %11370 = vst [vmem:[#allocation261_spill] sm:$0xff] %v8570_v13  ;;  %vm946_vm4 = vcmp.lt.f32.partialorder %v5517_v9, %v11368_v20  ;;  %v2181_v32 = vadd.f32 %v8564_v4, %v2180_v46  ;;  %vm11371_vm5 = vcmask 261312   ;;  %v2188_v63 = vadd.f32 %v8405_v16, %v8389_v43  ;;  %v1907_v46 = vpop.xlane.xlu0 %1906  ;;  %v1911_v25 = vpop.xlane.xlu1 %1910 }
 0x23f   :  { %v2604_v27 = vsel %vm11371_vm5, %v2603_v60, %v2599_v7  ;;  %v8586_v59 = vsel %vm949_vm7, 1.0, %v10899_v57  ;;  %vm954_vm12 = vcmp.lt.f32.partialorder %v5514_v10, %v11372_v47  ;;  %vm955_vm15 = vcmp.lt.f32.partialorder %v5517_v9, %v11372_v47 }
 0x240   :  { %vm11373_vm3 = vcmask 326912   ;;  %2182 = vadd.xlane.f32.xlu1 %v2181_v32  ;;  %v2185_v60 = vadd.f32 %v8570_v13, %v2184_v0  ;;  %v2613_v7 = vrot.slane %v1907_v46, %v7819_v54  ;;  %v2618_v16 = vrot.slane %v1911_v25, %v7827_v31  ;;  %v11382_v13 = vld [vmem:[#allocation284_spill] sm:$0xff] }
 0x241   :  { %v2609_v58 = vsel %vm11373_vm3, %v2608_v37, %v2604_v27  ;;  %v2192_v43 = vadd.f32 %v8361_v21, %v8355_v44  ;;  %v8602_v4 = vsel %vm945_vm13, 1.0, %v10899_v57  ;;  %v8608_v37 = vsel %vm946_vm4, 1.0, %v10899_v57  ;;  %v11376_v27 = vld [vmem:[#allocation268_spill] sm:$0xff] }
 0x242   :  { %v8614_v0 = vsel %vm929_vm2, 1.0, %v10899_v57  ;;  %v8620_v32 = vsel %vm932_vm6, 1.0, %v10899_v57  ;;  %vm950_vm3 = vcmp.lt.f32.partialorder %v5527_v3, %v11365_v61  ;;  %vm947_vm7 = vcmp.lt.f32.partialorder %v5527_v3, %v11368_v20  ;;  %2186 = vadd.xlane.f32.xlu0 %v2185_v60  ;;  %v1919_v60 = vpop.xlane.xlu1 %1918 }
 0x243   :  { %11374 = vst [vmem:[#allocation274_spill] sm:$0xff] %v8614_v0  ;;  %11375 = vst [vmem:[#allocation346_spill] sm:$0xff] %v8620_v32  ;;  %vm951_vm13 = vcmp.lt.f32.partialorder %v5514_v10, %v11376_v27  ;;  %v2189_v53 = vadd.f32 %v8614_v0, %v2188_v63  ;;  %vm11377_vm2 = vcmask 392512   ;;  %v2196_v25 = vadd.f32 %v8464_v15, %v8458_v41 }
 0x244   :  { %v2614_v46 = vsel %vm11377_vm2, %v2613_v7, %v2609_v58  ;;  %v8636_v8 = vsel %vm954_vm12, 1.0, %v10899_v57  ;;  %v8642_v21 = vsel %vm955_vm15, 1.0, %v10899_v57  ;;  %vm952_vm6 = vcmp.lt.f32.partialorder %v5517_v9, %v11376_v27  ;;  %v1915_v58 = vpop.xlane.xlu0 %1914 }
 0x245   :  { %11378 = vst [vmem:[#allocation268_spill] sm:$0xff] %v8636_v8  ;;  %11379 = vst [vmem:[#allocation347_spill] sm:$0xff] %v8642_v21  ;;  %vm11380_vm4 = vcmask 458112   ;;  %2190 = vadd.xlane.f32.xlu1 %v2189_v53  ;;  %v2193_v7 = vadd.f32 %v8620_v32, %v2192_v43  ;;  %v2623_v15 = vrot.slane %v1915_v58, %v7851_v52  ;;  %v2628_v41 = vrot.slane %v1919_v60, %v7859_v30  ;;  %v11387_v58 = vld [vmem:[#allocation116_spill] sm:$0xff] }
 0x246   :  { %v2619_v63 = vsel %vm11380_vm4, %v2618_v16, %v2614_v46  ;;  %v2200_v0 = vadd.f32 %v8441_v56, %v8435_v55  ;;  %v8656_v44 = vsel %vm951_vm13, 1.0, %v10899_v57  ;;  %vm960_vm5 = vcmp.lt.f32.partialorder %v5514_v10, %v11382_v13  ;;  %v1927_v38 = vpop.xlane.xlu1 %1926 }
 0x247   :  { %11381 = vst [vmem:[#allocation348_spill] sm:$0xff] %v8656_v44  ;;  %v8664_v16 = vsel %vm935_vm11, 1.0, %v10899_v57  ;;  %v8670_v43 = vsel %vm938_vm1, 1.0, %v10899_v57  ;;  %vm956_vm12 = vcmp.lt.f32.partialorder %v5527_v3, %v11372_v47  ;;  %vm953_vm15 = vcmp.lt.f32.partialorder %v5527_v3, %v11376_v27  ;;  %2194 = vadd.xlane.f32.xlu0 %v2193_v7 }
 0x248   :  { %11383 = vst [vmem:[#allocation284_spill] sm:$0xff] %v8664_v16  ;;  %11384 = vst [vmem:[#allocation349_spill] sm:$0xff] %v8670_v43  ;;  %vm961_vm13 = vcmp.lt.f32.partialorder %v5517_v9, %v11382_v13  ;;  %v2197_v49 = vadd.f32 %v8664_v16, %v2196_v25  ;;  %vm11385_vm11 = vcmask 523712   ;;  %v2204_v46 = vadd.f32 %v8542_v6, %v8536_v14  ;;  %v11389_v25 = vld [vmem:[#allocation291_spill] sm:$0xff]  ;;  %v1923_v56 = vpop.xlane.xlu0 %1922 }
 0x249   :  { %v2624_v53 = vsel %vm11385_vm11, %v2623_v15, %v2619_v63  ;;  %v8686_v40 = vsel %vm952_vm6, 1.0, %v10899_v57  ;;  %vm957_vm1 = vcmp.lt.f32.partialorder %v5514_v10, %v11387_v58  ;;  %vm958_vm2 = vcmp.lt.f32.partialorder %v5517_v9, %v11387_v58 }
 0x24a   :  { %11386 = vst [vmem:[#allocation350_spill] sm:$0xff] %v8686_v40  ;;  %vm11388_vm4 = vcmask 589312   ;;  %vm966_vm11 = vcmp.lt.f32.partialorder %v5514_v10, %v11389_v25  ;;  %vm967_vm10 = vcmp.lt.f32.partialorder %v5517_v9, %v11389_v25  ;;  %2198 = vadd.xlane.f32.xlu1 %v2197_v49  ;;  %v2201_v15 = vadd.f32 %v8670_v43, %v2200_v0 }
 0x24b   :  { %v2629_v60 = vsel %vm11388_vm4, %v2628_v41, %v2624_v53  ;;  %v2208_v63 = vadd.f32 %v8508_v36, %v8502_v35  ;;  %v8704_v7 = vsel %vm960_vm5, 1.0, %v10899_v57  ;;  %v8707_v41 = vsel %vm961_vm13, 1.0, %v10899_v57 }
 0x24c   :  { %11390 = vst [vmem:[#allocation116_spill] sm:$0xff] %v8707_v41  ;;  %v8713_v53 = vsel %vm941_vm9, 1.0, %v10899_v57  ;;  %v8719_v0 = vsel %vm944_vm14, 1.0, %v10899_v57  ;;  %vm962_vm6 = vcmp.lt.f32.partialorder %v5527_v3, %v11382_v13  ;;  %vm959_vm5 = vcmp.lt.f32.partialorder %v5527_v3, %v11387_v58  ;;  %2202 = vadd.xlane.f32.xlu0 %v2201_v15  ;;  %v11395_v15 = vld [vmem:[#allocation286_spill] sm:$0xff] }
 0x24d   :  { %v8726_v49 = vsel %vm957_vm1, 1.0, %v10899_v57  ;;  %v2205_v18 = vadd.f32 %v8713_v53, %v2204_v46  ;;  %v2212_v43 = vadd.f32 %v8608_v37, %v8602_v4  ;;  %v8735_v11 = vsel %vm958_vm2, 1.0, %v10899_v57 }
 0x24e   :  { %11391 = vst [vmem:[#allocation291_spill] sm:$0xff] %v8726_v49  ;;  %11392 = vst [vmem:[#allocation351_spill] sm:$0xff] %v8735_v11  ;;  %v8741_v16 = vsel %vm966_vm11, 1.0, %v10899_v57  ;;  %v8747_v46 = vsel %vm967_vm10, 1.0, %v10899_v57  ;;  %vm963_vm14 = vcmp.lt.f32.partialorder %v5514_v10, %v11395_v15  ;;  %vm964_vm9 = vcmp.lt.f32.partialorder %v5517_v9, %v11395_v15 }
 0x24f   :  { %11393 = vst [vmem:[#allocation352_spill] sm:$0xff] %v8741_v16  ;;  %11394 = vst [vmem:[#allocation353_spill] sm:$0xff] %v8747_v46  ;;  %2206 = vadd.xlane.f32.xlu1 %v2205_v18  ;;  %v2633_v55 = vrot.slane %v1923_v56, %v7887_v23  ;;  %v2209_v32 = vadd.f32 %v8719_v0, %v2208_v63  ;;  %v2216_v33 = vadd.f32 %v8586_v59, %v8556_v22  ;;  %vm11403_vm11 = vcmask 786112  }
 0x250   :  { %vm972_vm13 = vcmp.lt.f32.partialorder %v5514_v10, %v11396_v51  ;;  %vm973_vm10 = vcmp.lt.f32.partialorder %v5517_v9, %v11396_v51  ;;  %v8765_v62 = vsel %vm947_vm7, 1.0, %v10899_v57  ;;  %v8771_v56 = vsel %vm950_vm3, 1.0, %v10899_v57 }
 0x251   :  { %vm968_vm1 = vcmp.lt.f32.partialorder %v5527_v3, %v11389_v25  ;;  %vm965_vm2 = vcmp.lt.f32.partialorder %v5527_v3, %v11395_v15  ;;  %v2634_v63 = vsel %vm2463_vm8, %v2633_v55, %v2629_v60  ;;  %v2638_v18 = vrot.slane %v1927_v38, %v7893_v12  ;;  %2210 = vadd.xlane.f32.xlu0 %v2209_v32  ;;  %v11399_v55 = vld [vmem:[#allocation295_spill] sm:$0xff]  ;;  %v1931_v38 = vpop.xlane.xlu0 %1930  ;;  %v11418_v15 = vld [vmem:[#allocation318_spill] sm:$0xff] }
 0x252   :  { %v2213_v20 = vadd.f32 %v8765_v62, %v2212_v43  ;;  %v2220_v17 = vadd.f32 %v8686_v40, %v8656_v44  ;;  %v8786_v61 = vsel %vm963_vm14, 1.0, %v10899_v57  ;;  %v8792_v45 = vsel %vm964_vm9, 1.0, %v10899_v57 }
 0x253   :  { %11397 = vst [vmem:[#allocation286_spill] sm:$0xff] %v8786_v61  ;;  %11398 = vst [vmem:[#allocation171_spill] sm:$0xff] %v8792_v45  ;;  %vm969_vm3 = vcmp.lt.f32.partialorder %v5514_v10, %v11399_v55  ;;  %vm970_vm7 = vcmp.lt.f32.partialorder %v5517_v9, %v11399_v55  ;;  %v2639_v32 = vsel %vm2470_vm0, %v2638_v18, %v2634_v63  ;;  %v8807_v44 = vsel %vm972_vm13, 1.0, %v10899_v57  ;;  %v1935_v63 = vpop.xlane.xlu1 %1934 }
 0x254   :  { %2214 = vadd.xlane.f32.xlu1 %v2213_v20  ;;  %v2643_v43 = vrot.slane %v1931_v38, %v7921_v2  ;;  %v2217_v60 = vadd.f32 %v8771_v56, %v2216_v33  ;;  %v2224_v40 = vadd.f32 %v8642_v21, %v8636_v8  ;;  %11400 = vst [vmem:[#allocation295_spill] sm:$0xff] %v8807_v44  ;;  %v8813_v42 = vsel %vm973_vm10, 1.0, %v10899_v57 }
 0x255   :  { %11401 = vst [vmem:[#allocation354_spill] sm:$0xff] %v8813_v42  ;;  %v8819_v33 = vsel %vm953_vm15, 1.0, %v10899_v57  ;;  %v8825_v18 = vsel %vm956_vm12, 1.0, %v10899_v57  ;;  %vm974_vm4 = vcmp.lt.f32.partialorder %v5527_v3, %v11396_v51  ;;  %v2648_v38 = vrot.slane %v1935_v63, %v7927_v34 }
 0x256   :  { %11402 = vst [vmem:[#allocation355_spill] sm:$0xff] %v8819_v33  ;;  %v2644_v20 = vsel %vm11403_vm11, %v2643_v43, %v2639_v32  ;;  %2218 = vadd.xlane.f32.xlu0 %v2217_v60  ;;  %v2221_v21 = vadd.f32 %v8819_v33, %v2220_v17  ;;  %v2228_v27 = vadd.f32 %v8735_v11, %v8726_v49  ;;  %v8840_v47 = vsel %vm969_vm3, 1.0, %v10899_v57  ;;  %v11406_v43 = vld [vmem:[#allocation194_spill] sm:$0xff]  ;;  %v1939_v17 = vpop.xlane.xlu0 %1938  ;;  %v11408_v33 = vld [vmem:[#allocation303_spill] sm:$0xff] }
 0x257   :  { %vm971_vm15 = vcmp.lt.f32.partialorder %v5527_v3, %v11399_v55  ;;  %11404 = vst [vmem:[#allocation356_spill] sm:$0xff] %v8840_v47  ;;  %v8846_v32 = vsel %vm970_vm7, 1.0, %v10899_v57  ;;  %vm978_vm12 = vcmp.lt.f32.partialorder %v5514_v10, %v11406_v43  ;;  %vm11407_vm14 = vcmask 851712   ;;  %v1943_v8 = vpop.xlane.xlu1 %1942 }
 0x258   :  { %11405 = vst [vmem:[#allocation357_spill] sm:$0xff] %v8846_v32  ;;  %v2649_v60 = vsel %vm11407_vm14, %v2648_v38, %v2644_v20  ;;  %2222 = vadd.xlane.f32.xlu1 %v2221_v21  ;;  %v2653_v63 = vrot.slane %v1939_v17, %v7953_v19  ;;  %v2225_v11 = vadd.f32 %v8825_v18, %v2224_v40  ;;  %v8863_v20 = vsel %vm959_vm5, 1.0, %v10899_v57 }
 0x259   :  { %v2232_v49 = vadd.f32 %v8707_v41, %v8704_v7  ;;  %vm979_vm9 = vcmp.lt.f32.partialorder %v5517_v9, %v11406_v43  ;;  %vm975_vm13 = vcmp.lt.f32.partialorder %v5514_v10, %v11408_v33  ;;  %v8869_v21 = vsel %vm962_vm6, 1.0, %v10899_v57 }
 0x25a   :  { %vm11409_vm10 = vcmask 917312   ;;  %v2658_v38 = vrot.slane %v1943_v8, %v7958_v50  ;;  %2226 = vadd.xlane.f32.xlu0 %v2225_v11  ;;  %v2229_v17 = vadd.f32 %v8863_v20, %v2228_v27  ;;  %v2236_v41 = vadd.f32 %v8792_v45, %v8786_v61  ;;  %v1947_v8 = vpop.xlane.xlu0 %1946  ;;  %v11419_v61 = vld [vmem:[#allocation314_spill] sm:$0xff] }
 0x25b   :  { %v2654_v40 = vsel %vm11409_vm10, %v2653_v63, %v2649_v60  ;;  %vm980_vm5 = vcmp.lt.f32.partialorder %v5527_v3, %v11406_v43  ;;  %v8882_v13 = vsel %vm978_vm12, 1.0, %v10899_v57  ;;  %vm976_vm6 = vcmp.lt.f32.partialorder %v5517_v9, %v11408_v33 }
 0x25c   :  { %11410 = vst [vmem:[#allocation194_spill] sm:$0xff] %v8882_v13  ;;  %vm3062_vm3 = vcmask 1042434   ;;  %vm11411_vm7 = vcmask 982912   ;;  %2230 = vadd.xlane.f32.xlu1 %v2229_v17  ;;  %v2663_v11 = vrot.slane %v1947_v8, %v8004_v28  ;;  %v2233_v27 = vadd.f32 %v8869_v21, %v2232_v49 }
 0x25d   :  { %v2659_v58 = vsel %vm11411_vm7, %v2658_v38, %v2654_v40  ;;  %v2240_v60 = vadd.f32 %v8747_v46, %v8741_v16  ;;  %v8895_v63 = vsel %vm979_vm9, 1.0, %v10899_v57  ;;  %v8901_v45 = vsel %vm975_vm13, 1.0, %v10899_v57  ;;  %v1951_v40 = vpop.xlane.xlu1 %1950 }
 0x25e   :  { %11412 = vst [vmem:[#allocation303_spill] sm:$0xff] %v8895_v63  ;;  %11413 = vst [vmem:[#allocation358_spill] sm:$0xff] %v8901_v45  ;;  %v8907_v49 = vsel %vm965_vm2, 1.0, %v10899_v57  ;;  %v8913_v38 = vsel %vm968_vm1, 1.0, %v10899_v57  ;;  %v8916_v17 = vsel %vm976_vm6, 1.0, %v10899_v57  ;;  %vm11417_vm11 = vcmask 1048512   ;;  %2234 = vadd.xlane.f32.xlu0 %v2233_v27 }
 0x25f   :  { %11414 = vst [vmem:[#allocation359_spill] sm:$0xff] %v8907_v49  ;;  %11415 = vst [vmem:[#allocation360_spill] sm:$0xff] %v8913_v38  ;;  %v2664_v8 = vsel %vm11417_vm11, %v2663_v11, %v2659_v58  ;;  %v2237_v46 = vadd.f32 %v8907_v49, %v2236_v41  ;;  %v2244_v16 = vadd.f32 %v8846_v32, %v8840_v47  ;;  %v1955_v58 = vpop.xlane.xlu0 %1954  ;;  %vm11422_vm13 = vcmask 130112  }
 0x260   :  { %11416 = vst [vmem:[#allocation361_spill] sm:$0xff] %v8916_v17  ;;  %vm984_vm2 = vcmp.lt.f32.partialorder %v5514_v10, %v11418_v15  ;;  %vm981_vm12 = vcmp.lt.f32.partialorder %v5514_v10, %v11419_v61  ;;  %vm982_vm1 = vcmp.lt.f32.partialorder %v5517_v9, %v11419_v61  ;;  %v8930_v25 = vsel %vm3062_vm3, %v2664_v8, %v8490_v1 }
 0x261   :  { %v2668_v11 = vrot.slane %v1951_v40, %v7750_v26  ;;  %2238 = vadd.xlane.f32.xlu1 %v2237_v46  ;;  %v2672_v41 = vrot.slane %v1955_v58, %v7753_v24  ;;  %v2241_v27 = vadd.f32 %v8913_v38, %v2240_v60  ;;  %v2248_v32 = vadd.f32 %v8813_v42, %v8807_v44  ;;  %v1959_v47 = vpop.xlane.xlu1 %1958 }
 0x262   :  { %vm977_vm14 = vcmp.lt.f32.partialorder %v5527_v3, %v11408_v33  ;;  %vm985_vm9 = vcmp.lt.f32.partialorder %v5517_v9, %v11418_v15  ;;  %v8945_v1 = vsel %vm971_vm15, 1.0, %v10899_v57  ;;  %v8951_v46 = vsel %vm974_vm4, 1.0, %v10899_v57  ;;  %v5190_v33 = vld [vmem:[%s10256_s1] sm:$0x7]  ;;  %s5290_s1 = smov [#allocation9]  }
 0x263   :  { %11420 = vst [vmem:[#allocation318_spill] sm:$0xff] %v8945_v1  ;;  %11421 = vst [vmem:[#allocation314_spill] sm:$0xff] %v8951_v46  ;;  %v2673_v60 = vsel %vm11422_vm13, %v2672_v41, %v2668_v11  ;;  %v2677_v40 = vrot.slane %v1959_v47, %v7770_v39  ;;  %2242 = vadd.xlane.f32.xlu0 %v2241_v27  ;;  %v2245_v8 = vadd.f32 %v8945_v1, %v2244_v16  ;;  %v1963_v47 = vpop.xlane.xlu0 %1962  ;;  %vm11426_vm4 = vcmask 195712   ;;  %s4775_s16 = sshll.u32 %s5290_s1, 4  ;;  %s4776_s16 = int_to_ptr.vmem [resolvable:$true] %s4775_s16 }
 0x264   :  { %v2252_v58 = vadd.f32 %v8916_v17, %v8901_v45  ;;  %vm986_vm15 = vcmp.lt.f32.partialorder %v5527_v3, %v11418_v15  ;;  %v8964_v51 = vsel %vm984_vm2, 1.0, %v10899_v57  ;;  %v8970_v55 = vsel %vm981_vm12, 1.0, %v10899_v57  ;;  %v11438_v15 = vld [vmem:[#allocation84_spill] sm:$0xff]  ;;  %s5235_s17 = scalar_lea.vmem %s4776_s16, 128  ;;  %p5240_p3 = scmp.lt.s32.totalorder %s4776_s16, %s4776_s16 }
 0x265   :  { %11423 = vst [vmem:[#allocation362_spill] sm:$0xff] %v8964_v51  ;;  %11424 = vst [vmem:[#allocation363_spill] sm:$0xff] %v8970_v55  ;;  %v8976_v16 = vsel %vm982_vm1, 1.0, %v10899_v57  ;;  %v2678_v11 = vsel %vm11426_vm4, %v2677_v40, %v2673_v60  ;;  %2246 = vadd.xlane.f32.xlu1 %v2245_v8  ;;  %v2682_v41 = vrot.slane %v1963_v47, %v7787_v29  ;;  %v8987_v10 = vsel %vm985_vm9, 1.0, %v10899_v57  ;;  %v1967_v45 = vpop.xlane.xlu1 %1966  ;;  %p5236_p2 = scmp.ne.s32.totalorder %s4776_s16, %s5235_s17  ;;  %p5241_p4 = scmp.lt.s32.totalorder %s5235_s17, %s5235_s17 }
 0x266   :  { %11425 = vst [vmem:[#allocation364_spill] sm:$0xff] %v8976_v16  ;;  %v2249_v27 = vadd.f32 %v8951_v46, %v2248_v32  ;;  %v2256_v17 = vadd.f32 %v8895_v63, %v8882_v13  ;;  %11427 = vst [vmem:[#allocation365_spill] sm:$0xff] %v8987_v10  ;;  %vm983_vm10 = vcmp.lt.f32.partialorder %v5527_v3, %v11419_v61  ;;  %v8995_v60 = vsel %vm977_vm14, 1.0, %v10899_v57  ;;  %v11431_v63 = vld [vmem:[#allocation17_spill] sm:$0xff] }
 0x267   :  { %11428 = vst [vmem:[#allocation366_spill] sm:$0xff] %v8995_v60  ;;  %v9001_v32 = vsel %vm980_vm5, 1.0, %v10899_v57  ;;  %vm11430_vm6 = vcmask 261312   ;;  %v2687_v40 = vrot.slane %v1967_v45, %v7793_v48  ;;  %v2253_v8 = vadd.f32 %v8995_v60, %v2252_v58  ;;  %v1971_v43 = vpop.xlane.xlu0 %1970  ;;  %p5242_p5 = por %p5241_p4, %p5240_p3 }
 0x268   :  { %11429 = vst [vmem:[#allocation367_spill] sm:$0xff] %v9001_v32  ;;  %v2683_v9 = vsel %vm11430_vm6, %v2682_v41, %v2678_v11  ;;  %2250 = vadd.xlane.f32.xlu0 %v2249_v27  ;;  %v2260_v47 = vadd.f32 %v8976_v16, %v8970_v55  ;;  %v9012_v13 = vrot.slane %v5190_v33, %v11431_v63  ;;  %vm11432_vm5 = vcmask 326912  }
 0x269   :  { %v2688_v46 = vsel %vm11432_vm5, %v2687_v40, %v2683_v9  ;;  %2254 = vadd.xlane.f32.xlu1 %v2253_v8  ;;  %v2692_v11 = vrot.slane %v1971_v43, %v7819_v54  ;;  %v2257_v45 = vadd.f32 %v9001_v32, %v2256_v17  ;;  %v2264_v58 = vadd.f32 %v8987_v10, %v8964_v51  ;;  %v1975_v41 = vpop.xlane.xlu1 %1974  ;;  %v11437_v10 = vld [vmem:[#allocation66_spill] sm:$0xff]  ;;  %p5243_p6 = pnand %p5242_p5, %p5236_p2 }
 0x26a   :  { %v9023_v27 = vsel %vm983_vm10, 1.0, %v10899_v57  ;;  %v9029_v63 = vsel %vm986_vm15, 1.0, %v10899_v57  ;;  %vm11435_vm7 = vcmask 392512   ;;  %v2697_v17 = vrot.slane %v1975_v41, %v7827_v31 }
 0x26b   :  { %11433 = vst [vmem:[#allocation17_spill] sm:$0xff] %v9023_v27  ;;  %11434 = vst [vmem:[#allocation368_spill] sm:$0xff] %v9029_v63  ;;  %v2693_v9 = vsel %vm11435_vm7, %v2692_v11, %v2688_v46  ;;  %v2261_v40 = vadd.f32 %v9023_v27, %v2260_v47  ;;  %v1979_v8 = vpop.xlane.xlu0 %1978  ;;  %vm11436_vm11 = vcmask 458112   ;;  %v2265_v43 = vadd.f32 %v9029_v63, %v2264_v58  ;;  %v11440_v47 = vld [vmem:[#allocation140_spill] sm:$0xff] }
 0x26c   :  { %2258 = vadd.xlane.f32.xlu0 %v2257_v45  ;;  %v2698_v33 = vsel %vm11436_vm11, %v2697_v17, %v2693_v9  ;;  %v2702_v61 = vrot.slane %v1979_v8, %v7851_v52  ;;  %v3096_v3 = vmul.f32 %v11437_v10, %v9012_v13  ;;  %v3099_v46 = vmul.f32 %v11438_v15, %v9012_v13  ;;  %v11441_v9 = vld [vmem:[#allocation69_spill] sm:$0xff]  ;;  %v11443_v8 = vld [vmem:[#allocation72_spill] sm:$0xff]  ;;  %v11444_v15 = vld [vmem:[#allocation90_spill] sm:$0xff] }
 0x26d   :  { %2262 = vadd.xlane.f32.xlu1 %v2261_v40  ;;  %v1983_v57 = vpop.xlane.xlu1 %1982  ;;  %vm11439_vm2 = vcmask 523712   ;;  %v3102_v17 = vmul.f32 %v11441_v9, %v9012_v13  ;;  %vm11442_vm12 = vcmask 589312   ;;  %v3105_v27 = vmul.f32 %v11444_v15, %v9012_v13  ;;  %v11446_v9 = vld [vmem:[#allocation97_spill] sm:$0xff] }
 0x26e   :  { %v2703_v11 = vsel %vm11439_vm2, %v2702_v61, %v2698_v33  ;;  %v2707_v45 = vrot.slane %v1983_v57, %v7859_v30  ;;  %v3479_v41 = vadd.f32 %v11440_v47, %v3096_v3  ;;  %v3483_v63 = vadd.f32 %v11443_v8, %v3099_v46  ;;  %v11445_v3 = vld [vmem:[#allocation74_spill] sm:$0xff]  ;;  %v11448_v8 = vld [vmem:[#allocation107_spill] sm:$0xff] }
 0x26f   :  { %v1987_v40 = vpop.xlane.xlu0 %1986  ;;  %v3487_v57 = vadd.f32 %v11445_v3, %v3102_v17  ;;  %v3111_v15 = vmul.f32 %v11448_v8, %v9012_v13  ;;  %vm11449_vm1 = vcmask 786112   ;;  %v11450_v17 = vld [vmem:[#allocation64_spill] sm:$0xff]  ;;  %vm11452_vm14 = vcmask 851712  }
 0x270   :  { %2266 = vadd.xlane.f32.xlu0 %v2265_v43  ;;  %v2708_v58 = vsel %vm11442_vm12, %v2707_v45, %v2703_v11  ;;  %v2712_v10 = vrot.slane %v1987_v40, %v7887_v23  ;;  %v3108_v11 = vmul.f32 %v11446_v9, %v9012_v13  ;;  %v11451_v9 = vld [vmem:[#allocation112_spill] sm:$0xff]  ;;  %vm11455_vm9 = vcmask 917312  }
 0x271   :  { %3480 = vadd.xlane.f32.xlu1 %v3479_v41  ;;  %v1991_v33 = vpop.xlane.xlu1 %1990  ;;  %v11447_v41 = vld [vmem:[#allocation63_spill] sm:$0xff]  ;;  %vm3064_vm13 = vcmask 1043459   ;;  %vm11458_vm15 = vcmask 982912   ;;  %vm11461_vm4 = vcmask 1048512   ;;  %vm11466_vm10 = vcmask 130112  }
 0x272   :  { %v2713_v61 = vsel %vm2463_vm8, %v2712_v10, %v2708_v58  ;;  %v2717_v43 = vrot.slane %v1991_v33, %v7893_v12  ;;  %v3491_v40 = vadd.f32 %v11447_v41, %v3105_v27  ;;  %v3495_v33 = vadd.f32 %v11450_v17, %v3108_v11  ;;  %v11454_v41 = vld [vmem:[#allocation117_spill] sm:$0xff] }
 0x273   :  { %v1995_v47 = vpop.xlane.xlu0 %1994  ;;  %v3117_v8 = vmul.f32 %v11454_v41, %v9012_v13  ;;  %v11456_v11 = vld [vmem:[#allocation77_spill] sm:$0xff]  ;;  %vm11473_vm6 = vcmask 195712   ;;  %vm11476_vm5 = vcmask 261312   ;;  %vm11481_vm7 = vcmask 326912  }
 0x274   :  { %3484 = vadd.xlane.f32.xlu0 %v3483_v63  ;;  %v2718_v45 = vsel %vm2470_vm0, %v2717_v43, %v2713_v61  ;;  %v2722_v46 = vrot.slane %v1995_v47, %v7921_v2  ;;  %v3114_v61 = vmul.f32 %v11451_v9, %v9012_v13  ;;  %vm11486_vm11 = vcmask 392512  }
 0x275   :  { %3488 = vadd.xlane.f32.xlu1 %v3487_v57  ;;  %v1999_v58 = vpop.xlane.xlu1 %1998  ;;  %v11453_v57 = vld [vmem:[#allocation40_spill] sm:$0xff]  ;;  %vm11491_vm2 = vcmask 458112   ;;  %vm11495_vm12 = vcmask 523712  }
 0x276   :  { %v2723_v10 = vsel %vm11449_vm1, %v2722_v46, %v2718_v45  ;;  %v2727_v63 = vrot.slane %v1999_v58, %v7927_v34  ;;  %v3499_v47 = vadd.f32 %v11453_v57, %v3111_v15  ;;  %v3503_v58 = vadd.f32 %v11456_v11, %v3114_v61  ;;  %v11460_v57 = vld [vmem:[#allocation124_spill] sm:$0xff]  ;;  %v11462_v61 = vld [vmem:[#allocation83_spill] sm:$0xff] }
 0x277   :  { %v2003_v3 = vpop.xlane.xlu0 %2002  ;;  %vm11500_vm1 = vcmask 589312  }
 0x278   :  { %3492 = vadd.xlane.f32.xlu0 %v3491_v40  ;;  %v2728_v43 = vsel %vm11452_vm14, %v2727_v63, %v2723_v10  ;;  %v2732_v27 = vrot.slane %v2003_v3, %v7953_v19  ;;  %v11457_v10 = vld [vmem:[#allocation119_spill] sm:$0xff]  ;;  %vm11510_vm14 = vcmask 786112  }
 0x279   :  { %3496 = vadd.xlane.f32.xlu1 %v3495_v33  ;;  %v2007_v45 = vpop.xlane.xlu1 %2006  ;;  %v3120_v63 = vmul.f32 %v11457_v10, %v9012_v13  ;;  %v11459_v3 = vld [vmem:[#allocation79_spill] sm:$0xff] }
 0x27a   :  { %v2733_v46 = vsel %vm11455_vm9, %v2732_v27, %v2728_v43  ;;  %v2737_v40 = vrot.slane %v2007_v45, %v7958_v50  ;;  %v3507_v9 = vadd.f32 %v11459_v3, %v3117_v8  ;;  %v3123_v43 = vmul.f32 %v11460_v57, %v9012_v13 }
 0x27b   :  { %v2011_v17 = vpop.xlane.xlu0 %2010  ;;  %v3511_v41 = vadd.f32 %v11462_v61, %v3120_v63  ;;  %v11469_v61 = vld [vmem:[#allocation104_spill] sm:$0xff]  ;;  %vm11514_vm9 = vcmask 851712  }
 0x27c   :  { %3500 = vadd.xlane.f32.xlu0 %v3499_v47  ;;  %v2738_v33 = vsel %vm11458_vm15, %v2737_v40, %v2733_v46  ;;  %v2742_v15 = vrot.slane %v2011_v17, %v8004_v28  ;;  %v11463_v46 = vld [vmem:[#allocation129_spill] sm:$0xff]  ;;  %v11464_v17 = vld [vmem:[#allocation80_spill] sm:$0xff]  ;;  %vm11519_vm15 = vcmask 917312  }
 0x27d   :  { %3504 = vadd.xlane.f32.xlu1 %v3503_v58  ;;  %v2015_v27 = vpop.xlane.xlu1 %2014  ;;  %v3126_v40 = vmul.f32 %v11463_v46, %v9012_v13  ;;  %v3515_v10 = vadd.f32 %v11464_v17, %v3123_v43  ;;  %v11472_v43 = vld [vmem:[#allocation136_spill] sm:$0xff] }
 0x27e   :  { %v2743_v47 = vsel %vm11461_vm4, %v2742_v15, %v2738_v33  ;;  %v2747_v58 = vrot.slane %v2015_v27, %v7750_v26  ;;  %v11465_v33 = vld [vmem:[#allocation133_spill] sm:$0xff]  ;;  %v11470_v27 = vld [vmem:[#allocation60_spill] sm:$0xff]  ;;  %v3132_v17 = vmul.f32 %v11472_v43, %v9012_v13  ;;  %vm3066_vm4 = vcmask 1044484  }
 0x27f   :  { %v9085_v45 = vsel %vm3064_vm13, %v2743_v47, %v8930_v25  ;;  %v2019_v11 = vpop.xlane.xlu0 %2018  ;;  %v3129_v15 = vmul.f32 %v11465_v33, %v9012_v13  ;;  %v11468_v47 = vld [vmem:[#allocation59_spill] sm:$0xff]  ;;  %v11478_v43 = vld [vmem:[#allocation109_spill] sm:$0xff] }
 0x280   :  { %3508 = vadd.xlane.f32.xlu0 %v3507_v9  ;;  %v2751_v8 = vrot.slane %v2019_v11, %v7753_v24  ;;  %v11467_v9 = vld [vmem:[#allocation81_spill] sm:$0xff]  ;;  %v3139_v46 = vmul.f32 %v11469_v61, %v11468_v47  ;;  %v3145_v55 = vmul.f32 %v11478_v43, %v11468_v47 }
 0x281   :  { %3512 = vadd.xlane.f32.xlu1 %v3511_v41  ;;  %v2023_v3 = vpop.xlane.xlu1 %2022  ;;  %v3519_v57 = vadd.f32 %v11467_v9, %v3126_v40  ;;  %v11471_v41 = vld [vmem:[#allocation105_spill] sm:$0xff] }
 0x282   :  { %v2752_v63 = vsel %vm11466_vm10, %v2751_v8, %v2747_v58  ;;  %v2756_v25 = vrot.slane %v2023_v3, %v7770_v39  ;;  %v3140_v51 = vmul.f32 %v11471_v41, %v11470_v27  ;;  %v11474_v8 = vld [vmem:[#allocation88_spill] sm:$0xff]  ;;  %v11477_v41 = vld [vmem:[#allocation91_spill] sm:$0xff]  ;;  %vm11522_vm10 = vcmask 982912  }
 0x283   :  { %v2027_v11 = vpop.xlane.xlu0 %2026  ;;  %v3523_v3 = vadd.f32 %v11474_v8, %v3129_v15  ;;  %v3527_v16 = vadd.f32 %v11477_v41, %v3132_v17  ;;  %v11480_v15 = vld [vmem:[#allocation150_spill] sm:$0xff]  ;;  %v11483_v17 = vld [vmem:[#allocation145_spill] sm:$0xff]  ;;  %v11484_v41 = vld [vmem:[#allocation120_spill] sm:$0xff] }
 0x284   :  { %3516 = vadd.xlane.f32.xlu0 %v3515_v10  ;;  %v2757_v33 = vsel %vm11473_vm6, %v2756_v25, %v2752_v63  ;;  %v2761_v58 = vrot.slane %v2027_v11, %v7787_v29  ;;  %v11475_v10 = vld [vmem:[#allocation141_spill] sm:$0xff]  ;;  %v11479_v63 = vld [vmem:[#allocation110_spill] sm:$0xff]  ;;  %v3141_v11 = vmul.f32 %v11480_v15, %v9012_v13  ;;  %v3538_v8 = vadd.f32 %v3140_v51, %v3139_v46  ;;  %v11488_v46 = vld [vmem:[#allocation115_spill] sm:$0xff] }
 0x285   :  { %3520 = vadd.xlane.f32.xlu1 %v3519_v57  ;;  %v3135_v40 = vmul.f32 %v11475_v10, %v9012_v13  ;;  %v2031_v9 = vpop.xlane.xlu1 %2030  ;;  %v3146_v25 = vmul.f32 %v11479_v63, %v11470_v27  ;;  %v3148_v43 = vmul.f32 %v11484_v41, %v11468_v47  ;;  %v11485_v63 = vld [vmem:[#allocation121_spill] sm:$0xff]  ;;  %vm11527_vm6 = vcmask 1048512  }
 0x286   :  { %v2762_v61 = vsel %vm11476_vm5, %v2761_v58, %v2757_v33  ;;  %v2766_v32 = vrot.slane %v2031_v9, %v7793_v48  ;;  %v11482_v58 = vld [vmem:[#allocation95_spill] sm:$0xff]  ;;  %v3138_v9 = vmul.f32 %v11483_v17, %v9012_v13  ;;  %v3149_v1 = vmul.f32 %v11485_v63, %v11470_v27  ;;  %v11490_v41 = vld [vmem:[#allocation153_spill] sm:$0xff] }
 0x287   :  { %v2035_v57 = vpop.xlane.xlu0 %2034  ;;  %v3539_v17 = vadd.f32 %v3538_v8, %v3141_v11  ;;  %v3144_v42 = vmul.f32 %v11490_v41, %v9012_v13  ;;  %vm11533_vm5 = vcmask 130112  }
 0x288   :  { %3524 = vadd.xlane.f32.xlu0 %v3523_v3  ;;  %v2767_v10 = vsel %vm11481_vm7, %v2766_v32, %v2762_v61  ;;  %v2771_v33 = vrot.slane %v2035_v57, %v7819_v54  ;;  %v3531_v3 = vadd.f32 %v11482_v58, %v3135_v40  ;;  %v3151_v40 = vmul.f32 %v11488_v46, %v11468_v47  ;;  %v11489_v61 = vld [vmem:[#allocation118_spill] sm:$0xff]  ;;  %v11494_v46 = vld [vmem:[#allocation127_spill] sm:$0xff] }
 0x289   :  { %3528 = vadd.xlane.f32.xlu1 %v3527_v16  ;;  %v2039_v60 = vpop.xlane.xlu1 %2038  ;;  %v11487_v16 = vld [vmem:[#allocation96_spill] sm:$0xff]  ;;  %v3152_v57 = vmul.f32 %v11489_v61, %v11470_v27  ;;  %v3155_v61 = vmul.f32 %v11494_v46, %v11470_v27  ;;  %vm11537_vm7 = vcmask 195712  }
 0x28a   :  { %v2772_v15 = vsel %vm11486_vm11, %v2771_v33, %v2767_v10  ;;  %v2776_v51 = vrot.slane %v2039_v60, %v7827_v31  ;;  %v3535_v32 = vadd.f32 %v11487_v16, %v3138_v9  ;;  %v11492_v60 = vld [vmem:[#allocation157_spill] sm:$0xff]  ;;  %v11493_v9 = vld [vmem:[#allocation126_spill] sm:$0xff]  ;;  %vm11541_vm11 = vcmask 261312  }
 0x28b   :  { %v2043_v58 = vpop.xlane.xlu0 %2042  ;;  %v3147_v33 = vmul.f32 %v11492_v60, %v9012_v13  ;;  %v3154_v16 = vmul.f32 %v11493_v9, %v11468_v47  ;;  %v11499_v9 = vld [vmem:[#allocation165_spill] sm:$0xff]  ;;  %v3554_v46 = vadd.f32 %v3152_v57, %v3151_v40 }
 0x28c   :  { %3532 = vadd.xlane.f32.xlu0 %v3531_v3  ;;  %v2777_v63 = vsel %vm11491_vm2, %v2776_v51, %v2772_v15  ;;  %v2781_v10 = vrot.slane %v2043_v58, %v7851_v52  ;;  %v3546_v3 = vadd.f32 %v3146_v25, %v3145_v55  ;;  %v11496_v15 = vld [vmem:[#allocation94_spill] sm:$0xff]  ;;  %v11498_v55 = vld [vmem:[#allocation125_spill] sm:$0xff]  ;;  %v3153_v38 = vmul.f32 %v11499_v9, %v9012_v13 }
 0x28d   :  { %3536 = vadd.xlane.f32.xlu1 %v3535_v32  ;;  %v2047_v44 = vpop.xlane.xlu1 %2046  ;;  %v3543_v51 = vadd.f32 %v11496_v15, %v3144_v42  ;;  %v3550_v32 = vadd.f32 %v3149_v1, %v3148_v43  ;;  %v11497_v58 = vld [vmem:[#allocation122_spill] sm:$0xff]  ;;  %v3158_v25 = vmul.f32 %v11498_v55, %v11470_v27  ;;  %v11501_v42 = vld [vmem:[#allocation160_spill] sm:$0xff]  ;;  %vm11545_vm2 = vcmask 326912  }
 0x28e   :  { %v2782_v11 = vsel %vm11495_vm12, %v2781_v10, %v2777_v63  ;;  %v2786_v8 = vrot.slane %v2047_v44, %v7859_v30  ;;  %v3157_v41 = vmul.f32 %v11497_v58, %v11468_v47  ;;  %v3150_v1 = vmul.f32 %v11501_v42, %v9012_v13  ;;  %v11502_v43 = vld [vmem:[#allocation132_spill] sm:$0xff]  ;;  %v11503_v10 = vld [vmem:[#allocation134_spill] sm:$0xff] }
 0x28f   :  { %v2051_v60 = vpop.xlane.xlu0 %2050  ;;  %v3160_v63 = vmul.f32 %v11502_v43, %v11468_v47  ;;  %v3161_v15 = vmul.f32 %v11503_v10, %v11470_v27  ;;  %v3555_v9 = vadd.f32 %v3554_v46, %v3153_v38  ;;  %v11506_v42 = vld [vmem:[#allocation20_spill] sm:$0xff]  ;;  %vm11549_vm12 = vcmask 392512  }
 0x290   :  { %3540 = vadd.xlane.f32.xlu0 %v3539_v17  ;;  %v2787_v49 = vsel %vm11500_vm1, %v2786_v8, %v2782_v11  ;;  %v2791_v44 = vrot.slane %v2051_v60, %v7887_v23  ;;  %v3547_v17 = vadd.f32 %v3546_v3, %v3147_v33  ;;  %v3551_v57 = vadd.f32 %v3550_v32, %v3150_v1  ;;  %v11504_v8 = vld [vmem:[#allocation130_spill] sm:$0xff]  ;;  %v11505_v3 = vld [vmem:[#allocation131_spill] sm:$0xff] }
 0x291   :  { %3544 = vadd.xlane.f32.xlu1 %v3543_v51  ;;  %v2055_v58 = vpop.xlane.xlu1 %2054  ;;  %v3558_v11 = vadd.f32 %v3155_v61, %v3154_v16  ;;  %v3163_v33 = vmul.f32 %v11504_v8, %v11468_v47  ;;  %v3164_v51 = vmul.f32 %v11505_v3, %v11470_v27  ;;  %v3156_v43 = vmul.f32 %v11506_v42, %v9012_v13  ;;  %v11508_v61 = vld [vmem:[#allocation139_spill] sm:$0xff]  ;;  %v11509_v1 = vld [vmem:[#allocation142_spill] sm:$0xff]  ;;  %v11513_v42 = vld [vmem:[#allocation176_spill] sm:$0xff] }
 0x292   :  { %v2792_v55 = vsel %vm2463_vm8, %v2791_v44, %v2787_v49  ;;  %v2796_v40 = vrot.slane %v2055_v58, %v7893_v12  ;;  %v11507_v44 = vld [vmem:[#allocation169_spill] sm:$0xff]  ;;  %v3562_v16 = vadd.f32 %v3158_v25, %v3157_v41  ;;  %v3167_v58 = vmul.f32 %v11509_v1, %v11470_v27 }
 0x293   :  { %v2059_v60 = vpop.xlane.xlu0 %2058  ;;  %v3159_v32 = vmul.f32 %v11507_v44, %v9012_v13  ;;  %v3165_v44 = vmul.f32 %v11513_v42, %v9012_v13  ;;  %vm11553_vm1 = vcmask 458112  }
 0x294   :  { %3548 = vadd.xlane.f32.xlu0 %v3547_v17  ;;  %v2797_v10 = vsel %vm2470_vm0, %v2796_v40, %v2792_v55  ;;  %v2801_v49 = vrot.slane %v2059_v60, %v7921_v2  ;;  %v3166_v17 = vmul.f32 %v11508_v61, %v11468_v47  ;;  %v3559_v55 = vadd.f32 %v3558_v11, %v3156_v43  ;;  %v11512_v60 = vld [vmem:[#allocation138_spill] sm:$0xff]  ;;  %v11515_v11 = vld [vmem:[#allocation172_spill] sm:$0xff] }
 0x295   :  { %3552 = vadd.xlane.f32.xlu1 %v3551_v57  ;;  %v2063_v8 = vpop.xlane.xlu1 %2062  ;;  %v3566_v40 = vadd.f32 %v3161_v15, %v3160_v63  ;;  %v11511_v57 = vld [vmem:[#allocation137_spill] sm:$0xff]  ;;  %v3170_v41 = vmul.f32 %v11512_v60, %v11470_v27  ;;  %v3570_v61 = vadd.f32 %v3164_v51, %v3163_v33  ;;  %v3162_v63 = vmul.f32 %v11515_v11, %v9012_v13  ;;  %v11516_v15 = vld [vmem:[#allocation143_spill] sm:$0xff]  ;;  %v11517_v43 = vld [vmem:[#allocation146_spill] sm:$0xff] }
 0x296   :  { %v2802_v38 = vsel %vm11510_vm14, %v2801_v49, %v2797_v10  ;;  %v2806_v46 = vrot.slane %v2063_v8, %v7927_v34  ;;  %v3169_v3 = vmul.f32 %v11511_v57, %v11468_v47  ;;  %v3563_v49 = vadd.f32 %v3562_v16, %v3159_v32  ;;  %v11518_v57 = vld [vmem:[#allocation147_spill] sm:$0xff]  ;;  %v11520_v16 = vld [vmem:[#allocation144_spill] sm:$0xff]  ;;  %v11521_v11 = vld [vmem:[#allocation26_spill] sm:$0xff] }
 0x297   :  { %v2067_v25 = vpop.xlane.xlu0 %2066  ;;  %v3172_v8 = vmul.f32 %v11517_v43, %v11468_v47  ;;  %v3173_v60 = vmul.f32 %v11518_v57, %v11470_v27  ;;  %v3574_v32 = vadd.f32 %v3167_v58, %v3166_v17  ;;  %v11524_v17 = vld [vmem:[#allocation148_spill] sm:$0xff]  ;;  %vm11557_vm14 = vcmask 523712  }
 0x298   :  { %3556 = vadd.xlane.f32.xlu0 %v3555_v9  ;;  %v2807_v1 = vsel %vm11514_vm9, %v2806_v46, %v2802_v38  ;;  %v2811_v10 = vrot.slane %v2067_v25, %v7953_v19  ;;  %v3175_v9 = vmul.f32 %v11516_v15, %v11468_v47  ;;  %v3567_v38 = vadd.f32 %v3566_v40, %v3162_v63  ;;  %v11525_v40 = vld [vmem:[#allocation154_spill] sm:$0xff] }
 0x299   :  { %3560 = vadd.xlane.f32.xlu1 %v3559_v55  ;;  %v2071_v42 = vpop.xlane.xlu1 %2070  ;;  %v3176_v46 = vmul.f32 %v11520_v16, %v11470_v27  ;;  %v3571_v25 = vadd.f32 %v3570_v61, %v3165_v44  ;;  %v3168_v15 = vmul.f32 %v11521_v11, %v9012_v13  ;;  %v3181_v58 = vmul.f32 %v11524_v17, %v11468_v47  ;;  %v11526_v44 = vld [vmem:[#allocation155_spill] sm:$0xff]  ;;  %v11529_v11 = vld [vmem:[#allocation188_spill] sm:$0xff] }
 0x29a   :  { %v2812_v33 = vsel %vm11519_vm15, %v2811_v10, %v2807_v1  ;;  %v2816_v51 = vrot.slane %v2071_v42, %v7958_v50  ;;  %v11523_v1 = vld [vmem:[#allocation181_spill] sm:$0xff]  ;;  %v3178_v63 = vmul.f32 %v11525_v40, %v11468_v47  ;;  %v3179_v61 = vmul.f32 %v11526_v44, %v11470_v27 }
 0x29b   :  { %v2075_v55 = vpop.xlane.xlu0 %2074  ;;  %v3171_v10 = vmul.f32 %v11523_v1, %v9012_v13  ;;  %v3177_v1 = vmul.f32 %v11529_v11, %v9012_v13  ;;  %v3586_v17 = vadd.f32 %v3176_v46, %v3175_v9  ;;  %vm11561_vm9 = vcmask 589312  }
 0x29c   :  { %3564 = vadd.xlane.f32.xlu0 %v3563_v49  ;;  %v2817_v43 = vsel %vm11522_vm10, %v2816_v51, %v2812_v33  ;;  %v2821_v57 = vrot.slane %v2075_v55, %v8004_v28  ;;  %v3578_v49 = vadd.f32 %v3170_v41, %v3169_v3  ;;  %v3575_v33 = vadd.f32 %v3574_v32, %v3168_v15  ;;  %v11531_v32 = vld [vmem:[#allocation18_spill] sm:$0xff] }
 0x29d   :  { %3568 = vadd.xlane.f32.xlu1 %v3567_v38  ;;  %v2079_v42 = vpop.xlane.xlu1 %2078  ;;  %v3582_v51 = vadd.f32 %v3173_v60, %v3172_v8  ;;  %v11528_v38 = vld [vmem:[#allocation151_spill] sm:$0xff]  ;;  %v3184_v15 = vmul.f32 %v11531_v32, %v11468_v47  ;;  %v3587_v11 = vadd.f32 %v3586_v17, %v3177_v1  ;;  %vm11571_vm15 = vcmask 786112  }
 0x29e   :  { %v2822_v16 = vsel %vm11527_vm6, %v2821_v57, %v2817_v43  ;;  %v3182_v55 = vmul.f32 %v11528_v38, %v11470_v27  ;;  %v2826_v40 = vrot.slane %v2079_v42, %v7750_v26  ;;  %v11530_v8 = vld [vmem:[#allocation183_spill] sm:$0xff]  ;;  %v3590_v42 = vadd.f32 %v3179_v61, %v3178_v63 }
 0x29f   :  { %v9215_v3 = vsel %vm3066_vm4, %v2822_v16, %v9085_v45  ;;  %v2083_v41 = vpop.xlane.xlu0 %2082  ;;  %v3174_v60 = vmul.f32 %v11530_v8, %v9012_v13  ;;  %v11532_v45 = vld [vmem:[#allocation19_spill] sm:$0xff]  ;;  %vm11575_vm10 = vcmask 851712   ;;  %vm11580_vm6 = vcmask 917312  }
 0x2a0   :  { %3572 = vadd.xlane.f32.xlu0 %v3571_v25  ;;  %v2830_v43 = vrot.slane %v2083_v41, %v7753_v24  ;;  %v3579_v25 = vadd.f32 %v3578_v49, %v3171_v10  ;;  %v3185_v57 = vmul.f32 %v11532_v45, %v11470_v27  ;;  %v11535_v49 = vld [vmem:[#allocation158_spill] sm:$0xff]  ;;  %v11536_v8 = vld [vmem:[#allocation31_spill] sm:$0xff]  ;;  %v3594_v63 = vadd.f32 %v3182_v55, %v3181_v58 }
 0x2a1   :  { %3576 = vadd.xlane.f32.xlu1 %v3575_v33  ;;  %v2087_v44 = vpop.xlane.xlu1 %2086  ;;  %v3583_v46 = vadd.f32 %v3582_v51, %v3174_v60  ;;  %v11534_v33 = vld [vmem:[#allocation156_spill] sm:$0xff]  ;;  %v3188_v38 = vmul.f32 %v11535_v49, %v11470_v27  ;;  %v3180_v32 = vmul.f32 %v11536_v8, %v9012_v13  ;;  %v11539_v61 = vld [vmem:[#allocation163_spill] sm:$0xff]  ;;  %v11540_v60 = vld [vmem:[#allocation166_spill] sm:$0xff] }
 0x2a2   :  { %v2831_v16 = vsel %vm11533_vm5, %v2830_v43, %v2826_v40  ;;  %v2835_v9 = vrot.slane %v2087_v44, %v7770_v39  ;;  %v3187_v10 = vmul.f32 %v11534_v33, %v11468_v47  ;;  %v11538_v43 = vld [vmem:[#allocation192_spill] sm:$0xff]  ;;  %v3191_v44 = vmul.f32 %v11540_v60, %v11470_v27 }
 0x2a3   :  { %v2091_v41 = vpop.xlane.xlu0 %2090  ;;  %v3183_v51 = vmul.f32 %v11538_v43, %v9012_v13  ;;  %v11544_v8 = vld [vmem:[#allocation200_spill] sm:$0xff]  ;;  %vm3068_vm5 = vcmask 1045509  }
 0x2a4   :  { %3580 = vadd.xlane.f32.xlu0 %v3579_v25  ;;  %v2836_v45 = vsel %vm11537_vm7, %v2835_v9, %v2831_v16  ;;  %v2840_v40 = vrot.slane %v2091_v41, %v7787_v29  ;;  %v3190_v25 = vmul.f32 %v11539_v61, %v11468_v47  ;;  %v3591_v16 = vadd.f32 %v3590_v42, %v3180_v32  ;;  %v11543_v41 = vld [vmem:[#allocation162_spill] sm:$0xff]  ;;  %v11546_v42 = vld [vmem:[#allocation195_spill] sm:$0xff] }
 0x2a5   :  { %3584 = vadd.xlane.f32.xlu1 %v3583_v46  ;;  %v2095_v33 = vpop.xlane.xlu1 %2094  ;;  %v3598_v9 = vadd.f32 %v3185_v57, %v3184_v15  ;;  %v11542_v46 = vld [vmem:[#allocation161_spill] sm:$0xff]  ;;  %v3194_v58 = vmul.f32 %v11543_v41, %v11470_v27  ;;  %v3189_v43 = vmul.f32 %v11544_v8, %v9012_v13  ;;  %v3602_v61 = vadd.f32 %v3188_v38, %v3187_v10  ;;  %v11547_v57 = vld [vmem:[#allocation167_spill] sm:$0xff]  ;;  %v11548_v32 = vld [vmem:[#allocation170_spill] sm:$0xff] }
 0x2a6   :  { %v2841_v1 = vsel %vm11541_vm11, %v2840_v40, %v2836_v45  ;;  %v2845_v17 = vrot.slane %v2095_v33, %v7793_v48  ;;  %v3193_v49 = vmul.f32 %v11542_v46, %v11468_v47  ;;  %v3595_v40 = vadd.f32 %v3594_v63, %v3183_v51  ;;  %v11551_v63 = vld [vmem:[#allocation22_spill] sm:$0xff] }
 0x2a7   :  { %v2099_v55 = vpop.xlane.xlu0 %2098  ;;  %v3186_v15 = vmul.f32 %v11546_v42, %v9012_v13  ;;  %v3197_v33 = vmul.f32 %v11548_v32, %v11470_v27  ;;  %v3603_v8 = vadd.f32 %v3602_v61, %v3189_v43  ;;  %v11552_v42 = vld [vmem:[#allocation35_spill] sm:$0xff]  ;;  %vm11583_vm7 = vcmask 982912  }
 0x2a8   :  { %3588 = vadd.xlane.f32.xlu0 %v3587_v11  ;;  %v2846_v60 = vsel %vm11545_vm2, %v2845_v17, %v2841_v1  ;;  %v2850_v45 = vrot.slane %v2099_v55, %v7819_v54  ;;  %v3196_v11 = vmul.f32 %v11547_v57, %v11468_v47  ;;  %v3606_v1 = vadd.f32 %v3191_v44, %v3190_v25  ;;  %v11550_v17 = vld [vmem:[#allocation21_spill] sm:$0xff] }
 0x2a9   :  { %3592 = vadd.xlane.f32.xlu1 %v3591_v16  ;;  %v2103_v46 = vpop.xlane.xlu1 %2102  ;;  %v3599_v38 = vadd.f32 %v3598_v9, %v3186_v15  ;;  %v3199_v51 = vmul.f32 %v11550_v17, %v11468_v47  ;;  %v3200_v16 = vmul.f32 %v11551_v63, %v11470_v27  ;;  %v3192_v57 = vmul.f32 %v11552_v42, %v9012_v13  ;;  %v11555_v44 = vld [vmem:[#allocation173_spill] sm:$0xff]  ;;  %v11556_v15 = vld [vmem:[#allocation174_spill] sm:$0xff]  ;;  %v11560_v42 = vld [vmem:[#allocation211_spill] sm:$0xff] }
 0x2aa   :  { %v2851_v41 = vsel %vm11549_vm12, %v2850_v45, %v2846_v60  ;;  %v2855_v10 = vrot.slane %v2103_v46, %v7827_v31  ;;  %v11554_v45 = vld [vmem:[#allocation204_spill] sm:$0xff]  ;;  %v3610_v25 = vadd.f32 %v3194_v58, %v3193_v49  ;;  %v3203_v46 = vmul.f32 %v11556_v15, %v11470_v27 }
 0x2ab   :  { %v2107_v55 = vpop.xlane.xlu0 %2106  ;;  %v3195_v9 = vmul.f32 %v11554_v45, %v9012_v13  ;;  %v3201_v45 = vmul.f32 %v11560_v42, %v9012_v13  ;;  %vm11588_vm11 = vcmask 1048512   ;;  %vm11595_vm2 = vcmask 130112  }
 0x2ac   :  { %3596 = vadd.xlane.f32.xlu0 %v3595_v40  ;;  %v2856_v32 = vsel %vm11553_vm1, %v2855_v10, %v2851_v41  ;;  %v2860_v60 = vrot.slane %v2107_v55, %v7851_v52  ;;  %v3202_v40 = vmul.f32 %v11555_v44, %v11468_v47  ;;  %v3607_v41 = vadd.f32 %v3606_v1, %v3192_v57  ;;  %v11559_v55 = vld [vmem:[#allocation24_spill] sm:$0xff]  ;;  %v11562_v1 = vld [vmem:[#allocation207_spill] sm:$0xff]  ;;  %v11564_v57 = vld [vmem:[#allocation178_spill] sm:$0xff] }
 0x2ad   :  { %3600 = vadd.xlane.f32.xlu1 %v3599_v38  ;;  %v2111_v17 = vpop.xlane.xlu1 %2110  ;;  %v3614_v10 = vadd.f32 %v3197_v33, %v3196_v11  ;;  %v11558_v38 = vld [vmem:[#allocation23_spill] sm:$0xff]  ;;  %v3206_v49 = vmul.f32 %v11559_v55, %v11470_v27  ;;  %v3618_v44 = vadd.f32 %v3200_v16, %v3199_v51  ;;  %v3198_v11 = vmul.f32 %v11562_v1, %v9012_v13  ;;  %v11567_v1 = vld [vmem:[#allocation41_spill] sm:$0xff] }
 0x2ae   :  { %v2861_v43 = vsel %vm11557_vm14, %v2860_v60, %v2856_v32  ;;  %v2865_v61 = vrot.slane %v2111_v17, %v7859_v30  ;;  %v3205_v63 = vmul.f32 %v11558_v38, %v11468_v47  ;;  %v3611_v60 = vadd.f32 %v3610_v25, %v3195_v9  ;;  %v11563_v33 = vld [vmem:[#allocation27_spill] sm:$0xff]  ;;  %v11566_v25 = vld [vmem:[#allocation177_spill] sm:$0xff] }
 0x2af   :  { %v2115_v58 = vpop.xlane.xlu0 %2114  ;;  %v3209_v17 = vmul.f32 %v11564_v57, %v11470_v27  ;;  %v3615_v16 = vadd.f32 %v3614_v10, %v3198_v11  ;;  %v3619_v42 = vadd.f32 %v3618_v44, %v3201_v45  ;;  %v11570_v11 = vld [vmem:[#allocation29_spill] sm:$0xff]  ;;  %vm11599_vm12 = vcmask 195712  }
 0x2b0   :  { %3604 = vadd.xlane.f32.xlu0 %v3603_v8  ;;  %v2866_v15 = vsel %vm11561_vm9, %v2865_v61, %v2861_v43  ;;  %v2870_v32 = vrot.slane %v2115_v58, %v7887_v23  ;;  %v3208_v8 = vmul.f32 %v11563_v33, %v11468_v47  ;;  %v3622_v43 = vadd.f32 %v3203_v46, %v3202_v40  ;;  %v11565_v61 = vld [vmem:[#allocation175_spill] sm:$0xff]  ;;  %v11569_v46 = vld [vmem:[#allocation28_spill] sm:$0xff] }
 0x2b1   :  { %3608 = vadd.xlane.f32.xlu1 %v3607_v41  ;;  %v2119_v38 = vpop.xlane.xlu1 %2118  ;;  %v3211_v9 = vmul.f32 %v11565_v61, %v11468_v47  ;;  %v3212_v41 = vmul.f32 %v11566_v25, %v11470_v27  ;;  %v3204_v33 = vmul.f32 %v11567_v1, %v9012_v13  ;;  %v3626_v40 = vadd.f32 %v3206_v49, %v3205_v63  ;;  %v11574_v1 = vld [vmem:[#allocation220_spill] sm:$0xff] }
 0x2b2   :  { %v2871_v55 = vsel %vm2463_vm8, %v2870_v32, %v2866_v15  ;;  %v2875_v51 = vrot.slane %v2119_v38, %v7893_v12  ;;  %v11568_v32 = vld [vmem:[#allocation216_spill] sm:$0xff]  ;;  %v3215_v38 = vmul.f32 %v11570_v11, %v11470_v27  ;;  %vm11603_vm1 = vcmask 261312  }
 0x2b3   :  { %v2123_v58 = vpop.xlane.xlu0 %2122  ;;  %v3207_v10 = vmul.f32 %v11568_v32, %v9012_v13  ;;  %v3213_v32 = vmul.f32 %v11574_v1, %v9012_v13  ;;  %vm11607_vm14 = vcmask 326912   ;;  %vm11611_vm9 = vcmask 392512  }
 0x2b4   :  { %3612 = vadd.xlane.f32.xlu0 %v3611_v60  ;;  %v2876_v57 = vsel %vm2470_vm0, %v2875_v51, %v2871_v55  ;;  %v2880_v15 = vrot.slane %v2123_v58, %v7921_v2  ;;  %v3214_v60 = vmul.f32 %v11569_v46, %v11468_v47  ;;  %v3623_v55 = vadd.f32 %v3622_v43, %v3204_v33  ;;  %v11573_v58 = vld [vmem:[#allocation182_spill] sm:$0xff]  ;;  %v11576_v43 = vld [vmem:[#allocation43_spill] sm:$0xff] }
 0x2b5   :  { %3616 = vadd.xlane.f32.xlu1 %v3615_v16  ;;  %v2127_v61 = vpop.xlane.xlu1 %2126  ;;  %v3630_v51 = vadd.f32 %v3209_v17, %v3208_v8  ;;  %v11572_v16 = vld [vmem:[#allocation179_spill] sm:$0xff]  ;;  %v3218_v63 = vmul.f32 %v11573_v58, %v11470_v27  ;;  %v3634_v46 = vadd.f32 %v3212_v41, %v3211_v9  ;;  %v3210_v8 = vmul.f32 %v11576_v43, %v9012_v13  ;;  %v11577_v17 = vld [vmem:[#allocation184_spill] sm:$0xff]  ;;  %v11578_v33 = vld [vmem:[#allocation186_spill] sm:$0xff] }
 0x2b6   :  { %v2881_v45 = vsel %vm11571_vm15, %v2880_v15, %v2876_v57  ;;  %v2885_v44 = vrot.slane %v2127_v61, %v7927_v34  ;;  %v3217_v25 = vmul.f32 %v11572_v16, %v11468_v47  ;;  %v3627_v15 = vadd.f32 %v3626_v40, %v3207_v10  ;;  %v11579_v16 = vld [vmem:[#allocation189_spill] sm:$0xff]  ;;  %v11582_v43 = vld [vmem:[#allocation223_spill] sm:$0xff] }
 0x2b7   :  { %v2131_v49 = vpop.xlane.xlu0 %2130  ;;  %v3220_v61 = vmul.f32 %v11578_v33, %v11468_v47  ;;  %v3221_v58 = vmul.f32 %v11579_v16, %v11470_v27  ;;  %v3638_v10 = vadd.f32 %v3215_v38, %v3214_v60  ;;  %v11581_v40 = vld [vmem:[#allocation185_spill] sm:$0xff]  ;;  %v11585_v60 = vld [vmem:[#allocation32_spill] sm:$0xff]  ;;  %vm11615_vm15 = vcmask 458112  }
 0x2b8   :  { %3620 = vadd.xlane.f32.xlu0 %v3619_v42  ;;  %v2886_v11 = vsel %vm11575_vm10, %v2885_v44, %v2881_v45  ;;  %v2890_v57 = vrot.slane %v2131_v49, %v7953_v19  ;;  %v3223_v42 = vmul.f32 %v11577_v17, %v11468_v47  ;;  %v3631_v45 = vadd.f32 %v3630_v51, %v3210_v8  ;;  %v11586_v51 = vld [vmem:[#allocation191_spill] sm:$0xff] }
 0x2b9   :  { %3624 = vadd.xlane.f32.xlu1 %v3623_v55  ;;  %v2135_v1 = vpop.xlane.xlu1 %2134  ;;  %v3224_v44 = vmul.f32 %v11581_v40, %v11470_v27  ;;  %v3635_v49 = vadd.f32 %v3634_v46, %v3213_v32  ;;  %v3216_v17 = vmul.f32 %v11582_v43, %v9012_v13  ;;  %v3229_v38 = vmul.f32 %v11585_v60, %v11468_v47  ;;  %v11587_v32 = vld [vmem:[#allocation193_spill] sm:$0xff] }
 0x2ba   :  { %v2891_v9 = vsel %vm11580_vm6, %v2890_v57, %v2886_v11  ;;  %v2895_v41 = vrot.slane %v2135_v1, %v7958_v50  ;;  %v11584_v11 = vld [vmem:[#allocation233_spill] sm:$0xff]  ;;  %v3226_v8 = vmul.f32 %v11586_v51, %v11468_v47  ;;  %v3227_v46 = vmul.f32 %v11587_v32, %v11470_v27 }
 0x2bb   :  { %v2139_v55 = vpop.xlane.xlu0 %2138  ;;  %v3219_v57 = vmul.f32 %v11584_v11, %v9012_v13  ;;  %v11591_v43 = vld [vmem:[#allocation241_spill] sm:$0xff]  ;;  %v3650_v60 = vadd.f32 %v3224_v44, %v3223_v42  ;;  %vm11619_vm10 = vcmask 523712   ;;  %vm11623_vm6 = vcmask 589312  }
 0x2bc   :  { %3628 = vadd.xlane.f32.xlu0 %v3627_v15  ;;  %v2896_v33 = vsel %vm11583_vm7, %v2895_v41, %v2891_v9  ;;  %v2900_v16 = vrot.slane %v2139_v55, %v8004_v28  ;;  %v3642_v15 = vadd.f32 %v3218_v63, %v3217_v25  ;;  %v3639_v9 = vadd.f32 %v3638_v10, %v3216_v17  ;;  %v11593_v10 = vld [vmem:[#allocation196_spill] sm:$0xff] }
 0x2bd   :  { %3632 = vadd.xlane.f32.xlu1 %v3631_v45  ;;  %v2143_v1 = vpop.xlane.xlu1 %2142  ;;  %v3646_v41 = vadd.f32 %v3221_v58, %v3220_v61  ;;  %v11589_v45 = vld [vmem:[#allocation190_spill] sm:$0xff]  ;;  %v3225_v11 = vmul.f32 %v11591_v43, %v9012_v13  ;;  %v11592_v61 = vld [vmem:[#allocation240_spill] sm:$0xff]  ;;  %v3232_v17 = vmul.f32 %v11593_v10, %v11468_v47  ;;  %vm11633_vm7 = vcmask 786112  }
 0x2be   :  { %v2901_v40 = vsel %vm11588_vm11, %v2900_v16, %v2896_v33  ;;  %v3230_v55 = vmul.f32 %v11589_v45, %v11470_v27  ;;  %v2905_v51 = vrot.slane %v2143_v1, %v7750_v26  ;;  %v3222_v58 = vmul.f32 %v11592_v61, %v9012_v13  ;;  %v11598_v61 = vld [vmem:[#allocation245_spill] sm:$0xff] }
 0x2bf   :  { %v9346_v25 = vsel %vm3068_vm5, %v2901_v40, %v9215_v3  ;;  %v2147_v63 = vpop.xlane.xlu0 %2146  ;;  %v11594_v3 = vld [vmem:[#allocation197_spill] sm:$0xff]  ;;  %v3654_v1 = vadd.f32 %v3227_v46, %v3226_v8  ;;  %v3651_v43 = vadd.f32 %v3650_v60, %v3225_v11  ;;  %v3228_v10 = vmul.f32 %v11598_v61, %v9012_v13  ;;  %v11601_v46 = vld [vmem:[#allocation36_spill] sm:$0xff] }
 0x2c0   :  { %3636 = vadd.xlane.f32.xlu0 %v3635_v49  ;;  %11590 = vst [vmem:[#allocation66_spill] sm:$0xff] %v9346_v25  ;;  %v2909_v33 = vrot.slane %v2147_v63, %v7753_v24  ;;  %v3643_v49 = vadd.f32 %v3642_v15, %v3219_v57  ;;  %v3233_v16 = vmul.f32 %v11594_v3, %v11470_v27  ;;  %v11597_v15 = vld [vmem:[#allocation34_spill] sm:$0xff]  ;;  %v11606_v61 = vld [vmem:[#allocation253_spill] sm:$0xff]  ;;  %vm11637_vm11 = vcmask 851712  }
 0x2c1   :  { %3640 = vadd.xlane.f32.xlu1 %v3639_v9  ;;  %v2151_v32 = vpop.xlane.xlu1 %2150  ;;  %v3647_v44 = vadd.f32 %v3646_v41, %v3222_v58  ;;  %v11596_v9 = vld [vmem:[#allocation33_spill] sm:$0xff]  ;;  %v3236_v45 = vmul.f32 %v11597_v15, %v11470_v27  ;;  %v3658_v8 = vadd.f32 %v3230_v55, %v3229_v38 }
 0x2c2   :  { %v2910_v40 = vsel %vm11595_vm2, %v2909_v33, %v2905_v51  ;;  %v2914_v42 = vrot.slane %v2151_v32, %v7770_v39  ;;  %v3235_v57 = vmul.f32 %v11596_v9, %v11468_v47  ;;  %v11600_v33 = vld [vmem:[#allocation246_spill] sm:$0xff]  ;;  %v11602_v58 = vld [vmem:[#allocation37_spill] sm:$0xff]  ;;  %vm11641_vm2 = vcmask 917312  }
 0x2c3   :  { %v2155_v63 = vpop.xlane.xlu0 %2154  ;;  %v3231_v41 = vmul.f32 %v11600_v33, %v9012_v13  ;;  %v3239_v32 = vmul.f32 %v11602_v58, %v11470_v27  ;;  %v3237_v33 = vmul.f32 %v11606_v61, %v9012_v13 }
 0x2c4   :  { %3644 = vadd.xlane.f32.xlu0 %v3643_v49  ;;  %v2915_v3 = vsel %vm11599_vm12, %v2914_v42, %v2910_v40  ;;  %v2919_v51 = vrot.slane %v2155_v63, %v7787_v29  ;;  %v3238_v49 = vmul.f32 %v11601_v46, %v11468_v47  ;;  %v3655_v40 = vadd.f32 %v3654_v1, %v3228_v10  ;;  %v11605_v63 = vld [vmem:[#allocation201_spill] sm:$0xff]  ;;  %v11608_v1 = vld [vmem:[#allocation252_spill] sm:$0xff]  ;;  %v11610_v10 = vld [vmem:[#allocation39_spill] sm:$0xff] }
 0x2c5   :  { %3648 = vadd.xlane.f32.xlu1 %v3647_v44  ;;  %v2159_v9 = vpop.xlane.xlu1 %2158  ;;  %v3662_v42 = vadd.f32 %v3233_v16, %v3232_v17  ;;  %v11604_v44 = vld [vmem:[#allocation198_spill] sm:$0xff]  ;;  %v3242_v38 = vmul.f32 %v11605_v63, %v11470_v27  ;;  %v3666_v46 = vadd.f32 %v3236_v45, %v3235_v57  ;;  %v3234_v17 = vmul.f32 %v11608_v1, %v9012_v13  ;;  %v11614_v1 = vld [vmem:[#allocation257_spill] sm:$0xff] }
 0x2c6   :  { %v2920_v11 = vsel %vm11603_vm1, %v2919_v51, %v2915_v3  ;;  %v2924_v60 = vrot.slane %v2159_v9, %v7793_v48  ;;  %v3241_v15 = vmul.f32 %v11604_v44, %v11468_v47  ;;  %v3659_v51 = vadd.f32 %v3658_v8, %v3231_v41  ;;  %v11609_v16 = vld [vmem:[#allocation38_spill] sm:$0xff]  ;;  %v11613_v8 = vld [vmem:[#allocation205_spill] sm:$0xff] }
 0x2c7   :  { %v2163_v55 = vpop.xlane.xlu0 %2162  ;;  %v3245_v9 = vmul.f32 %v11610_v10, %v11470_v27  ;;  %v3663_v45 = vadd.f32 %v3662_v42, %v3234_v17  ;;  %v3667_v61 = vadd.f32 %v3666_v46, %v3237_v33  ;;  %v11618_v17 = vld [vmem:[#allocation212_spill] sm:$0xff]  ;;  %vm11645_vm12 = vcmask 982912  }
 0x2c8   :  { %3652 = vadd.xlane.f32.xlu0 %v3651_v43  ;;  %v2925_v58 = vsel %vm11607_vm14, %v2924_v60, %v2920_v11  ;;  %v2929_v3 = vrot.slane %v2163_v55, %v7819_v54  ;;  %v3244_v43 = vmul.f32 %v11609_v16, %v11468_v47  ;;  %v3670_v11 = vadd.f32 %v3239_v32, %v3238_v49  ;;  %v11612_v60 = vld [vmem:[#allocation202_spill] sm:$0xff] }
 0x2c9   :  { %3656 = vadd.xlane.f32.xlu1 %v3655_v40  ;;  %v2167_v44 = vpop.xlane.xlu1 %2166  ;;  %v3247_v41 = vmul.f32 %v11612_v60, %v11468_v47  ;;  %v3248_v40 = vmul.f32 %v11613_v8, %v11470_v27  ;;  %v3240_v16 = vmul.f32 %v11614_v1, %v9012_v13  ;;  %v3674_v49 = vadd.f32 %v3242_v38, %v3241_v15  ;;  %v11617_v32 = vld [vmem:[#allocation210_spill] sm:$0xff]  ;;  %v11622_v1 = vld [vmem:[#allocation264_spill] sm:$0xff] }
 0x2ca   :  { %v2930_v63 = vsel %vm11611_vm9, %v2929_v3, %v2925_v58  ;;  %v2934_v57 = vrot.slane %v2167_v44, %v7827_v31  ;;  %v11616_v3 = vld [vmem:[#allocation258_spill] sm:$0xff]  ;;  %v3251_v44 = vmul.f32 %v11618_v17, %v11470_v27  ;;  %vm11649_vm1 = vcmask 1048512  }
 0x2cb   :  { %v2171_v55 = vpop.xlane.xlu0 %2170  ;;  %v3243_v42 = vmul.f32 %v11616_v3, %v9012_v13  ;;  %v3249_v3 = vmul.f32 %v11622_v1, %v9012_v13  ;;  %vm11657_vm14 = vcmask 130112   ;;  %vm11662_vm9 = vcmask 195712  }
 0x2cc   :  { %3660 = vadd.xlane.f32.xlu0 %v3659_v51  ;;  %v2935_v10 = vsel %vm11615_vm15, %v2934_v57, %v2930_v63  ;;  %v2939_v58 = vrot.slane %v2171_v55, %v7851_v52  ;;  %v3250_v51 = vmul.f32 %v11617_v32, %v11468_v47  ;;  %v3671_v63 = vadd.f32 %v3670_v11, %v3240_v16  ;;  %v11621_v55 = vld [vmem:[#allocation209_spill] sm:$0xff]  ;;  %v11624_v11 = vld [vmem:[#allocation263_spill] sm:$0xff] }
 0x2cd   :  { %3664 = vadd.xlane.f32.xlu1 %v3663_v45  ;;  %v2175_v60 = vpop.xlane.xlu1 %2174  ;;  %v3678_v57 = vadd.f32 %v3245_v9, %v3244_v43  ;;  %v11620_v45 = vld [vmem:[#allocation208_spill] sm:$0xff]  ;;  %v3254_v15 = vmul.f32 %v11621_v55, %v11470_v27  ;;  %v3682_v32 = vadd.f32 %v3248_v40, %v3247_v41  ;;  %v3246_v43 = vmul.f32 %v11624_v11, %v9012_v13  ;;  %v11625_v9 = vld [vmem:[#allocation214_spill] sm:$0xff]  ;;  %v11626_v16 = vld [vmem:[#allocation217_spill] sm:$0xff] }
 0x2ce   :  { %v2940_v33 = vsel %vm11619_vm10, %v2939_v58, %v2935_v10  ;;  %v2944_v46 = vrot.slane %v2175_v60, %v7859_v30  ;;  %v3253_v8 = vmul.f32 %v11620_v45, %v11468_v47  ;;  %v3675_v58 = vadd.f32 %v3674_v49, %v3243_v42  ;;  %v11628_v49 = vld [vmem:[#allocation213_spill] sm:$0xff] }
 0x2cf   :  { %v2179_v38 = vpop.xlane.xlu0 %2178  ;;  %v3257_v60 = vmul.f32 %v11626_v16, %v11470_v27  ;;  %v3679_v40 = vadd.f32 %v3678_v57, %v3246_v43  ;;  %v3683_v1 = vadd.f32 %v3682_v32, %v3249_v3  ;;  %v11629_v11 = vld [vmem:[#allocation269_spill] sm:$0xff]  ;;  %vm11665_vm15 = vcmask 261312  }
 0x2d0   :  { %3668 = vadd.xlane.f32.xlu0 %v3667_v61  ;;  %v2945_v17 = vsel %vm11623_vm6, %v2944_v46, %v2940_v33  ;;  %v2949_v10 = vrot.slane %v2179_v38, %v7887_v23  ;;  %v3256_v61 = vmul.f32 %v11625_v9, %v11468_v47  ;;  %v3686_v33 = vadd.f32 %v3251_v44, %v3250_v51  ;;  %v11627_v46 = vld [vmem:[#allocation42_spill] sm:$0xff]  ;;  %v11631_v44 = vld [vmem:[#allocation44_spill] sm:$0xff]  ;;  %v11632_v43 = vld [vmem:[#allocation221_spill] sm:$0xff] }
 0x2d1   :  { %3672 = vadd.xlane.f32.xlu1 %v3671_v63  ;;  %v2183_v45 = vpop.xlane.xlu1 %2182  ;;  %v3259_v42 = vmul.f32 %v11627_v46, %v11468_v47  ;;  %v3260_v63 = vmul.f32 %v11628_v49, %v11470_v27  ;;  %v3252_v9 = vmul.f32 %v11629_v11, %v9012_v13  ;;  %v3690_v51 = vadd.f32 %v3254_v15, %v3253_v8  ;;  %v11636_v11 = vld [vmem:[#allocation276_spill] sm:$0xff] }
 0x2d2   :  { %v2950_v55 = vsel %vm2463_vm8, %v2949_v10, %v2945_v17  ;;  %v2954_v41 = vrot.slane %v2183_v45, %v7893_v12  ;;  %v11630_v10 = vld [vmem:[#allocation270_spill] sm:$0xff]  ;;  %v3263_v45 = vmul.f32 %v11632_v43, %v11470_v27  ;;  %vm11669_vm10 = vcmask 326912  }
 0x2d3   :  { %v2187_v38 = vpop.xlane.xlu0 %2186  ;;  %v3255_v57 = vmul.f32 %v11630_v10, %v9012_v13  ;;  %v3261_v10 = vmul.f32 %v11636_v11, %v9012_v13  ;;  %vm11673_vm6 = vcmask 392512  }
 0x2d4   :  { %3676 = vadd.xlane.f32.xlu0 %v3675_v58  ;;  %v2955_v16 = vsel %vm2470_vm0, %v2954_v41, %v2950_v55  ;;  %v2959_v17 = vrot.slane %v2187_v38, %v7921_v2  ;;  %v3262_v58 = vmul.f32 %v11631_v44, %v11468_v47  ;;  %v3687_v55 = vadd.f32 %v3686_v33, %v3252_v9  ;;  %v11635_v38 = vld [vmem:[#allocation219_spill] sm:$0xff]  ;;  %v11640_v9 = vld [vmem:[#allocation48_spill] sm:$0xff] }
 0x2d5   :  { %3680 = vadd.xlane.f32.xlu1 %v3679_v40  ;;  %v2191_v46 = vpop.xlane.xlu1 %2190  ;;  %v3694_v41 = vadd.f32 %v3257_v60, %v3256_v61  ;;  %v11634_v40 = vld [vmem:[#allocation218_spill] sm:$0xff]  ;;  %v3266_v8 = vmul.f32 %v11635_v38, %v11470_v27  ;;  %v3698_v44 = vadd.f32 %v3260_v63, %v3259_v42  ;;  %v11638_v33 = vld [vmem:[#allocation275_spill] sm:$0xff]  ;;  %v11639_v60 = vld [vmem:[#allocation224_spill] sm:$0xff] }
 0x2d6   :  { %v2960_v3 = vsel %vm11633_vm7, %v2959_v17, %v2955_v16  ;;  %v2964_v32 = vrot.slane %v2191_v46, %v7927_v34  ;;  %v3265_v49 = vmul.f32 %v11634_v40, %v11468_v47  ;;  %v3691_v17 = vadd.f32 %v3690_v51, %v3255_v57  ;;  %v11643_v51 = vld [vmem:[#allocation47_spill] sm:$0xff] }
 0x2d7   :  { %v2195_v15 = vpop.xlane.xlu0 %2194  ;;  %v3258_v61 = vmul.f32 %v11638_v33, %v9012_v13  ;;  %v3269_v46 = vmul.f32 %v11640_v9, %v11470_v27  ;;  %v3699_v11 = vadd.f32 %v3698_v44, %v3261_v10  ;;  %v11644_v33 = vld [vmem:[#allocation280_spill] sm:$0xff]  ;;  %vm11677_vm7 = vcmask 458112  }
 0x2d8   :  { %3684 = vadd.xlane.f32.xlu0 %v3683_v1  ;;  %v2965_v43 = vsel %vm11637_vm11, %v2964_v32, %v2960_v3  ;;  %v2969_v16 = vrot.slane %v2195_v15, %v7953_v19  ;;  %v3268_v1 = vmul.f32 %v11639_v60, %v11468_v47  ;;  %v3702_v3 = vadd.f32 %v3263_v45, %v3262_v58  ;;  %v11642_v32 = vld [vmem:[#allocation46_spill] sm:$0xff]  ;;  %v11647_v45 = vld [vmem:[#allocation227_spill] sm:$0xff] }
 0x2d9   :  { %3688 = vadd.xlane.f32.xlu1 %v3687_v55  ;;  %v2199_v40 = vpop.xlane.xlu1 %2198  ;;  %v3695_v63 = vadd.f32 %v3694_v41, %v3258_v61  ;;  %v3271_v57 = vmul.f32 %v11642_v32, %v11468_v47  ;;  %v3272_v55 = vmul.f32 %v11643_v51, %v11470_v27  ;;  %v3264_v60 = vmul.f32 %v11644_v33, %v9012_v13  ;;  %v11652_v51 = vld [vmem:[#allocation226_spill] sm:$0xff] }
 0x2da   :  { %v2970_v38 = vsel %vm11641_vm2, %v2969_v16, %v2965_v43  ;;  %v2974_v42 = vrot.slane %v2199_v40, %v7958_v50  ;;  %v11646_v16 = vld [vmem:[#allocation281_spill] sm:$0xff]  ;;  %v3706_v58 = vadd.f32 %v3266_v8, %v3265_v49  ;;  %v11648_v40 = vld [vmem:[#allocation228_spill] sm:$0xff]  ;;  %v11653_v8 = vld [vmem:[#allocation287_spill] sm:$0xff]  ;;  %vm11681_vm11 = vcmask 523712  }
 0x2db   :  { %v2203_v15 = vpop.xlane.xlu0 %2202  ;;  %v3267_v41 = vmul.f32 %v11646_v16, %v9012_v13  ;;  %v3275_v32 = vmul.f32 %v11648_v40, %v11470_v27  ;;  %v3703_v44 = vadd.f32 %v3702_v3, %v3264_v60  ;;  %v3270_v33 = vmul.f32 %v11653_v8, %v9012_v13  ;;  %v11654_v16 = vld [vmem:[#allocation288_spill] sm:$0xff] }
 0x2dc   :  { %3692 = vadd.xlane.f32.xlu0 %v3691_v17  ;;  %v2975_v9 = vsel %vm11645_vm12, %v2974_v42, %v2970_v38  ;;  %v2979_v43 = vrot.slane %v2203_v15, %v8004_v28  ;;  %v3274_v17 = vmul.f32 %v11647_v45, %v11468_v47  ;;  %v3710_v38 = vadd.f32 %v3269_v46, %v3268_v1  ;;  %v11651_v42 = vld [vmem:[#allocation225_spill] sm:$0xff]  ;;  %v11655_v46 = vld [vmem:[#allocation230_spill] sm:$0xff] }
 0x2dd   :  { %3696 = vadd.xlane.f32.xlu1 %v3695_v63  ;;  %v2207_v61 = vpop.xlane.xlu1 %2206  ;;  %v3277_v63 = vmul.f32 %v11651_v42, %v11468_v47  ;;  %v3278_v15 = vmul.f32 %v11652_v51, %v11470_v27  ;;  %v3273_v45 = vmul.f32 %v11654_v16, %v9012_v13  ;;  %v3707_v3 = vadd.f32 %v3706_v58, %v3267_v41  ;;  %v11659_v41 = vld [vmem:[#allocation229_spill] sm:$0xff]  ;;  %v11660_v58 = vld [vmem:[#allocation292_spill] sm:$0xff] }
 0x2de   :  { %v9471_v10 = vsel %vm11649_vm1, %v2979_v43, %v2975_v9  ;;  %v2984_v40 = vrot.slane %v2207_v61, %v7750_v26  ;;  %v3714_v1 = vadd.f32 %v3272_v55, %v3271_v57  ;;  %v3280_v60 = vmul.f32 %v11655_v46, %v11468_v47  ;;  %v11656_v9 = vld [vmem:[#allocation231_spill] sm:$0xff]  ;;  %v11658_v61 = vld [vmem:[#allocation49_spill] sm:$0xff] }
 0x2df   :  { %11650 = vst [vmem:[#allocation84_spill] sm:$0xff] %v9471_v10  ;;  %v2211_v49 = vpop.xlane.xlu0 %2210  ;;  %v3281_v43 = vmul.f32 %v11656_v9, %v11470_v27  ;;  %v3711_v16 = vadd.f32 %v3710_v38, %v3270_v33  ;;  %v3718_v10 = vadd.f32 %v3275_v32, %v3274_v17  ;;  %v3284_v57 = vmul.f32 %v11659_v41, %v11470_v27  ;;  %v11661_v46 = vld [vmem:[#allocation293_spill] sm:$0xff]  ;;  %v11663_v32 = vld [vmem:[#allocation236_spill] sm:$0xff] }
 0x2e0   :  { %3700 = vadd.xlane.f32.xlu0 %v3699_v11  ;;  %v2988_v11 = vrot.slane %v2211_v49, %v7753_v24  ;;  %v3276_v49 = vmul.f32 %v11660_v58, %v9012_v13  ;;  %v3279_v9 = vmul.f32 %v11661_v46, %v9012_v13  ;;  %v3715_v38 = vadd.f32 %v3714_v1, %v3273_v45  ;;  %v11667_v45 = vld [vmem:[#allocation235_spill] sm:$0xff] }
 0x2e1   :  { %3704 = vadd.xlane.f32.xlu1 %v3703_v44  ;;  %v2215_v42 = vpop.xlane.xlu1 %2214  ;;  %v3283_v44 = vmul.f32 %v11658_v61, %v11468_v47  ;;  %v3722_v17 = vadd.f32 %v3278_v15, %v3277_v63  ;;  %v3286_v33 = vmul.f32 %v11663_v32, %v11468_v47  ;;  %v3726_v25 = vadd.f32 %v3281_v43, %v3280_v60  ;;  %v11668_v1 = vld [vmem:[#allocation299_spill] sm:$0xff]  ;;  %v11671_v43 = vld [vmem:[#allocation54_spill] sm:$0xff] }
 0x2e2   :  { %v2989_v51 = vsel %vm11657_vm14, %v2988_v11, %v2984_v40  ;;  %v2993_v8 = vrot.slane %v2215_v42, %v7770_v39  ;;  %v3719_v46 = vadd.f32 %v3718_v10, %v3276_v49  ;;  %v3290_v63 = vmul.f32 %v11667_v45, %v11470_v27  ;;  %v11670_v10 = vld [vmem:[#allocation298_spill] sm:$0xff] }
 0x2e3   :  { %v2219_v55 = vpop.xlane.xlu0 %2218  ;;  %v3282_v60 = vmul.f32 %v11670_v10, %v9012_v13  ;;  %v3292_v49 = vmul.f32 %v11671_v43, %v11468_v47  ;;  %vm11685_vm2 = vcmask 589312   ;;  %vm11695_vm12 = vcmask 786112  }
 0x2e4   :  { %3708 = vadd.xlane.f32.xlu0 %v3707_v3  ;;  %v2994_v40 = vsel %vm11662_vm9, %v2993_v8, %v2989_v51  ;;  %v2998_v11 = vrot.slane %v2219_v55, %v7787_v29  ;;  %v11664_v3 = vld [vmem:[#allocation53_spill] sm:$0xff]  ;;  %v11666_v51 = vld [vmem:[#allocation234_spill] sm:$0xff]  ;;  %v3730_v55 = vadd.f32 %v3284_v57, %v3283_v44  ;;  %vm11699_vm1 = vcmask 851712  }
 0x2e5   :  { %3712 = vadd.xlane.f32.xlu1 %v3711_v16  ;;  %v3287_v42 = vmul.f32 %v11664_v3, %v11470_v27  ;;  %v2223_v61 = vpop.xlane.xlu1 %2222  ;;  %v3289_v8 = vmul.f32 %v11666_v51, %v11468_v47  ;;  %v3285_v16 = vmul.f32 %v11668_v1, %v9012_v13  ;;  %v3727_v57 = vadd.f32 %v3726_v25, %v3282_v60  ;;  %v11676_v1 = vld [vmem:[#allocation304_spill] sm:$0xff] }
 0x2e6   :  { %v2999_v41 = vsel %vm11665_vm15, %v2998_v11, %v2994_v40  ;;  %v3003_v58 = vrot.slane %v2223_v61, %v7793_v48  ;;  %v3723_v11 = vadd.f32 %v3722_v17, %v3279_v9  ;;  %v11675_v17 = vld [vmem:[#allocation238_spill] sm:$0xff]  ;;  %v3288_v10 = vmul.f32 %v11676_v1, %v9012_v13  ;;  %v11680_v60 = vld [vmem:[#allocation244_spill] sm:$0xff] }
 0x2e7   :  { %v2227_v15 = vpop.xlane.xlu0 %2226  ;;  %vm11703_vm14 = vcmask 917312   ;;  %vm11707_vm9 = vcmask 982912   ;;  %vm11711_vm15 = vcmask 1048512  }
 0x2e8   :  { %3716 = vadd.xlane.f32.xlu0 %v3715_v38  ;;  %v3004_v32 = vsel %vm11669_vm10, %v3003_v58, %v2999_v41  ;;  %v3008_v40 = vrot.slane %v2227_v15, %v7819_v54  ;;  %v11672_v38 = vld [vmem:[#allocation55_spill] sm:$0xff]  ;;  %v3734_v41 = vadd.f32 %v3287_v42, %v3286_v33  ;;  %v11674_v58 = vld [vmem:[#allocation237_spill] sm:$0xff]  ;;  %v3731_v15 = vadd.f32 %v3730_v55, %v3285_v16  ;;  %v11679_v42 = vld [vmem:[#allocation56_spill] sm:$0xff] }
 0x2e9   :  { %3720 = vadd.xlane.f32.xlu1 %v3719_v46  ;;  %v3293_v3 = vmul.f32 %v11672_v38, %v11470_v27  ;;  %v2231_v61 = vpop.xlane.xlu1 %2230  ;;  %v3295_v9 = vmul.f32 %v11674_v58, %v11468_v47  ;;  %v3296_v46 = vmul.f32 %v11675_v17, %v11470_v27  ;;  %v3738_v33 = vadd.f32 %v3290_v63, %v3289_v8  ;;  %v11683_v17 = vld [vmem:[#allocation243_spill] sm:$0xff] }
 0x2ea   :  { %v3009_v51 = vsel %vm11673_vm6, %v3008_v40, %v3004_v32  ;;  %v3013_v44 = vrot.slane %v2231_v61, %v7827_v31  ;;  %v11678_v40 = vld [vmem:[#allocation305_spill] sm:$0xff]  ;;  %v3299_v38 = vmul.f32 %v11680_v60, %v11470_v27  ;;  %v3302_v8 = vmul.f32 %v11683_v17, %v11470_v27 }
 0x2eb   :  { %v2235_v45 = vpop.xlane.xlu0 %2234  ;;  %v3291_v25 = vmul.f32 %v11678_v40, %v9012_v13  ;;  %v3746_v40 = vadd.f32 %v3296_v46, %v3295_v9  ;;  %vm11718_vm10 = vcmask 130112   ;;  %vm11722_vm6 = vcmask 195712  }
 0x2ec   :  { %3724 = vadd.xlane.f32.xlu0 %v3723_v11  ;;  %v3014_v43 = vsel %vm11677_vm7, %v3013_v44, %v3009_v51  ;;  %v3018_v32 = vrot.slane %v2235_v45, %v7851_v52  ;;  %v3298_v11 = vmul.f32 %v11679_v42, %v11468_v47  ;;  %v3735_v51 = vadd.f32 %v3734_v41, %v3288_v10  ;;  %v11684_v45 = vld [vmem:[#allocation309_spill] sm:$0xff]  ;;  %v11686_v41 = vld [vmem:[#allocation30_spill] sm:$0xff] }
 0x2ed   :  { %3728 = vadd.xlane.f32.xlu1 %v3727_v57  ;;  %v3742_v44 = vadd.f32 %v3293_v3, %v3292_v49  ;;  %v11682_v57 = vld [vmem:[#allocation242_spill] sm:$0xff]  ;;  %v3297_v1 = vmul.f32 %v11684_v45, %v9012_v13  ;;  %v3294_v49 = vmul.f32 %v11686_v41, %v9012_v13  ;;  %v11687_v3 = vld [vmem:[#allocation248_spill] sm:$0xff]  ;;  %vm11726_vm7 = vcmask 261312  }
 0x2ee   :  { %v2239_v61 = vpop.xlane.xlu1 %2238  ;;  %v3019_v16 = vsel %vm11681_vm11, %v3018_v32, %v3014_v43  ;;  %v3301_v58 = vmul.f32 %v11682_v57, %v11468_v47  ;;  %v3739_v32 = vadd.f32 %v3738_v33, %v3291_v25  ;;  %v11688_v10 = vld [vmem:[#allocation58_spill] sm:$0xff]  ;;  %v11690_v33 = vld [vmem:[#allocation247_spill] sm:$0xff]  ;;  %v11691_v45 = vld [vmem:[#allocation316_spill] sm:$0xff]  ;;  %vm11730_vm11 = vcmask 326912  }
 0x2ef   :  { %v3023_v55 = vrot.slane %v2239_v61, %v7859_v30  ;;  %v3305_v60 = vmul.f32 %v11688_v10, %v11470_v27  ;;  %v3743_v46 = vadd.f32 %v3742_v44, %v3294_v49  ;;  %v3300_v41 = vmul.f32 %v11691_v45, %v9012_v13  ;;  %v11694_v49 = vld [vmem:[#allocation255_spill] sm:$0xff] }
 0x2f0   :  { %3732 = vadd.xlane.f32.xlu0 %v3731_v15  ;;  %v2243_v63 = vpop.xlane.xlu0 %2242  ;;  %v3304_v15 = vmul.f32 %v11687_v3, %v11468_v47  ;;  %v3311_v10 = vmul.f32 %v11694_v49, %v11470_v27 }
 0x2f1   :  { %v3024_v42 = vsel %vm11685_vm2, %v3023_v55, %v3019_v16  ;;  %3736 = vadd.xlane.f32.xlu1 %v3735_v51  ;;  %v3028_v43 = vrot.slane %v2243_v63, %v7887_v23  ;;  %v3750_v16 = vadd.f32 %v3299_v38, %v3298_v11  ;;  %v11689_v55 = vld [vmem:[#allocation61_spill] sm:$0xff]  ;;  %v3308_v51 = vmul.f32 %v11690_v33, %v11470_v27  ;;  %v11693_v38 = vld [vmem:[#allocation254_spill] sm:$0xff]  ;;  %v11697_v33 = vld [vmem:[#allocation71_spill] sm:$0xff] }
 0x2f2   :  { %v2247_v61 = vpop.xlane.xlu1 %2246  ;;  %v3307_v25 = vmul.f32 %v11689_v55, %v11468_v47  ;;  %v3747_v63 = vadd.f32 %v3746_v40, %v3297_v1  ;;  %v3754_v11 = vadd.f32 %v3302_v8, %v3301_v58  ;;  %v3314_v58 = vmul.f32 %v11697_v33, %v11470_v27 }
 0x2f3   :  { %v3029_v57 = vsel %vm2463_vm8, %v3028_v43, %v3024_v42  ;;  %v3033_v9 = vrot.slane %v2247_v61, %v7893_v12  ;;  %v11692_v43 = vld [vmem:[#allocation317_spill] sm:$0xff]  ;;  %vm11734_vm2 = vcmask 392512  }
 0x2f4   :  { %3740 = vadd.xlane.f32.xlu0 %v3739_v32  ;;  %v3303_v44 = vmul.f32 %v11692_v43, %v9012_v13  ;;  %v3310_v32 = vmul.f32 %v11693_v38, %v11468_v47  ;;  %v3762_v43 = vadd.f32 %v3308_v51, %v3307_v25 }
 0x2f5   :  { %v2251_v17 = vpop.xlane.xlu0 %2250  ;;  %v3034_v3 = vsel %vm2470_vm0, %v3033_v9, %v3029_v57  ;;  %3744 = vadd.xlane.f32.xlu1 %v3743_v46  ;;  %v3751_v57 = vadd.f32 %v3750_v16, %v3300_v41  ;;  %v3758_v9 = vadd.f32 %v3305_v60, %v3304_v15  ;;  %v11696_v46 = vld [vmem:[#allocation250_spill] sm:$0xff]  ;;  %v11700_v16 = vld [vmem:[#allocation319_spill] sm:$0xff]  ;;  %v11701_v60 = vld [vmem:[#allocation73_spill] sm:$0xff] }
 0x2f6   :  { %v3038_v42 = vrot.slane %v2251_v17, %v7921_v2  ;;  %v2255_v61 = vpop.xlane.xlu1 %2254  ;;  %v3313_v55 = vmul.f32 %v11696_v46, %v11468_v47  ;;  %v11698_v17 = vld [vmem:[#allocation320_spill] sm:$0xff]  ;;  %v3306_v15 = vmul.f32 %v11700_v16, %v9012_v13  ;;  %v11702_v41 = vld [vmem:[#allocation259_spill] sm:$0xff] }
 0x2f7   :  { %v3043_v40 = vrot.slane %v2255_v61, %v7927_v34  ;;  %v3309_v45 = vmul.f32 %v11698_v17, %v9012_v13  ;;  %v3317_v49 = vmul.f32 %v11702_v41, %v11470_v27  ;;  %v11706_v17 = vld [vmem:[#allocation321_spill] sm:$0xff]  ;;  %v11710_v41 = vld [vmem:[#allocation82_spill] sm:$0xff] }
 0x2f8   :  { %v3039_v1 = vsel %vm11695_vm12, %v3038_v42, %v3034_v3  ;;  %3748 = vadd.xlane.f32.xlu0 %v3747_v63  ;;  %v3755_v42 = vadd.f32 %v3754_v11, %v3303_v44  ;;  %v3316_v63 = vmul.f32 %v11701_v60, %v11468_v47  ;;  %v3759_v51 = vadd.f32 %v3758_v9, %v3306_v15  ;;  %v11705_v11 = vld [vmem:[#allocation78_spill] sm:$0xff] }
 0x2f9   :  { %v2259_v8 = vpop.xlane.xlu0 %2258  ;;  %v3044_v38 = vsel %vm11699_vm1, %v3043_v40, %v3039_v1  ;;  %3752 = vadd.xlane.f32.xlu1 %v3751_v57  ;;  %v3766_v1 = vadd.f32 %v3311_v10, %v3310_v32  ;;  %v11704_v40 = vld [vmem:[#allocation62_spill] sm:$0xff]  ;;  %v3320_v57 = vmul.f32 %v11705_v11, %v11470_v27  ;;  %v3312_v16 = vmul.f32 %v11706_v17, %v9012_v13 }
 0x2fa   :  { %v3048_v3 = vrot.slane %v2259_v8, %v7953_v19  ;;  %v2263_v61 = vpop.xlane.xlu1 %2262  ;;  %v3319_v44 = vmul.f32 %v11704_v40, %v11468_v47  ;;  %v3763_v8 = vadd.f32 %v3762_v43, %v3309_v45  ;;  %v3770_v32 = vadd.f32 %v3314_v58, %v3313_v55  ;;  %v11709_v10 = vld [vmem:[#allocation262_spill] sm:$0xff]  ;;  %v11713_v40 = vld [vmem:[#allocation89_spill] sm:$0xff]  ;;  %v11714_v58 = vld [vmem:[#allocation324_spill] sm:$0xff] }
 0x2fb   :  { %v3053_v25 = vrot.slane %v2263_v61, %v7958_v50  ;;  %v3323_v61 = vmul.f32 %v11710_v41, %v11470_v27  ;;  %v3767_v43 = vadd.f32 %v3766_v1, %v3312_v16  ;;  %v3326_v11 = vmul.f32 %v11713_v40, %v11470_v27  ;;  %v11715_v1 = vld [vmem:[#allocation323_spill] sm:$0xff] }
 0x2fc   :  { %v3049_v46 = vsel %vm11703_vm14, %v3048_v3, %v3044_v38  ;;  %3756 = vadd.xlane.f32.xlu0 %v3755_v42  ;;  %v11708_v3 = vld [vmem:[#allocation322_spill] sm:$0xff]  ;;  %v3322_v42 = vmul.f32 %v11709_v10, %v11468_v47  ;;  %v3778_v17 = vadd.f32 %v3320_v57, %v3319_v44  ;;  %v11717_v16 = vld [vmem:[#allocation267_spill] sm:$0xff]  ;;  %vm11738_vm12 = vcmask 458112  }
 0x2fd   :  { %v2267_v33 = vpop.xlane.xlu0 %2266  ;;  %v3054_v60 = vsel %vm11707_vm9, %v3053_v25, %v3049_v46  ;;  %3760 = vadd.xlane.f32.xlu1 %v3759_v51  ;;  %v3315_v9 = vmul.f32 %v11708_v3, %v9012_v13  ;;  %v3774_v46 = vadd.f32 %v3317_v49, %v3316_v63  ;;  %v11712_v25 = vld [vmem:[#allocation260_spill] sm:$0xff]  ;;  %v3318_v63 = vmul.f32 %v11715_v1, %v9012_v13  ;;  %v11721_v1 = vld [vmem:[#allocation325_spill] sm:$0xff] }
 0x2fe   :  { %v3058_v38 = vrot.slane %v2267_v33, %v8004_v28  ;;  %v3481_v15 = vpop.xlane.xlu1 %3480  ;;  %v3325_v51 = vmul.f32 %v11712_v25, %v11468_v47  ;;  %v3321_v33 = vmul.f32 %v11714_v58, %v9012_v13  ;;  %v11716_v49 = vld [vmem:[#allocation92_spill] sm:$0xff]  ;;  %v3329_v10 = vmul.f32 %v11717_v16, %v11470_v27 }
 0x2ff   :  { %v4121_v3 = vrot.slane %v3481_v15, %v7750_v26  ;;  %v3775_v57 = vadd.f32 %v3774_v46, %v3318_v63  ;;  %v3782_v15 = vadd.f32 %v3323_v61, %v3322_v42  ;;  %v11724_v61 = vld [vmem:[#allocation272_spill] sm:$0xff]  ;;  %v11725_v63 = vld [vmem:[#allocation103_spill] sm:$0xff]  ;;  %vm11742_vm1 = vcmask 523712  }
 0x300   :  { %v9600_v45 = vsel %vm11711_vm15, %v3058_v38, %v3054_v60  ;;  %3764 = vadd.xlane.f32.xlu0 %v3763_v8  ;;  %v3771_v38 = vadd.f32 %v3770_v32, %v3315_v9  ;;  %v3328_v8 = vmul.f32 %v11716_v49, %v11468_v47  ;;  %v11720_v32 = vld [vmem:[#allocation266_spill] sm:$0xff]  ;;  %v3779_v58 = vadd.f32 %v3778_v17, %v3321_v33 }
 0x301   :  { %v3485_v55 = vpop.xlane.xlu0 %3484  ;;  %3768 = vadd.xlane.f32.xlu1 %v3767_v43  ;;  %v11719_v43 = vld [vmem:[#allocation265_spill] sm:$0xff]  ;;  %v3332_v40 = vmul.f32 %v11720_v32, %v11470_v27  ;;  %v3324_v49 = vmul.f32 %v11721_v1, %v9012_v13  ;;  %v3786_v42 = vadd.f32 %v3326_v11, %v3325_v51  ;;  %v11729_v1 = vld [vmem:[#allocation328_spill] sm:$0xff]  ;;  %vm11745_vm14 = vcmask 589312  }
 0x302   :  { %v4125_v60 = vrot.slane %v3485_v55, %v7753_v24  ;;  %v3489_v41 = vpop.xlane.xlu1 %3488  ;;  %v3331_v9 = vmul.f32 %v11719_v43, %v11468_v47  ;;  %vm11752_vm9 = vcmask 786112   ;;  %vm11756_vm15 = vcmask 851712  }
 0x303   :  { %v4130_v44 = vrot.slane %v3489_v41, %v7770_v39  ;;  %v3335_v41 = vmul.f32 %v11725_v63, %v11470_v27 }
 0x304   :  { %v4126_v25 = vsel %vm11718_vm10, %v4125_v60, %v4121_v3  ;;  %3772 = vadd.xlane.f32.xlu0 %v3771_v38  ;;  %v11723_v60 = vld [vmem:[#allocation326_spill] sm:$0xff]  ;;  %v3334_v38 = vmul.f32 %v11724_v61, %v11468_v47  ;;  %v3794_v61 = vadd.f32 %v3332_v40, %v3331_v9  ;;  %vm11759_vm10 = vcmask 917312  }
 0x305   :  { %v3493_v55 = vpop.xlane.xlu0 %3492  ;;  %v4131_v16 = vsel %vm11722_vm6, %v4130_v44, %v4126_v25  ;;  %3776 = vadd.xlane.f32.xlu1 %v3775_v57  ;;  %v3327_v46 = vmul.f32 %v11723_v60, %v9012_v13  ;;  %v3783_v25 = vadd.f32 %v3782_v15, %v3324_v49  ;;  %v3790_v44 = vadd.f32 %v3329_v10, %v3328_v8  ;;  %v11727_v57 = vld [vmem:[#allocation111_spill] sm:$0xff]  ;;  %v11732_v10 = vld [vmem:[#allocation277_spill] sm:$0xff]  ;;  %v11733_v49 = vld [vmem:[#allocation278_spill] sm:$0xff] }
 0x306   :  { %v4135_v3 = vrot.slane %v3493_v55, %v7787_v29  ;;  %v3497_v43 = vpop.xlane.xlu1 %3496  ;;  %v3337_v32 = vmul.f32 %v11727_v57, %v11468_v47  ;;  %v11728_v55 = vld [vmem:[#allocation271_spill] sm:$0xff]  ;;  %v3333_v60 = vmul.f32 %v11729_v1, %v9012_v13  ;;  %vm11760_vm6 = vcmask 982912  }
 0x307   :  { %v4140_v17 = vrot.slane %v3497_v43, %v7793_v48  ;;  %v3338_v51 = vmul.f32 %v11728_v55, %v11470_v27  ;;  %v11731_v15 = vld [vmem:[#allocation327_spill] sm:$0xff]  ;;  %v3341_v43 = vmul.f32 %v11733_v49, %v11470_v27 }
 0x308   :  { %v4136_v33 = vsel %vm11726_vm7, %v4135_v3, %v4131_v16  ;;  %3780 = vadd.xlane.f32.xlu0 %v3779_v58  ;;  %v3787_v3 = vadd.f32 %v3786_v42, %v3327_v46  ;;  %v3330_v8 = vmul.f32 %v11731_v15, %v9012_v13  ;;  %v3340_v58 = vmul.f32 %v11732_v10, %v11468_v47  ;;  %v11736_v42 = vld [vmem:[#allocation311_spill] sm:$0xff]  ;;  %v11737_v15 = vld [vmem:[#allocation329_spill] sm:$0xff] }
 0x309   :  { %v3501_v11 = vpop.xlane.xlu0 %3500  ;;  %v4141_v63 = vsel %vm11730_vm11, %v4140_v17, %v4136_v33  ;;  %3784 = vadd.xlane.f32.xlu1 %v3783_v25  ;;  %v3798_v33 = vadd.f32 %v3335_v41, %v3334_v38  ;;  %v11735_v17 = vld [vmem:[#allocation310_spill] sm:$0xff]  ;;  %v3383_v25 = vmul.f32 %v11736_v42, %v11470_v27  ;;  %v3795_v1 = vadd.f32 %v3794_v61, %v3333_v60  ;;  %v11740_v41 = vld [vmem:[#allocation308_spill] sm:$0xff] }
 0x30a   :  { %v4145_v16 = vrot.slane %v3501_v11, %v7819_v54  ;;  %v3505_v57 = vpop.xlane.xlu1 %3504  ;;  %v3791_v40 = vadd.f32 %v3790_v44, %v3330_v8  ;;  %v3382_v46 = vmul.f32 %v11735_v17, %v11468_v47  ;;  %v3336_v10 = vmul.f32 %v11737_v15, %v9012_v13  ;;  %v11741_v8 = vld [vmem:[#allocation180_spill] sm:$0xff] }
 0x30b   :  { %v4150_v9 = vrot.slane %v3505_v57, %v7827_v31  ;;  %v3802_v38 = vadd.f32 %v3338_v51, %v3337_v32  ;;  %v3386_v57 = vmul.f32 %v11741_v8, %v11470_v27  ;;  %vm11764_vm7 = vcmask 1048512  }
 0x30c   :  { %v4146_v55 = vsel %vm11734_vm2, %v4145_v16, %v4141_v63  ;;  %3788 = vadd.xlane.f32.xlu0 %v3787_v3  ;;  %v11739_v16 = vld [vmem:[#allocation330_spill] sm:$0xff]  ;;  %v3385_v3 = vmul.f32 %v11740_v41, %v11468_v47  ;;  %v3862_v15 = vadd.f32 %v3383_v25, %v3382_v46  ;;  %vm11768_vm11 = vcmask 130112  }
 0x30d   :  { %v3509_v11 = vpop.xlane.xlu0 %3508  ;;  %v4151_v49 = vsel %vm11738_vm12, %v4150_v9, %v4146_v55  ;;  %3792 = vadd.xlane.f32.xlu1 %v3791_v40  ;;  %v3339_v44 = vmul.f32 %v11739_v16, %v9012_v13  ;;  %v3799_v55 = vadd.f32 %v3798_v33, %v3336_v10  ;;  %v3806_v9 = vadd.f32 %v3341_v43, %v3340_v58  ;;  %v11743_v40 = vld [vmem:[#allocation273_spill] sm:$0xff]  ;;  %v11747_v33 = vld [vmem:[#allocation315_spill] sm:$0xff]  ;;  %v11750_v46 = vld [vmem:[#allocation222_spill] sm:$0xff] }
 0x30e   :  { %v4155_v63 = vrot.slane %v3509_v11, %v7851_v52  ;;  %v3513_v17 = vpop.xlane.xlu1 %3512  ;;  %v3343_v42 = vmul.f32 %v11743_v40, %v11468_v47  ;;  %v11744_v11 = vld [vmem:[#allocation123_spill] sm:$0xff]  ;;  %v3388_v58 = vmul.f32 %v11747_v33, %v11468_v47  ;;  %v3387_v25 = vmul.f32 %v11750_v46, %v9012_v13 }
 0x30f   :  { %v4160_v61 = vrot.slane %v3513_v17, %v7859_v30  ;;  %v3344_v32 = vmul.f32 %v11744_v11, %v11470_v27  ;;  %v3803_v8 = vadd.f32 %v3802_v38, %v3339_v44  ;;  %v11748_v43 = vld [vmem:[#allocation203_spill] sm:$0xff]  ;;  %v11749_v17 = vld [vmem:[#allocation50_spill] sm:$0xff]  ;;  %v3431_v11 = vmul.f32 %v8542_v6, %v11470_v27 }
 0x310   :  { %v4156_v60 = vsel %vm11742_vm1, %v4155_v63, %v4151_v49  ;;  %3796 = vadd.xlane.f32.xlu0 %v3795_v1  ;;  %v11746_v49 = vld [vmem:[#allocation334_spill] sm:$0xff]  ;;  %v3389_v1 = vmul.f32 %v11748_v43, %v11470_v27  ;;  %v3384_v40 = vmul.f32 %v11749_v17, %v9012_v13  ;;  %vm11771_vm2 = vcmask 195712  }
 0x311   :  { %v3517_v51 = vpop.xlane.xlu0 %3516  ;;  %v4161_v16 = vsel %vm11745_vm14, %v4160_v61, %v4156_v60  ;;  %3800 = vadd.xlane.f32.xlu1 %v3799_v55  ;;  %v3342_v63 = vmul.f32 %v11746_v49, %v9012_v13  ;;  %v3866_v61 = vadd.f32 %v3386_v57, %v3385_v3  ;;  %v3430_v55 = vmul.f32 %v8536_v14, %v11468_v47 }
 0x312   :  { %v4165_v41 = vrot.slane %v3517_v51, %v7887_v23  ;;  %v3521_v10 = vpop.xlane.xlu1 %3520  ;;  %v3863_v49 = vadd.f32 %v3862_v15, %v3384_v40  ;;  %v3433_v3 = vmul.f32 %v8502_v35, %v11468_v47  ;;  %v3434_v14 = vmul.f32 %v8508_v36, %v11470_v27  ;;  %v11754_v40 = vld [vmem:[#allocation282_spill] sm:$0xff]  ;;  %v11755_v35 = vld [vmem:[#allocation337_spill] sm:$0xff] }
 0x313   :  { %v4170_v44 = vrot.slane %v3521_v10, %v7893_v12  ;;  %v3807_v38 = vadd.f32 %v3806_v9, %v3342_v63  ;;  %v3810_v10 = vadd.f32 %v3344_v32, %v3343_v42  ;;  %v3870_v9 = vadd.f32 %v3389_v1, %v3388_v58  ;;  %v11753_v63 = vld [vmem:[#allocation128_spill] sm:$0xff] }
 0x314   :  { %v4166_v60 = vsel %vm2463_vm8, %v4165_v41, %v4161_v16  ;;  %3804 = vadd.xlane.f32.xlu0 %v3803_v8  ;;  %v11751_v16 = vld [vmem:[#allocation199_spill] sm:$0xff]  ;;  %v3867_v8 = vadd.f32 %v3866_v61, %v3387_v25  ;;  %v3346_v17 = vmul.f32 %v11753_v63, %v11468_v47  ;;  %v3347_v42 = vmul.f32 %v11754_v40, %v11470_v27 }
 0x315   :  { %v3525_v51 = vpop.xlane.xlu0 %3524  ;;  %v4171_v33 = vsel %vm2470_vm0, %v4170_v44, %v4166_v60  ;;  %3808 = vadd.xlane.f32.xlu1 %v3807_v38  ;;  %v3345_v41 = vmul.f32 %v11751_v16, %v9012_v13  ;;  %v3390_v46 = vmul.f32 %v11755_v35, %v9012_v13  ;;  %v3926_v60 = vadd.f32 %v3431_v11, %v3430_v55  ;;  %v11757_v44 = vld [vmem:[#allocation312_spill] sm:$0xff]  ;;  %v11758_v38 = vld [vmem:[#allocation313_spill] sm:$0xff] }
 0x316   :  { %v4175_v43 = vrot.slane %v3525_v51, %v7921_v2  ;;  %v3529_v57 = vpop.xlane.xlu1 %3528  ;;  %v3391_v25 = vmul.f32 %v11757_v44, %v11468_v47  ;;  %v3392_v61 = vmul.f32 %v11758_v38, %v11470_v27  ;;  %v3930_v55 = vadd.f32 %v3434_v14, %v3433_v3 }
 0x317   :  { %v4180_v15 = vrot.slane %v3529_v57, %v7927_v34  ;;  %v3811_v1 = vadd.f32 %v3810_v10, %v3345_v41  ;;  %v3435_v41 = vmul.f32 %v8719_v0, %v9012_v13  ;;  %v3436_v11 = vmul.f32 %v8602_v4, %v11468_v47  ;;  %v11762_v0 = vld [vmem:[#allocation279_spill] sm:$0xff]  ;;  %v11763_v4 = vld [vmem:[#allocation65_spill] sm:$0xff] }
 0x318   :  { %v4176_v6 = vsel %vm11752_vm9, %v4175_v43, %v4171_v33  ;;  %3864 = vadd.xlane.f32.xlu0 %v3863_v49  ;;  %v3871_v49 = vadd.f32 %v3870_v9, %v3390_v46  ;;  %v3432_v33 = vmul.f32 %v8713_v53, %v9012_v13  ;;  %v3437_v10 = vmul.f32 %v8608_v37, %v11470_v27 }
 0x319   :  { %v3533_v32 = vpop.xlane.xlu0 %3532  ;;  %v4181_v58 = vsel %vm11756_vm15, %v4180_v15, %v4176_v6  ;;  %3868 = vadd.xlane.f32.xlu1 %v3867_v8  ;;  %v3814_v15 = vadd.f32 %v3347_v42, %v3346_v17  ;;  %v11761_v8 = vld [vmem:[#allocation135_spill] sm:$0xff]  ;;  %v3350_v3 = vmul.f32 %v11762_v0, %v11470_v27  ;;  %v3348_v40 = vmul.f32 %v11763_v4, %v9012_v13  ;;  %v11765_v17 = vld [vmem:[#allocation332_spill] sm:$0xff] }
 0x31a   :  { %v4185_v36 = vrot.slane %v3533_v32, %v7953_v19  ;;  %v3537_v51 = vpop.xlane.xlu1 %3536  ;;  %v3927_v6 = vadd.f32 %v3926_v60, %v3432_v33  ;;  %v3349_v63 = vmul.f32 %v11761_v8, %v11468_v47  ;;  %v3931_v32 = vadd.f32 %v3930_v55, %v3435_v41 }
 0x31b   :  { %v4190_v16 = vrot.slane %v3537_v51, %v7958_v50  ;;  %v3393_v35 = vmul.f32 %v8373_v5, %v9012_v13  ;;  %v3874_v46 = vadd.f32 %v3392_v61, %v3391_v25  ;;  %v3394_v42 = vmul.f32 %v11765_v17, %v11468_v47  ;;  %v11767_v61 = vld [vmem:[#allocation67_spill] sm:$0xff] }
 0x31c   :  { %v4186_v43 = vsel %vm11759_vm10, %v4185_v36, %v4181_v58  ;;  %3812 = vadd.xlane.f32.xlu0 %v3811_v1  ;;  %v11766_v58 = vld [vmem:[#allocation333_spill] sm:$0xff]  ;;  %v3815_v38 = vadd.f32 %v3814_v15, %v3348_v40  ;;  %v3934_v51 = vadd.f32 %v3437_v10, %v3436_v11  ;;  %v3440_v5 = vmul.f32 %v8586_v59, %v11470_v27 }
 0x31d   :  { %v3541_v57 = vpop.xlane.xlu0 %3540  ;;  %v4191_v9 = vsel %vm11760_vm6, %v4190_v16, %v4186_v43  ;;  %3872 = vadd.xlane.f32.xlu1 %v3871_v49  ;;  %v3395_v36 = vmul.f32 %v11766_v58, %v11470_v27  ;;  %v3439_v49 = vmul.f32 %v8556_v22, %v11468_v47  ;;  %v3351_v33 = vmul.f32 %v11767_v61, %v9012_v13  ;;  %v11769_v10 = vld [vmem:[#allocation285_spill] sm:$0xff]  ;;  %v11776_v58 = vld [vmem:[#allocation348_spill] sm:$0xff] }
 0x31e   :  { %v4195_v53 = vrot.slane %v3541_v57, %v8004_v28  ;;  %v3545_v14 = vpop.xlane.xlu1 %3544  ;;  %v3818_v43 = vadd.f32 %v3350_v3, %v3349_v63  ;;  %v3875_v55 = vadd.f32 %v3874_v46, %v3393_v35  ;;  %v3438_v11 = vmul.f32 %v8765_v62, %v9012_v13  ;;  %v11770_v57 = vld [vmem:[#allocation51_spill] sm:$0xff]  ;;  %v11772_v63 = vld [vmem:[#allocation16_spill] sm:$0xff]  ;;  %v11774_v40 = vld [vmem:[#allocation57_spill] sm:$0xff] }
 0x31f   :  { %v4200_v60 = vrot.slane %v3545_v14, %v7750_v26  ;;  %v3352_v22 = vmul.f32 %v11769_v10, %v11468_v47  ;;  %v3353_v59 = vmul.f32 %v11770_v57, %v11470_v27  ;;  %v3878_v8 = vadd.f32 %v3395_v36, %v3394_v42  ;;  %v11773_v3 = vld [vmem:[#allocation331_spill] sm:$0xff] }
 0x320   :  { %v9729_v37 = vsel %vm11764_vm7, %v4195_v53, %v4191_v9  ;;  %3928 = vadd.xlane.f32.xlu0 %v3927_v6  ;;  %v3935_v15 = vadd.f32 %v3934_v51, %v3438_v11  ;;  %v3397_v0 = vmul.f32 %v11772_v63, %v11468_v47  ;;  %v3398_v62 = vmul.f32 %v11773_v3, %v11470_v27 }
 0x321   :  { %v3549_v1 = vpop.xlane.xlu0 %3548  ;;  %3932 = vadd.xlane.f32.xlu1 %v3931_v32  ;;  %v3819_v4 = vadd.f32 %v3818_v43, %v3351_v33  ;;  %v3396_v32 = vmul.f32 %v11774_v40, %v9012_v13  ;;  %vm11775_vm12 = vcmask 261312   ;;  %v3441_v17 = vmul.f32 %v8771_v56, %v9012_v13  ;;  %v11779_v33 = vld [vmem:[#allocation283_spill] sm:$0xff]  ;;  %v11780_v56 = vld [vmem:[#allocation149_spill] sm:$0xff]  ;;  %v11787_v40 = vld [vmem:[#allocation268_spill] sm:$0xff] }
 0x322   :  { %v4204_v44 = vrot.slane %v3549_v1, %v7753_v24  ;;  %v3553_v25 = vpop.xlane.xlu1 %3552  ;;  %v3938_v42 = vadd.f32 %v3440_v5, %v3439_v49  ;;  %v3442_v36 = vmul.f32 %v11776_v58, %v11468_v47  ;;  %v11777_v1 = vld [vmem:[#allocation350_spill] sm:$0xff]  ;;  %vm11778_vm1 = vcmask 326912  }
 0x323   :  { %v4209_v41 = vrot.slane %v3553_v25, %v7770_v39  ;;  %v3879_v25 = vadd.f32 %v3878_v8, %v3396_v32  ;;  %v3822_v61 = vadd.f32 %v3353_v59, %v3352_v22  ;;  %v3355_v43 = vmul.f32 %v11779_v33, %v11468_v47  ;;  %v11784_v59 = vld [vmem:[#allocation93_spill] sm:$0xff] }
 0x324   :  { %v4205_v16 = vsel %vm11768_vm11, %v4204_v44, %v4200_v60  ;;  %3816 = vadd.xlane.f32.xlu0 %v3815_v38  ;;  %v3443_v60 = vmul.f32 %v11777_v1, %v11470_v27  ;;  %v3356_v49 = vmul.f32 %v11780_v56, %v11470_v27  ;;  %vm11783_vm14 = vcmask 392512  }
 0x325   :  { %v3557_v9 = vpop.xlane.xlu0 %3556  ;;  %v4210_v53 = vsel %vm11771_vm2, %v4209_v41, %v4205_v16  ;;  %3876 = vadd.xlane.f32.xlu1 %v3875_v55  ;;  %v11781_v16 = vld [vmem:[#allocation68_spill] sm:$0xff]  ;;  %v11782_v55 = vld [vmem:[#allocation339_spill] sm:$0xff]  ;;  %v3882_v22 = vadd.f32 %v3398_v62, %v3397_v0  ;;  %vm11786_vm9 = vcmask 458112   ;;  %v3445_v32 = vmul.f32 %v11787_v40, %v11468_v47 }
 0x326   :  { %v4214_v6 = vrot.slane %v3557_v9, %v7787_v29  ;;  %v3561_v14 = vpop.xlane.xlu1 %3560  ;;  %v3354_v41 = vmul.f32 %v11781_v16, %v9012_v13  ;;  %v3399_v11 = vmul.f32 %v11782_v55, %v9012_v13  ;;  %v3939_v9 = vadd.f32 %v3938_v42, %v3441_v17  ;;  %v11795_v16 = vld [vmem:[#allocation75_spill] sm:$0xff]  ;;  %v11796_v55 = vld [vmem:[#allocation76_spill] sm:$0xff] }
 0x327   :  { %v4219_v46 = vrot.slane %v3561_v14, %v7793_v48  ;;  %v3826_v42 = vadd.f32 %v3356_v49, %v3355_v43  ;;  %vm11790_vm15 = vcmask 523712   ;;  %vm11794_vm10 = vcmask 589312  }
 0x328   :  { %v4215_v35 = vsel %vm11775_vm12, %v4214_v6, %v4210_v53  ;;  %3936 = vadd.xlane.f32.xlu0 %v3935_v15  ;;  %v3400_v53 = vmul.f32 %v11784_v59, %v11468_v47  ;;  %v11785_v6 = vld [vmem:[#allocation206_spill] sm:$0xff]  ;;  %v3823_v14 = vadd.f32 %v3822_v61, %v3354_v41  ;;  %v3403_v41 = vmul.f32 %v11795_v16, %v11468_v47 }
 0x329   :  { %v3565_v44 = vpop.xlane.xlu0 %3564  ;;  %v4220_v38 = vsel %vm11778_vm1, %v4219_v46, %v4215_v35  ;;  %3820 = vadd.xlane.f32.xlu1 %v3819_v4  ;;  %v3401_v15 = vmul.f32 %v11785_v6, %v11470_v27  ;;  %v3942_v4 = vadd.f32 %v3443_v60, %v3442_v36  ;;  %v11788_v35 = vld [vmem:[#allocation347_spill] sm:$0xff]  ;;  %v11789_v46 = vld [vmem:[#allocation70_spill] sm:$0xff]  ;;  %vm11803_vm6 = vcmask 786112  }
 0x32a   :  { %v4224_v51 = vrot.slane %v3565_v44, %v7819_v54  ;;  %v3569_v5 = vpop.xlane.xlu1 %3568  ;;  %v3446_v0 = vmul.f32 %v11788_v35, %v11470_v27  ;;  %v3357_v17 = vmul.f32 %v11789_v46, %v9012_v13  ;;  %v3883_v44 = vadd.f32 %v3882_v22, %v3399_v11  ;;  %v11792_v60 = vld [vmem:[#allocation159_spill] sm:$0xff] }
 0x32b   :  { %v4229_v57 = vrot.slane %v3569_v5, %v7827_v31  ;;  %v3886_v5 = vadd.f32 %v3401_v15, %v3400_v53  ;;  %v3404_v11 = vmul.f32 %v11796_v55, %v11470_v27  ;;  %v11798_v15 = vld [vmem:[#allocation291_spill] sm:$0xff]  ;;  %vm11807_vm7 = vcmask 851712  }
 0x32c   :  { %v4225_v10 = vsel %vm11783_vm14, %v4224_v51, %v4220_v38  ;;  %3880 = vadd.xlane.f32.xlu0 %v3879_v25  ;;  %v11791_v38 = vld [vmem:[#allocation355_spill] sm:$0xff]  ;;  %v3358_v51 = vmul.f32 %v11792_v60, %v11468_v47  ;;  %v11793_v25 = vld [vmem:[#allocation152_spill] sm:$0xff]  ;;  %v3946_v53 = vadd.f32 %v3446_v0, %v3445_v32  ;;  %vm11810_vm11 = vcmask 917312  }
 0x32d   :  { %v3573_v8 = vpop.xlane.xlu0 %3572  ;;  %v4230_v63 = vsel %vm11786_vm9, %v4229_v57, %v4225_v10  ;;  %3940 = vadd.xlane.f32.xlu1 %v3939_v9  ;;  %v3444_v36 = vmul.f32 %v11791_v38, %v9012_v13  ;;  %v3359_v61 = vmul.f32 %v11793_v25, %v11470_v27  ;;  %v3827_v57 = vadd.f32 %v3826_v42, %v3357_v17  ;;  %v11797_v9 = vld [vmem:[#allocation256_spill] sm:$0xff]  ;;  %v11800_v17 = vld [vmem:[#allocation289_spill] sm:$0xff] }
 0x32e   :  { %v4234_v3 = vrot.slane %v3573_v8, %v7851_v52  ;;  %v3577_v62 = vpop.xlane.xlu1 %3576  ;;  %v3402_v22 = vmul.f32 %v11797_v9, %v9012_v13  ;;  %v3447_v8 = vmul.f32 %v8825_v18, %v9012_v13  ;;  %v3361_v42 = vmul.f32 %v11800_v17, %v11468_v47  ;;  %v11801_v18 = vld [vmem:[#allocation290_spill] sm:$0xff]  ;;  %v11804_v25 = vld [vmem:[#allocation85_spill] sm:$0xff] }
 0x32f   :  { %v4239_v1 = vrot.slane %v3577_v62, %v7859_v30  ;;  %v3943_v49 = vadd.f32 %v3942_v4, %v3444_v36  ;;  %v3830_v46 = vadd.f32 %v3359_v61, %v3358_v51  ;;  %v3362_v32 = vmul.f32 %v11801_v18, %v11470_v27  ;;  %v11805_v61 = vld [vmem:[#allocation106_spill] sm:$0xff] }
 0x330   :  { %v4235_v58 = vsel %vm11790_vm15, %v4234_v3, %v4230_v63  ;;  %3824 = vadd.xlane.f32.xlu0 %v3823_v14  ;;  %v3448_v63 = vmul.f32 %v11798_v15, %v11468_v47  ;;  %v11799_v3 = vld [vmem:[#allocation351_spill] sm:$0xff]  ;;  %v3887_v62 = vadd.f32 %v3886_v5, %v3402_v22  ;;  %v3947_v60 = vadd.f32 %v3946_v53, %v3447_v8  ;;  %v11814_v18 = vld [vmem:[#allocation98_spill] sm:$0xff] }
 0x331   :  { %v3581_v33 = vpop.xlane.xlu0 %3580  ;;  %v4240_v56 = vsel %vm11794_vm10, %v4239_v1, %v4235_v58  ;;  %3884 = vadd.xlane.f32.xlu1 %v3883_v44  ;;  %v3449_v14 = vmul.f32 %v11799_v3, %v11470_v27  ;;  %v11802_v58 = vld [vmem:[#allocation342_spill] sm:$0xff]  ;;  %v3890_v44 = vadd.f32 %v3404_v11, %v3403_v41  ;;  %v3360_v51 = vmul.f32 %v11804_v25, %v9012_v13 }
 0x332   :  { %v4244_v43 = vrot.slane %v3581_v33, %v7887_v23  ;;  %v3585_v10 = vpop.xlane.xlu1 %3584  ;;  %v3405_v1 = vmul.f32 %v11802_v58, %v9012_v13  ;;  %v3406_v33 = vmul.f32 %v11805_v61, %v11468_v47  ;;  %v3451_v11 = vmul.f32 %v8704_v7, %v11468_v47  ;;  %v11811_v3 = vld [vmem:[#allocation294_spill] sm:$0xff]  ;;  %v11816_v58 = vld [vmem:[#allocation251_spill] sm:$0xff] }
 0x333   :  { %v4249_v6 = vrot.slane %v3585_v10, %v7893_v12  ;;  %v3831_v41 = vadd.f32 %v3830_v46, %v3360_v51  ;;  %v3950_v55 = vadd.f32 %v3449_v14, %v3448_v63  ;;  %v11808_v10 = vld [vmem:[#allocation116_spill] sm:$0xff]  ;;  %v3450_v15 = vmul.f32 %v8863_v20, %v9012_v13  ;;  %v11815_v20 = vld [vmem:[#allocation99_spill] sm:$0xff]  ;;  %v11818_v25 = vld [vmem:[#allocation286_spill] sm:$0xff] }
 0x334   :  { %v4245_v59 = vsel %vm2463_vm8, %v4244_v43, %v4240_v56  ;;  %3944 = vadd.xlane.f32.xlu0 %v3943_v49  ;;  %v11806_v56 = vld [vmem:[#allocation108_spill] sm:$0xff]  ;;  %v3891_v22 = vadd.f32 %v3890_v44, %v3405_v1  ;;  %v3834_v63 = vadd.f32 %v3362_v32, %v3361_v42  ;;  %v3364_v7 = vmul.f32 %v11811_v3, %v11468_v47  ;;  %v11819_v61 = vld [vmem:[#allocation171_spill] sm:$0xff] }
 0x335   :  { %v3589_v4 = vpop.xlane.xlu0 %3588  ;;  %v4250_v40 = vsel %vm2470_vm0, %v4249_v6, %v4245_v59  ;;  %3828 = vadd.xlane.f32.xlu1 %v3827_v57  ;;  %v3407_v43 = vmul.f32 %v11806_v56, %v11470_v27  ;;  %v3452_v57 = vmul.f32 %v11808_v10, %v11470_v27  ;;  %v11809_v59 = vld [vmem:[#allocation164_spill] sm:$0xff]  ;;  %vm11813_vm2 = vcmask 982912  }
 0x336   :  { %v4254_v35 = vrot.slane %v3589_v4, %v7921_v2  ;;  %v3593_v0 = vpop.xlane.xlu1 %3592  ;;  %v3363_v6 = vmul.f32 %v11809_v59, %v9012_v13  ;;  %v11812_v14 = vld [vmem:[#allocation296_spill] sm:$0xff]  ;;  %v3951_v46 = vadd.f32 %v3950_v55, %v3450_v15  ;;  %v3410_v42 = vmul.f32 %v11815_v20, %v11470_v27  ;;  %v11830_v20 = vld [vmem:[#allocation353_spill] sm:$0xff] }
 0x337   :  { %v4259_v36 = vrot.slane %v3593_v0, %v7927_v34  ;;  %v3365_v4 = vmul.f32 %v11812_v14, %v11470_v27  ;;  %v3894_v17 = vadd.f32 %v3407_v43, %v3406_v33  ;;  %v3409_v0 = vmul.f32 %v11814_v18, %v11468_v47 }
 0x338   :  { %v4255_v38 = vsel %vm11803_vm6, %v4254_v35, %v4250_v40  ;;  %3888 = vadd.xlane.f32.xlu0 %v3887_v62  ;;  %v3408_v1 = vmul.f32 %v11816_v58, %v9012_v13  ;;  %vm11817_vm12 = vcmask 1048512   ;;  %v3454_v51 = vmul.f32 %v11818_v25, %v11468_v47 }
 0x339   :  { %v3597_v49 = vpop.xlane.xlu0 %3596  ;;  %v4260_v5 = vsel %vm11807_vm7, %v4259_v36, %v4255_v38  ;;  %3948 = vadd.xlane.f32.xlu1 %v3947_v60  ;;  %v3835_v38 = vadd.f32 %v3834_v63, %v3363_v6  ;;  %v3453_v36 = vmul.f32 %v8869_v21, %v9012_v13  ;;  %v3954_v60 = vadd.f32 %v3452_v57, %v3451_v11  ;;  %v11821_v21 = vld [vmem:[#allocation52_spill] sm:$0xff]  ;;  %v11826_v63 = vld [vmem:[#allocation239_spill] sm:$0xff] }
 0x33a   :  { %v4264_v16 = vrot.slane %v3597_v49, %v7953_v19  ;;  %v3601_v9 = vpop.xlane.xlu1 %3600  ;;  %v3455_v33 = vmul.f32 %v11819_v61, %v11470_v27  ;;  %vm11820_vm1 = vcmask 1041409   ;;  %v3367_v55 = vmul.f32 %v11821_v21, %v11468_v47  ;;  %v11822_v11 = vld [vmem:[#allocation168_spill] sm:$0xff] }
 0x33b   :  { %v4269_v53 = vrot.slane %v3601_v9, %v7958_v50  ;;  %v3368_v10 = vmul.f32 %v11822_v11, %v11470_v27  ;;  %v11823_v9 = vld [vmem:[#allocation86_spill] sm:$0xff]  ;;  %vm11825_vm14 = vcmask 130112   ;;  %v3898_v15 = vadd.f32 %v3410_v42, %v3409_v0 }
 0x33c   :  { %v4265_v8 = vsel %vm11810_vm11, %v4264_v16, %v4260_v5  ;;  %3832 = vadd.xlane.f32.xlu0 %v3831_v41  ;;  %v3895_v16 = vadd.f32 %v3894_v17, %v3408_v1  ;;  %v3838_v41 = vadd.f32 %v3365_v4, %v3364_v7  ;;  %v3412_v3 = vmul.f32 %v11826_v63, %v11468_v47  ;;  %v11827_v7 = vld [vmem:[#allocation335_spill] sm:$0xff]  ;;  %v11829_v17 = vld [vmem:[#allocation352_spill] sm:$0xff] }
 0x33d   :  { %v3605_v40 = vpop.xlane.xlu0 %3604  ;;  %v4270_v35 = vsel %vm11813_vm2, %v4269_v53, %v4265_v8  ;;  %3892 = vadd.xlane.f32.xlu1 %v3891_v22  ;;  %v3366_v22 = vmul.f32 %v11823_v9, %v9012_v13  ;;  %v3955_v53 = vadd.f32 %v3954_v60, %v3453_v36  ;;  %v3413_v14 = vmul.f32 %v11827_v7, %v11470_v27  ;;  %v11833_v60 = vld [vmem:[#allocation359_spill] sm:$0xff] }
 0x33e   :  { %v4274_v62 = vrot.slane %v3605_v40, %v8004_v28  ;;  %v3609_v32 = vpop.xlane.xlu1 %3608  ;;  %vm11828_vm9 = vcmask 195712   ;;  %v3457_v18 = vmul.f32 %v11829_v17, %v11468_v47  ;;  %v3458_v0 = vmul.f32 %v11830_v20, %v11470_v27  ;;  %v11845_v20 = vld [vmem:[#allocation297_spill] sm:$0xff] }
 0x33f   :  { %v4279_v49 = vrot.slane %v3609_v32, %v7750_v26  ;;  %v11831_v32 = vld [vmem:[#allocation87_spill] sm:$0xff]  ;;  %v3842_v1 = vadd.f32 %v3368_v10, %v3367_v55  ;;  %vm11832_vm15 = vcmask 261312   ;;  %v3456_v25 = vmul.f32 %v11833_v60, %v9012_v13  ;;  %v11837_v55 = vld [vmem:[#allocation114_spill] sm:$0xff] }
 0x340   :  { %v4275_v44 = vsel %vm11817_vm12, %v4274_v62, %v4270_v35  ;;  %3952 = vadd.xlane.f32.xlu0 %v3951_v46  ;;  %v3839_v62 = vadd.f32 %v3838_v41, %v3366_v22  ;;  %v3958_v46 = vadd.f32 %v3455_v33, %v3454_v51  ;;  %v3369_v58 = vmul.f32 %v11831_v32, %v9012_v13  ;;  %v11834_v51 = vld [vmem:[#allocation300_spill] sm:$0xff]  ;;  %v11835_v33 = vld [vmem:[#allocation301_spill] sm:$0xff]  ;;  %v11838_v10 = vld [vmem:[#allocation215_spill] sm:$0xff] }
 0x341   :  { %v9866_v56 = vsel %vm11820_vm1, %v4275_v44, %v9729_v37  ;;  %v3613_v43 = vpop.xlane.xlu0 %3612  ;;  %3836 = vadd.xlane.f32.xlu1 %v3835_v38  ;;  %v11824_v37 = vld [vmem:[#allocation345_spill] sm:$0xff]  ;;  %v3370_v61 = vmul.f32 %v11834_v51, %v11468_v47  ;;  %vm11836_vm10 = vcmask 326912   ;;  %v3902_v21 = vadd.f32 %v3413_v14, %v3412_v3  ;;  %v11842_v3 = vld [vmem:[#allocation356_spill] sm:$0xff] }
 0x342   :  { %v4283_v5 = vrot.slane %v3613_v43, %v7753_v24  ;;  %v3617_v57 = vpop.xlane.xlu1 %3616  ;;  %v3411_v59 = vmul.f32 %v11824_v37, %v9012_v13  ;;  %v3371_v43 = vmul.f32 %v11835_v33, %v11470_v27  ;;  %v3959_v41 = vadd.f32 %v3958_v46, %v3456_v25  ;;  %v11839_v37 = vld [vmem:[#allocation101_spill] sm:$0xff] }
 0x343   :  { %v4288_v8 = vrot.slane %v3617_v57, %v7770_v39  ;;  %v3415_v11 = vmul.f32 %v11837_v55, %v11468_v47  ;;  %v3416_v57 = vmul.f32 %v11838_v10, %v11470_v27  ;;  %v3843_v22 = vadd.f32 %v3842_v1, %v3369_v58  ;;  %v11843_v14 = vld [vmem:[#allocation357_spill] sm:$0xff]  ;;  %v11847_v58 = vld [vmem:[#allocation100_spill] sm:$0xff]  ;;  %v11853_v10 = vld [vmem:[#allocation295_spill] sm:$0xff] }
 0x344   :  { %v4284_v6 = vsel %vm11825_vm14, %v4283_v5, %v4279_v49  ;;  %3896 = vadd.xlane.f32.xlu0 %v3895_v16  ;;  %v3899_v36 = vadd.f32 %v3898_v15, %v3411_v59  ;;  %v3414_v59 = vmul.f32 %v11839_v37, %v9012_v13  ;;  %vm11840_vm6 = vcmask 392512   ;;  %v11846_v32 = vld [vmem:[#allocation25_spill] sm:$0xff]  ;;  %v11855_v37 = vld [vmem:[#allocation102_spill] sm:$0xff] }
 0x345   :  { %v3621_v4 = vpop.xlane.xlu0 %3620  ;;  %v4289_v40 = vsel %vm11828_vm9, %v4288_v8, %v4284_v6  ;;  %3956 = vadd.xlane.f32.xlu1 %v3955_v53  ;;  %v11841_v53 = vld [vmem:[#allocation360_spill] sm:$0xff]  ;;  %v3962_v63 = vadd.f32 %v3458_v0, %v3457_v18  ;;  %v3460_v7 = vmul.f32 %v11842_v3, %v11468_v47  ;;  %vm11844_vm7 = vcmask 458112  }
 0x346   :  { %v4293_v35 = vrot.slane %v3621_v4, %v7787_v29  ;;  %v3625_v42 = vpop.xlane.xlu1 %3624  ;;  %v3459_v15 = vmul.f32 %v11841_v53, %v9012_v13  ;;  %v3461_v4 = vmul.f32 %v11843_v14, %v11470_v27  ;;  %v3903_v46 = vadd.f32 %v3902_v21, %v3414_v59 }
 0x347   :  { %v4298_v38 = vrot.slane %v3625_v42, %v7793_v48  ;;  %v3846_v17 = vadd.f32 %v3371_v43, %v3370_v61  ;;  %v3373_v42 = vmul.f32 %v11845_v20, %v11468_v47  ;;  %v3374_v18 = vmul.f32 %v11846_v32, %v11470_v27  ;;  %v11850_v61 = vld [vmem:[#allocation338_spill] sm:$0xff]  ;;  %v11851_v43 = vld [vmem:[#allocation249_spill] sm:$0xff] }
 0x348   :  { %v4294_v44 = vsel %vm11832_vm15, %v4293_v35, %v4289_v40  ;;  %3840 = vadd.xlane.f32.xlu0 %v3839_v62  ;;  %v3372_v1 = vmul.f32 %v11847_v58, %v9012_v13  ;;  %vm11849_vm11 = vcmask 523712   ;;  %v3963_v25 = vadd.f32 %v3962_v63, %v3459_v15  ;;  %v11856_v63 = vld [vmem:[#allocation318_spill] sm:$0xff] }
 0x349   :  { %v3629_v49 = vpop.xlane.xlu0 %3628  ;;  %v4299_v5 = vsel %vm11836_vm10, %v4298_v38, %v4294_v44  ;;  %3900 = vadd.xlane.f32.xlu1 %v3899_v36  ;;  %v11848_v44 = vld [vmem:[#allocation261_spill] sm:$0xff]  ;;  %v3906_v51 = vadd.f32 %v3416_v57, %v3415_v11  ;;  %v3418_v33 = vmul.f32 %v11850_v61, %v11468_v47  ;;  %vm11852_vm2 = vcmask 589312  }
 0x34a   :  { %v4303_v16 = vrot.slane %v3629_v49, %v7819_v54  ;;  %v3633_v9 = vpop.xlane.xlu1 %3632  ;;  %v3417_v38 = vmul.f32 %v11848_v44, %v9012_v13  ;;  %v3419_v49 = vmul.f32 %v11851_v43, %v11470_v27  ;;  %v3847_v21 = vadd.f32 %v3846_v17, %v3372_v1  ;;  %v11861_v44 = vld [vmem:[#allocation274_spill] sm:$0xff] }
 0x34b   :  { %v4308_v8 = vrot.slane %v3633_v9, %v7827_v31  ;;  %v3966_v55 = vadd.f32 %v3461_v4, %v3460_v7  ;;  %v3463_v9 = vmul.f32 %v11853_v10, %v11468_v47  ;;  %v3375_v59 = vmul.f32 %v11855_v37, %v9012_v13  ;;  %v11857_v7 = vld [vmem:[#allocation306_spill] sm:$0xff]  ;;  %v11858_v4 = vld [vmem:[#allocation307_spill] sm:$0xff] }
 0x34c   :  { %v4304_v6 = vsel %vm11840_vm6, %v4303_v16, %v4299_v5  ;;  %3960 = vadd.xlane.f32.xlu0 %v3959_v41  ;;  %v3907_v15 = vadd.f32 %v3906_v51, %v3417_v38  ;;  %v3462_v3 = vmul.f32 %v11856_v63, %v9012_v13  ;;  %v3376_v14 = vmul.f32 %v11857_v7, %v11468_v47  ;;  %v11868_v37 = vld [vmem:[#allocation302_spill] sm:$0xff] }
 0x34d   :  { %v3637_v40 = vpop.xlane.xlu0 %3636  ;;  %v4309_v35 = vsel %vm11844_vm7, %v4308_v8, %v4304_v6  ;;  %3844 = vadd.xlane.f32.xlu1 %v3843_v22  ;;  %v11854_v22 = vld [vmem:[#allocation354_spill] sm:$0xff]  ;;  %v3850_v6 = vadd.f32 %v3374_v18, %v3373_v42  ;;  %v3910_v20 = vadd.f32 %v3419_v49, %v3418_v33  ;;  %v11859_v42 = vld [vmem:[#allocation232_spill] sm:$0xff]  ;;  %v3420_v38 = vmul.f32 %v11861_v44, %v9012_v13  ;;  %v11865_v49 = vld [vmem:[#allocation361_spill] sm:$0xff] }
 0x34e   :  { %v4313_v62 = vrot.slane %v3637_v40, %v7851_v52  ;;  %v3641_v0 = vpop.xlane.xlu1 %3640  ;;  %v3464_v11 = vmul.f32 %v11854_v22, %v11470_v27  ;;  %v3377_v40 = vmul.f32 %v11858_v4, %v11470_v27  ;;  %v3967_v17 = vadd.f32 %v3966_v55, %v3462_v3  ;;  %v11860_v18 = vld [vmem:[#allocation336_spill] sm:$0xff]  ;;  %v11864_v33 = vld [vmem:[#allocation358_spill] sm:$0xff]  ;;  %v11867_v22 = vld [vmem:[#allocation187_spill] sm:$0xff] }
 0x34f   :  { %v4318_v60 = vrot.slane %v3641_v0, %v7859_v30  ;;  %v3421_v32 = vmul.f32 %v11859_v42, %v11468_v47  ;;  %v3422_v0 = vmul.f32 %v11860_v18, %v11470_v27  ;;  %v3851_v1 = vadd.f32 %v3850_v6, %v3375_v59  ;;  %v11869_v59 = vld [vmem:[#allocation45_spill] sm:$0xff]  ;;  %v11875_v18 = vld [vmem:[#allocation194_spill] sm:$0xff] }
 0x350   :  { %v4314_v36 = vsel %vm11849_vm11, %v4313_v62, %v4309_v35  ;;  %3904 = vadd.xlane.f32.xlu0 %v3903_v46  ;;  %vm11862_vm12 = vcmask 786112   ;;  %v3970_v61 = vadd.f32 %v3464_v11, %v3463_v9  ;;  %v3466_v43 = vmul.f32 %v11864_v33, %v11468_v47  ;;  %v11877_v44 = vld [vmem:[#allocation366_spill] sm:$0xff]  ;;  %v11880_v33 = vld [vmem:[#allocation340_spill] sm:$0xff] }
 0x351   :  { %v3645_v5 = vpop.xlane.xlu0 %3644  ;;  %v4319_v16 = vsel %vm11852_vm2, %v4318_v60, %v4314_v36  ;;  %3964 = vadd.xlane.f32.xlu1 %v3963_v25  ;;  %v11863_v25 = vld [vmem:[#allocation314_spill] sm:$0xff]  ;;  %vm11866_vm1 = vcmask 851712   ;;  %v3911_v55 = vadd.f32 %v3910_v20, %v3420_v38  ;;  %v3854_v10 = vadd.f32 %v3377_v40, %v3376_v14  ;;  %v11872_v14 = vld [vmem:[#allocation343_spill] sm:$0xff]  ;;  %v11873_v40 = vld [vmem:[#allocation344_spill] sm:$0xff] }
 0x352   :  { %v4323_v41 = vrot.slane %v3645_v5, %v7887_v23  ;;  %v3649_v57 = vpop.xlane.xlu1 %3648  ;;  %v3465_v51 = vmul.f32 %v11863_v25, %v9012_v13  ;;  %v3467_v5 = vmul.f32 %v11865_v49, %v11470_v27  ;;  %v3380_v9 = vmul.f32 %v11868_v37, %v11470_v27  ;;  %v11879_v25 = vld [vmem:[#allocation113_spill] sm:$0xff] }
 0x353   :  { %v4328_v53 = vrot.slane %v3649_v57, %v7893_v12  ;;  %v3379_v57 = vmul.f32 %v11867_v22, %v11468_v47  ;;  %v3378_v6 = vmul.f32 %v11869_v59, %v9012_v13  ;;  %vm11871_vm14 = vcmask 917312   ;;  %v11881_v49 = vld [vmem:[#allocation341_spill] sm:$0xff] }
 0x354   :  { %v4324_v8 = vsel %vm2463_vm8, %v4323_v41, %v4319_v16  ;;  %3848 = vadd.xlane.f32.xlu0 %v3847_v21  ;;  %v3971_v3 = vadd.f32 %v3970_v61, %v3465_v51  ;;  %v3914_v7 = vadd.f32 %v3422_v0, %v3421_v32  ;;  %v3424_v4 = vmul.f32 %v11872_v14, %v11468_v47  ;;  %v11887_v14 = vld [vmem:[#allocation362_spill] sm:$0xff] }
 0x355   :  { %v3653_v35 = vpop.xlane.xlu0 %3652  ;;  %v4329_v62 = vsel %vm2470_vm0, %v4328_v53, %v4324_v8  ;;  %3908 = vadd.xlane.f32.xlu1 %v3907_v15  ;;  %v11870_v8 = vld [vmem:[#allocation346_spill] sm:$0xff]  ;;  %vm11874_vm9 = vcmask 982912   ;;  %v3855_v20 = vadd.f32 %v3854_v10, %v3378_v6  ;;  %v3974_v42 = vadd.f32 %v3467_v5, %v3466_v43  ;;  %v11884_v6 = vld [vmem:[#allocation284_spill] sm:$0xff] }
 0x356   :  { %v4333_v46 = vrot.slane %v3653_v35, %v7921_v2  ;;  %v3657_v58 = vpop.xlane.xlu1 %3656  ;;  %v3423_v53 = vmul.f32 %v11870_v8, %v9012_v13  ;;  %v3425_v35 = vmul.f32 %v11873_v40, %v11470_v27  ;;  %v3468_v38 = vmul.f32 %v11877_v44, %v9012_v13 }
 0x357   :  { %v4338_v60 = vrot.slane %v3657_v58, %v7927_v34  ;;  %v3469_v58 = vmul.f32 %v11875_v18, %v11468_v47  ;;  %vm11878_vm15 = vcmask 1048512   ;;  %v3381_v51 = vmul.f32 %v11879_v25, %v9012_v13 }
 0x358   :  { %v4334_v36 = vsel %vm11862_vm12, %v4333_v46, %v4329_v62  ;;  %3968 = vadd.xlane.f32.xlu0 %v3967_v17  ;;  %v3858_v61 = vadd.f32 %v3380_v9, %v3379_v57  ;;  %v3427_v43 = vmul.f32 %v11880_v33, %v11468_v47  ;;  %v3428_v5 = vmul.f32 %v11881_v49, %v11470_v27  ;;  %v11882_v57 = vld [vmem:[#allocation363_spill] sm:$0xff]  ;;  %v11883_v9 = vld [vmem:[#allocation364_spill] sm:$0xff] }
 0x359   :  { %v3661_v16 = vpop.xlane.xlu0 %3660  ;;  %v4339_v41 = vsel %vm11866_vm1, %v4338_v60, %v4334_v36  ;;  %3852 = vadd.xlane.f32.xlu1 %v3851_v1  ;;  %v11876_v1 = vld [vmem:[#allocation303_spill] sm:$0xff]  ;;  %v3915_v60 = vadd.f32 %v3914_v7, %v3423_v53  ;;  %v3975_v10 = vadd.f32 %v3974_v42, %v3468_v38  ;;  %v3918_v22 = vadd.f32 %v3425_v35, %v3424_v4  ;;  %v11888_v35 = vld [vmem:[#allocation349_spill] sm:$0xff] }
 0x35a   :  { %v4343_v21 = vrot.slane %v3661_v16, %v7953_v19  ;;  %v3665_v11 = vpop.xlane.xlu1 %3664  ;;  %v3470_v32 = vmul.f32 %v11876_v1, %v11470_v27  ;;  %v3472_v37 = vmul.f32 %v11882_v57, %v11468_v47  ;;  %v3426_v8 = vmul.f32 %v11884_v6, %v9012_v13 }
 0x35b   :  { %v4348_v63 = vrot.slane %v3665_v11, %v7958_v50  ;;  %v3473_v11 = vmul.f32 %v11883_v9, %v11470_v27  ;;  %v3475_v4 = vmul.f32 %v11887_v14, %v11468_v47  ;;  %vm11890_vm10 = vcmask 195712  }
 0x35c   :  { %v4344_v15 = vsel %vm11871_vm14, %v4343_v21, %v4339_v41  ;;  %3912 = vadd.xlane.f32.xlu0 %v3911_v55  ;;  %v3978_v7 = vadd.f32 %v3470_v32, %v3469_v58  ;;  %v3919_v1 = vadd.f32 %v3918_v22, %v3426_v8  ;;  %vm11891_vm6 = vcmask 261312  }
 0x35d   :  { %v3669_v62 = vpop.xlane.xlu0 %3668  ;;  %v4349_v46 = vsel %vm11874_vm9, %v4348_v63, %v4344_v15  ;;  %3972 = vadd.xlane.f32.xlu1 %v3971_v3  ;;  %v3859_v3 = vadd.f32 %v3858_v61, %v3381_v51  ;;  %v3982_v44 = vadd.f32 %v3473_v11, %v3472_v37  ;;  %vm11893_vm7 = vcmask 326912   ;;  %v11894_v61 = vld [vmem:[#allocation368_spill] sm:$0xff] }
 0x35e   :  { %v4353_v17 = vrot.slane %v3669_v62, %v8004_v28  ;;  %v3673_v0 = vpop.xlane.xlu1 %3672  ;;  %v3429_v62 = vmul.f32 %v11888_v35, %v9012_v13  ;;  %v3477_v33 = vmul.f32 %v11894_v61, %v9012_v13  ;;  %vm11895_vm11 = vcmask 392512  }
 0x35f   :  { %v4358_v21 = vrot.slane %v3673_v0, %v7750_v26  ;;  %vm11896_vm2 = vcmask 458112   ;;  %vm11897_vm12 = vcmask 523712   ;;  %vm11898_vm1 = vcmask 589312  }
 0x360   :  { %v4354_v36 = vsel %vm11878_vm15, %v4353_v17, %v4349_v46  ;;  %3856 = vadd.xlane.f32.xlu0 %v3855_v20  ;;  %v3922_v46 = vadd.f32 %v3428_v5, %v3427_v43  ;;  %v11889_v17 = vld [vmem:[#allocation365_spill] sm:$0xff]  ;;  %vm11899_vm14 = vcmask 786112   ;;  %vm11900_vm9 = vcmask 851712  }
 0x361   :  { %v9997_v16 = vsel %vm3062_vm3, %v4354_v36, %v9866_v56  ;;  %v3677_v41 = vpop.xlane.xlu0 %3676  ;;  %3916 = vadd.xlane.f32.xlu1 %v3915_v60  ;;  %v11885_v56 = vld [vmem:[#allocation367_spill] sm:$0xff]  ;;  %vm11886_vm3 = vcmask 130112   ;;  %v3476_v20 = vmul.f32 %v11889_v17, %v11470_v27  ;;  %v11892_v60 = vld [vmem:[#allocation17_spill] sm:$0xff]  ;;  %vm11901_vm15 = vcmask 917312  }
 0x362   :  { %v4362_v55 = vrot.slane %v3677_v41, %v7753_v24  ;;  %v3681_v59 = vpop.xlane.xlu1 %3680  ;;  %v3471_v53 = vmul.f32 %v11885_v56, %v9012_v13  ;;  %v3923_v36 = vadd.f32 %v3922_v46, %v3429_v62  ;;  %v3474_v25 = vmul.f32 %v11892_v60, %v9012_v13 }
 0x363   :  { %v4367_v63 = vrot.slane %v3681_v59, %v7770_v39  ;;  %v3986_v43 = vadd.f32 %v3476_v20, %v3475_v4 }
 0x364   :  { %v4363_v15 = vsel %vm11886_vm3, %v4362_v55, %v4358_v21  ;;  %3976 = vadd.xlane.f32.xlu0 %v3975_v10  ;;  %v3979_v47 = vadd.f32 %v3978_v7, %v3471_v53  ;;  %v3983_v21 = vadd.f32 %v3982_v44, %v3474_v25  ;;  %vm11902_vm3 = vcmask 982912  }
 0x365   :  { %v3685_v40 = vpop.xlane.xlu0 %3684  ;;  %v4368_v42 = vsel %vm11890_vm10, %v4367_v63, %v4363_v15  ;;  %3860 = vadd.xlane.f32.xlu1 %v3859_v3  ;;  %v3987_v57 = vadd.f32 %v3986_v43, %v3477_v33  ;;  %vm3070_vm10 = vcmask 1046534  }
 0x366   :  { %v4372_v18 = vrot.slane %v3685_v40, %v7787_v29  ;;  %v3689_v0 = vpop.xlane.xlu1 %3688 }
 0x367   :  { %v4377_v32 = vrot.slane %v3689_v0, %v7793_v48 }
 0x368   :  { %v4373_v58 = vsel %vm11891_vm6, %v4372_v18, %v4368_v42  ;;  %3920 = vadd.xlane.f32.xlu0 %v3919_v1  ;;  %vm3072_vm6 = vcmask 1047559  }
 0x369   :  { %v3693_v38 = vpop.xlane.xlu0 %3692  ;;  %v4378_v27 = vsel %vm11893_vm7, %v4377_v32, %v4373_v58  ;;  %3980 = vadd.xlane.f32.xlu1 %v3979_v47  ;;  %v11903_v58 = vld [vmem:[#allocation66_spill] sm:$0xff]  ;;  %v11904_v32 = vld [vmem:[#allocation84_spill] sm:$0xff]  ;;  %vm11905_vm7 = vcmask 1048512  }
 0x36a   :  { %v4382_v51 = vrot.slane %v3693_v38, %v7819_v54  ;;  %v3697_v49 = vpop.xlane.xlu1 %3696  ;;  %v3071_v47 = vsel %vm3070_vm10, %v11904_v32, %v11903_v58 }
 0x36b   :  { %v4387_v41 = vrot.slane %v3697_v49, %v7827_v31  ;;  %v3073_v38 = vsel %vm3072_vm6, %v9600_v45, %v3071_v47 }
 0x36c   :  { %v4383_v5 = vsel %vm11895_vm11, %v4382_v51, %v4378_v27  ;;  %3924 = vadd.xlane.f32.xlu0 %v3923_v36  ;;  %v5183_v25 = vtrunc.f32 %v3073_v38  ;;  %vm11906_vm11 = vcmask 130112  }
 0x36d   :  { %v3701_v55 = vpop.xlane.xlu0 %3700  ;;  %v4388_v10 = vsel %vm11896_vm2, %v4387_v41, %v4383_v5  ;;  %3984 = vadd.xlane.f32.xlu1 %v3983_v21  ;;  %vm11907_vm2 = vcmask 195712  }
 0x36e   :  { %v4392_v22 = vrot.slane %v3701_v55, %v7851_v52  ;;  %v3705_v37 = vpop.xlane.xlu1 %3704  ;;  %v5184_v33 = vcvt.f32.s32 %v5183_v25 }
 0x36f   :  { %v4397_v13 = vrot.slane %v3705_v37, %v7859_v30 }
 0x370   :  { %v4393_v9 = vsel %vm11897_vm12, %v4392_v22, %v4388_v10  ;;  %3988 = vadd.xlane.f32.xlu0 %v3987_v57  ;;  %4765 = vst [vmem:[#allocation9] sm:$0xff] %v5184_v33 }
 0x371   :  { %v3709_v11 = vpop.xlane.xlu0 %3708  ;;  %v4398_v59 = vsel %vm11898_vm1, %v4397_v13, %v4393_v9 }
 0x372   :  { %v4402_v6 = vrot.slane %v3709_v11, %v7887_v23  ;;  %v3713_v8 = vpop.xlane.xlu1 %3712 }
 0x373   :  { %v4407_v53 = vrot.slane %v3713_v8, %v7893_v12 }
 0x374   :  { %v4403_v56 = vsel %vm2463_vm8, %v4402_v6, %v4398_v59 }
 0x375   :  { %v3717_v15 = vpop.xlane.xlu0 %3716  ;;  %v4408_v63 = vsel %vm2470_vm0, %v4407_v53, %v4403_v56 }
 0x376   :  { %v4412_v3 = vrot.slane %v3717_v15, %v7921_v2  ;;  %v3721_v7 = vpop.xlane.xlu1 %3720 }
 0x377   :  { %v4417_v4 = vrot.slane %v3721_v7, %v7927_v34 }
 0x378   :  { %v4413_v14 = vsel %vm11899_vm14, %v4412_v3, %v4408_v63 }
 0x379   :  { %v3725_v40 = vpop.xlane.xlu0 %3724  ;;  %v4418_v35 = vsel %vm11900_vm9, %v4417_v4, %v4413_v14 }
 0x37a   :  { %v4422_v62 = vrot.slane %v3725_v40, %v7953_v19  ;;  %v3729_v46 = vpop.xlane.xlu1 %3728 }
 0x37b   :  { %v4427_v20 = vrot.slane %v3729_v46, %v7958_v50 }
 0x37c   :  { %v4423_v17 = vsel %vm11901_vm15, %v4422_v62, %v4418_v35 }
 0x37d   :  { %v3733_v42 = vpop.xlane.xlu0 %3732  ;;  %v4428_v18 = vsel %vm11902_vm3, %v4427_v20, %v4423_v17 }
 0x37e   :  { %v4432_v1 = vrot.slane %v3733_v42, %v8004_v28  ;;  %v3737_v0 = vpop.xlane.xlu1 %3736 }
 0x37f   :  { %v4437_v27 = vrot.slane %v3737_v0, %v7750_v26 }
 0x380   :  { %v4433_v44 = vsel %vm11905_vm7, %v4432_v1, %v4428_v18 }
 0x381   :  { %v10055_v36 = vsel %vm3064_vm13, %v4433_v44, %v9997_v16  ;;  %v3741_v60 = vpop.xlane.xlu0 %3740 }
 0x382   :  { %v4441_v51 = vrot.slane %v3741_v60, %v7753_v24  ;;  %v3745_v61 = vpop.xlane.xlu1 %3744 }
 0x383   :  { %v4446_v49 = vrot.slane %v3745_v61, %v7770_v39 }
 0x384   :  { %v4442_v43 = vsel %vm11906_vm11, %v4441_v51, %v4437_v27 }
 0x385   :  { %v3749_v45 = vpop.xlane.xlu0 %3748  ;;  %v4447_v5 = vsel %vm11907_vm2, %v4446_v49, %v4442_v43 }
 0x386   :  { %v4451_v16 = vrot.slane %v3749_v45, %v7787_v29 }
 0x387   :  { %5246 = shalt.err (!%p5243_p6)
}
 0x388   :  { %s5247_s20 = scalar_lea.hbm %s10258_s3, 128 }
 0x389   :  { %p5248_p7 = scmp.ne.s32.totalorder %s10258_s3, %s5247_s20  ;;  %p5251_p8 = scmp.lt.u32.totalorder %s5247_s20, %s10258_s3 }
 0x38b   :  { %p5253_p9 = pnand %p5251_p8, %p5248_p7 }
 0x38d   :  { %5256 = shalt.err (!%p5253_p9)
}
 0x38e   :  { %4778 = dma.vmem_to_hbm [thread:$0]  %s4776_s16, 128, %s10258_s3, [#allocation6]   ;;  %v3753_v41 = vpop.xlane.xlu1 %3752  ;;  %vm11908_vm13 = vcmask 261312   ;;  %v3757_v10 = vpop.xlane.xlu0 %3756  ;;  %vm11909_vm12 = vcmask 326912   ;;  %vm11910_vm1 = vcmask 392512   ;;  %vm11911_vm14 = vcmask 458112  }
 0x38f   :  { %v4452_v21 = vsel %vm11908_vm13, %v4451_v16, %v4447_v5  ;;  %v4456_v55 = vrot.slane %v3753_v41, %v7793_v48  ;;  %v4461_v57 = vrot.slane %v3757_v10, %v7819_v54  ;;  %vm11912_vm9 = vcmask 523712   ;;  %s5291_s3 = smov [#allocation10]  }
 0x390   :  { %vm11913_vm15 = vcmask 589312   ;;  %vm11914_vm3 = vcmask 786112   ;;  %vm11915_vm7 = vcmask 851712   ;;  %vm11916_vm11 = vcmask 917312   ;;  %s4785_s27 = sshll.u32 %s5291_s3, 4  ;;  %s4786_s27 = int_to_ptr.vmem [resolvable:$true] %s4785_s27 }
 0x391   :  { %v4457_v22 = vsel %vm11909_vm12, %v4456_v55, %v4452_v21  ;;  %vm11917_vm2 = vcmask 982912   ;;  %vm11918_vm13 = vcmask 1048512   ;;  %vm11919_vm12 = vcmask 130112   ;;  %s5257_s28 = scalar_lea.vmem %s4786_s27, 128  ;;  %p5262_p11 = scmp.lt.s32.totalorder %s4786_s27, %s4786_s27 }
 0x392   :  { %v3761_v37 = vpop.xlane.xlu1 %3760  ;;  %v4462_v9 = vsel %vm11910_vm1, %v4461_v57, %v4457_v22  ;;  %v3765_v11 = vpop.xlane.xlu0 %3764  ;;  %vm11920_vm1 = vcmask 195712   ;;  %p5258_p10 = scmp.ne.s32.totalorder %s4786_s27, %s5257_s28  ;;  %p5263_p12 = scmp.lt.s32.totalorder %s5257_s28, %s5257_s28 }
 0x393   :  { %v4466_v13 = vrot.slane %v3761_v37, %v7827_v31  ;;  %v4471_v6 = vrot.slane %v3765_v11, %v7851_v52 }
 0x394   :  { %p5264_p13 = por %p5263_p12, %p5262_p11 }
 0x395   :  { %v4467_v59 = vsel %vm11911_vm14, %v4466_v13, %v4462_v9  ;;  %vm11922_vm14 = vcmask 261312  }
 0x396   :  { %v3769_v8 = vpop.xlane.xlu1 %3768  ;;  %v4472_v56 = vsel %vm11912_vm9, %v4471_v6, %v4467_v59  ;;  %v3773_v15 = vpop.xlane.xlu0 %3772  ;;  %vm11923_vm9 = vmmov %vm11920_vm1  ;;  %p5265_p0 = pnand %p5264_p13, %p5258_p10 }
 0x397   :  { %v4476_v53 = vrot.slane %v3769_v8, %v7859_v30  ;;  %v4481_v3 = vrot.slane %v3773_v15, %v7887_v23 }
 0x399   :  { %v4477_v63 = vsel %vm11913_vm15, %v4476_v53, %v4472_v56 }
 0x39a   :  { %v3777_v7 = vpop.xlane.xlu1 %3776  ;;  %v4482_v14 = vsel %vm2463_vm8, %v4481_v3, %v4477_v63  ;;  %v3781_v40 = vpop.xlane.xlu0 %3780 }
 0x39b   :  { %v4486_v4 = vrot.slane %v3777_v7, %v7893_v12  ;;  %v4491_v62 = vrot.slane %v3781_v40, %v7921_v2 }
 0x39d   :  { %v4487_v35 = vsel %vm2470_vm0, %v4486_v4, %v4482_v14 }
 0x39e   :  { %v3785_v46 = vpop.xlane.xlu1 %3784  ;;  %v4492_v17 = vsel %vm11914_vm3, %v4491_v62, %v4487_v35  ;;  %v3789_v42 = vpop.xlane.xlu0 %3788  ;;  %vm11925_vm3 = vcmask 326912  }
 0x39f   :  { %v4496_v20 = vrot.slane %v3785_v46, %v7927_v34  ;;  %v4501_v1 = vrot.slane %v3789_v42, %v7953_v19 }
 0x3a1   :  { %v4497_v18 = vsel %vm11915_vm7, %v4496_v20, %v4492_v17  ;;  %vm11926_vm7 = vmmov %vm11922_vm14 }
 0x3a2   :  { %v3793_v0 = vpop.xlane.xlu1 %3792  ;;  %v4502_v58 = vsel %vm11916_vm11, %v4501_v1, %v4497_v18  ;;  %v3797_v47 = vpop.xlane.xlu0 %3796  ;;  %vm11927_vm11 = vmmov %vm11920_vm1 }
 0x3a3   :  { %v4506_v32 = vrot.slane %v3793_v0, %v7958_v50  ;;  %v4511_v38 = vrot.slane %v3797_v47, %v8004_v28 }
 0x3a5   :  { %v4507_v44 = vsel %vm11917_vm2, %v4506_v32, %v4502_v58  ;;  %vm11928_vm2 = vcmask 392512  }
 0x3a6   :  { %v3801_v60 = vpop.xlane.xlu1 %3800  ;;  %v4512_v25 = vsel %vm11918_vm13, %v4511_v38, %v4507_v44  ;;  %v3805_v51 = vpop.xlane.xlu0 %3804  ;;  %vm11929_vm13 = vmmov %vm11925_vm3 }
 0x3a7   :  { %v10102_v27 = vsel %vm3066_vm4, %v4512_v25, %v10055_v36  ;;  %v4516_v61 = vrot.slane %v3801_v60, %v7750_v26  ;;  %v4520_v33 = vrot.slane %v3805_v51, %v7753_v24  ;;  %vm11921_vm4 = vmmov %vm11919_vm12 }
 0x3a8   :  { %vm11924_vm15 = vmmov %vm11921_vm4 }
 0x3a9   :  { %v4521_v49 = vsel %vm11919_vm12, %v4520_v33, %v4516_v61  ;;  %vm11930_vm12 = vcmask 458112  }
 0x3aa   :  { %v3809_v43 = vpop.xlane.xlu1 %3808  ;;  %v3865_v5 = vpop.xlane.xlu0 %3864 }
 0x3ab   :  { %v4525_v45 = vrot.slane %v3809_v43, %v7770_v39  ;;  %v4595_v41 = vrot.slane %v3865_v5, %v7750_v26 }
 0x3ad   :  { %v4526_v16 = vsel %vm11920_vm1, %v4525_v45, %v4521_v49  ;;  %vm11931_vm1 = vcmask 523712  }
 0x3ae   :  { %v3869_v21 = vpop.xlane.xlu1 %3868  ;;  %v3813_v36 = vpop.xlane.xlu0 %3812 }
 0x3af   :  { %v4599_v55 = vrot.slane %v3869_v21, %v7753_v24  ;;  %v4530_v22 = vrot.slane %v3813_v36, %v7787_v29 }
 0x3b1   :  { %v4600_v10 = vsel %vm11921_vm4, %v4599_v55, %v4595_v41  ;;  %v4531_v37 = vsel %vm11922_vm14, %v4530_v22, %v4526_v16  ;;  %vm11932_vm4 = vcmask 589312   ;;  %vm11933_vm14 = vmmov %vm11926_vm7 }
 0x3b2   :  { %v3873_v57 = vpop.xlane.xlu1 %3872  ;;  %v3929_v13 = vpop.xlane.xlu0 %3928 }
 0x3b3   :  { %v4604_v9 = vrot.slane %v3873_v57, %v7770_v39  ;;  %v4674_v51 = vrot.slane %v3929_v13, %v7750_v26 }
 0x3b5   :  { %v4605_v11 = vsel %vm11923_vm9, %v4604_v9, %v4600_v10  ;;  %vm11934_vm9 = vmmov %vm11928_vm2 }
 0x3b6   :  { %v3933_v59 = vpop.xlane.xlu1 %3932  ;;  %v3817_v6 = vpop.xlane.xlu0 %3816 }
 0x3b7   :  { %v4678_v61 = vrot.slane %v3933_v59, %v7753_v24  ;;  %v4535_v33 = vrot.slane %v3817_v6, %v7793_v48 }
 0x3b9   :  { %v4679_v55 = vsel %vm11924_vm15, %v4678_v61, %v4674_v51  ;;  %v4536_v24 = vsel %vm11925_vm3, %v4535_v33, %v4531_v37  ;;  %vm11935_vm15 = vmmov %vm11925_vm3 }
 0x3ba   :  { %v3877_v8 = vpop.xlane.xlu1 %3876  ;;  %v3937_v56 = vpop.xlane.xlu0 %3936  ;;  %vm11936_vm3 = vmmov %vm11930_vm12 }
 0x3bb   :  { %v4609_v43 = vrot.slane %v3877_v8, %v7787_v29  ;;  %v4683_v49 = vrot.slane %v3937_v56, %v7770_v39 }
 0x3bd   :  { %v4610_v36 = vsel %vm11926_vm7, %v4609_v43, %v4605_v11  ;;  %v4684_v10 = vsel %vm11927_vm11, %v4683_v49, %v4679_v55  ;;  %vm11937_vm7 = vmmov %vm11928_vm2  ;;  %vm11938_vm11 = vcmask 786112  }
 0x3be   :  { %v3821_v53 = vpop.xlane.xlu1 %3820  ;;  %v3881_v15 = vpop.xlane.xlu0 %3880 }
 0x3bf   :  { %v4540_v5 = vrot.slane %v3821_v53, %v7819_v54  ;;  %v4614_v16 = vrot.slane %v3881_v15, %v7793_v48 }
 0x3c1   :  { %v4541_v57 = vsel %vm11928_vm2, %v4540_v5, %v4536_v24  ;;  %v4615_v6 = vsel %vm11929_vm13, %v4614_v16, %v4610_v36  ;;  %vm11939_vm2 = vmmov %vm11931_vm1 }
 0x3c2   :  { %v3941_v63 = vpop.xlane.xlu1 %3940  ;;  %v3825_v3 = vpop.xlane.xlu0 %3824  ;;  %vm11940_vm13 = vmmov %vm11936_vm3 }
 0x3c3   :  { %v4545_v41 = vrot.slane %v3825_v3, %v7827_v31  ;;  %v4688_v9 = vrot.slane %v3941_v63, %v7787_v29 }
 0x3c5   :  { %v4546_v37 = vsel %vm11930_vm12, %v4545_v41, %v4541_v57  ;;  %vm11941_vm12 = vcmask 851712  }
 0x3c6   :  { %v3885_v7 = vpop.xlane.xlu1 %3884  ;;  %v3945_v14 = vpop.xlane.xlu0 %3944 }
 0x3c7   :  { %v4619_v13 = vrot.slane %v3885_v7, %v7819_v54  ;;  %v4693_v11 = vrot.slane %v3945_v14, %v7793_v48 }
 0x3ca   :  { %v3829_v4 = vpop.xlane.xlu1 %3828  ;;  %v10116_v40 = vpop.xlane.xlu0 %3888 }
 0x3cb   :  { %v4550_v26 = vrot.slane %v3829_v4, %v7851_v52  ;;  %v4624_v15 = vrot.slane %v10116_v40, %v7827_v31  ;;  %v4620_v40 = vsel %vm11934_vm9, %v4619_v13, %v4615_v6  ;;  %vm11944_vm9 = vcmask 1048512  }
 0x3cd   :  { %v4551_v53 = vsel %vm11931_vm1, %v4550_v26, %v4546_v37  ;;  %vm11942_vm1 = vcmask 917312  }
 0x3ce   :  { %v10118_v35 = vpop.xlane.xlu1 %3948  ;;  %v3833_v62 = vpop.xlane.xlu0 %3832 }
 0x3cf   :  { %v4555_v39 = vrot.slane %v3833_v62, %v7859_v30  ;;  %v4698_v29 = vrot.slane %v10118_v35, %v7819_v54  ;;  %v4689_v62 = vsel %vm11933_vm14, %v4688_v9, %v4684_v10  ;;  %vm11943_vm14 = vcmask 982912  }
 0x3d0   :  { %v4694_v35 = vsel %vm11935_vm15, %v4693_v11, %v4689_v62  ;;  %vm11945_vm15 = vmmov %vm11939_vm2 }
 0x3d1   :  { %v4556_v3 = vsel %vm11932_vm4, %v4555_v39, %v4551_v53 }
 0x3d2   :  { %v10120_v46 = vpop.xlane.xlu1 %3892  ;;  %v10122_v17 = vpop.xlane.xlu0 %3952 }
 0x3d3   :  { %v4629_v7 = vrot.slane %v10120_v46, %v7851_v52  ;;  %v4703_v48 = vrot.slane %v10122_v17, %v7827_v31 }
 0x3d6   :  { %v3837_v20 = vpop.xlane.xlu1 %3836  ;;  %v10124_v42 = vpop.xlane.xlu0 %3896 }
 0x3d7   :  { %v4560_v59 = vrot.slane %v3837_v20, %v7887_v23 }
 0x3d9   :  { %v4561_v20 = vsel %vm2463_vm8, %v4560_v59, %v4556_v3 }
 0x3da   :  { %v10126_v18 = vpop.xlane.xlu1 %3956  ;;  %v3841_v1 = vpop.xlane.xlu0 %3840 }
 0x3db   :  { %v4565_v8 = vrot.slane %v3841_v1, %v7893_v12  ;;  %v4634_v1 = vrot.slane %v10124_v42, %v7859_v30  ;;  %v4708_v5 = vrot.slane %v10126_v18, %v7851_v52 }
 0x3dd   :  { %v4566_v46 = vsel %vm2470_vm0, %v4565_v8, %v4561_v20 }
 0x3de   :  { %v10128_v0 = vpop.xlane.xlu1 %3900  ;;  %v10130_v58 = vpop.xlane.xlu0 %3960 }
 0x3df   :  { %v4639_v51 = vrot.slane %v10128_v0, %v7887_v23  ;;  %v4713_v26 = vrot.slane %v10130_v58, %v7859_v30 }
 0x3e2   :  { %v3845_v32 = vpop.xlane.xlu1 %3844  ;;  %v10132_v47 = vpop.xlane.xlu0 %3904 }
 0x3e3   :  { %v4570_v63 = vrot.slane %v3845_v32, %v7921_v2  ;;  %v4625_v32 = vsel %vm11936_vm3, %v4624_v15, %v4620_v40  ;;  %v4644_v42 = vrot.slane %v10132_v47, %v7893_v12  ;;  %vm11946_vm3 = vmmov %vm11938_vm11 }
 0x3e4   :  { %v4630_v33 = vsel %vm11939_vm2, %v4629_v7, %v4625_v32  ;;  %vm11949_vm2 = vmmov %vm11942_vm1 }
 0x3e5   :  { %v4571_v61 = vsel %vm11938_vm11, %v4570_v63, %v4566_v46  ;;  %v4635_v55 = vsel %vm11932_vm4, %v4634_v1, %v4630_v33  ;;  %vm11948_vm11 = vmmov %vm11941_vm12 }
 0x3e6   :  { %v10134_v44 = vpop.xlane.xlu1 %3964  ;;  %v3849_v38 = vpop.xlane.xlu0 %3848  ;;  %v4640_v52 = vsel %vm2463_vm8, %v4639_v51, %v4635_v55 }
 0x3e7   :  { %v4575_v14 = vrot.slane %v3849_v38, %v7927_v34  ;;  %v4699_v38 = vsel %vm11937_vm7, %v4698_v29, %v4694_v35  ;;  %v4718_v18 = vrot.slane %v10134_v44, %v7887_v23  ;;  %v4645_v39 = vsel %vm2470_vm0, %v4644_v42, %v4640_v52  ;;  %vm11947_vm7 = vmmov %vm11932_vm4 }
 0x3e8   :  { %v4704_v43 = vsel %vm11940_vm13, %v4703_v48, %v4699_v38  ;;  %vm11951_vm13 = vmmov %vm11946_vm3 }
 0x3e9   :  { %v4576_v49 = vsel %vm11941_vm12, %v4575_v14, %v4571_v61  ;;  %v4709_v9 = vsel %vm11945_vm15, %v4708_v5, %v4704_v43  ;;  %vm11952_vm12 = vmmov %vm11944_vm9 }
 0x3ea   :  { %v10136_v60 = vpop.xlane.xlu1 %3908  ;;  %v10138_v25 = vpop.xlane.xlu0 %3968  ;;  %v4714_v44 = vsel %vm11947_vm7, %v4713_v26, %v4709_v9  ;;  %vm11956_vm4 = vmmov %vm11944_vm9 }
 0x3eb   :  { %v4649_v16 = vrot.slane %v10136_v60, %v7921_v2  ;;  %v4723_v30 = vrot.slane %v10138_v25, %v7893_v12  ;;  %v4719_v25 = vsel %vm2463_vm8, %v4718_v18, %v4714_v44  ;;  %vm11954_vm8 = vmmov %vm11949_vm2 }
 0x3ed   :  { %v4650_v13 = vsel %vm11946_vm3, %v4649_v16, %v4645_v39  ;;  %v4724_v8 = vsel %vm2470_vm0, %v4723_v30, %v4719_v25 }
 0x3ee   :  { %v3853_v45 = vpop.xlane.xlu1 %3852  ;;  %v10148_v21 = vpop.xlane.xlu0 %3912 }
 0x3ef   :  { %v4580_v54 = vrot.slane %v3853_v45, %v7953_v19  ;;  %v4654_v47 = vrot.slane %v10148_v21, %v7927_v34 }
 0x3f1   :  { %v4581_v0 = vsel %vm11942_vm1, %v4580_v54, %v4576_v49  ;;  %v4655_v59 = vsel %vm11948_vm11, %v4654_v47, %v4650_v13  ;;  %vm11953_vm1 = vmmov %vm11948_vm11 }
 0x3f2   :  { %v10156_v22 = vpop.xlane.xlu1 %3972  ;;  %v3857_v56 = vpop.xlane.xlu0 %3856 }
 0x3f3   :  { %v4585_v31 = vrot.slane %v3857_v56, %v7958_v50  ;;  %v4728_v23 = vrot.slane %v10156_v22, %v7921_v2 }
 0x3f5   :  { %v4586_v24 = vsel %vm11943_vm14, %v4585_v31, %v4581_v0  ;;  %v4729_v22 = vsel %vm11951_vm13, %v4728_v23, %v4724_v8 }
 0x3f6   :  { %v3917_v4 = vpop.xlane.xlu1 %3916  ;;  %v3977_v17 = vpop.xlane.xlu0 %3976 }
 0x3f7   :  { %v4659_v60 = vrot.slane %v3917_v4, %v7953_v19  ;;  %v4733_v6 = vrot.slane %v3977_v17, %v7927_v34 }
 0x3f9   :  { %v4660_v37 = vsel %vm11949_vm2, %v4659_v60, %v4655_v59  ;;  %v4734_v15 = vsel %vm11953_vm1, %v4733_v6, %v4729_v22 }
 0x3fa   :  { %v3861_v45 = vpop.xlane.xlu1 %3860  ;;  %v3921_v36 = vpop.xlane.xlu0 %3920 }
 0x3fb   :  { %v4590_v41 = vrot.slane %v3861_v45, %v8004_v28  ;;  %v4664_v58 = vrot.slane %v3921_v36, %v7958_v50 }
 0x3fd   :  { %v4591_v10 = vsel %vm11944_vm9, %v4590_v41, %v4586_v24 }
 0x3fe   :  { %v3981_v21 = vpop.xlane.xlu1 %3980  ;;  %v4754_v57 = vsel %vm3068_vm5, %v4591_v10, %v10102_v27  ;;  %v3925_v12 = vpop.xlane.xlu0 %3924  ;;  %vm11950_vm5 = vmmov %vm11943_vm14 }
 0x3ff   :  { %v4738_v27 = vrot.slane %v3981_v21, %v7953_v19  ;;  %v4669_v11 = vrot.slane %v3925_v12, %v8004_v28  ;;  %v4665_v56 = vsel %vm11950_vm5, %v4664_v58, %v4660_v37  ;;  %vm11955_vm0 = vmmov %vm11950_vm5 }
 0x401   :  { %v4670_v53 = vsel %vm11952_vm12, %v4669_v11, %v4665_v56  ;;  %v4739_v19 = vsel %vm11954_vm8, %v4738_v27, %v4734_v15 }
 0x402   :  { %v3985_v2 = vpop.xlane.xlu1 %3984  ;;  %v3989_v29 = vpop.xlane.xlu0 %3988  ;;  %v4755_v63 = vsel %vm3070_vm10, %v4670_v53, %v4754_v57 }
 0x403   :  { %v4743_v34 = vrot.slane %v3985_v2, %v7958_v50  ;;  %v4748_v3 = vrot.slane %v3989_v29, %v8004_v28 }
 0x405   :  { %v4744_v7 = vsel %vm11955_vm0, %v4743_v34, %v4739_v19 }
 0x406   :  { %v4749_v48 = vsel %vm11956_vm4, %v4748_v3, %v4744_v7 }
 0x407   :  { %v4756_v14 = vsel %vm3072_vm6, %v4749_v48, %v4755_v63 }
 0x408   :  { %4768 = vst [vmem:[#allocation10] sm:$0xff] %v4756_v14 }
 0x409   :  { %5268 = shalt.err (!%p5265_p0)
}
 0x40a   :  { %s5269_s5 = scalar_lea.hbm %s10259_s4, 128 }
 0x40b   :  { %p5270_p1 = scmp.ne.s32.totalorder %s10259_s4, %s5269_s5  ;;  %p5273_p2 = scmp.lt.u32.totalorder %s5269_s5, %s10259_s4 }
 0x40d   :  { %p5275_p3 = pnand %p5273_p2, %p5270_p1 }
 0x40f   :  { %5278 = shalt.err (!%p5275_p3)
}
 0x410   :  { %4788 = dma.vmem_to_hbm [thread:$0]  %s4786_s27, 128, %s10259_s4, [#allocation11]  }
 0x411   :  { %5283 = dma.done.wait [#allocation6], 128  }
 0x412   :  { %5284 = vsyncadd [#allocation6], 4294967168 }
 0x413   :  { %5285 = dma.done.wait [#allocation11], 128  }
 0x414   :  { %5286 = vsyncadd [#allocation11], 4294967168 }
 0x415   :  { %4795 = vsyncpa [#allocation5], 1 }
 0x416   :  { %4796 = vsyncpa [#allocation8], 1 }
 0x417   :  { %4797 = vsyncpa [#allocation6], 1 }
 0x418   :  { %4798 = vsyncpa [#allocation11], 1 }

</bundles_post_ra>
